<compile_context>
chip_gen: v5e
topology: v5e:2x2
jax: 0.10.0
libtpu: 0.0.40
codegen_flags: <defaults>
</compile_context>

<pallas_src>
import functools

import jax
import jax.numpy as jnp
from jax.experimental import pallas as pl
from jax.experimental.pallas import tpu as pltpu


def _round_up(x, m):
    return ((x + m - 1) // m) * m


def _choose_block_rows(n, block_rows):
    """Row tile: multiple of 8, <= block_rows, and keeps >=2 grid steps when possible."""
    if n <= 8:
        return 8
    half = _round_up(pl.cdiv(n, 2), 8)   # cap so grid >= 2 (both v7x TensorCores busy)
    bm = min(block_rows, half)
    return max(8, (bm // 8) * 8)


def _layer_norm(h, gamma, beta, eps=1e-5):
    mu = jnp.mean(h, axis=-1, keepdims=True)
    d = h - mu                                   # reused for var and normalize
    var = jnp.mean(d * d, axis=-1, keepdims=True)
    return d * jax.lax.rsqrt(var + eps) * gamma + beta


def _leaky_relu(h, slope=0.01):
    return jnp.where(h >= 0, h, slope * h)


def traj_pred_mlp_kernel(x_ref, w1_ref, w2_ref, w3_ref, vec_ref, b3_ref, o_ref):
    # in-kernel bf16 cast of x (free VPU op, hidden under the input DMA)
    x = x_ref[...].astype(jnp.bfloat16)

    # packed per-feature vectors: rows = [b1, g1, be1, b2, g2, be2], f32 [6, hidden]
    vecs = vec_ref[...]
    b1, g1, be1 = vecs[0:1], vecs[1:2], vecs[2:3]
    b2, g2, be2 = vecs[3:4], vecs[4:5], vecs[5:6]

    # Linear 1 (bf16 MXU, f32 accum) + LayerNorm + LeakyReLU (f32 VPU/EUP)
    h = jnp.dot(x, w1_ref[...], preferred_element_type=jnp.float32) + b1
    h = _leaky_relu(_layer_norm(h, g1, be1))

    # Linear 2 + LayerNorm + LeakyReLU
    h = jnp.dot(h.astype(jnp.bfloat16), w2_ref[...],
                preferred_element_type=jnp.float32) + b2
    h = _leaky_relu(_layer_norm(h, g2, be2))

    # Linear 3 (output projection, true out_channels width -> minimal HBM writeback)
    o_ref[...] = (
        jnp.dot(h.astype(jnp.bfloat16), w3_ref[...],
                preferred_element_type=jnp.float32) + b3_ref[...]
    ).astype(o_ref.dtype)


@functools.partial(jax.jit, static_argnames=("block_rows",))
def traj_pred_mlp(x, prepared, block_rows=1024):
    """x: [N, in_channels] f32.  prepared: output of preprocess_params()."""
    n, in_c = x.shape
    hidden = prepared["w1"].shape[1]
    out_c = prepared["w3"].shape[1]

    bm = _choose_block_rows(n, block_rows)
    grid = pl.cdiv(n, bm)            # ragged tail handled by Pallas partial blocks

    def resident(shape):
        # constant block index -> block stays resident in VMEM, no per-step re-DMA
        return pl.BlockSpec(shape, lambda i: (0, 0))

    return pl.pallas_call(
        traj_pred_mlp_kernel,
        out_shape=jax.ShapeDtypeStruct((n, out_c), jnp.float32),
        grid_spec=pltpu.PrefetchScalarGridSpec(
            num_scalar_prefetch=0,
            grid=(grid,),
            in_specs=[
                pl.BlockSpec((bm, in_c), lambda i: (i, 0)),   # x row tile
                resident((in_c, hidden)),                     # w1 (bf16)
                resident((hidden, hidden)),                   # w2 (bf16)
                resident((hidden, out_c)),                    # w3 (bf16)
                resident((6, hidden)),                        # packed b1,g1,be1,b2,g2,be2
                resident((1, out_c)),                         # b3
            ],
            out_specs=pl.BlockSpec((bm, out_c), lambda i: (i, 0)),
        ),
        compiler_params=pltpu.CompilerParams(
            dimension_semantics=("parallel",)
        ),
    )(x, prepared["w1"], prepared["w2"], prepared["w3"],
      prepared["ln_vec"], prepared["b3"])


def init_params(key, in_channels, out_channels, hidden_unit):
    """Deterministic synthetic init (shapes match nn.Linear / nn.LayerNorm), all f32."""
    ks = jax.random.split(key, 6)

    def linear(kw, kb, fan_in, fan_out):
        bound = 1.0 / jnp.sqrt(fan_in)
        w = jax.random.uniform(kw, (fan_in, fan_out), jnp.float32, -bound, bound)
        b = jax.random.uniform(kb, (1, fan_out), jnp.float32, -bound, bound)
        return w, b

    w1, b1 = linear(ks[0], ks[1], in_channels, hidden_unit)
    w2, b2 = linear(ks[2], ks[3], hidden_unit, hidden_unit)
    w3, b3 = linear(ks[4], ks[5], hidden_unit, out_channels)
    # LayerNorm affine params (PyTorch default init: ones / zeros).
    g1 = jnp.ones((1, hidden_unit), jnp.float32)
    be1 = jnp.zeros((1, hidden_unit), jnp.float32)
    g2 = jnp.ones((1, hidden_unit), jnp.float32)
    be2 = jnp.zeros((1, hidden_unit), jnp.float32)
    return dict(w1=w1, b1=b1, g1=g1, be1=be1,
                w2=w2, b2=b2, g2=g2, be2=be2,
                w3=w3, b3=b3)


def preprocess_params(p):
    """One-time setup (NOT per call): bf16 weight cast + pack the six (1,hidden) vectors."""
    ln_vec = jnp.concatenate(
        [p["b1"], p["g1"], p["be1"], p["b2"], p["g2"], p["be2"]], axis=0
    ).astype(jnp.float32)                          # [6, hidden]
    return dict(
        w1=p["w1"].astype(jnp.bfloat16),
        w2=p["w2"].astype(jnp.bfloat16),
        w3=p["w3"].astype(jnp.bfloat16),
        ln_vec=ln_vec,
        b3=p["b3"].astype(jnp.float32),
    )


def reference_mlp(x, p, compute_dtype=jnp.float32):
    """Pure-JAX reference of the PyTorch forward pass.

    compute_dtype controls the matmul-input dtype so we can check against both the
    exact f32 math and the kernel's bf16-input / f32-accumulate policy.
    """
    def lin(h, w, b):
        return jnp.dot(h.astype(compute_dtype), w.astype(compute_dtype),
                       preferred_element_type=jnp.float32) + b
    h = lin(x, p["w1"], p["b1"])
    h = _leaky_relu(_layer_norm(h, p["g1"], p["be1"]))
    h = lin(h, p["w2"], p["b2"])
    h = _leaky_relu(_layer_norm(h, p["g2"], p["be2"]))
    return lin(h, p["w3"], p["b3"])


if __name__ == "__main__":
    in_channels, out_channels, hidden_unit = 16, 12, 32
    batch = 1000  # deliberately not a multiple of the row tile (exercises ragged tail)

    key = jax.random.PRNGKey(0)
    kx, kp = jax.random.split(key)
    x = jax.random.normal(kx, (batch, in_channels), jnp.float32)
    params = init_params(kp, in_channels, out_channels, hidden_unit)
    prepared = preprocess_params(params)           # one-time bf16 cast + vector packing

    out = traj_pred_mlp(x, prepared, block_rows=1024)   # bm=504 -> grid=2 (megacore-friendly)
    out = jax.block_until_ready(out)
    assert out.shape == (batch, out_channels)

    # Check against a reference that uses the same bf16-input / f32-accum policy.
    ref_bf16 = reference_mlp(x, params, compute_dtype=jnp.bfloat16)
    assert jnp.allclose(out, ref_bf16, atol=2e-2, rtol=2e-2), "mismatch vs bf16-policy ref"

    # Looser sanity check against the exact f32 reference (bf16 rounding only).
    ref_f32 = reference_mlp(x, params, compute_dtype=jnp.float32)
    assert jnp.allclose(out, ref_f32, atol=1e-1, rtol=1e-1), "mismatch vs f32 ref"

    print("KERNEL_OK")
</pallas_src>

<mosaic_0001>
module attributes {stable_mosaic.version = 11 : i64} {
  func.func @traj_pred_mlp_kernel(%arg0: i32, %arg1: memref<504x16xf32, #tpu.memory_space<vmem>>, %arg2: memref<16x32xbf16, #tpu.memory_space<vmem>>, %arg3: memref<32x32xbf16, #tpu.memory_space<vmem>>, %arg4: memref<32x12xbf16, #tpu.memory_space<vmem>>, %arg5: memref<6x32xf32, #tpu.memory_space<vmem>>, %arg6: memref<1x12xf32, #tpu.memory_space<vmem>>, %arg7: memref<504x12xf32, #tpu.memory_space<vmem>>) attributes {dimension_semantics = [#tpu.dimension_semantics<parallel>], iteration_bounds = array<i64: 2>, scalar_prefetch = 0 : i64, scratch_operands = 0 : i64, tpu.core_type = #tpu.core_type<tc>, window_params = [{transform_indices = @transform_0, window_bounds = array<i64: 504, 16>}, {pipeline_mode = #tpu.pipeline_mode<synchronous>, transform_indices = @transform_1, window_bounds = array<i64: 16, 32>}, {pipeline_mode = #tpu.pipeline_mode<synchronous>, transform_indices = @transform_2, window_bounds = array<i64: 32, 32>}, {pipeline_mode = #tpu.pipeline_mode<synchronous>, transform_indices = @transform_3, window_bounds = array<i64: 32, 12>}, {pipeline_mode = #tpu.pipeline_mode<synchronous>, transform_indices = @transform_4, window_bounds = array<i64: 6, 32>}, {pipeline_mode = #tpu.pipeline_mode<synchronous>, transform_indices = @transform_5, window_bounds = array<i64: 1, 12>}, {transform_indices = @transform_6, window_bounds = array<i64: 504, 12>}]} {
    %c0 = arith.constant 0 : index
    %c0_0 = arith.constant 0 : index
    %0 = vector.load %arg1[%c0, %c0_0] : memref<504x16xf32, #tpu.memory_space<vmem>>, vector<504x16xf32>
    %1 = arith.truncf %0 : vector<504x16xf32> to vector<504x16xbf16>
    %c0_1 = arith.constant 0 : index
    %c0_2 = arith.constant 0 : index
    %2 = vector.load %arg5[%c0_1, %c0_2] : memref<6x32xf32, #tpu.memory_space<vmem>>, vector<6x32xf32>
    %3 = vector.extract_strided_slice %2 {offsets = [0, 0], sizes = [1, 32], strides = [1, 1]} : vector<6x32xf32> to vector<1x32xf32>
    %4 = vector.extract_strided_slice %2 {offsets = [1, 0], sizes = [1, 32], strides = [1, 1]} : vector<6x32xf32> to vector<1x32xf32>
    %5 = vector.extract_strided_slice %2 {offsets = [2, 0], sizes = [1, 32], strides = [1, 1]} : vector<6x32xf32> to vector<1x32xf32>
    %6 = vector.extract_strided_slice %2 {offsets = [3, 0], sizes = [1, 32], strides = [1, 1]} : vector<6x32xf32> to vector<1x32xf32>
    %7 = vector.extract_strided_slice %2 {offsets = [4, 0], sizes = [1, 32], strides = [1, 1]} : vector<6x32xf32> to vector<1x32xf32>
    %8 = vector.extract_strided_slice %2 {offsets = [5, 0], sizes = [1, 32], strides = [1, 1]} : vector<6x32xf32> to vector<1x32xf32>
    %c0_3 = arith.constant 0 : index
    %c0_4 = arith.constant 0 : index
    %9 = vector.load %arg2[%c0_3, %c0_4] : memref<16x32xbf16, #tpu.memory_space<vmem>>, vector<16x32xbf16>
    %cst = arith.constant dense<0.000000e+00> : vector<504x32xf32>
    %10 = tpu.matmul %1, %9, %cst {dimension_numbers = #tpu.dot_dimension_numbers<[1], [0], [0], [1], [0, 0, 1, 1], [], []>} : vector<504x16xbf16>, vector<16x32xbf16>, vector<504x32xf32> -> vector<504x32xf32>
    %11 = vector.broadcast %3 : vector<1x32xf32> to vector<504x32xf32>
    %12 = arith.addf %10, %11 : vector<504x32xf32>
    %cst_5 = arith.constant dense<0.000000e+00> : vector<504xf32>
    %13 = vector.multi_reduction <add>, %12, %cst_5 [1] : vector<504x32xf32> to vector<504xf32>
    %14 = vector.shape_cast %13 : vector<504xf32> to vector<504x1xf32>
    %cst_6 = arith.constant 3.200000e+01 : f32
    %15 = vector.broadcast %cst_6 : f32 to vector<504x1xf32>
    %16 = arith.divf %14, %15 : vector<504x1xf32>
    %17 = vector.broadcast %16 : vector<504x1xf32> to vector<504x32xf32>
    %18 = arith.subf %12, %17 : vector<504x32xf32>
    %19 = arith.mulf %18, %18 : vector<504x32xf32>
    %cst_7 = arith.constant dense<0.000000e+00> : vector<504xf32>
    %20 = vector.multi_reduction <add>, %19, %cst_7 [1] : vector<504x32xf32> to vector<504xf32>
    %21 = vector.shape_cast %20 : vector<504xf32> to vector<504x1xf32>
    %cst_8 = arith.constant 3.200000e+01 : f32
    %22 = vector.broadcast %cst_8 : f32 to vector<504x1xf32>
    %23 = arith.divf %21, %22 : vector<504x1xf32>
    %cst_9 = arith.constant 9.99999974E-6 : f32
    %24 = vector.broadcast %cst_9 : f32 to vector<504x1xf32>
    %25 = arith.addf %23, %24 : vector<504x1xf32>
    %26 = math.rsqrt %25 : vector<504x1xf32>
    %27 = vector.broadcast %26 : vector<504x1xf32> to vector<504x32xf32>
    %28 = arith.mulf %18, %27 : vector<504x32xf32>
    %29 = vector.broadcast %4 : vector<1x32xf32> to vector<504x32xf32>
    %30 = arith.mulf %28, %29 : vector<504x32xf32>
    %31 = vector.broadcast %5 : vector<1x32xf32> to vector<504x32xf32>
    %32 = arith.addf %30, %31 : vector<504x32xf32>
    %cst_10 = arith.constant 0.000000e+00 : f32
    %33 = vector.broadcast %cst_10 : f32 to vector<504x32xf32>
    %34 = arith.cmpf oge, %32, %33 : vector<504x32xf32>
    %cst_11 = arith.constant 0.00999999977 : f32
    %35 = vector.broadcast %cst_11 : f32 to vector<504x32xf32>
    %36 = arith.mulf %35, %32 : vector<504x32xf32>
    %37 = arith.select %34, %32, %36 : vector<504x32xi1>, vector<504x32xf32>
    %38 = arith.truncf %37 : vector<504x32xf32> to vector<504x32xbf16>
    %c0_12 = arith.constant 0 : index
    %c0_13 = arith.constant 0 : index
    %39 = vector.load %arg3[%c0_12, %c0_13] : memref<32x32xbf16, #tpu.memory_space<vmem>>, vector<32x32xbf16>
    %cst_14 = arith.constant dense<0.000000e+00> : vector<504x32xf32>
    %40 = tpu.matmul %38, %39, %cst_14 {dimension_numbers = #tpu.dot_dimension_numbers<[1], [0], [0], [1], [0, 0, 1, 1], [], []>} : vector<504x32xbf16>, vector<32x32xbf16>, vector<504x32xf32> -> vector<504x32xf32>
    %41 = vector.broadcast %6 : vector<1x32xf32> to vector<504x32xf32>
    %42 = arith.addf %40, %41 : vector<504x32xf32>
    %cst_15 = arith.constant dense<0.000000e+00> : vector<504xf32>
    %43 = vector.multi_reduction <add>, %42, %cst_15 [1] : vector<504x32xf32> to vector<504xf32>
    %44 = vector.shape_cast %43 : vector<504xf32> to vector<504x1xf32>
    %cst_16 = arith.constant 3.200000e+01 : f32
    %45 = vector.broadcast %cst_16 : f32 to vector<504x1xf32>
    %46 = arith.divf %44, %45 : vector<504x1xf32>
    %47 = vector.broadcast %46 : vector<504x1xf32> to vector<504x32xf32>
    %48 = arith.subf %42, %47 : vector<504x32xf32>
    %49 = arith.mulf %48, %48 : vector<504x32xf32>
    %cst_17 = arith.constant dense<0.000000e+00> : vector<504xf32>
    %50 = vector.multi_reduction <add>, %49, %cst_17 [1] : vector<504x32xf32> to vector<504xf32>
    %51 = vector.shape_cast %50 : vector<504xf32> to vector<504x1xf32>
    %cst_18 = arith.constant 3.200000e+01 : f32
    %52 = vector.broadcast %cst_18 : f32 to vector<504x1xf32>
    %53 = arith.divf %51, %52 : vector<504x1xf32>
    %cst_19 = arith.constant 9.99999974E-6 : f32
    %54 = vector.broadcast %cst_19 : f32 to vector<504x1xf32>
    %55 = arith.addf %53, %54 : vector<504x1xf32>
    %56 = math.rsqrt %55 : vector<504x1xf32>
    %57 = vector.broadcast %56 : vector<504x1xf32> to vector<504x32xf32>
    %58 = arith.mulf %48, %57 : vector<504x32xf32>
    %59 = vector.broadcast %7 : vector<1x32xf32> to vector<504x32xf32>
    %60 = arith.mulf %58, %59 : vector<504x32xf32>
    %61 = vector.broadcast %8 : vector<1x32xf32> to vector<504x32xf32>
    %62 = arith.addf %60, %61 : vector<504x32xf32>
    %cst_20 = arith.constant 0.000000e+00 : f32
    %63 = vector.broadcast %cst_20 : f32 to vector<504x32xf32>
    %64 = arith.cmpf oge, %62, %63 : vector<504x32xf32>
    %cst_21 = arith.constant 0.00999999977 : f32
    %65 = vector.broadcast %cst_21 : f32 to vector<504x32xf32>
    %66 = arith.mulf %65, %62 : vector<504x32xf32>
    %67 = arith.select %64, %62, %66 : vector<504x32xi1>, vector<504x32xf32>
    %68 = arith.truncf %67 : vector<504x32xf32> to vector<504x32xbf16>
    %c0_22 = arith.constant 0 : index
    %c0_23 = arith.constant 0 : index
    %69 = vector.load %arg4[%c0_22, %c0_23] : memref<32x12xbf16, #tpu.memory_space<vmem>>, vector<32x12xbf16>
    %cst_24 = arith.constant dense<0.000000e+00> : vector<504x12xf32>
    %70 = tpu.matmul %68, %69, %cst_24 {dimension_numbers = #tpu.dot_dimension_numbers<[1], [0], [0], [1], [0, 0, 1, 1], [], []>} : vector<504x32xbf16>, vector<32x12xbf16>, vector<504x12xf32> -> vector<504x12xf32>
    %c0_25 = arith.constant 0 : index
    %c0_26 = arith.constant 0 : index
    %71 = vector.load %arg6[%c0_25, %c0_26] : memref<1x12xf32, #tpu.memory_space<vmem>>, vector<1x12xf32>
    %72 = vector.broadcast %71 : vector<1x12xf32> to vector<504x12xf32>
    %73 = arith.addf %70, %72 : vector<504x12xf32>
    %c0_27 = arith.constant 0 : index
    %c0_28 = arith.constant 0 : index
    %74 = vector.load %arg7[%c0_27, %c0_28] : memref<504x12xf32, #tpu.memory_space<vmem>>, vector<504x12xf32>
    tpu.vector_store %arg7[%c0_27, %c0_28], %73 {strides = array<i32>} : memref<504x12xf32, #tpu.memory_space<vmem>>, vector<504x12xf32>,
    return
  }
  func.func @transform_0(%arg0: i32) -> (i32, i32) {
    %c0_i32 = arith.constant 0 : i32
    %c0_i32_0 = arith.constant 0 : i32
    return %arg0, %c0_i32 : i32, i32
  }
  func.func @transform_1(%arg0: i32) -> (i32, i32) {
    %c0_i32 = arith.constant 0 : i32
    %c0_i32_0 = arith.constant 0 : i32
    %c0_i32_1 = arith.constant 0 : i32
    return %c0_i32, %c0_i32_0 : i32, i32
  }
  func.func @transform_2(%arg0: i32) -> (i32, i32) {
    %c0_i32 = arith.constant 0 : i32
    %c0_i32_0 = arith.constant 0 : i32
    %c0_i32_1 = arith.constant 0 : i32
    return %c0_i32, %c0_i32_0 : i32, i32
  }
  func.func @transform_3(%arg0: i32) -> (i32, i32) {
    %c0_i32 = arith.constant 0 : i32
    %c0_i32_0 = arith.constant 0 : i32
    %c0_i32_1 = arith.constant 0 : i32
    return %c0_i32, %c0_i32_0 : i32, i32
  }
  func.func @transform_4(%arg0: i32) -> (i32, i32) {
    %c0_i32 = arith.constant 0 : i32
    %c0_i32_0 = arith.constant 0 : i32
    %c0_i32_1 = arith.constant 0 : i32
    return %c0_i32, %c0_i32_0 : i32, i32
  }
  func.func @transform_5(%arg0: i32) -> (i32, i32) {
    %c0_i32 = arith.constant 0 : i32
    %c0_i32_0 = arith.constant 0 : i32
    %c0_i32_1 = arith.constant 0 : i32
    return %c0_i32, %c0_i32_0 : i32, i32
  }
  func.func @transform_6(%arg0: i32) -> (i32, i32) {
    %c0_i32 = arith.constant 0 : i32
    %c0_i32_0 = arith.constant 0 : i32
    return %arg0, %c0_i32 : i32, i32
  }
}

</mosaic_0001>

<bundles_post_ra>
// kernel: traj_pred_mlp.1
= control target key start
LH: loop header
LB: loop body
LE: loop exit
PB: predicated region body
PF: predicated region fallthrough
CT: control target
= control target key end

     0   :  { %s5714_s21 = smov 0   ;;  %s5716_s22 = smov 0   ;;  %s9910_s0 = inlined_call_operand.vmem [shape: f32[1000,16], index: 0, kind: input, shape index: {}]   ;;  %s9911_s1 = inlined_call_operand.vmem [shape: bf16[16,32], index: 1, kind: input, shape index: {}]   ;;  %s9912_s2 = inlined_call_operand.vmem [shape: bf16[32,32], index: 2, kind: input, shape index: {}]   ;;  %s9913_s3 = inlined_call_operand.vmem [shape: bf16[32,12], index: 3, kind: input, shape index: {}]   ;;  %s9914_s4 = inlined_call_operand.vmem [shape: f32[6,32], index: 4, kind: input, shape index: {}]   ;;  %s9915_s5 = inlined_call_operand.vmem [shape: f32[1,12], index: 5, kind: input, shape index: {}]   ;;  %s9916_s6 = inlined_call_operand.vmem [shape: f32[1000,12], index: 6, kind: output, shape index: {}]  }
   0x1   :  { %s5718_s23 = smov 0  }
   0x2 LB: > { %s5727_s24 = sadd.s32 4294967295, %s5644_s23   ;;  %s5729_s25 = sadd.s32 1, %s5644_s23   ;;  %s5644_s23 = sphi %s5718_s23, %s10143_s23   ;;  %s5640_s22 = sphi %s5716_s22, %s10142_s22   ;;  %s5636_s21 = sphi %s5714_s21, %s10141_s21  }
   0x3   : > { %s151_s26 = ssub.s32 %s5644_s23, %s5729_s25  ;;  %s154_s27 = sadd.s32 1, %s5640_s22 }
   0x4   : > { %p152_p0 = scmp.eq.s32.totalorder %s151_s26, 0  ;;  %p164_p1 = scmp.ne.s32.totalorder %s5640_s22, %s5636_s21 }
   0x5   : > { %p165_p2 = scmp.eq.s32.totalorder %s5727_s24, 1  ;;  %p5094_p3 = scmp.ge.s32.totalorder %s5644_s23, 1 }
   0x6   : > { %s5737_s28 = scalar_select %p152_p0, %s5640_s22, %s154_s27  }
   0x7   : > { %p5739_p4 = por %p165_p2, %p164_p1  ;;  %p221_p5 = scmp.lt.s32.totalorder %s5644_s23, 3 }
   0x9   : > { %p222_p6 = pnand %p5094_p3, %p221_p5 }
   0xb   : > { %225 = sbr.rel (%p222_p6) target bundleno = 1875 (0x753), region = 44 }
  0x10   : > { %v5227_v0 = vld [vmem:[%s9911_s1] sm:$0xff]  ;;  %s5747_s8 = smul.u32 63, %s5727_s24  ;;  %vm379_vm0 = vcmask 130048   ;;  %vm644_vm1 = vcmask 261120   ;;  %s251_s11 = sand.u32 1, %s5636_s21  }
  0x11   : > { %483 = vmatpush.bf16.msra.mxu0 %v5227_v0  ;;  %5235 = vmatpush.bf16.msra.mxu3 %v5227_v0  ;;  %v5792_v34 = vld [vmem:[%s9914_s4] sm:$0x3f]  ;;  %s5240_s12 = smul.u32 504, %s251_s11 }
  0x12   : > { %p259_p7 = scmp.lt.s32.totalorder %s5747_s8, 124  ;;  %v5797_v37 = vperm.slane %v5792_v34, 0  ;;  %s4759_s23 = ssub.s32 (%p5739_p4), 125, %s5747_s8 }
  0x13   : > { %s8510_s21 = scalar_lea.vmem [#allocation2], %s5240_s12   ;;  %s5232_s26 = smul.u32 (%p5739_p4), 504, %s5727_s24 }
  0x14   : > { %s260_s9 = scalar_select %p259_p7, %s5747_s8, 124 }
  0x15   : > { %p4760_p8 = scmp.lt.s32.totalorder (%p5739_p4), %s4759_s23, 63  ;;  %s9775_s7 = scalar_lea.vmem (%p5739_p4), %s9916_s6, %s5232_s26  }
  0x16   : > { %s5095_s10 = sshll.u32 %s260_s9, 3 }
  0x17   : > { %s5754_s13 = scalar_lea.vmem %s9910_s0, %s5095_s10 }
  0x18   : > { %v274_v1 = vld [vmem:[%s5754_s13] sm:$0xff]  ;;  %v275_v2 = vld [vmem:[%s5754_s13 + $0x8] sm:$0xff]  ;;  %v324_v3 = vld [vmem:[%s5754_s13 + $0x190] sm:$0xff] }
  0x19   : > { %v337_v4 = vpack.c.bf16 %v275_v2, %v274_v1  ;;  %v325_v5 = vld [vmem:[%s5754_s13 + $0x198] sm:$0xff]  ;;  %v276_v7 = vld [vmem:[%s5754_s13 + $0x10] sm:$0xff]  ;;  %v326_v9 = vld [vmem:[%s5754_s13 + $0x1a0] sm:$0xff] }
  0x1a   : > { %v362_v6 = vpack.c.bf16 %v325_v5, %v324_v3  ;;  %v277_v8 = vld [vmem:[%s5754_s13 + $0x18] sm:$0xff]  ;;  %v327_v10 = vld [vmem:[%s5754_s13 + $0x1a8] sm:$0xff]  ;;  %v278_v13 = vld [vmem:[%s5754_s13 + $0x20] sm:$0xff] }
  0x1b   : > { %5100 = vmatmul.msk.bf16.vlgmr.msra.gmra.mxu0 %vm379_vm0, %v337_v4  ;;  %v338_v11 = vpack.c.bf16 %v277_v8, %v276_v7  ;;  %v363_v12 = vpack.c.bf16 %v327_v10, %v326_v9  ;;  %v279_v14 = vld [vmem:[%s5754_s13 + $0x28] sm:$0xff]  ;;  %v280_v16 = vld [vmem:[%s5754_s13 + $0x30] sm:$0xff]  ;;  %v281_v17 = vld [vmem:[%s5754_s13 + $0x38] sm:$0xff] }
  0x1c   : > { %5125 = vmatmul.msk.bf16.vlgmr.msra.gmra.mxu3 %vm379_vm0, %v362_v6  ;;  %v339_v15 = vpack.c.bf16 %v279_v14, %v278_v13  ;;  %v340_v18 = vpack.c.bf16 %v281_v17, %v280_v16  ;;  %v282_v19 = vld [vmem:[%s5754_s13 + $0x40] sm:$0xff]  ;;  %v283_v20 = vld [vmem:[%s5754_s13 + $0x48] sm:$0xff]  ;;  %v284_v22 = vld [vmem:[%s5754_s13 + $0x50] sm:$0xff] }
  0x1d   : > { %v341_v21 = vpack.c.bf16 %v283_v20, %v282_v19  ;;  %v285_v23 = vld [vmem:[%s5754_s13 + $0x58] sm:$0xff]  ;;  %v286_v25 = vld [vmem:[%s5754_s13 + $0x60] sm:$0xff]  ;;  %v287_v26 = vld [vmem:[%s5754_s13 + $0x68] sm:$0xff] }
  0x1e   : > { %v342_v24 = vpack.c.bf16 %v285_v23, %v284_v22  ;;  %v343_v27 = vpack.c.bf16 %v287_v26, %v286_v25  ;;  %v288_v28 = vld [vmem:[%s5754_s13 + $0x70] sm:$0xff]  ;;  %v289_v29 = vld [vmem:[%s5754_s13 + $0x78] sm:$0xff]  ;;  %v290_v35 = vld [vmem:[%s5754_s13 + $0x80] sm:$0xff] }
  0x1f   : > { %v328_v30 = vld [vmem:[%s5754_s13 + $0x1b0] sm:$0xff]  ;;  %v329_v31 = vld [vmem:[%s5754_s13 + $0x1b8] sm:$0xff]  ;;  %v344_v33 = vpack.c.bf16 %v289_v29, %v288_v28  ;;  %v291_v36 = vld [vmem:[%s5754_s13 + $0x88] sm:$0xff] }
  0x20   : > { %v364_v32 = vpack.c.bf16 %v329_v31, %v328_v30  ;;  %v345_v38 = vpack.c.bf16 %v291_v36, %v290_v35  ;;  %v292_v46 = vld [vmem:[%s5754_s13 + $0x90] sm:$0xff]  ;;  %v293_v47 = vld [vmem:[%s5754_s13 + $0x98] sm:$0xff]  ;;  %v330_v55 = vld [vmem:[%s5754_s13 + $0x1c0] sm:$0xff] }
  0x21   : > { %v346_v50 = vpack.c.bf16 %v293_v47, %v292_v46  ;;  %v331_v56 = vld [vmem:[%s5754_s13 + $0x1c8] sm:$0xff]  ;;  %v294_v0 = vld [vmem:[%s5754_s13 + $0xa0] sm:$0xff]  ;;  %v332_v20 = vld [vmem:[%s5754_s13 + $0x1d0] sm:$0xff]  ;;  %v5678_v47 = vmov 32.0  }
  0x22   : > { %v365_v57 = vpack.c.bf16 %v331_v56, %v330_v55  ;;  %v295_v1 = vld [vmem:[%s5754_s13 + $0xa8] sm:$0xff]  ;;  %v298_v22 = vld [vmem:[%s5754_s13 + $0xc0] sm:$0xff]  ;;  %5331 = vrcp.f32 %v5678_v47 }
  0x23   : > { %v347_v3 = vpack.c.bf16 %v295_v1, %v294_v0  ;;  %v299_v23 = vld [vmem:[%s5754_s13 + $0xc8] sm:$0xff] }
  0x24   : > { %v349_v25 = vpack.c.bf16 %v299_v23, %v298_v22  ;;  %v303_v46 = vld [vmem:[%s5754_s13 + $0xe8] sm:$0xff] }
  0x2b   : > { %5101 = vmatmul.msk.bf16.gmra.mxu0 %vm379_vm0, %v338_v11  ;;  %v296_v11 = vld [vmem:[%s5754_s13 + $0xb0] sm:$0xff] }
  0x2c   : > { %5126 = vmatmul.msk.bf16.gmra.mxu3 %vm379_vm0, %v363_v12  ;;  %v297_v12 = vld [vmem:[%s5754_s13 + $0xb8] sm:$0xff] }
  0x2d   : > { %v348_v13 = vpack.c.bf16 %v297_v12, %v296_v11 }
  0x3b   : > { %5102 = vmatmul.msk.bf16.gmra.mxu0 %vm379_vm0, %v339_v15 }
  0x3c   : > { %5127 = vmatmul.msk.bf16.gmra.mxu3 %vm379_vm0, %v364_v32  ;;  %v300_v32 = vld [vmem:[%s5754_s13 + $0xd0] sm:$0xff] }
  0x4b   : > { %5103 = vmatmul.msk.bf16.gmra.mxu0 %vm379_vm0, %v340_v18 }
  0x4c   : > { %5128 = vmatmul.msk.bf16.gmra.mxu3 %vm379_vm0, %v365_v57 }
  0x5b   : > { %5104 = vmatmul.msk.bf16.gmra.mxu0 %vm379_vm0, %v341_v21  ;;  %v333_v21 = vld [vmem:[%s5754_s13 + $0x1d8] sm:$0xff] }
  0x6b   : > { %5105 = vmatmul.msk.bf16.gmra.mxu0 %vm379_vm0, %v342_v24  ;;  %v366_v24 = vpack.c.bf16 %v333_v21, %v332_v20  ;;  %v307_v20 = vld [vmem:[%s5754_s13 + $0x108] sm:$0xff] }
  0x6d   : > { %5129 = vmatmul.msk.bf16.gmra.mxu3 %vm379_vm0, %v366_v24 }
  0x7b   : > { %5106 = vmatmul.msk.bf16.gmra.mxu0 %vm379_vm0, %v343_v27 }
  0x8b   : > { %5107 = vmatmul.msk.bf16.gmra.mxu0 %vm379_vm0, %v344_v33  ;;  %v301_v33 = vld [vmem:[%s5754_s13 + $0xd8] sm:$0xff] }
  0x8c   : > { %v350_v35 = vpack.c.bf16 %v301_v33, %v300_v32 }
  0x98   : > { %v485_v39 = vpop.f32.mrf.mxu0 }
  0x99   : > { %v5800_v40 = vadd.f32 %v485_v39, %v5797_v37 }
  0x9b   : > { %5108 = vmatmul.msk.bf16.gmra.mxu0 %vm379_vm0, %v345_v38  ;;  %v645_v41 = vsel %vm644_vm1, %v5800_v40, 0.0 }
  0x9c   : > { %646 = vadd.xlane.f32.xlu0 %v645_v41 }
  0x9f   : > { %v610_v42 = vpop.f32.mrf.mxu3 }
  0xa0   : > { %v487_v43 = vpop.f32.mrf.mxu0  ;;  %v5813_v48 = vadd.f32 %v610_v42, %v5797_v37 }
  0xa1   : > { %v5806_v44 = vadd.f32 %v487_v43, %v5797_v37 }
  0xa2   : > { %v795_v53 = vsel %vm644_vm1, %v5813_v48, 0.0 }
  0xa3   : > { %v648_v45 = vsel %vm644_vm1, %v5806_v44, 0.0 }
  0xa4   : > { %649 = vadd.xlane.f32.xlu0 %v648_v45  ;;  %v302_v45 = vld [vmem:[%s5754_s13 + $0xe0] sm:$0xff] }
  0xa7   : > { %v612_v49 = vpop.f32.mrf.mxu3 }
  0xa8   : > { %v490_v51 = vpop.f32.mrf.mxu0  ;;  %v5816_v52 = vadd.f32 %v612_v49, %v5797_v37  ;;  %v351_v49 = vpack.c.bf16 %v303_v46, %v302_v45  ;;  %v308_v45 = vld [vmem:[%s5754_s13 + $0x110] sm:$0xff]  ;;  %v309_v46 = vld [vmem:[%s5754_s13 + $0x118] sm:$0xff] }
  0xa9   : > { %v5826_v58 = vadd.f32 %v490_v51, %v5797_v37 }
  0xaa   : > { %v798_v54 = vsel %vm644_vm1, %v5816_v52, 0.0 }
  0xab   : > { %799 = vadd.xlane.f32.xlu1 %v798_v54  ;;  %5109 = vmatmul.msk.bf16.gmra.mxu0 %vm379_vm0, %v346_v50  ;;  %v651_v63 = vsel %vm644_vm1, %v5826_v58, 0.0 }
  0xac   : > { %796 = vadd.xlane.f32.xlu0 %v795_v53  ;;  %v5332_v53 = vpop.eup %5331 }
  0xad   : > { %v835_v55 = vmul.f32 32.0, %v5332_v53  ;;  %vm839_vm2 = vweird.f32 %v5332_v53 }
  0xaf   : > { %v615_v59 = vpop.f32.mrf.mxu3 }
  0xb0   : > { %v5830_v60 = vadd.f32 %v615_v59, %v5797_v37  ;;  %v492_v61 = vpop.f32.mrf.mxu0  ;;  %v836_v59 = vsub.f32 1.0, %v835_v55 }
  0xb1   : > { %v5839_v2 = vadd.f32 %v492_v61, %v5797_v37 }
  0xb2   : > { %v801_v62 = vsel %vm644_vm1, %v5830_v60, 0.0  ;;  %v837_v0 = vmul.f32 %v5332_v53, %v836_v59 }
  0xb3   : > { %802 = vadd.xlane.f32.xlu2 %v801_v62  ;;  %652 = vadd.xlane.f32.xlu1 %v651_v63  ;;  %v654_v6 = vsel %vm644_vm1, %v5839_v2, 0.0  ;;  %v304_v62 = vld [vmem:[%s5754_s13 + $0xf0] sm:$0xff]  ;;  %v305_v63 = vld [vmem:[%s5754_s13 + $0xf8] sm:$0xff] }
  0xb4   : > { %v352_v1 = vpack.c.bf16 %v305_v63, %v304_v62 }
  0xb7   : > { %v617_v22 = vpop.f32.mrf.mxu3 }
  0xb8   : > { %v495_v4 = vpop.f32.mrf.mxu0 }
  0xb9   : > { %v5842_v5 = vadd.f32 %v495_v4, %v5797_v37 }
  0xbb   : > { %655 = vadd.xlane.f32.xlu1 %v654_v6  ;;  %5110 = vmatmul.msk.bf16.gmra.mxu0 %vm379_vm0, %v347_v3  ;;  %v657_v7 = vsel %vm644_vm1, %v5842_v5, 0.0  ;;  %v838_v6 = vadd.f32 %v5332_v53, %v837_v0 }
  0xbc   : > { %658 = vadd.xlane.f32.xlu2 %v657_v7 }
  0xc0   : > { %v497_v8 = vpop.f32.mrf.mxu0 }
  0xc1   : > { %v5850_v9 = vadd.f32 %v497_v8, %v5797_v37  ;;  %v5917_v8 = vsel %vm839_vm2, %v5332_v53, %v838_v6  ;;  %v354_v53 = vpack.c.bf16 %v309_v46, %v308_v45 }
  0xc3   : > { %v660_v10 = vsel %vm644_vm1, %v5850_v9, 0.0 }
  0xc4   : > { %661 = vadd.xlane.f32.xlu2 %v660_v10 }
  0xc8   : > { %v500_v14 = vpop.f32.mrf.mxu0 }
  0xc9   : > { %v5857_v15 = vadd.f32 %v500_v14, %v5797_v37 }
  0xcb   : > { %5111 = vmatmul.msk.bf16.gmra.mxu0 %vm379_vm0, %v348_v13  ;;  %v663_v16 = vsel %vm644_vm1, %v5857_v15, 0.0 }
  0xcc   : > { %664 = vadd.xlane.f32.xlu2 %v663_v16 }
  0xd0   : > { %v502_v17 = vpop.f32.mrf.mxu0 }
  0xd1   : > { %v5863_v18 = vadd.f32 %v502_v17, %v5797_v37 }
  0xd3   : > { %v666_v19 = vsel %vm644_vm1, %v5863_v18, 0.0 }
  0xd4   : > { %667 = vadd.xlane.f32.xlu0 %v666_v19  ;;  %v306_v19 = vld [vmem:[%s5754_s13 + $0x100] sm:$0xff] }
  0xd5   : > { %v353_v24 = vpack.c.bf16 %v307_v20, %v306_v19 }
  0xd8   : > { %v505_v26 = vpop.f32.mrf.mxu0 }
  0xd9   : > { %v5873_v27 = vadd.f32 %v505_v26, %v5797_v37 }
  0xdb   : > { %5112 = vmatmul.msk.bf16.gmra.mxu0 %vm379_vm0, %v349_v25  ;;  %v669_v28 = vsel %vm644_vm1, %v5873_v27, 0.0 }
  0xdc   : > { %670 = vadd.xlane.f32.xlu0 %v669_v28  ;;  %v5938_v28 = vadd.f32 %v617_v22, %v5797_v37  ;;  %v311_v22 = vld [vmem:[%s5754_s13 + $0x128] sm:$0xff] }
  0xde   : > { %v804_v33 = vsel %vm644_vm1, %v5938_v28, 0.0 }
  0xe0   : > { %v507_v29 = vpop.f32.mrf.mxu0 }
  0xe1   : > { %v5879_v30 = vadd.f32 %v507_v29, %v5797_v37 }
  0xe3   : > { %v672_v31 = vsel %vm644_vm1, %v5879_v30, 0.0 }
  0xe4   : > { %673 = vadd.xlane.f32.xlu1 %v672_v31 }
  0xe8   : > { %v510_v36 = vpop.f32.mrf.mxu0 }
  0xe9   : > { %v5886_v38 = vadd.f32 %v510_v36, %v5797_v37 }
  0xeb   : > { %5113 = vmatmul.msk.bf16.gmra.mxu0 %vm379_vm0, %v350_v35  ;;  %v675_v39 = vsel %vm644_vm1, %v5886_v38, 0.0 }
  0xec   : > { %676 = vadd.xlane.f32.xlu1 %v675_v39 }
  0xf0   : > { %v512_v41 = vpop.f32.mrf.mxu0 }
  0xf1   : > { %v5892_v42 = vadd.f32 %v512_v41, %v5797_v37 }
  0xf3   : > { %v678_v43 = vsel %vm644_vm1, %v5892_v42, 0.0 }
  0xf4   : > { %679 = vadd.xlane.f32.xlu2 %v678_v43 }
  0xf8   : > { %v515_v50 = vpop.f32.mrf.mxu0 }
  0xf9   : > { %v5899_v51 = vadd.f32 %v515_v50, %v5797_v37 }
  0xfb   : > { %5114 = vmatmul.msk.bf16.gmra.mxu0 %vm379_vm0, %v351_v49  ;;  %v681_v54 = vsel %vm644_vm1, %v5899_v51, 0.0 }
  0xfc   : > { %682 = vadd.xlane.f32.xlu2 %v681_v54 }
 0x100   : > { %v517_v56 = vpop.f32.mrf.mxu0 }
 0x101   : > { %v5905_v57 = vadd.f32 %v517_v56, %v5797_v37 }
 0x103   : > { %v684_v61 = vsel %vm644_vm1, %v5905_v57, 0.0 }
 0x104   : > { %685 = vadd.xlane.f32.xlu0 %v684_v61 }
 0x108   : > { %v520_v3 = vpop.f32.mrf.mxu0 }
 0x109   : > { %v5912_v4 = vadd.f32 %v520_v3, %v5797_v37 }
 0x10b   : > { %5115 = vmatmul.msk.bf16.gmra.mxu0 %vm379_vm0, %v352_v1  ;;  %v687_v7 = vsel %vm644_vm1, %v5912_v4, 0.0 }
 0x10c   : > { %688 = vadd.xlane.f32.xlu0 %v687_v7 }
 0x10f   : > { %v647_v10 = vpop.xlane.xlu0 %646 }
 0x110   : > { %v841_v11 = vmul.f32 %v5917_v8, %v647_v10  ;;  %v522_v12 = vpop.f32.mrf.mxu0 }
 0x111   : > { %v5921_v13 = vadd.f32 %v522_v12, %v5797_v37 }
 0x112   : > { %v5924_v14 = vsub.f32 %v5800_v40, %v841_v11 }
 0x113   : > { %v690_v16 = vsel %vm644_vm1, %v5921_v13, 0.0 }
 0x114   : > { %691 = vadd.xlane.f32.xlu1 %v690_v16  ;;  %v967_v17 = vmul.f32 %v5924_v14, %v5924_v14 }
 0x116   : > { %v1030_v21 = vsel %vm644_vm1, %v967_v17, 0.0 }
 0x117   : > { %1031 = vadd.xlane.f32.xlu0 %v1030_v21  ;;  %v650_v23 = vpop.xlane.xlu0 %649  ;;  %v310_v21 = vld [vmem:[%s5754_s13 + $0x120] sm:$0xff] }
 0x118   : > { %v842_v25 = vmul.f32 %v5917_v8, %v650_v23  ;;  %v525_v26 = vpop.f32.mrf.mxu0 }
 0x119   : > { %v5935_v40 = vadd.f32 %v525_v26, %v5797_v37  ;;  %v355_v26 = vpack.c.bf16 %v311_v22, %v310_v21 }
 0x11a   : > { %v5941_v29 = vsub.f32 %v5806_v44, %v842_v25  ;;  %v5953_v44 = vpop.f32.mrf.mxu3 }
 0x11b   : > { %5116 = vmatmul.msk.bf16.gmra.mxu0 %vm379_vm0, %v353_v24  ;;  %v693_v31 = vsel %vm644_vm1, %v5935_v40, 0.0 }
 0x11c   : > { %694 = vadd.xlane.f32.xlu1 %v693_v31  ;;  %v968_v35 = vmul.f32 %v5941_v29, %v5941_v29 }
 0x11e   : > { %v800_v32 = vpop.xlane.xlu1 %799  ;;  %v1033_v43 = vsel %vm644_vm1, %v968_v35, 0.0 }
 0x11f   : > { %805 = vadd.xlane.f32.xlu0 %v804_v33  ;;  %v797_v0 = vpop.xlane.xlu0 %796  ;;  %v892_v35 = vmul.f32 %v5917_v8, %v800_v32 }
 0x120   : > { %v527_v36 = vpop.f32.mrf.mxu0  ;;  %v891_v10 = vmul.f32 %v5917_v8, %v797_v0 }
 0x121   : > { %v5951_v39 = vadd.f32 %v527_v36, %v5797_v37  ;;  %v6018_v32 = vsub.f32 %v5816_v52, %v892_v35  ;;  %v315_v35 = vld [vmem:[%s5754_s13 + $0x148] sm:$0xff] }
 0x122   : > { %v622_v62 = vpop.f32.mrf.mxu3 }
 0x123   : > { %v696_v41 = vsel %vm644_vm1, %v5951_v39, 0.0  ;;  %v5977_v6 = vadd.f32 %v622_v62, %v5797_v37  ;;  %9956 = vst [vmem:[#allocation5_spill] sm:$0xff] %v6018_v32  ;;  %v313_v62 = vld [vmem:[%s5754_s13 + $0x138] sm:$0xff] }
 0x124   : > { %697 = vadd.xlane.f32.xlu2 %v696_v41  ;;  %1034 = vadd.xlane.f32.xlu1 %v1033_v43 }
 0x125   : > { %9954 = vst [vmem:[#allocation3_spill] sm:$0xff] %v5977_v6  ;;  %v810_v20 = vsel %vm644_vm1, %v5977_v6, 0.0 }
 0x126   : > { %v653_v47 = vpop.xlane.xlu1 %652  ;;  %v5960_v49 = vpop.xlane.xlu2 %802 }
 0x127   : > { %v843_v50 = vmul.f32 %v5917_v8, %v653_v47 }
 0x128   : > { %v530_v54 = vpop.f32.mrf.mxu0 }
 0x129   : > { %v5964_v55 = vsub.f32 %v5826_v58, %v843_v50  ;;  %v5967_v56 = vadd.f32 %v530_v54, %v5797_v37 }
 0x12b   : > { %5117 = vmatmul.msk.bf16.gmra.mxu0 %vm379_vm0, %v354_v53  ;;  %v699_v59 = vsel %vm644_vm1, %v5967_v56, 0.0  ;;  %v969_v61 = vmul.f32 %v5964_v55, %v5964_v55  ;;  %v1018_v53 = vmul.f32 %v6018_v32, %v6018_v32 }
 0x12c   : > { %700 = vadd.xlane.f32.xlu2 %v699_v59 }
 0x12d   : > { %v1036_v63 = vsel %vm644_vm1, %v969_v61, 0.0  ;;  %v312_v61 = vld [vmem:[%s5754_s13 + $0x130] sm:$0xff]  ;;  %v1183_v0 = vsel %vm644_vm1, %v1018_v53, 0.0 }
 0x12e   : > { %v656_v58 = vpop.xlane.xlu1 %655  ;;  %1037 = vadd.xlane.f32.xlu1 %v1036_v63  ;;  %v6036_v63 = vadd.f32 %v5953_v44, %v5797_v37 }
 0x12f   : > { %v844_v1 = vmul.f32 %v5917_v8, %v656_v58  ;;  %v659_v3 = vpop.xlane.xlu2 %658 }
 0x130   : > { %v532_v7 = vpop.f32.mrf.mxu0  ;;  %v845_v12 = vmul.f32 %v5917_v8, %v659_v3  ;;  %v356_v3 = vpack.c.bf16 %v313_v62, %v312_v61  ;;  %v893_v61 = vmul.f32 %v5917_v8, %v5960_v49 }
 0x131   : > { %v5981_v11 = vsub.f32 %v5839_v2, %v844_v1  ;;  %v5985_v16 = vadd.f32 %v532_v7, %v5797_v37  ;;  %v5996_v2 = vsub.f32 %v5813_v48, %v891_v10 }
 0x132   : > { %v5999_v23 = vsub.f32 %v5842_v5, %v845_v12 }
 0x133   : > { %v702_v17 = vsel %vm644_vm1, %v5985_v16, 0.0  ;;  %v970_v19 = vmul.f32 %v5981_v11, %v5981_v11  ;;  %9955 = vst [vmem:[#allocation4_spill] sm:$0xff] %v5996_v2  ;;  %v1017_v5 = vmul.f32 %v5996_v2, %v5996_v2 }
 0x134   : > { %703 = vadd.xlane.f32.xlu0 %v702_v17  ;;  %v971_v48 = vmul.f32 %v5999_v23, %v5999_v23  ;;  %v807_v17 = vsel %vm644_vm1, %v6036_v63, 0.0 }
 0x135   : > { %v1039_v24 = vsel %vm644_vm1, %v970_v19, 0.0  ;;  %v1180_v46 = vsel %vm644_vm1, %v1017_v5, 0.0  ;;  %v625_v19 = vpop.f32.mrf.mxu3 }
 0x136   : > { %1040 = vadd.xlane.f32.xlu2 %v1039_v24  ;;  %811 = vadd.xlane.f32.xlu1 %v810_v20  ;;  %v1042_v45 = vsel %vm644_vm1, %v971_v48, 0.0  ;;  %v6068_v48 = vadd.f32 %v625_v19, %v5797_v37 }
 0x137   : > { %v662_v25 = vpop.xlane.xlu2 %661 }
 0x138   : > { %v846_v31 = vmul.f32 %v5917_v8, %v662_v25  ;;  %v535_v33 = vpop.f32.mrf.mxu0  ;;  %9957 = vst [vmem:[#allocation6_spill] sm:$0xff] %v6068_v48  ;;  %v813_v53 = vsel %vm644_vm1, %v6068_v48, 0.0 }
 0x139   : > { %v6005_v36 = vadd.f32 %v535_v33, %v5797_v37  ;;  %v314_v33 = vld [vmem:[%s5754_s13 + $0x140] sm:$0xff] }
 0x13a   : > { %v6012_v41 = vsub.f32 %v5850_v9, %v846_v31 }
 0x13b   : > { %5118 = vmatmul.msk.bf16.gmra.mxu0 %vm379_vm0, %v355_v26  ;;  %v705_v43 = vsel %vm644_vm1, %v6005_v36, 0.0 }
 0x13c   : > { %706 = vadd.xlane.f32.xlu0 %v705_v43  ;;  %v972_v9 = vmul.f32 %v6012_v41, %v6012_v41 }
 0x13e   : > { %1043 = vadd.xlane.f32.xlu2 %v1042_v45  ;;  %1181 = vadd.xlane.f32.xlu1 %v1180_v46  ;;  %v1045_v54 = vsel %vm644_vm1, %v972_v9, 0.0  ;;  %v357_v46 = vpack.c.bf16 %v315_v35, %v314_v33 }
 0x13f   : > { %v665_v59 = vpop.xlane.xlu2 %664 }
 0x140   : > { %v537_v47 = vpop.f32.mrf.mxu0  ;;  %v847_v58 = vmul.f32 %v5917_v8, %v665_v59 }
 0x141   : > { %v6025_v50 = vadd.f32 %v537_v47, %v5797_v37 }
 0x142   : > { %v6047_v44 = vsub.f32 %v5857_v15, %v847_v58 }
 0x143   : > { %v708_v52 = vsel %vm644_vm1, %v6025_v50, 0.0 }
 0x144   : > { %1046 = vadd.xlane.f32.xlu0 %v1045_v54  ;;  %v973_v22 = vmul.f32 %v6047_v44, %v6047_v44 }
 0x146   : > { %1184 = vadd.xlane.f32.xlu2 %v1183_v0  ;;  %709 = vadd.xlane.f32.xlu1 %v708_v52  ;;  %v1048_v31 = vsel %vm644_vm1, %v973_v22, 0.0 }
 0x147   : > { %v668_v1 = vpop.xlane.xlu0 %667 }
 0x148   : > { %v540_v7 = vpop.f32.mrf.mxu0  ;;  %v848_v10 = vmul.f32 %v5917_v8, %v668_v1  ;;  %v316_v1 = vld [vmem:[%s5754_s13 + $0x150] sm:$0xff] }
 0x149   : > { %v6042_v12 = vadd.f32 %v540_v7, %v5797_v37 }
 0x14a   : > { %v6053_v21 = vsub.f32 %v5863_v18, %v848_v10  ;;  %v627_v18 = vpop.f32.mrf.mxu3 }
 0x14b   : > { %5119 = vmatmul.msk.bf16.gmra.mxu0 %vm379_vm0, %v356_v3  ;;  %v711_v20 = vsel %vm644_vm1, %v6042_v12, 0.0  ;;  %v6072_v45 = vadd.f32 %v627_v18, %v5797_v37  ;;  %v317_v3 = vld [vmem:[%s5754_s13 + $0x158] sm:$0xff] }
 0x14c   : > { %808 = vadd.xlane.f32.xlu0 %v807_v17  ;;  %v974_v15 = vmul.f32 %v6053_v21, %v6053_v21  ;;  %v358_v49 = vpack.c.bf16 %v317_v3, %v316_v1 }
 0x14d   : > { %9958 = vst [vmem:[#allocation7_spill] sm:$0xff] %v6072_v45  ;;  %v816_v54 = vsel %vm644_vm1, %v6072_v45, 0.0 }
 0x14e   : > { %712 = vadd.xlane.f32.xlu1 %v711_v20  ;;  %v1051_v5 = vsel %vm644_vm1, %v974_v15, 0.0 }
 0x14f   : > { %v671_v43 = vpop.xlane.xlu0 %670 }
 0x150   : > { %v542_v24 = vpop.f32.mrf.mxu0  ;;  %v849_v47 = vmul.f32 %v5917_v8, %v671_v43 }
 0x151   : > { %v6058_v25 = vadd.f32 %v542_v24, %v5797_v37 }
 0x152   : > { %v6083_v52 = vsub.f32 %v5873_v27, %v849_v47  ;;  %v6097_v27 = vsub.f32 %v5830_v60, %v893_v61  ;;  %v630_v33 = vpop.f32.mrf.mxu3 }
 0x153   : > { %v714_v26 = vsel %vm644_vm1, %v6058_v25, 0.0 }
 0x154   : > { %715 = vadd.xlane.f32.xlu2 %v714_v26  ;;  %1049 = vadd.xlane.f32.xlu0 %v1048_v31  ;;  %v975_v0 = vmul.f32 %v6083_v52, %v6083_v52  ;;  %9959 = vst [vmem:[#allocation8_spill] sm:$0xff] %v6097_v27  ;;  %v1019_v22 = vmul.f32 %v6097_v27, %v6097_v27 }
 0x156   : > { %1052 = vadd.xlane.f32.xlu1 %v1051_v5  ;;  %v1054_v7 = vsel %vm644_vm1, %v975_v0, 0.0  ;;  %v1186_v15 = vsel %vm644_vm1, %v1019_v22, 0.0  ;;  %v319_v22 = vld [vmem:[%s5754_s13 + $0x168] sm:$0xff] }
 0x157   : > { %v6121_v43 = vpop.xlane.xlu1 %673 }
 0x158   : > { %v6074_v9 = vpop.f32.mrf.mxu0  ;;  %v850_v27 = vmul.f32 %v5917_v8, %v6121_v43 }
 0x15b   : > { %5120 = vmatmul.msk.bf16.gmra.mxu0 %vm379_vm0, %v357_v46  ;;  %v6124_v46 = vadd.f32 %v630_v33, %v5797_v37 }
 0x15c   : > { %814 = vadd.xlane.f32.xlu0 %v813_v53 }
 0x15d   : > { %9960 = vst [vmem:[#allocation9_spill] sm:$0xff] %v6124_v46  ;;  %v819_v0 = vsel %vm644_vm1, %v6124_v46, 0.0 }
 0x15e   : > { %817 = vadd.xlane.f32.xlu1 %v816_v54 }
 0x160   : > { %v547_v59 = vpop.f32.mrf.mxu0 }
 0x161   : > { %v6088_v62 = vadd.f32 %v547_v59, %v5797_v37 }
 0x163   : > { %v720_v58 = vsel %vm644_vm1, %v6088_v62, 0.0 }
 0x164   : > { %721 = vadd.xlane.f32.xlu0 %v720_v58 }
 0x166   : > { %1055 = vadd.xlane.f32.xlu1 %v1054_v7  ;;  %v6141_v7 = vpop.xlane.xlu1 %676 }
 0x167   : > { %v680_v10 = vpop.xlane.xlu2 %679  ;;  %v851_v2 = vmul.f32 %v5917_v8, %v6141_v7 }
 0x168   : > { %v852_v17 = vmul.f32 %v5917_v8, %v680_v10  ;;  %v550_v19 = vpop.f32.mrf.mxu0 }
 0x169   : > { %v6102_v20 = vadd.f32 %v550_v19, %v5797_v37  ;;  %v318_v19 = vld [vmem:[%s5754_s13 + $0x160] sm:$0xff] }
 0x16a   : > { %v6107_v24 = vsub.f32 %v5892_v42, %v852_v17 }
 0x16b   : > { %5121 = vmatmul.msk.bf16.gmra.mxu0 %vm379_vm0, %v358_v49  ;;  %v723_v60 = vsel %vm644_vm1, %v6102_v20, 0.0 }
 0x16c   : > { %724 = vadd.xlane.f32.xlu0 %v723_v60  ;;  %v978_v26 = vmul.f32 %v6107_v24, %v6107_v24 }
 0x16e   : > { %1187 = vadd.xlane.f32.xlu1 %v1186_v15  ;;  %v1063_v42 = vsel %vm644_vm1, %v978_v26, 0.0  ;;  %v359_v15 = vpack.c.bf16 %v319_v22, %v318_v19  ;;  %v5229_v19 = vld [vmem:[%s9912_s2 + $0x8] sm:$0xff] }
 0x16f   : > { %v683_v5 = vpop.xlane.xlu2 %682  ;;  %2506 = vmatpush.bf16.msra.mxu1 %v5229_v19  ;;  %5236 = vmatpush.bf16.msrb.mxu3 %v5229_v19 }
 0x170   : > { %v552_v31 = vpop.f32.mrf.mxu0  ;;  %v853_v47 = vmul.f32 %v5917_v8, %v683_v5 }
 0x171   : > { %v6116_v18 = vadd.f32 %v552_v31, %v5797_v37 }
 0x172   : > { %v6134_v58 = vsub.f32 %v5899_v51, %v853_v47 }
 0x173   : > { %v726_v35 = vsel %vm644_vm1, %v6116_v18, 0.0 }
 0x174   : > { %1064 = vadd.xlane.f32.xlu0 %v1063_v42  ;;  %v979_v10 = vmul.f32 %v6134_v58, %v6134_v58 }
 0x176   : > { %727 = vadd.xlane.f32.xlu1 %v726_v35  ;;  %v1066_v60 = vsel %vm644_vm1, %v979_v10, 0.0 }
 0x177   : > { %v686_v53 = vpop.xlane.xlu0 %685 }
 0x178   : > { %v555_v54 = vpop.f32.mrf.mxu0  ;;  %v854_v59 = vmul.f32 %v5917_v8, %v686_v53 }
 0x179   : > { %v6129_v61 = vadd.f32 %v555_v54, %v5797_v37 }
 0x17a   : > { %v6139_v3 = vsub.f32 %v5905_v57, %v854_v59  ;;  %v632_v57 = vpop.f32.mrf.mxu3 }
 0x17b   : > { %v729_v1 = vsel %vm644_vm1, %v6129_v61, 0.0  ;;  %5122 = vmatmul.msk.bf16.gmra.mxu0 %vm379_vm0, %v359_v15  ;;  %v6157_v33 = vadd.f32 %v632_v57, %v5797_v37  ;;  %v321_v15 = vld [vmem:[%s5754_s13 + $0x178] sm:$0xff] }
 0x17c   : > { %820 = vadd.xlane.f32.xlu0 %v819_v0  ;;  %v980_v17 = vmul.f32 %v6139_v3, %v6139_v3 }
 0x17d   : > { %9961 = vst [vmem:[#allocation10_spill] sm:$0xff] %v6157_v33  ;;  %v822_v53 = vsel %vm644_vm1, %v6157_v33, 0.0 }
 0x17e   : > { %730 = vadd.xlane.f32.xlu1 %v729_v1  ;;  %v1069_v26 = vsel %vm644_vm1, %v980_v17, 0.0 }
 0x17f   : > { %v689_v51 = vpop.xlane.xlu0 %688 }
 0x180   : > { %v6145_v49 = vpop.f32.mrf.mxu0  ;;  %v855_v35 = vmul.f32 %v5917_v8, %v689_v51 }
 0x182   : > { %v6166_v54 = vsub.f32 %v5912_v4, %v855_v35 }
 0x184   : > { %1067 = vadd.xlane.f32.xlu0 %v1066_v60  ;;  %v981_v17 = vmul.f32 %v6166_v54, %v6166_v54  ;;  %v320_v60 = vld [vmem:[%s5754_s13 + $0x170] sm:$0xff] }
 0x185   : > { %v360_v57 = vpack.c.bf16 %v321_v15, %v320_v60 }
 0x186   : > { %1070 = vadd.xlane.f32.xlu1 %v1069_v26 }
 0x187   : > { %v6154_v31 = vpop.xlane.xlu1 %691 }
 0x188   : > { %v6159_v42 = vpop.f32.mrf.mxu0 }
 0x18a   : > { %v1032_v5 = vpop.xlane.xlu0 %1031 }
 0x18b   : > { %v1219_v47 = vmul.f32 %v1032_v5, %v5917_v8  ;;  %v1072_v5 = vsel %vm644_vm1, %v981_v17, 0.0  ;;  %5123 = vmatmul.msk.bf16.gmra.mxu0 %vm379_vm0, %v360_v57 }
 0x18d   : > { %v1282_v59 = vadd.f32 1e-05, %v1219_v47 }
 0x18e   : > { %823 = vadd.xlane.f32.xlu1 %v822_v53  ;;  %v5228_v53 = vld [vmem:[%s9912_s2] sm:$0xff] }
 0x18f   : > { %5333 = vrsqrt.f32 %v1282_v59  ;;  %v6168_v0 = vpop.xlane.xlu1 %694  ;;  %2507 = vmatpush.bf16.msra.mxu1 %v5228_v53  ;;  %5237 = vmatpush.bf16.msrb.mxu3 %v5228_v53  ;;  %vm1351_vm4 = vweird.f32 %v1282_v59 }
 0x190   : > { %v562_v1 = vpop.f32.mrf.mxu0 }
 0x191   : > { %v6171_v10 = vadd.f32 %v562_v1, %v5797_v37 }
 0x192   : > { %v806_v51 = vpop.xlane.xlu0 %805 }
 0x193   : > { %v894_v4 = vmul.f32 %v5917_v8, %v806_v51  ;;  %v738_v22 = vsel %vm644_vm1, %v6171_v10, 0.0 }
 0x194   : > { %739 = vadd.xlane.f32.xlu0 %v738_v22 }
 0x195   : > { %v5334_v26 = vpop.eup %5333  ;;  %v6184_v35 = vsub.f32 %v5938_v28, %v894_v4 }
 0x196   : > { %v1346_v47 = vmul.f32 %v5334_v26, %v1282_v59  ;;  %1073 = vadd.xlane.f32.xlu1 %v1072_v5  ;;  %vm1352_vm3 = vweird.f32 %v5334_v26 }
 0x197   : > { %9962 = vst [vmem:[#allocation11_spill] sm:$0xff] %v6184_v35  ;;  %v698_v1 = vpop.xlane.xlu2 %697  ;;  %v1035_v51 = vpop.xlane.xlu1 %1034  ;;  %v1020_v22 = vmul.f32 %v6184_v35, %v6184_v35  ;;  %vm1353_vm5 = vmor %vm1351_vm4, %vm1352_vm3 }
 0x198   : > { %v1347_v60 = vmul.f32 %v5334_v26, %v1346_v47  ;;  %v858_v28 = vmul.f32 %v5917_v8, %v698_v1  ;;  %v1220_v4 = vmul.f32 %v1035_v51, %v5917_v8  ;;  %v6195_v17 = vpop.f32.mrf.mxu0  ;;  %v6207_v51 = vadd.f32 %v6074_v9, %v5797_v37 }
 0x199   : > { %v1189_v19 = vsel %vm644_vm1, %v1020_v22, 0.0 }
 0x19a   : > { %v1348_v15 = vmul.f32 0.5, %v1347_v60  ;;  %v6199_v57 = vsub.f32 %v5951_v39, %v858_v28  ;;  %v1283_v5 = vadd.f32 1e-05, %v1220_v4  ;;  %1190 = vadd.xlane.f32.xlu2 %v1189_v19  ;;  %v6211_v60 = vsub.f32 %v5879_v30, %v850_v27  ;;  %v322_v30 = vld [vmem:[%s5754_s13 + $0x180] sm:$0xff]  ;;  %v323_v27 = vld [vmem:[%s5754_s13 + $0x188] sm:$0xff] }
 0x19b   : > { %v717_v9 = vsel %vm644_vm1, %v6207_v51, 0.0  ;;  %v361_v32 = vpack.c.bf16 %v323_v27, %v322_v30 }
 0x19c   : > { %v1349_v47 = vsub.f32 1.5, %v1348_v15  ;;  %5335 = vrsqrt.f32 %v1283_v5  ;;  %v984_v1 = vmul.f32 %v6199_v57, %v6199_v57  ;;  %vm1361_vm7 = vweird.f32 %v1283_v5 }
 0x19d   : > { %5124 = vmatmul.msk.bf16.gmra.mxu0 %vm379_vm0, %v361_v32 }
 0x19e   : > { %v1081_v53 = vsel %vm644_vm1, %v984_v1, 0.0  ;;  %v1350_v22 = vmul.f32 %v5334_v26, %v1349_v47 }
 0x19f   : > { %v701_v39 = vpop.xlane.xlu2 %700  ;;  %1082 = vadd.xlane.f32.xlu0 %v1081_v53 }
 0x1a0   : > { %v567_v43 = vpop.f32.mrf.mxu0  ;;  %v859_v15 = vmul.f32 %v5917_v8, %v701_v39  ;;  %v1354_v1 = vsel %vm1353_vm5, %v5334_v26, %v1350_v22  ;;  %v6236_v22 = vperm.slane %v5792_v34, 1 }
 0x1a1   : > { %v6214_v28 = vadd.f32 %v567_v43, %v5797_v37  ;;  %v1038_v4 = vpop.xlane.xlu1 %1037  ;;  %v976_v43 = vmul.f32 %v6211_v60, %v6211_v60 }
 0x1a2   : > { %v5336_v19 = vpop.eup %5335  ;;  %v1221_v47 = vmul.f32 %v1038_v4, %v5917_v8  ;;  %718 = vadd.xlane.f32.xlu2 %v717_v9  ;;  %v1975_v4 = vmul.f32 %v1354_v1, %v5924_v14  ;;  %v6232_v26 = vsub.f32 %v5967_v56, %v859_v15  ;;  %v6242_v14 = vsub.f32 %v5886_v38, %v851_v2 }
 0x1a3   : > { %v1356_v53 = vmul.f32 %v5336_v19, %v1283_v5  ;;  %v744_v59 = vsel %vm644_vm1, %v6214_v28, 0.0  ;;  %v1057_v7 = vsel %vm644_vm1, %v976_v43, 0.0  ;;  %vm1362_vm6 = vweird.f32 %v5336_v19 }
 0x1a4   : > { %v6222_v35 = vadd.f32 1e-05, %v1221_v47  ;;  %v6254_v43 = vperm.slane %v5792_v34, 2  ;;  %vm1363_vm8 = vmor %vm1361_vm7, %vm1362_vm6  ;;  %v977_v34 = vmul.f32 %v6242_v14, %v6242_v14 }
 0x1a5   : > { %v1357_v39 = vmul.f32 %v5336_v19, %v1356_v53 }
 0x1a6   : > { %5337 = vrsqrt.f32 %v6222_v35  ;;  %vm1371_vm12 = vweird.f32 %v6222_v35 }
 0x1a7   : > { %v1358_v9 = vmul.f32 0.5, %v1357_v39  ;;  %745 = vadd.xlane.f32.xlu0 %v744_v59  ;;  %v704_v47 = vpop.xlane.xlu0 %703  ;;  %v985_v59 = vmul.f32 %v6232_v26, %v6232_v26  ;;  %v2039_v39 = vmul.f32 %v6236_v22, %v1975_v4 }
 0x1a8   : > { %v860_v30 = vmul.f32 %v5917_v8, %v704_v47  ;;  %v570_v27 = vpop.f32.mrf.mxu0 }
 0x1a9   : > { %v1359_v56 = vsub.f32 1.5, %v1358_v9  ;;  %v6245_v15 = vadd.f32 %v570_v27, %v5797_v37  ;;  %v1041_v1 = vpop.xlane.xlu2 %1040  ;;  %v6247_v53 = vpop.xlane.xlu1 %811  ;;  %v2103_v5 = vadd.f32 %v6254_v43, %v2039_v39  ;;  %v1060_v39 = vsel %vm644_vm1, %v977_v34, 0.0 }
 0x1aa   : > { %9963 = vst [vmem:[#allocation12_spill] sm:$0xff] %v6247_v53  ;;  %v1222_v32 = vmul.f32 %v1041_v1, %v5917_v8  ;;  %1058 = vadd.xlane.f32.xlu2 %v1057_v7  ;;  %v6257_v2 = vsub.f32 %v5985_v16, %v860_v30  ;;  %v1084_v16 = vsel %vm644_vm1, %v985_v59, 0.0 }
 0x1ab   : > { %v1360_v38 = vmul.f32 %v5336_v19, %v1359_v56  ;;  %v747_v9 = vsel %vm644_vm1, %v6245_v15, 0.0  ;;  %vm2166_vm9 = vcmp.ge.f32.partialorder %v2103_v5, 0.0 }
 0x1ac   : > { %v5338_v47 = vpop.eup %5337  ;;  %v6261_v27 = vadd.f32 1e-05, %v1222_v32  ;;  %748 = vadd.xlane.f32.xlu1 %v747_v9  ;;  %v986_v32 = vmul.f32 %v6257_v2, %v6257_v2 }
 0x1ad   : > { %v1364_v7 = vsel %vm1363_vm8, %v5336_v19, %v1360_v38  ;;  %v1366_v1 = vmul.f32 %v5338_v47, %v6222_v35  ;;  %vm1372_vm10 = vweird.f32 %v5338_v47 }
 0x1ae   : > { %v1976_v4 = vmul.f32 %v1364_v7, %v5941_v29  ;;  %5339 = vrsqrt.f32 %v6261_v27  ;;  %v6278_v29 = vadd.f32 %v6145_v49, %v5797_v37  ;;  %v1087_v49 = vsel %vm644_vm1, %v986_v32, 0.0  ;;  %vm1373_vm13 = vmor %vm1371_vm12, %vm1372_vm10 }
 0x1af   : > { %v1367_v30 = vmul.f32 %v5338_v47, %v1366_v1  ;;  %1085 = vadd.xlane.f32.xlu0 %v1084_v16  ;;  %v707_v56 = vpop.xlane.xlu0 %706  ;;  %vm1381_vm15 = vweird.f32 %v6261_v27 }
 0x1b0   : > { %v861_v19 = vmul.f32 %v5917_v8, %v707_v56  ;;  %v6273_v38 = vpop.f32.mrf.mxu0  ;;  %v2040_v9 = vmul.f32 %v6236_v22, %v1976_v4  ;;  %v2229_v56 = vmul.f32 0.01, %v2103_v5 }
 0x1b1   : > { %v1368_v7 = vmul.f32 0.5, %v1367_v30  ;;  %v1044_v59 = vpop.xlane.xlu2 %1043  ;;  %v6280_v46 = vpop.xlane.xlu1 %1181 }
 0x1b2   : > { %9964 = vst [vmem:[#allocation13_spill] sm:$0xff] %v6280_v46  ;;  %v1223_v1 = vmul.f32 %v1044_v59, %v5917_v8  ;;  %1061 = vadd.xlane.f32.xlu2 %v1060_v39  ;;  %v2104_v16 = vadd.f32 %v6254_v43, %v2040_v9  ;;  %v6286_v4 = vsub.f32 %v6005_v36, %v861_v19  ;;  %v732_v36 = vsel %vm644_vm1, %v6278_v29, 0.0 }
 0x1b3   : > { %v1369_v33 = vsub.f32 1.5, %v1368_v7  ;;  %v2292_v7 = vsel %vm2166_vm9, %v2103_v5, %v2229_v56 }
 0x1b4   : > { %9965 = vst [vmem:[#allocation14_spill] sm:$0xff] %v6286_v4  ;;  %v5340_v30 = vpop.eup %5339  ;;  %v6289_v45 = vadd.f32 1e-05, %v1223_v1  ;;  %1088 = vadd.xlane.f32.xlu1 %v1087_v49  ;;  %vm2167_vm11 = vcmp.ge.f32.partialorder %v2104_v16, 0.0  ;;  %v2230_v9 = vmul.f32 0.01, %v2104_v16 }
 0x1b5   : > { %v1370_v34 = vmul.f32 %v5338_v47, %v1369_v33  ;;  %v1376_v59 = vmul.f32 %v5340_v30, %v6261_v27  ;;  %v987_v33 = vmul.f32 %v6286_v4, %v6286_v4  ;;  %vm1382_vm14 = vweird.f32 %v5340_v30 }
 0x1b6   : > { %5341 = vrsqrt.f32 %v6289_v45  ;;  %v2293_v1 = vsel %vm2167_vm11, %v2104_v16, %v2230_v9  ;;  %v6310_v16 = vadd.f32 %v6159_v42, %v5797_v37  ;;  %vm1383_vm2 = vmor %vm1381_vm15, %vm1382_vm14  ;;  %vm1391_vm4 = vweird.f32 %v6289_v45 }
 0x1b7   : > { %v1374_v32 = vsel %vm1373_vm13, %v5338_v47, %v1370_v34  ;;  %v1377_v19 = vmul.f32 %v5340_v30, %v1376_v59  ;;  %v1047_v39 = vpop.xlane.xlu0 %1046  ;;  %v2355_v48 = vpack.c.bf16 %v2293_v1, %v2292_v7  ;;  %v856_v47 = vmul.f32 %v5917_v8, %v6154_v31 }
 0x1b8   : > { %v1977_v35 = vmul.f32 %v1374_v32, %v5964_v55  ;;  %v1224_v49 = vmul.f32 %v1047_v39, %v5917_v8  ;;  %v575_v46 = vpop.f32.mrf.mxu0  ;;  %v1090_v34 = vsel %vm644_vm1, %v987_v33, 0.0 }
 0x1b9   : > { %v1378_v6 = vmul.f32 0.5, %v1377_v19  ;;  %v6302_v53 = vadd.f32 %v575_v46, %v5797_v37  ;;  %v6304_v5 = vpop.xlane.xlu1 %709  ;;  %5140 = vmatmul.msk.bf16.vlgmr.msra.gmra.mxu1 %vm644_vm1, %v2355_v48  ;;  %v735_v19 = vsel %vm644_vm1, %v6310_v16, 0.0 }
 0x1ba   : > { %v6312_v56 = vadd.f32 1e-05, %v1224_v49  ;;  %733 = vadd.xlane.f32.xlu2 %v732_v36  ;;  %v2041_v31 = vmul.f32 %v6236_v22, %v1977_v35  ;;  %v6325_v36 = vpop.xlane.xlu2 %1184 }
 0x1bb   : > { %v1379_v55 = vsub.f32 1.5, %v1378_v6  ;;  %v753_v46 = vsel %vm644_vm1, %v6302_v53, 0.0  ;;  %v6323_v6 = vsub.f32 %v5921_v13, %v856_v47  ;;  %9966 = vst [vmem:[#allocation15_spill] sm:$0xff] %v6325_v36 }
 0x1bc   : > { %v5342_v59 = vpop.eup %5341  ;;  %5343 = vrsqrt.f32 %v6312_v56  ;;  %754 = vadd.xlane.f32.xlu0 %v753_v46  ;;  %1091 = vadd.xlane.f32.xlu1 %v1090_v34  ;;  %v2105_v27 = vadd.f32 %v6254_v43, %v2041_v31  ;;  %v857_v34 = vmul.f32 %v5917_v8, %v6168_v0  ;;  %vm1401_vm9 = vweird.f32 %v6312_v56 }
 0x1bd   : > { %v1380_v42 = vmul.f32 %v5340_v30, %v1379_v55  ;;  %v1386_v48 = vmul.f32 %v5342_v59, %v6289_v45  ;;  %v982_v47 = vmul.f32 %v6323_v6, %v6323_v6  ;;  %vm1392_vm3 = vweird.f32 %v5342_v59 }
 0x1be   : > { %vm2168_vm5 = vcmp.ge.f32.partialorder %v2105_v27, 0.0  ;;  %vm1393_vm6 = vmor %vm1391_vm4, %vm1392_vm3  ;;  %v6350_v0 = vsub.f32 %v5935_v40, %v857_v34 }
 0x1bf   : > { %v1384_v9 = vsel %vm1383_vm2, %v5340_v30, %v1380_v42  ;;  %v1387_v7 = vmul.f32 %v5342_v59, %v1386_v48  ;;  %v6327_v32 = vpop.xlane.xlu0 %808  ;;  %v2231_v42 = vmul.f32 0.01, %v2105_v27  ;;  %v1075_v36 = vsel %vm644_vm1, %v982_v47, 0.0 }
 0x1c0   : > { %v1978_v39 = vmul.f32 %v1384_v9, %v5981_v11  ;;  %v577_v1 = vpop.f32.mrf.mxu0 }
 0x1c1   : > { %v1388_v33 = vmul.f32 0.5, %v1387_v7  ;;  %v6334_v35 = vadd.f32 %v577_v1, %v5797_v37  ;;  %v6336_v13 = vpop.xlane.xlu1 %712  ;;  %v2294_v45 = vsel %vm2168_vm5, %v2105_v27, %v2231_v42 }
 0x1c2   : > { %v5344_v30 = vpop.eup %5343  ;;  %736 = vadd.xlane.f32.xlu2 %v735_v19  ;;  %v2042_v49 = vmul.f32 %v6236_v22, %v1978_v39 }
 0x1c3   : > { %v1389_v55 = vsub.f32 1.5, %v1388_v33  ;;  %v1396_v11 = vmul.f32 %v5344_v30, %v6312_v56  ;;  %v756_v46 = vsel %vm644_vm1, %v6334_v35, 0.0  ;;  %vm1402_vm8 = vweird.f32 %v5344_v30 }
 0x1c4   : > { %757 = vadd.xlane.f32.xlu1 %v756_v46  ;;  %v2106_v31 = vadd.f32 %v6254_v43, %v2042_v49  ;;  %vm1403_vm10 = vmor %vm1401_vm9, %vm1402_vm8 }
 0x1c5   : > { %v1390_v48 = vmul.f32 %v5342_v59, %v1389_v55  ;;  %v1397_v9 = vmul.f32 %v5344_v30, %v1396_v11 }
 0x1c6   : > { %v2232_v7 = vmul.f32 0.01, %v2106_v31  ;;  %vm2169_vm7 = vcmp.ge.f32.partialorder %v2106_v31, 0.0 }
 0x1c7   : > { %v1394_v19 = vsel %vm1393_vm6, %v5342_v59, %v1390_v48  ;;  %v1398_v39 = vmul.f32 0.5, %v1397_v9  ;;  %v716_v1 = vpop.xlane.xlu2 %715  ;;  %v1050_v33 = vpop.xlane.xlu0 %1049 }
 0x1c8   : > { %v864_v49 = vmul.f32 %v5917_v8, %v716_v1  ;;  %v1225_v55 = vmul.f32 %v1050_v33, %v5917_v8  ;;  %v580_v46 = vpop.f32.mrf.mxu0  ;;  %v1979_v11 = vmul.f32 %v1394_v19, %v5999_v23  ;;  %v2295_v34 = vsel %vm2169_vm7, %v2106_v31, %v2232_v7 }
 0x1c9   : > { %v1399_v4 = vsub.f32 1.5, %v1398_v39  ;;  %v6356_v59 = vadd.f32 %v580_v46, %v5797_v37  ;;  %v1053_v48 = vpop.xlane.xlu1 %1052  ;;  %v2356_v27 = vpack.c.bf16 %v2295_v34, %v2294_v45  ;;  %v6385_v45 = vadd.f32 %v6195_v17, %v5797_v37 }
 0x1ca   : > { %v6359_v9 = vsub.f32 %v6058_v25, %v864_v49  ;;  %v1288_v47 = vadd.f32 1e-05, %v1225_v55  ;;  %v1226_v40 = vmul.f32 %v1053_v48, %v5917_v8  ;;  %1076 = vadd.xlane.f32.xlu2 %v1075_v36  ;;  %v983_v36 = vmul.f32 %v6350_v0, %v6350_v0 }
 0x1cb   : > { %v1400_v1 = vmul.f32 %v5344_v30, %v1399_v4  ;;  %v759_v23 = vsel %vm644_vm1, %v6356_v59, 0.0  ;;  %5141 = vmatmul.msk.bf16.gmra.mxu1 %vm644_vm1, %v2356_v27  ;;  %v2043_v4 = vmul.f32 %v6236_v22, %v1979_v11 }
 0x1cc   : > { %5345 = vrsqrt.f32 %v1288_v47  ;;  %v1289_v42 = vadd.f32 1e-05, %v1226_v40  ;;  %760 = vadd.xlane.f32.xlu1 %v759_v23  ;;  %v990_v25 = vmul.f32 %v6359_v9, %v6359_v9  ;;  %v1078_v55 = vsel %vm644_vm1, %v983_v36, 0.0 }
 0x1cd   : > { %v1404_v19 = vsel %vm1403_vm10, %v5344_v30, %v1400_v1  ;;  %v2107_v30 = vadd.f32 %v6254_v43, %v2043_v4  ;;  %v741_v4 = vsel %vm644_vm1, %v6385_v45, 0.0  ;;  %vm1411_vm14 = vweird.f32 %v1288_v47 }
 0x1ce   : > { %v1980_v56 = vmul.f32 %v1404_v19, %v6012_v41  ;;  %5347 = vrsqrt.f32 %v1289_v42  ;;  %v1099_v31 = vsel %vm644_vm1, %v990_v25, 0.0  ;;  %vm1421_vm3 = vweird.f32 %v1289_v42 }
 0x1cf   : > { %1100 = vadd.xlane.f32.xlu0 %v1099_v31  ;;  %v6373_v7 = vpop.xlane.xlu0 %814  ;;  %v2233_v40 = vmul.f32 0.01, %v2107_v30  ;;  %vm2170_vm12 = vcmp.ge.f32.partialorder %v2107_v30, 0.0 }
 0x1d0   : > { %9967 = vst [vmem:[#allocation16_spill] sm:$0xff] %v6373_v7  ;;  %v6375_v39 = vpop.f32.mrf.mxu0  ;;  %v2044_v33 = vmul.f32 %v6236_v22, %v1980_v56 }
 0x1d1   : > { %v6379_v49 = vpop.xlane.xlu1 %817  ;;  %v2296_v31 = vsel %vm2170_vm12, %v2107_v30, %v2233_v40  ;;  %v862_v40 = vmul.f32 %v5917_v8, %v6304_v5 }
 0x1d2   : > { %9968 = vst [vmem:[#allocation17_spill] sm:$0xff] %v6379_v49  ;;  %v5346_v46 = vpop.eup %5345  ;;  %1079 = vadd.xlane.f32.xlu2 %v1078_v55  ;;  %v2108_v41 = vadd.f32 %v6254_v43, %v2044_v33 }
 0x1d3   : > { %v1406_v11 = vmul.f32 %v5346_v46, %v1288_v47  ;;  %vm1412_vm13 = vweird.f32 %v5346_v46 }
 0x1d4   : > { %v5348_v48 = vpop.eup %5347  ;;  %vm2171_vm11 = vcmp.ge.f32.partialorder %v2108_v41, 0.0  ;;  %v2234_v34 = vmul.f32 0.01, %v2108_v41  ;;  %vm1413_vm2 = vmor %vm1411_vm14, %vm1412_vm13 }
 0x1d5   : > { %v1407_v1 = vmul.f32 %v5346_v46, %v1406_v11  ;;  %v1416_v27 = vmul.f32 %v5348_v48, %v1289_v42  ;;  %vm1422_vm15 = vweird.f32 %v5348_v48 }
 0x1d6   : > { %v2297_v23 = vsel %vm2171_vm11, %v2108_v41, %v2234_v34  ;;  %v6397_v41 = vadd.f32 %v6273_v38, %v5797_v37  ;;  %vm1423_vm4 = vmor %vm1421_vm3, %vm1422_vm15 }
 0x1d7   : > { %v1408_v25 = vmul.f32 0.5, %v1407_v1  ;;  %v1417_v19 = vmul.f32 %v5348_v48, %v1416_v27  ;;  %v722_v36 = vpop.xlane.xlu0 %721  ;;  %v2357_v7 = vpack.c.bf16 %v2297_v23, %v2296_v31  ;;  %v863_v31 = vmul.f32 %v5917_v8, %v6336_v13 }
 0x1d8   : > { %v866_v56 = vmul.f32 %v5917_v8, %v722_v36  ;;  %v585_v17 = vpop.f32.mrf.mxu0 }
 0x1d9   : > { %v1409_v33 = vsub.f32 1.5, %v1408_v25  ;;  %v1418_v55 = vmul.f32 0.5, %v1417_v19  ;;  %v6391_v49 = vadd.f32 %v585_v17, %v5797_v37  ;;  %v6393_v11 = vpop.xlane.xlu1 %1055 }
 0x1da   : > { %742 = vadd.xlane.f32.xlu2 %v741_v4  ;;  %v6400_v27 = vsub.f32 %v6088_v62, %v866_v56  ;;  %v750_v62 = vsel %vm644_vm1, %v6397_v41, 0.0 }
 0x1db   : > { %9969 = vst [vmem:[#allocation18_spill] sm:$0xff] %v6391_v49  ;;  %v1410_v34 = vmul.f32 %v5346_v46, %v1409_v33  ;;  %v1419_v1 = vsub.f32 1.5, %v1418_v55  ;;  %v765_v30 = vsel %vm644_vm1, %v6391_v49, 0.0  ;;  %5142 = vmatmul.msk.bf16.gmra.mxu1 %vm644_vm1, %v2357_v7 }
 0x1dc   : > { %766 = vadd.xlane.f32.xlu1 %v765_v30  ;;  %v992_v19 = vmul.f32 %v6400_v27, %v6400_v27  ;;  %v6429_v30 = vsub.f32 %v6042_v12, %v863_v31 }
 0x1dd   : > { %v1414_v23 = vsel %vm1413_vm2, %v5346_v46, %v1410_v34  ;;  %v1420_v38 = vmul.f32 %v5348_v48, %v1419_v1  ;;  %v6416_v46 = vsub.f32 %v6025_v50, %v862_v40 }
 0x1de   : > { %v1981_v47 = vmul.f32 %v1414_v23, %v6047_v44  ;;  %v989_v12 = vmul.f32 %v6429_v30, %v6429_v30 }
 0x1df   : > { %v1424_v25 = vsel %vm1423_vm4, %v5348_v48, %v1420_v38  ;;  %v1105_v48 = vsel %vm644_vm1, %v992_v19, 0.0  ;;  %v725_v56 = vpop.xlane.xlu0 %724  ;;  %v988_v50 = vmul.f32 %v6416_v46, %v6416_v46 }
 0x1e0   : > { %v1982_v36 = vmul.f32 %v1424_v25, %v6053_v21  ;;  %v587_v4 = vpop.f32.mrf.mxu0  ;;  %v2045_v5 = vmul.f32 %v6236_v22, %v1981_v47 }
 0x1e1   : > { %v6418_v42 = vpop.xlane.xlu1 %1187  ;;  %v1093_v38 = vsel %vm644_vm1, %v988_v50, 0.0 }
 0x1e2   : > { %9970 = vst [vmem:[#allocation19_spill] sm:$0xff] %v6418_v42  ;;  %751 = vadd.xlane.f32.xlu2 %v750_v62  ;;  %v2046_v44 = vmul.f32 %v6236_v22, %v1982_v36  ;;  %v2109_v7 = vadd.f32 %v6254_v43, %v2045_v5  ;;  %v1096_v5 = vsel %vm644_vm1, %v989_v12, 0.0 }
 0x1e4   : > { %1106 = vadd.xlane.f32.xlu1 %v1105_v48  ;;  %v2110_v17 = vadd.f32 %v6254_v43, %v2046_v44  ;;  %vm2172_vm5 = vcmp.ge.f32.partialorder %v2109_v7, 0.0  ;;  %v2235_v21 = vmul.f32 0.01, %v2109_v7  ;;  %v6449_v44 = vadd.f32 %v6375_v39, %v5797_v37 }
 0x1e6   : > { %vm2173_vm6 = vcmp.ge.f32.partialorder %v2110_v17, 0.0  ;;  %v2236_v33 = vmul.f32 0.01, %v2110_v17  ;;  %v2298_v55 = vsel %vm2172_vm5, %v2109_v7, %v2235_v21  ;;  %9972 = vst [vmem:[#allocation21_spill] sm:$0xff] %v6449_v44  ;;  %v762_v7 = vsel %vm644_vm1, %v6449_v44, 0.0 }
 0x1e7   : > { %v1065_v19 = vpop.xlane.xlu0 %1064 }
 0x1e8   : > { %v590_v34 = vpop.f32.mrf.mxu0  ;;  %v2299_v1 = vsel %vm2173_vm6, %v2110_v17, %v2236_v33  ;;  %v6457_v17 = vadd.f32 %v587_v4, %v5797_v37 }
 0x1e9   : > { %v6432_v40 = vadd.f32 %v590_v34, %v5797_v37  ;;  %v728_v23 = vpop.xlane.xlu1 %727  ;;  %v2358_v47 = vpack.c.bf16 %v2299_v1, %v2298_v55  ;;  %v1227_v55 = vmul.f32 %v6393_v11, %v5917_v8 }
 0x1ea   : > { %v868_v13 = vmul.f32 %v5917_v8, %v728_v23  ;;  %1094 = vadd.xlane.f32.xlu2 %v1093_v38  ;;  %9974 = vst [vmem:[#allocation23_spill] sm:$0xff] %v6457_v17  ;;  %v768_v21 = vsel %vm644_vm1, %v6457_v17, 0.0 }
 0x1eb   : > { %9971 = vst [vmem:[#allocation20_spill] sm:$0xff] %v6432_v40  ;;  %v771_v25 = vsel %vm644_vm1, %v6432_v40, 0.0  ;;  %5143 = vmatmul.msk.bf16.gmra.mxu1 %vm644_vm1, %v2358_v47  ;;  %v1290_v4 = vadd.f32 1e-05, %v1227_v55 }
 0x1ec   : > { %v6439_v62 = vsub.f32 %v6116_v18, %v868_v13  ;;  %772 = vadd.xlane.f32.xlu1 %v771_v25 }
 0x1ed   : > { %5349 = vrsqrt.f32 %v1290_v4  ;;  %vm1431_vm8 = vweird.f32 %v1290_v4 }
 0x1ee   : > { %v994_v36 = vmul.f32 %v6439_v62, %v6439_v62 }
 0x1ef   : > { %v6454_v48 = vpop.xlane.xlu0 %820 }
 0x1f0   : > { %v1111_v18 = vsel %vm644_vm1, %v994_v36, 0.0  ;;  %9973 = vst [vmem:[#allocation22_spill] sm:$0xff] %v6454_v48  ;;  %v592_v31 = vpop.f32.mrf.mxu0 }
 0x1f1   : > { %v731_v50 = vpop.xlane.xlu1 %730  ;;  %v6462_v39 = vadd.f32 %v592_v31, %v5797_v37 }
 0x1f2   : > { %1097 = vadd.xlane.f32.xlu2 %v1096_v5  ;;  %v869_v34 = vmul.f32 %v5917_v8, %v731_v50 }
 0x1f3   : > { %9975 = vst [vmem:[#allocation24_spill] sm:$0xff] %v6462_v39  ;;  %v774_v1 = vsel %vm644_vm1, %v6462_v39, 0.0  ;;  %v5350_v36 = vpop.eup %5349 }
 0x1f4   : > { %1112 = vadd.xlane.f32.xlu1 %v1111_v18  ;;  %v6470_v23 = vsub.f32 %v6129_v61, %v869_v34  ;;  %v1426_v61 = vmul.f32 %v5350_v36, %v1290_v4  ;;  %v1230_v18 = vmul.f32 %v1065_v19, %v5917_v8  ;;  %vm1432_vm7 = vweird.f32 %v5350_v36 }
 0x1f5   : > { %vm1433_vm9 = vmor %vm1431_vm8, %vm1432_vm7 }
 0x1f6   : > { %v995_v25 = vmul.f32 %v6470_v23, %v6470_v23  ;;  %v1427_v55 = vmul.f32 %v5350_v36, %v1426_v61  ;;  %v6491_v34 = vadd.f32 1e-05, %v1230_v18 }
 0x1f7   : > { %v1068_v33 = vpop.xlane.xlu0 %1067 }
 0x1f8   : > { %v1114_v12 = vsel %vm644_vm1, %v995_v25, 0.0  ;;  %v6481_v5 = vpop.f32.mrf.mxu0  ;;  %5351 = vrsqrt.f32 %v6491_v34  ;;  %vm1461_vm15 = vweird.f32 %v6491_v34 }
 0x1fa   : > { %763 = vadd.xlane.f32.xlu2 %v762_v7 }
 0x200   : > { %v6503_v61 = vpop.f32.mrf.mxu0 }
 0x201   : > { %9978 = vst [vmem:[#allocation27_spill] sm:$0xff] %v6503_v61 }
 0x202   : > { %769 = vadd.xlane.f32.xlu2 %v768_v21 }
 0x207   : > { %v740_v38 = vpop.xlane.xlu0 %739 }
 0x208   : > { %v872_v47 = vmul.f32 %v5917_v8, %v740_v38 }
 0x20a   : > { %775 = vadd.xlane.f32.xlu2 %v774_v1  ;;  %v6478_v11 = vsub.f32 %v6171_v10, %v872_v47  ;;  %v867_v10 = vmul.f32 %v5917_v8, %v725_v56  ;;  %v1071_v47 = vpop.xlane.xlu1 %1070  ;;  %v335_v56 = vld [vmem:[%s5754_s13 + $0x1e8] sm:$0xff] }
 0x20c   : > { %9977 = vst [vmem:[#allocation26_spill] sm:$0xff] %v6478_v11  ;;  %v998_v21 = vmul.f32 %v6478_v11, %v6478_v11  ;;  %v6497_v38 = vsub.f32 %v6102_v20, %v867_v10 }
 0x20d   : > { %v6473_v13 = vpop.xlane.xlu2 %1190 }
 0x20e   : > { %9976 = vst [vmem:[#allocation25_spill] sm:$0xff] %v6473_v13  ;;  %v1123_v1 = vsel %vm644_vm1, %v998_v21, 0.0  ;;  %v993_v10 = vmul.f32 %v6497_v38, %v6497_v38 }
 0x212   : > { %1115 = vadd.xlane.f32.xlu2 %v1114_v12  ;;  %v334_v12 = vld [vmem:[%s5754_s13 + $0x1e0] sm:$0xff]  ;;  %v6515_v40 = vpop.xlane.xlu0 %1082 }
 0x213   : > { %v367_v18 = vpack.c.bf16 %v335_v56, %v334_v12  ;;  %v1108_v12 = vsel %vm644_vm1, %v993_v10, 0.0 }
 0x215   : > { %v719_v7 = vpop.xlane.xlu2 %718  ;;  %5130 = vmatmul.msk.bf16.gmra.mxu3 %vm379_vm0, %v367_v18  ;;  %v6522_v18 = vpop.xlane.xlu1 %823 }
 0x216   : > { %v865_v31 = vmul.f32 %v5917_v8, %v719_v7  ;;  %v1428_v7 = vmul.f32 0.5, %v1427_v55  ;;  %v1232_v55 = vmul.f32 %v1071_v47, %v5917_v8  ;;  %9979 = vst [vmem:[#allocation28_spill] sm:$0xff] %v6522_v18 }
 0x218   : > { %v6489_v50 = vsub.f32 %v6207_v51, %v865_v31  ;;  %v1231_v31 = vmul.f32 %v1068_v33, %v5917_v8  ;;  %v6518_v33 = vadd.f32 1e-05, %v1232_v55 }
 0x21a   : > { %1124 = vadd.xlane.f32.xlu2 %v1123_v1  ;;  %v991_v19 = vmul.f32 %v6489_v50, %v6489_v50  ;;  %v1429_v1 = vsub.f32 1.5, %v1428_v7  ;;  %v746_v18 = vpop.xlane.xlu0 %745 }
 0x21c   : > { %v1102_v25 = vsel %vm644_vm1, %v991_v19, 0.0  ;;  %v6511_v19 = vpop.eup %5351  ;;  %v1430_v56 = vmul.f32 %v5350_v36, %v1429_v1 }
 0x21d   : > { %1103 = vadd.xlane.f32.xlu0 %v1102_v25  ;;  %v1059_v51 = vpop.xlane.xlu2 %1058  ;;  %v6513_v25 = vadd.f32 1e-05, %v1231_v31  ;;  %v1456_v7 = vmul.f32 %v6511_v19, %v6491_v34  ;;  %vm1462_vm13 = vweird.f32 %v6511_v19 }
 0x21e   : > { %v1228_v21 = vmul.f32 %v1059_v51, %v5917_v8  ;;  %v1434_v1 = vsel %vm1433_vm9, %v5350_v36, %v1430_v56  ;;  %vm6572_vm2 = vmor %vm1461_vm15, %vm1462_vm13 }
 0x21f   : > { %v1983_v42 = vmul.f32 %v1434_v1, %v6083_v52  ;;  %vm1471_vm8 = vweird.f32 %v6513_v25 }
 0x220   : > { %v1291_v20 = vadd.f32 1e-05, %v1228_v21  ;;  %v6526_v21 = vpop.f32.mrf.mxu0 }
 0x221   : > { %9980 = vst [vmem:[#allocation29_spill] sm:$0xff] %v6526_v21  ;;  %v2047_v52 = vmul.f32 %v6236_v22, %v1983_v42 }
 0x222   : > { %5353 = vrsqrt.f32 %v1291_v20  ;;  %vm1441_vm11 = vweird.f32 %v1291_v20 }
 0x223   : > { %5355 = vrsqrt.f32 %v6513_v25 }
 0x224   : > { %5357 = vrsqrt.f32 %v6518_v33 }
 0x225   : > { %v1062_v51 = vpop.xlane.xlu2 %1061  ;;  %1109 = vadd.xlane.f32.xlu0 %v1108_v12  ;;  %v1457_v12 = vmul.f32 %v6511_v19, %v1456_v7 }
 0x226   : > { %v1229_v47 = vmul.f32 %v1062_v51, %v5917_v8 }
 0x227   : > { %v1458_v48 = vmul.f32 0.5, %v1457_v12 }
 0x228   : > { %v5354_v31 = vpop.eup %5353  ;;  %v1292_v10 = vadd.f32 1e-05, %v1229_v47  ;;  %v1074_v47 = vpop.xlane.xlu1 %1073 }
 0x229   : > { %v1436_v55 = vmul.f32 %v5354_v31, %v1291_v20  ;;  %v6531_v13 = vpop.eup %5355  ;;  %vm1442_vm10 = vweird.f32 %v5354_v31  ;;  %v1459_v17 = vsub.f32 1.5, %v1458_v48 }
 0x22a   : > { %5359 = vrsqrt.f32 %v1292_v10  ;;  %v6534_v49 = vpop.eup %5357  ;;  %v1466_v7 = vmul.f32 %v6531_v13, %v6513_v25  ;;  %vm1443_vm12 = vmor %vm1441_vm11, %vm1442_vm10  ;;  %vm1451_vm3 = vweird.f32 %v1292_v10  ;;  %vm1472_vm7 = vweird.f32 %v6531_v13 }
 0x22b   : > { %v1437_v39 = vmul.f32 %v5354_v31, %v1436_v55  ;;  %v1476_v61 = vmul.f32 %v6534_v49, %v6518_v33  ;;  %v1460_v44 = vmul.f32 %v6511_v19, %v1459_v17  ;;  %vm1482_vm9 = vweird.f32 %v6534_v49  ;;  %vm6614_vm10 = vmor %vm1471_vm8, %vm1472_vm7 }
 0x22c   : > { %vm1481_vm11 = vweird.f32 %v6518_v33 }
 0x22d   : > { %v1438_v4 = vmul.f32 0.5, %v1437_v39  ;;  %v734_v51 = vpop.xlane.xlu2 %733  ;;  %v874_v39 = vmul.f32 %v5917_v8, %v746_v18  ;;  %v2111_v18 = vadd.f32 %v6254_v43, %v2047_v52 }
 0x22e   : > { %v870_v21 = vmul.f32 %v5917_v8, %v734_v51  ;;  %v6543_v51 = vpop.f32.mrf.mxu0 }
 0x22f   : > { %v1439_v36 = vsub.f32 1.5, %v1438_v4  ;;  %9981 = vst [vmem:[#allocation30_spill] sm:$0xff] %v6543_v51  ;;  %v6554_v20 = vsub.f32 %v6214_v28, %v874_v39  ;;  %vm2174_vm5 = vcmp.ge.f32.partialorder %v2111_v18, 0.0 }
 0x230   : > { %v5360_v56 = vpop.eup %5359  ;;  %v6539_v55 = vsub.f32 %v6278_v29, %v870_v21  ;;  %v1467_v21 = vmul.f32 %v6531_v13, %v1466_v7  ;;  %v6565_v39 = vpop.xlane.xlu1 %748 }
 0x231   : > { %v1440_v1 = vmul.f32 %v5354_v31, %v1439_v36  ;;  %v1446_v12 = vmul.f32 %v5360_v56, %v1292_v10  ;;  %vm1452_vm14 = vweird.f32 %v5360_v56 }
 0x232   : > { %v996_v4 = vmul.f32 %v6539_v55, %v6539_v55  ;;  %v1468_v28 = vmul.f32 0.5, %v1467_v21  ;;  %vm1453_vm4 = vmor %vm1451_vm3, %vm1452_vm14 }
 0x233   : > { %v1444_v11 = vsel %vm1443_vm12, %v5354_v31, %v1440_v1  ;;  %v1447_v29 = vmul.f32 %v5360_v56, %v1446_v12  ;;  %v1233_v31 = vmul.f32 %v1074_v47, %v5917_v8  ;;  %v2237_v47 = vmul.f32 0.01, %v2111_v18  ;;  %vm1483_vm12 = vmor %vm1481_vm11, %vm1482_vm9 }
 0x234   : > { %v1984_v42 = vmul.f32 %v1444_v11, %v6211_v60  ;;  %v1117_v51 = vsel %vm644_vm1, %v996_v4, 0.0  ;;  %v1477_v11 = vmul.f32 %v6534_v49, %v1476_v61  ;;  %v1464_v4 = vsel %vm6572_vm2, %v6511_v19, %v1460_v44 }
 0x235   : > { %v1448_v48 = vmul.f32 0.5, %v1447_v29  ;;  %v737_v36 = vpop.xlane.xlu2 %736  ;;  %1118 = vadd.xlane.f32.xlu0 %v1117_v51  ;;  %v1000_v51 = vmul.f32 %v6554_v20, %v6554_v20 }
 0x236   : > { %v871_v1 = vmul.f32 %v5917_v8, %v737_v36  ;;  %v2048_v60 = vmul.f32 %v6236_v22, %v1984_v42  ;;  %v6562_v52 = vpop.f32.mrf.mxu1  ;;  %v1478_v21 = vmul.f32 0.5, %v1477_v11 }
 0x237   : > { %v1449_v7 = vsub.f32 1.5, %v1448_v48  ;;  %v605_v48 = vpop.f32.mrf.mxu0  ;;  %v1129_v19 = vsel %vm644_vm1, %v1000_v51, 0.0 }
 0x238   : > { %v6568_v17 = vsub.f32 %v6310_v16, %v871_v1  ;;  %v2112_v34 = vadd.f32 %v6254_v43, %v2048_v60  ;;  %v6582_v16 = vadd.f32 1e-05, %v1233_v31  ;;  %v1986_v60 = vmul.f32 %v1464_v4, %v6107_v24 }
 0x239   : > { %v1450_v61 = vmul.f32 %v5360_v56, %v1449_v7  ;;  %v1469_v7 = vsub.f32 1.5, %v1468_v28  ;;  %v2300_v31 = vsel %vm2174_vm5, %v2111_v18, %v2237_v47  ;;  %v1479_v12 = vsub.f32 1.5, %v1478_v21  ;;  %v6603_v18 = vpop.xlane.xlu1 %1088 }
 0x23a   : > { %v997_v29 = vmul.f32 %v6568_v17, %v6568_v17  ;;  %vm2175_vm6 = vcmp.ge.f32.partialorder %v2112_v34, 0.0  ;;  %v2238_v1 = vmul.f32 0.01, %v2112_v34  ;;  %5361 = vrsqrt.f32 %v6582_v16 }
 0x23b   : > { %v1454_v42 = vsel %vm1453_vm4, %v5360_v56, %v1450_v61  ;;  %v1470_v51 = vmul.f32 %v6531_v13, %v1469_v7  ;;  %v1480_v4 = vmul.f32 %v6534_v49, %v1479_v12  ;;  %vm1491_vm7 = vweird.f32 %v6582_v16 }
 0x23c   : > { %v1985_v10 = vmul.f32 %v1454_v42, %v6242_v14  ;;  %v1120_v36 = vsel %vm644_vm1, %v997_v29, 0.0  ;;  %v2301_v56 = vsel %vm2175_vm6, %v2112_v34, %v2238_v1  ;;  %v6593_v14 = vadd.f32 %v605_v48, %v5797_v37  ;;  %v5585_v48 = vld [vmem:[%s9914_s4] sm:$0x3f] }
 0x23d   : > { %v1077_v44 = vpop.xlane.xlu2 %1076  ;;  %1121 = vadd.xlane.f32.xlu1 %v1120_v36  ;;  %1130 = vadd.xlane.f32.xlu0 %v1129_v19  ;;  %v2359_v61 = vpack.c.bf16 %v2301_v56, %v2300_v31  ;;  %v2050_v34 = vmul.f32 %v6236_v22, %v1986_v60  ;;  %v1474_v25 = vsel %vm6614_vm10, %v6531_v13, %v1470_v51 }
 0x23e   : > { %v1234_v11 = vmul.f32 %v1077_v44, %v5917_v8  ;;  %v6597_v24 = vpop.f32.mrf.mxu1  ;;  %v2049_v28 = vmul.f32 %v6236_v22, %v1985_v10  ;;  %v789_v47 = vsel %vm644_vm1, %v6593_v14, 0.0  ;;  %v6621_v10 = vperm.slane %v5585_v48, 3 }
 0x23f   : > { %5144 = vmatmul.msk.bf16.gmra.mxu1 %vm644_vm1, %v2359_v61  ;;  %v1236_v60 = vmul.f32 %v6515_v40, %v5917_v8  ;;  %v2114_v44 = vadd.f32 %v6254_v43, %v2050_v34  ;;  %v895_v19 = vmul.f32 %v5917_v8, %v6327_v32  ;;  %v1484_v31 = vsel %vm1483_vm12, %v6534_v49, %v1480_v4 }
 0x240   : > { %v6595_v29 = vadd.f32 1e-05, %v1234_v11  ;;  %v6612_v21 = vpop.eup %5361  ;;  %v2113_v36 = vadd.f32 %v6254_v43, %v2049_v28  ;;  %v1987_v33 = vmul.f32 %v1474_v25, %v6134_v58  ;;  %v6642_v56 = vadd.f32 %v6562_v52, %v6621_v10 }
 0x241   : > { %v1486_v13 = vmul.f32 %v6612_v21, %v6582_v16  ;;  %v1988_v32 = vmul.f32 %v1484_v31, %v6139_v3  ;;  %v6649_v49 = vadd.f32 1e-05, %v1236_v60  ;;  %v2240_v51 = vmul.f32 0.01, %v2114_v44  ;;  %v6658_v34 = vpop.xlane.xlu1 %1091 }
 0x242   : > { %5363 = vrsqrt.f32 %v6595_v29  ;;  %v2239_v12 = vmul.f32 0.01, %v2113_v36  ;;  %vm2176_vm13 = vcmp.ge.f32.partialorder %v2113_v36, 0.0  ;;  %v6654_v58 = vsub.f32 %v6036_v63, %v895_v19 }
 0x243   : > { %v1487_v52 = vmul.f32 %v6612_v21, %v1486_v13  ;;  %vm2177_vm14 = vcmp.ge.f32.partialorder %v2114_v44, 0.0  ;;  %v2668_v3 = vsel %vm644_vm1, %v6642_v56, 0.0  ;;  %v2051_v42 = vmul.f32 %v6236_v22, %v1987_v33 }
 0x244   : > { %9986 = vst [vmem:[#allocation31_spill] sm:$0xff] %v6654_v58  ;;  %v2302_v4 = vsel %vm2176_vm13, %v2113_v36, %v2239_v12  ;;  %v2052_v60 = vmul.f32 %v6236_v22, %v1988_v32  ;;  %v1021_v31 = vmul.f32 %v6654_v58, %v6654_v58  ;;  %vm1492_vm2 = vweird.f32 %v6612_v21 }
 0x245   : > { %v1080_v1 = vpop.xlane.xlu2 %1079  ;;  %790 = vadd.xlane.f32.xlu1 %v789_v47  ;;  %v2115_v36 = vadd.f32 %v6254_v43, %v2051_v42  ;;  %v875_v58 = vmul.f32 %v5917_v8, %v6565_v39  ;;  %vm1501_vm4 = vweird.f32 %v6595_v29  ;;  %vm6723_vm8 = vmor %vm1491_vm7, %vm1492_vm2  ;;  %vm1521_vm12 = vweird.f32 %v6649_v49 }
 0x246   : > { %v1235_v7 = vmul.f32 %v1080_v1, %v5917_v8  ;;  %v2303_v1 = vsel %vm2177_vm14, %v2114_v44, %v2240_v51  ;;  %v2116_v32 = vadd.f32 %v6254_v43, %v2052_v60 }
 0x247   : > { %v2360_v19 = vpack.c.bf16 %v2303_v1, %v2302_v4  ;;  %v1238_v4 = vmul.f32 %v6603_v18, %v5917_v8  ;;  %vm2178_vm15 = vcmp.ge.f32.partialorder %v2115_v36, 0.0 }
 0x248   : > { %v6637_v11 = vpop.eup %5363  ;;  %v6644_v40 = vadd.f32 1e-05, %v1235_v7  ;;  %v6651_v28 = vpop.f32.mrf.mxu1  ;;  %v1488_v7 = vmul.f32 0.5, %v1487_v52  ;;  %vm2179_vm6 = vcmp.ge.f32.partialorder %v2116_v32, 0.0 }
 0x249   : > { %v1496_v61 = vmul.f32 %v6637_v11, %v6595_v29  ;;  %v1086_v52 = vpop.xlane.xlu0 %1085  ;;  %vm1502_vm3 = vweird.f32 %v6637_v11 }
 0x24a   : > { %5365 = vrsqrt.f32 %v6644_v40  ;;  %v1489_v51 = vsub.f32 1.5, %v1488_v7  ;;  %v1237_v60 = vmul.f32 %v1086_v52, %v5917_v8  ;;  %v758_v7 = vpop.xlane.xlu1 %757  ;;  %vm6705_vm5 = vmor %vm1501_vm4, %vm1502_vm3  ;;  %vm1511_vm11 = vweird.f32 %v6644_v40 }
 0x24b   : > { %v1497_v47 = vmul.f32 %v6637_v11, %v1496_v61  ;;  %5367 = vrsqrt.f32 %v6649_v49  ;;  %v878_v39 = vmul.f32 %v5917_v8, %v758_v7  ;;  %v6741_v7 = vsub.f32 %v6245_v15, %v875_v58 }
 0x24d   : > { %v1498_v48 = vmul.f32 0.5, %v1497_v47  ;;  %v743_v25 = vpop.xlane.xlu2 %742  ;;  %2669 = vadd.xlane.f32.xlu1 %v2668_v3  ;;  %v1192_v47 = vsel %vm644_vm1, %v1021_v31, 0.0  ;;  %v607_v3 = vpop.f32.mrf.mxu0  ;;  %v2242_v31 = vmul.f32 0.01, %v2116_v32 }
 0x24e   : > { %v873_v63 = vmul.f32 %v5917_v8, %v743_v25 }
 0x24f   : > { %v1499_v33 = vsub.f32 1.5, %v1498_v48  ;;  %5145 = vmatmul.msk.bf16.gmra.mxu1 %vm644_vm1, %v2360_v19  ;;  %v2241_v48 = vmul.f32 0.01, %v2115_v36  ;;  %v6693_v19 = vadd.f32 %v607_v3, %v5797_v37 }
 0x250   : > { %v6670_v13 = vsub.f32 %v6385_v45, %v873_v63  ;;  %v6674_v12 = vpop.eup %5365  ;;  %v2516_v61 = vpop.f32.mrf.mxu1 }
 0x251   : > { %v6680_v45 = vpop.eup %5367  ;;  %v1500_v25 = vmul.f32 %v6637_v11, %v1499_v33  ;;  %v1506_v63 = vmul.f32 %v6674_v12, %v6644_v40  ;;  %v6710_v3 = vadd.f32 %v2516_v61, %v6621_v10  ;;  %v6727_v61 = vadd.f32 1e-05, %v1237_v60 }
 0x252   : > { %v999_v44 = vmul.f32 %v6670_v13, %v6670_v13  ;;  %v1516_v33 = vmul.f32 %v6680_v45, %v6649_v49  ;;  %v792_v16 = vsel %vm644_vm1, %v6693_v19, 0.0  ;;  %v2305_v60 = vsel %vm2179_vm6, %v2116_v32, %v2242_v31 }
 0x253   : > { %v1504_v29 = vsel %vm6705_vm5, %v6637_v11, %v1500_v25  ;;  %v2304_v11 = vsel %vm2178_vm15, %v2115_v36, %v2241_v48  ;;  %v2677_v52 = vsel %vm644_vm1, %v6710_v3, 0.0  ;;  %v755_v36 = vpop.xlane.xlu0 %754  ;;  %v6749_v48 = vsub.f32 %v6334_v35, %v878_v39 }
 0x254   : > { %v1126_v42 = vsel %vm644_vm1, %v999_v44, 0.0  ;;  %v1490_v44 = vmul.f32 %v6612_v21, %v1489_v51  ;;  %v2361_v32 = vpack.c.bf16 %v2305_v60, %v2304_v11  ;;  %v1001_v31 = vmul.f32 %v6741_v7, %v6741_v7 }
 0x255   : > { %v752_v1 = vpop.xlane.xlu2 %751  ;;  %1193 = vadd.xlane.f32.xlu1 %v1192_v47  ;;  %1127 = vadd.xlane.f32.xlu2 %v1126_v42  ;;  %v6701_v47 = vadd.f32 1e-05, %v1238_v4  ;;  %v1507_v4 = vmul.f32 %v6674_v12, %v1506_v63  ;;  %v1517_v63 = vmul.f32 %v6680_v45, %v1516_v33  ;;  %v1004_v39 = vmul.f32 %v6749_v48, %v6749_v48 }
 0x256   : > { %v876_v18 = vmul.f32 %v5917_v8, %v752_v1  ;;  %v1494_v25 = vsel %vm6723_vm8, %v6612_v21, %v1490_v44  ;;  %v1132_v11 = vsel %vm644_vm1, %v1001_v31, 0.0  ;;  %vm1512_vm9 = vweird.f32 %v6674_v12 }
 0x257   : > { %5369 = vrsqrt.f32 %v6701_v47  ;;  %v1508_v21 = vmul.f32 0.5, %v1507_v4  ;;  %v1989_v15 = vmul.f32 %v1494_v25, %v6166_v54  ;;  %v1518_v58 = vmul.f32 0.5, %v1517_v63  ;;  %vm1513_vm13 = vmor %vm1511_vm11, %vm1512_vm9 }
 0x258   : > { %v6713_v51 = vsub.f32 %v6397_v41, %v876_v18  ;;  %v6729_v41 = vpop.f32.mrf.mxu1  ;;  %v1990_v18 = vmul.f32 %v1504_v29, %v6323_v6  ;;  %5371 = vrsqrt.f32 %v6727_v61  ;;  %v877_v6 = vmul.f32 %v5917_v8, %v755_v36 }
 0x259   : > { %v1509_v33 = vsub.f32 1.5, %v1508_v21  ;;  %v1519_v4 = vsub.f32 1.5, %v1518_v58  ;;  %vm1522_vm10 = vweird.f32 %v6680_v45  ;;  %v6793_v31 = vadd.f32 %v6651_v28, %v6621_v10 }
 0x25a   : > { %9989 = vst [vmem:[#allocation32_spill] sm:$0xff] %v6713_v51  ;;  %v1002_v1 = vmul.f32 %v6713_v51, %v6713_v51  ;;  %v2054_v44 = vmul.f32 %v6236_v22, %v1990_v18  ;;  %v1141_v18 = vsel %vm644_vm1, %v1004_v39, 0.0  ;;  %vm1523_vm15 = vmor %vm1521_vm12, %vm1522_vm10  ;;  %vm1541_vm4 = vweird.f32 %v6701_v47 }
 0x25b   : > { %v1510_v60 = vmul.f32 %v6674_v12, %v1509_v33  ;;  %v1520_v36 = vmul.f32 %v6680_v45, %v1519_v4  ;;  %v6804_v4 = vpop.xlane.xlu1 %760  ;;  %vm1531_vm5 = vweird.f32 %v6727_v61 }
 0x25c   : > { %v1135_v51 = vsel %vm644_vm1, %v1002_v1, 0.0  ;;  %v2118_v25 = vadd.f32 %v6254_v43, %v2054_v44 }
 0x25d   : > { %2678 = vadd.xlane.f32.xlu1 %v2677_v52  ;;  %793 = vadd.xlane.f32.xlu2 %v792_v16  ;;  %v1095_v35 = vpop.xlane.xlu2 %1094  ;;  %v6760_v54 = vpop.eup %5369  ;;  %v6766_v16 = vsub.f32 %v6302_v53, %v877_v6  ;;  %v1239_v53 = vmul.f32 %v6658_v34, %v5917_v8  ;;  %v1514_v6 = vsel %vm1513_vm13, %v6674_v12, %v1510_v60 }
 0x25e   : > { %1136 = vadd.xlane.f32.xlu0 %v1135_v51  ;;  %v2053_v51 = vmul.f32 %v6236_v22, %v1989_v15  ;;  %v6763_v42 = vpop.eup %5371  ;;  %v1240_v1 = vmul.f32 %v1095_v35, %v5917_v8  ;;  %v1536_v63 = vmul.f32 %v6760_v54, %v6701_v47  ;;  %v2244_v58 = vmul.f32 0.01, %v2118_v25 }
 0x25f   : > { %5146 = vmatmul.msk.bf16.gmra.mxu1 %vm644_vm1, %v2361_v32  ;;  %v1526_v21 = vmul.f32 %v6763_v42, %v6727_v61  ;;  %v1003_v34 = vmul.f32 %v6766_v16, %v6766_v16  ;;  %vm2181_vm14 = vcmp.ge.f32.partialorder %v2118_v25, 0.0  ;;  %v6795_v40 = vadd.f32 1e-05, %v1239_v53 }
 0x260   : > { %v2521_v29 = vpop.f32.mrf.mxu1  ;;  %v2117_v52 = vadd.f32 %v6254_v43, %v2053_v51  ;;  %v6785_v15 = vadd.f32 1e-05, %v1240_v1  ;;  %v1537_v32 = vmul.f32 %v6760_v54, %v1536_v63  ;;  %v1524_v44 = vsel %vm1523_vm15, %v6680_v45, %v1520_v36 }
 0x261   : > { %v1527_v33 = vmul.f32 %v6763_v42, %v1526_v21  ;;  %v1991_v35 = vmul.f32 %v1514_v6, %v6350_v0  ;;  %v1138_v12 = vsel %vm644_vm1, %v1003_v34, 0.0  ;;  %v2307_v28 = vsel %vm2181_vm14, %v2118_v25, %v2244_v58 }
 0x262   : > { %v2243_v49 = vmul.f32 0.01, %v2117_v52  ;;  %vm2180_vm2 = vcmp.ge.f32.partialorder %v2117_v52, 0.0  ;;  %5373 = vrsqrt.f32 %v6785_v15  ;;  %v1538_v51 = vmul.f32 0.5, %v1537_v32  ;;  %v1101_v32 = vpop.xlane.xlu0 %1100 }
 0x263   : > { %v2674_v1 = vsel %vm644_vm1, %v6793_v31, 0.0  ;;  %v1992_v45 = vmul.f32 %v1524_v44, %v6199_v57  ;;  %5375 = vrsqrt.f32 %v6795_v40  ;;  %v6812_v60 = vadd.f32 %v6597_v24, %v6621_v10  ;;  %v336_v57 = vld [vmem:[%s5754_s13 + $0x1f0] sm:$0xff] }
 0x264   : > { %v2306_v0 = vsel %vm2180_vm2, %v2117_v52, %v2243_v49  ;;  %v2055_v25 = vmul.f32 %v6236_v22, %v1991_v35  ;;  %v6816_v53 = vadd.f32 %v2521_v29, %v6621_v10  ;;  %v368_v34 = vpack.c.bf16 %v336_v57, %v336_v57 }
 0x265   : > { %1133 = vadd.xlane.f32.xlu2 %v1132_v11  ;;  %v1528_v11 = vmul.f32 0.5, %v1527_v33  ;;  %v2362_v63 = vpack.c.bf16 %v2307_v28, %v2306_v0  ;;  %v1098_v36 = vpop.xlane.xlu2 %1097  ;;  %v2056_v52 = vmul.f32 %v6236_v22, %v1992_v45  ;;  %v2671_v49 = vsel %vm644_vm1, %v6812_v60, 0.0  ;;  %v6832_v33 = vpop.xlane.xlu1 %766 }
 0x266   : > { %1142 = vadd.xlane.f32.xlu0 %v1141_v18  ;;  %v1539_v18 = vsub.f32 1.5, %v1538_v51  ;;  %v1241_v24 = vmul.f32 %v1098_v36, %v5917_v8  ;;  %v2119_v29 = vadd.f32 %v6254_v43, %v2055_v25  ;;  %5131 = vmatmul.msk.bf16.gmra.mxu3 %vm379_vm0, %v368_v34  ;;  %vm1542_vm3 = vweird.f32 %v6760_v54 }
 0x267   : > { %v1529_v58 = vsub.f32 1.5, %v1528_v11  ;;  %v1242_v28 = vmul.f32 %v1101_v32, %v5917_v8  ;;  %vm1532_vm0 = vweird.f32 %v6763_v42  ;;  %vm1543_vm6 = vmor %vm1541_vm4, %vm1542_vm3  ;;  %v6848_v11 = vadd.f32 %v6729_v41, %v6621_v10 }
 0x268   : > { %v6801_v39 = vpop.f32.mrf.mxu1  ;;  %v6820_v21 = vpop.eup %5373  ;;  %v1540_v44 = vmul.f32 %v6760_v54, %v1539_v18  ;;  %v2245_v25 = vmul.f32 0.01, %v2119_v29  ;;  %vm2182_vm7 = vcmp.ge.f32.partialorder %v2119_v29, 0.0  ;;  %vm1533_vm8 = vmor %vm1531_vm5, %vm1532_vm0  ;;  %vm1561_vm12 = vweird.f32 %v6785_v15 }
 0x269   : > { %v6823_v6 = vpop.eup %5375  ;;  %v1556_v35 = vmul.f32 %v6820_v21, %v6785_v15  ;;  %v1530_v45 = vmul.f32 %v6763_v42, %v1529_v58  ;;  %v6857_v47 = vadd.f32 1e-05, %v1242_v28  ;;  %vm1562_vm10 = vweird.f32 %v6820_v21 }
 0x26a   : > { %v1546_v0 = vmul.f32 %v6823_v6, %v6795_v40  ;;  %v1544_v18 = vsel %vm1543_vm6, %v6760_v54, %v1540_v44  ;;  %v2680_v54 = vsel %vm644_vm1, %v6848_v11, 0.0  ;;  %v2308_v58 = vsel %vm2182_vm7, %v2119_v29, %v2245_v25  ;;  %vm1563_vm13 = vmor %vm1561_vm12, %vm1562_vm10 }
 0x26b   : > { %v1557_v36 = vmul.f32 %v6820_v21, %v1556_v35  ;;  %v1994_v34 = vmul.f32 %v1544_v18, %v6257_v2  ;;  %vm1552_vm11 = vweird.f32 %v6823_v6  ;;  %vm1551_vm14 = vweird.f32 %v6795_v40 }
 0x26c   : > { %v1547_v41 = vmul.f32 %v6823_v6, %v1546_v0  ;;  %vm1553_vm2 = vmor %vm1551_vm14, %vm1552_vm11  ;;  %vm1581_vm7 = vweird.f32 %v6857_v47 }
 0x26d   : > { %1139 = vadd.xlane.f32.xlu2 %v1138_v12  ;;  %v2683_v12 = vsel %vm644_vm1, %v6816_v53, 0.0  ;;  %v1558_v32 = vmul.f32 0.5, %v1557_v36  ;;  %v1107_v35 = vpop.xlane.xlu1 %1106  ;;  %v2058_v29 = vmul.f32 %v6236_v22, %v1994_v34 }
 0x26e   : > { %2675 = vadd.xlane.f32.xlu0 %v2674_v1  ;;  %v2120_v1 = vadd.f32 %v6254_v43, %v2056_v52  ;;  %v1534_v52 = vsel %vm1533_vm8, %v6763_v42, %v1530_v45  ;;  %v1548_v44 = vmul.f32 0.5, %v1547_v41 }
 0x26f   : > { %5147 = vmatmul.msk.bf16.gmra.mxu1 %vm644_vm1, %v2362_v63  ;;  %v6850_v63 = vadd.f32 1e-05, %v1241_v24  ;;  %v1559_v28 = vsub.f32 1.5, %v1558_v32 }
 0x270   : > { %v2526_v51 = vpop.f32.mrf.mxu1  ;;  %v2246_v61 = vmul.f32 0.01, %v2120_v1  ;;  %vm2183_vm9 = vcmp.ge.f32.partialorder %v2120_v1, 0.0  ;;  %v1549_v45 = vsub.f32 1.5, %v1548_v44 }
 0x271   : > { %v6855_v57 = vadd.f32 %v2526_v51, %v6621_v10  ;;  %5377 = vrsqrt.f32 %v6850_v63  ;;  %v1560_v18 = vmul.f32 %v6820_v21, %v1559_v28  ;;  %vm1571_vm5 = vweird.f32 %v6850_v63 }
 0x272   : > { %5379 = vrsqrt.f32 %v6857_v47  ;;  %v2309_v42 = vsel %vm2183_vm9, %v2120_v1, %v2246_v61  ;;  %v6880_v1 = vpop.xlane.xlu2 %763  ;;  %v1244_v61 = vmul.f32 %v1107_v35, %v5917_v8  ;;  %v1550_v41 = vmul.f32 %v6823_v6, %v1549_v45 }
 0x273   : > { %v2689_v24 = vsel %vm644_vm1, %v6855_v57, 0.0  ;;  %v2363_v2 = vpack.c.bf16 %v2309_v42, %v2308_v58  ;;  %v1564_v58 = vsel %vm1563_vm13, %v6820_v21, %v1560_v18 }
 0x274   : > { %v1554_v44 = vsel %vm1553_vm2, %v6823_v6, %v1550_v41  ;;  %v1996_v15 = vmul.f32 %v1564_v58, %v6416_v46 }
 0x275   : > { %2672 = vadd.xlane.f32.xlu2 %v2671_v49  ;;  %v1993_v49 = vmul.f32 %v1534_v52, %v6232_v26  ;;  %v6898_v32 = vpop.xlane.xlu1 %772 }
 0x276   : > { %2684 = vadd.xlane.f32.xlu0 %v2683_v12  ;;  %v6871_v12 = vadd.f32 %v6801_v39, %v6621_v10  ;;  %v2122_v39 = vadd.f32 %v6254_v43, %v2058_v29  ;;  %v9992_v29 = vld [vmem:[#allocation14_spill] sm:$0xff] }
 0x277   : > { %v6875_v51 = vpop.eup %5377  ;;  %v2057_v26 = vmul.f32 %v6236_v22, %v1993_v49  ;;  %v6901_v49 = vadd.f32 1e-05, %v1244_v61  ;;  %v1995_v21 = vmul.f32 %v1554_v44, %v9992_v29 }
 0x278   : > { %v6878_v0 = vpop.eup %5379  ;;  %v2686_v25 = vsel %vm644_vm1, %v6871_v12, 0.0  ;;  %v1566_v36 = vmul.f32 %v6875_v51, %v6850_v63  ;;  %vm2185_vm15 = vcmp.ge.f32.partialorder %v2122_v39, 0.0  ;;  %vm1572_vm0 = vweird.f32 %v6875_v51 }
 0x279   : > { %v2121_v52 = vadd.f32 %v6254_v43, %v2057_v26  ;;  %v1576_v34 = vmul.f32 %v6878_v0, %v6857_v47  ;;  %5381 = vrsqrt.f32 %v6901_v49  ;;  %v2059_v46 = vmul.f32 %v6236_v22, %v1995_v21  ;;  %vm6926_vm6 = vmor %vm1571_vm5, %vm1572_vm0 }
 0x27a   : > { %v6908_v28 = vpop.xlane.xlu2 %769  ;;  %vm1582_vm4 = vweird.f32 %v6878_v0  ;;  %vm1601_vm14 = vweird.f32 %v6901_v49 }
 0x27b   : > { %v2247_v42 = vmul.f32 0.01, %v2121_v52  ;;  %v1577_v35 = vmul.f32 %v6878_v0, %v1576_v34  ;;  %vm2184_vm3 = vcmp.ge.f32.partialorder %v2121_v52, 0.0  ;;  %vm1583_vm9 = vmor %vm1581_vm7, %vm1582_vm4 }
 0x27d   : > { %2681 = vadd.xlane.f32.xlu2 %v2680_v54  ;;  %v2248_v54 = vmul.f32 0.01, %v2122_v39  ;;  %v2310_v26 = vsel %vm2184_vm3, %v2121_v52, %v2247_v42  ;;  %v1578_v45 = vmul.f32 0.5, %v1577_v35  ;;  %v1113_v41 = vpop.xlane.xlu1 %1112  ;;  %v2123_v42 = vadd.f32 %v6254_v43, %v2059_v46 }
 0x27e   : > { %2690 = vadd.xlane.f32.xlu0 %v2689_v24  ;;  %v1567_v24 = vmul.f32 %v6875_v51, %v1566_v36  ;;  %v2060_v36 = vmul.f32 %v6236_v22, %v1996_v15 }
 0x27f   : > { %5148 = vmatmul.msk.bf16.gmra.mxu1 %vm644_vm1, %v2363_v2  ;;  %v2311_v2 = vsel %vm2185_vm15, %v2122_v39, %v2248_v54  ;;  %v1579_v39 = vsub.f32 1.5, %v1578_v45  ;;  %v6914_v54 = vpop.eup %5381  ;;  %v2249_v63 = vmul.f32 0.01, %v2123_v42  ;;  %vm2186_vm10 = vcmp.ge.f32.partialorder %v2123_v42, 0.0 }
 0x280   : > { %v1568_v40 = vmul.f32 0.5, %v1567_v24  ;;  %v2124_v58 = vadd.f32 %v6254_v43, %v2060_v36  ;;  %v1246_v24 = vmul.f32 %v1113_v41, %v5917_v8  ;;  %v1596_v35 = vmul.f32 %v6914_v54, %v6901_v49 }
 0x281   : > { %v1580_v44 = vmul.f32 %v6878_v0, %v1579_v39  ;;  %v2312_v41 = vsel %vm2186_vm10, %v2123_v42, %v2249_v63  ;;  %vm1602_vm12 = vweird.f32 %v6914_v54 }
 0x282   : > { %v1569_v6 = vsub.f32 1.5, %v1568_v40  ;;  %v2250_v29 = vmul.f32 0.01, %v2124_v58  ;;  %vm2187_vm8 = vcmp.ge.f32.partialorder %v2124_v58, 0.0  ;;  %v6937_v45 = vadd.f32 1e-05, %v1246_v24  ;;  %vm1603_vm3 = vmor %vm1601_vm14, %vm1602_vm12 }
 0x283   : > { %v1597_v36 = vmul.f32 %v6914_v54, %v1596_v35 }
 0x284   : > { %v1570_v52 = vmul.f32 %v6875_v51, %v1569_v6  ;;  %v2313_v46 = vsel %vm2187_vm8, %v2124_v58, %v2250_v29  ;;  %vm1621_vm7 = vweird.f32 %v6937_v45 }
 0x285   : > { %2687 = vadd.xlane.f32.xlu2 %v2686_v25  ;;  %v2364_v25 = vpack.c.bf16 %v2311_v2, %v2310_v26  ;;  %v6930_v2 = vpop.xlane.xlu2 %775  ;;  %v2365_v24 = vpack.c.bf16 %v2313_v46, %v2312_v41 }
 0x286   : > { %v1574_v21 = vsel %vm6926_vm6, %v6875_v51, %v1570_v52  ;;  %v1598_v52 = vmul.f32 0.5, %v1597_v36 }
 0x287   : > { %v1997_v47 = vmul.f32 %v1574_v21, %v6429_v30 }
 0x28d   : > { %v1116_v35 = vpop.xlane.xlu2 %1115 }
 0x28e   : > { %v1247_v42 = vmul.f32 %v1116_v35, %v5917_v8 }
 0x28f   : > { %5149 = vmatmul.msk.bf16.gmra.mxu1 %vm644_vm1, %v2364_v25 }
 0x290   : > { %v1104_v18 = vpop.xlane.xlu0 %1103 }
 0x291   : > { %v1243_v61 = vmul.f32 %v1104_v18, %v5917_v8  ;;  %v1584_v18 = vsel %vm1583_vm9, %v6878_v0, %v1580_v44  ;;  %v2061_v44 = vmul.f32 %v6236_v22, %v1997_v47 }
 0x292   : > { %v1998_v51 = vmul.f32 %v1584_v18, %v6359_v9 }
 0x293   : > { %v1306_v34 = vadd.f32 1e-05, %v1243_v61  ;;  %v2125_v9 = vadd.f32 %v6254_v43, %v2061_v44 }
 0x294   : > { %v2062_v30 = vmul.f32 %v6236_v22, %v1998_v51 }
 0x295   : > { %5383 = vrsqrt.f32 %v1306_v34  ;;  %vm1591_vm13 = vweird.f32 %v1306_v34  ;;  %v2251_v47 = vmul.f32 0.01, %v2125_v9  ;;  %vm2188_vm2 = vcmp.ge.f32.partialorder %v2125_v9, 0.0 }
 0x296   : > { %v2126_v63 = vadd.f32 %v6254_v43, %v2062_v30 }
 0x297   : > { %v2314_v44 = vsel %vm2188_vm2, %v2125_v9, %v2251_v47 }
 0x298   : > { %v1110_v40 = vpop.xlane.xlu0 %1109  ;;  %vm2189_vm0 = vcmp.ge.f32.partialorder %v2126_v63, 0.0  ;;  %v6984_v47 = vpop.f32.mrf.mxu3 }
 0x299   : > { %v1245_v26 = vmul.f32 %v1110_v40, %v5917_v8  ;;  %v1599_v40 = vsub.f32 1.5, %v1598_v52  ;;  %v2252_v52 = vmul.f32 0.01, %v2126_v63 }
 0x29b   : > { %v5384_v25 = vpop.eup %5383  ;;  %v6941_v6 = vadd.f32 1e-05, %v1245_v26  ;;  %v1600_v18 = vmul.f32 %v6914_v54, %v1599_v40 }
 0x29c   : > { %v1586_v61 = vmul.f32 %v5384_v25, %v1306_v34  ;;  %vm1592_vm11 = vweird.f32 %v5384_v25 }
 0x29d   : > { %5385 = vrsqrt.f32 %v6941_v6  ;;  %vm1593_vm15 = vmor %vm1591_vm13, %vm1592_vm11  ;;  %vm1611_vm6 = vweird.f32 %v6941_v6 }
 0x29e   : > { %5387 = vrsqrt.f32 %v6937_v45  ;;  %v1587_v39 = vmul.f32 %v5384_v25, %v1586_v61  ;;  %v6964_v61 = vadd.f32 1e-05, %v1247_v42 }
 0x29f   : > { %5150 = vmatmul.msk.bf16.gmra.mxu1 %vm644_vm1, %v2365_v24  ;;  %v1604_v24 = vsel %vm1603_vm3, %v6914_v54, %v1600_v18  ;;  %v1125_v18 = vpop.xlane.xlu2 %1124 }
 0x2a0   : > { %v1588_v0 = vmul.f32 0.5, %v1587_v39  ;;  %5389 = vrsqrt.f32 %v6964_v61  ;;  %v2000_v35 = vmul.f32 %v1604_v24, %v6400_v27 }
 0x2a2   : > { %v1589_v15 = vsub.f32 1.5, %v1588_v0 }
 0x2a3   : > { %v6950_v58 = vpop.eup %5385 }
 0x2a4   : > { %v6952_v29 = vpop.eup %5387  ;;  %v1590_v21 = vmul.f32 %v5384_v25, %v1589_v15  ;;  %v1606_v26 = vmul.f32 %v6950_v58, %v6941_v6  ;;  %v2315_v15 = vsel %vm2189_vm0, %v2126_v63, %v2252_v52  ;;  %vm1612_vm4 = vweird.f32 %v6950_v58 }
 0x2a5   : > { %v1616_v36 = vmul.f32 %v6952_v29, %v6937_v45  ;;  %v2366_v40 = vpack.c.bf16 %v2315_v15, %v2314_v44  ;;  %vm1622_vm5 = vweird.f32 %v6952_v29  ;;  %vm1613_vm8 = vmor %vm1611_vm6, %vm1612_vm4 }
 0x2a6   : > { %v1594_v46 = vsel %vm1593_vm15, %v5384_v25, %v1590_v21  ;;  %v1607_v51 = vmul.f32 %v6950_v58, %v1606_v26  ;;  %v6979_v26 = vpop.eup %5389  ;;  %vm1623_vm10 = vmor %vm1621_vm7, %vm1622_vm5  ;;  %vm1631_vm15 = vweird.f32 %v6964_v61 }
 0x2a7   : > { %v1617_v0 = vmul.f32 %v6952_v29, %v1616_v36  ;;  %v1999_v49 = vmul.f32 %v1594_v46, %v6489_v50  ;;  %v2064_v50 = vmul.f32 %v6236_v22, %v2000_v35  ;;  %v1626_v24 = vmul.f32 %v6979_v26, %v6964_v61 }
 0x2a8   : > { %v1119_v39 = vpop.xlane.xlu0 %1118  ;;  %v1608_v25 = vmul.f32 0.5, %v1607_v51  ;;  %vm1632_vm13 = vweird.f32 %v6979_v26 }
 0x2a9   : > { %v1248_v41 = vmul.f32 %v1119_v39, %v5917_v8  ;;  %v1618_v30 = vmul.f32 0.5, %v1617_v0  ;;  %v2063_v54 = vmul.f32 %v6236_v22, %v1999_v49  ;;  %v1250_v39 = vmul.f32 %v1125_v18, %v5917_v8  ;;  %vm1633_vm0 = vmor %vm1631_vm15, %vm1632_vm13 }
 0x2aa   : > { %v1609_v21 = vsub.f32 1.5, %v1608_v25  ;;  %v1627_v45 = vmul.f32 %v6979_v26, %v1626_v24 }
 0x2ab   : > { %v6971_v34 = vadd.f32 1e-05, %v1248_v41  ;;  %v1619_v9 = vsub.f32 1.5, %v1618_v30  ;;  %v2127_v63 = vadd.f32 %v6254_v43, %v2063_v54  ;;  %v2128_v41 = vadd.f32 %v6254_v43, %v2064_v50 }
 0x2ac   : > { %v1610_v46 = vmul.f32 %v6950_v58, %v1609_v21  ;;  %v7006_v30 = vadd.f32 1e-05, %v1250_v39 }
 0x2ad   : > { %5391 = vrsqrt.f32 %v6971_v34  ;;  %v1620_v52 = vmul.f32 %v6952_v29, %v1619_v9  ;;  %v2253_v44 = vmul.f32 0.01, %v2127_v63  ;;  %vm2190_vm9 = vcmp.ge.f32.partialorder %v2127_v63, 0.0 }
 0x2ae   : > { %v1614_v25 = vsel %vm1613_vm8, %v6950_v58, %v1610_v46  ;;  %vm2191_vm11 = vcmp.ge.f32.partialorder %v2128_v41, 0.0  ;;  %v2254_v6 = vmul.f32 0.01, %v2128_v41  ;;  %v1628_v46 = vmul.f32 0.5, %v1627_v45 }
 0x2af   : > { %5151 = vmatmul.msk.bf16.gmra.mxu1 %vm644_vm1, %v2366_v40  ;;  %v1624_v40 = vsel %vm1623_vm10, %v6952_v29, %v1620_v52  ;;  %v2001_v54 = vmul.f32 %v1614_v25, %v6497_v38  ;;  %vm1641_vm14 = vweird.f32 %v6971_v34 }
 0x2b0   : > { %v1122_v42 = vpop.xlane.xlu1 %1121  ;;  %v2002_v9 = vmul.f32 %v1624_v40, %v6439_v62  ;;  %v2317_v29 = vsel %vm2191_vm11, %v2128_v41, %v2254_v6  ;;  %v1131_v24 = vpop.xlane.xlu0 %1130 }
 0x2b1   : > { %v1249_v36 = vmul.f32 %v1122_v42, %v5917_v8  ;;  %v2316_v42 = vsel %vm2190_vm9, %v2127_v63, %v2253_v44  ;;  %v2065_v38 = vmul.f32 %v6236_v22, %v2001_v54  ;;  %v1629_v44 = vsub.f32 1.5, %v1628_v46 }
 0x2b2   : > { %vm1661_vm9 = vweird.f32 %v7006_v30 }
 0x2b3   : > { %v6982_v27 = vpop.eup %5391  ;;  %v6998_v0 = vadd.f32 1e-05, %v1249_v36  ;;  %v637_v36 = vpop.f32.mrf.mxu3  ;;  %v2129_v6 = vadd.f32 %v6254_v43, %v2065_v38  ;;  %v7068_v38 = vadd.f32 %v6481_v5, %v5797_v37 }
 0x2b4   : > { %v1636_v51 = vmul.f32 %v6982_v27, %v6971_v34  ;;  %v7030_v41 = vadd.f32 %v637_v36, %v5797_v37  ;;  %vm1642_vm12 = vweird.f32 %v6982_v27 }
 0x2b5   : > { %5393 = vrsqrt.f32 %v6998_v0  ;;  %vm7053_vm2 = vmor %vm1641_vm14, %vm1642_vm12  ;;  %vm2192_vm3 = vcmp.ge.f32.partialorder %v2129_v6, 0.0  ;;  %vm1651_vm7 = vweird.f32 %v6998_v0 }
 0x2b6   : > { %v1637_v35 = vmul.f32 %v6982_v27, %v1636_v51  ;;  %5395 = vrsqrt.f32 %v7006_v30  ;;  %v828_v45 = vsel %vm644_vm1, %v7030_v41, 0.0 }
 0x2b8   : > { %v791_v49 = vpop.xlane.xlu1 %790  ;;  %v1638_v21 = vmul.f32 0.5, %v1637_v35 }
 0x2b9   : > { %v889_v15 = vmul.f32 %v5917_v8, %v791_v49  ;;  %v2066_v49 = vmul.f32 %v6236_v22, %v2002_v9 }
 0x2ba   : > { %v1639_v52 = vsub.f32 1.5, %v1638_v21  ;;  %v1630_v21 = vmul.f32 %v6979_v26, %v1629_v44 }
 0x2bb   : > { %v7012_v58 = vsub.f32 %v6593_v14, %v889_v15  ;;  %v2367_v14 = vpack.c.bf16 %v2317_v29, %v2316_v42  ;;  %v7024_v63 = vpop.eup %5393  ;;  %v1252_v15 = vmul.f32 %v1131_v24, %v5917_v8  ;;  %v2130_v42 = vadd.f32 %v6254_v43, %v2066_v49 }
 0x2bc   : > { %v2529_v18 = vpop.f32.mrf.mxu1  ;;  %v7033_v25 = vpop.eup %5395  ;;  %v1646_v35 = vmul.f32 %v7024_v63, %v6998_v0  ;;  %v1640_v40 = vmul.f32 %v6982_v27, %v1639_v52  ;;  %v1634_v24 = vsel %vm1633_vm0, %v6979_v26, %v1630_v21  ;;  %v777_v21 = vsel %vm644_vm1, %v7068_v38, 0.0 }
 0x2bd   : > { %v1015_v50 = vmul.f32 %v7012_v58, %v7012_v58  ;;  %v7020_v51 = vadd.f32 %v2529_v18, %v6621_v10  ;;  %v7058_v36 = vadd.f32 1e-05, %v1252_v15  ;;  %v2256_v52 = vmul.f32 0.01, %v2130_v42  ;;  %v9997_v18 = vld [vmem:[#allocation12_spill] sm:$0xff] }
 0x2be   : > { %v1647_v29 = vmul.f32 %v7024_v63, %v1646_v35  ;;  %v1644_v34 = vsel %vm7053_vm2, %v6982_v27, %v1640_v40  ;;  %vm2193_vm4 = vcmp.ge.f32.partialorder %v2130_v42, 0.0  ;;  %v2003_v5 = vmul.f32 %v1634_v24, %v6470_v23 }
 0x2bf   : > { %v1174_v39 = vsel %vm644_vm1, %v1015_v50, 0.0  ;;  %5152 = vmatmul.msk.bf16.gmra.mxu1 %vm644_vm1, %v2367_v14  ;;  %v2692_v62 = vsel %vm644_vm1, %v7020_v51, 0.0  ;;  %v1656_v50 = vmul.f32 %v7033_v25, %v7006_v30  ;;  %v2255_v14 = vmul.f32 0.01, %v2129_v6 }
 0x2c0   : > { %1175 = vadd.xlane.f32.xlu1 %v1174_v39  ;;  %2693 = vadd.xlane.f32.xlu2 %v2692_v62  ;;  %v2004_v49 = vmul.f32 %v1644_v34, %v6539_v55  ;;  %v1648_v44 = vmul.f32 0.5, %v1647_v29  ;;  %5397 = vrsqrt.f32 %v7058_v36  ;;  %v2319_v40 = vsel %vm2193_vm4, %v2130_v42, %v2256_v52 }
 0x2c1   : > { %v1657_v62 = vmul.f32 %v7033_v25, %v1656_v50  ;;  %v2318_v35 = vsel %vm2192_vm3, %v2129_v6, %v2255_v14  ;;  %v896_v23 = vmul.f32 %v5917_v8, %v9997_v18  ;;  %vm1652_vm5 = vweird.f32 %v7024_v63 }
 0x2c2   : > { %v2068_v55 = vmul.f32 %v6236_v22, %v2004_v49  ;;  %v1649_v50 = vsub.f32 1.5, %v1648_v44  ;;  %v9998_v49 = vld [vmem:[#allocation3_spill] sm:$0xff]  ;;  %vm1662_vm6 = vweird.f32 %v7033_v25  ;;  %vm7115_vm8 = vmor %vm1651_vm7, %vm1652_vm5  ;;  %v879_v0 = vmul.f32 %v5917_v8, %v6804_v4 }
 0x2c3   : > { %v7104_v44 = vsub.f32 %v9998_v49, %v896_v23  ;;  %vm7139_vm11 = vmor %vm1661_vm9, %vm1662_vm6  ;;  %v2670_v49 = vpop.xlane.xlu1 %2669  ;;  %vm1681_vm2 = vweird.f32 %v7058_v36 }
 0x2c4   : > { %v2531_v54 = vpop.f32.mrf.mxu1  ;;  %v1650_v24 = vmul.f32 %v7024_v63, %v1649_v50 }
 0x2c5   : > { %v7050_v9 = vadd.f32 %v2531_v54, %v6621_v10  ;;  %v2368_v54 = vpack.c.bf16 %v2319_v40, %v2318_v35 }
 0x2c6   : > { %v7093_v14 = vpop.eup %5397 }
 0x2c7   : > { %v2695_v61 = vsel %vm644_vm1, %v7050_v9, 0.0  ;;  %vm1682_vm14 = vweird.f32 %v7093_v14 }
 0x2c8   : > { %829 = vadd.xlane.f32.xlu1 %v828_v45  ;;  %v1128_v46 = vpop.xlane.xlu2 %1127  ;;  %2696 = vadd.xlane.f32.xlu0 %v2695_v61  ;;  %v1658_v45 = vmul.f32 0.5, %v1657_v62  ;;  %v2132_v62 = vadd.f32 %v6254_v43, %v2068_v55  ;;  %vm7219_vm4 = vmor %vm1681_vm2, %vm1682_vm14 }
 0x2c9   : > { %v1251_v39 = vmul.f32 %v1128_v46, %v5917_v8  ;;  %v2067_v46 = vmul.f32 %v6236_v22, %v2003_v5 }
 0x2ca   : > { %v1659_v34 = vsub.f32 1.5, %v1658_v45  ;;  %v2258_v23 = vmul.f32 0.01, %v2132_v62  ;;  %vm2195_vm10 = vcmp.ge.f32.partialorder %v2132_v62, 0.0 }
 0x2cb   : > { %v7074_v27 = vadd.f32 1e-05, %v1251_v39  ;;  %v2131_v40 = vadd.f32 %v6254_v43, %v2067_v46 }
 0x2cc   : > { %v2534_v15 = vpop.f32.mrf.mxu1  ;;  %v1660_v45 = vmul.f32 %v7033_v25, %v1659_v34  ;;  %v880_v34 = vmul.f32 %v5917_v8, %v6880_v1  ;;  %v7151_v1 = vadd.f32 %v6984_v47, %v5797_v37  ;;  %v10004_v47 = vld [vmem:[#allocation26_spill] sm:$0xff] }
 0x2cd   : > { %5399 = vrsqrt.f32 %v7074_v27  ;;  %v7081_v26 = vadd.f32 %v2534_v15, %v6621_v10  ;;  %vm2194_vm12 = vcmp.ge.f32.partialorder %v2131_v40, 0.0  ;;  %vm1671_vm15 = vweird.f32 %v7074_v27 }
 0x2cf   : > { %5153 = vmatmul.msk.bf16.gmra.mxu1 %vm644_vm1, %v2368_v54  ;;  %v2698_v29 = vsel %vm644_vm1, %v7081_v26, 0.0 }
 0x2d0   : > { %778 = vadd.xlane.f32.xlu1 %v777_v21  ;;  %v794_v6 = vpop.xlane.xlu2 %793  ;;  %2699 = vadd.xlane.f32.xlu2 %v2698_v29  ;;  %v1676_v21 = vmul.f32 %v7093_v14, %v7058_v36 }
 0x2d1   : > { %v890_v42 = vmul.f32 %v5917_v8, %v794_v6  ;;  %v1137_v61 = vpop.xlane.xlu0 %1136  ;;  %v1654_v6 = vsel %vm7115_vm8, %v7024_v63, %v1650_v24  ;;  %v2257_v63 = vmul.f32 0.01, %v2131_v40 }
 0x2d2   : > { %v1677_v24 = vmul.f32 %v7093_v14, %v1676_v21 }
 0x2d3   : > { %v7096_v39 = vsub.f32 %v6693_v19, %v890_v42  ;;  %v7098_v52 = vpop.eup %5399  ;;  %v1254_v19 = vmul.f32 %v1137_v61, %v5917_v8  ;;  %v1664_v61 = vsel %vm7139_vm11, %v7033_v25, %v1660_v45  ;;  %v1022_v25 = vmul.f32 %v7104_v44, %v7104_v44  ;;  %v10003_v45 = vld [vmem:[#allocation21_spill] sm:$0xff] }
 0x2d4   : > { %v1666_v35 = vmul.f32 %v7098_v52, %v7074_v27  ;;  %v2536_v15 = vpop.f32.mrf.mxu1  ;;  %v7163_v21 = vsub.f32 %v10003_v45, %v880_v34  ;;  %vm1672_vm13 = vweird.f32 %v7098_v52 }
 0x2d5   : > { %v1016_v5 = vmul.f32 %v7096_v39, %v7096_v39  ;;  %v7122_v55 = vadd.f32 %v2536_v15, %v6621_v10  ;;  %v7143_v30 = vadd.f32 1e-05, %v1254_v19  ;;  %v2321_v19 = vsel %vm2195_vm10, %v2132_v62, %v2258_v23  ;;  %vm7204_vm3 = vmor %vm1671_vm15, %vm1672_vm13 }
 0x2d6   : > { %v1667_v42 = vmul.f32 %v7098_v52, %v1666_v35  ;;  %v7157_v15 = vsub.f32 %v6356_v59, %v879_v0  ;;  %v825_v59 = vsel %vm644_vm1, %v7151_v1, 0.0 }
 0x2d7   : > { %v1177_v50 = vsel %vm644_vm1, %v1016_v5, 0.0  ;;  %v2701_v46 = vsel %vm644_vm1, %v7122_v55, 0.0  ;;  %v2005_v5 = vmul.f32 %v1654_v6, %v6568_v17  ;;  %v1678_v17 = vmul.f32 0.5, %v1677_v24 }
 0x2d8   : > { %v1134_v18 = vpop.xlane.xlu2 %1133  ;;  %2702 = vadd.xlane.f32.xlu0 %v2701_v46  ;;  %1178 = vadd.xlane.f32.xlu2 %v1177_v50  ;;  %v1668_v54 = vmul.f32 0.5, %v1667_v42  ;;  %v2006_v50 = vmul.f32 %v1664_v61, %v10004_v47  ;;  %v1195_v42 = vsel %vm644_vm1, %v1022_v25, 0.0  ;;  %v1005_v46 = vmul.f32 %v7157_v15, %v7157_v15 }
 0x2d9   : > { %v1253_v29 = vmul.f32 %v1134_v18, %v5917_v8  ;;  %v2320_v18 = vsel %vm2194_vm12, %v2131_v40, %v2257_v63  ;;  %v2069_v0 = vmul.f32 %v6236_v22, %v2005_v5  ;;  %v1006_v40 = vmul.f32 %v7163_v21, %v7163_v21  ;;  %v1143_v63 = vpop.xlane.xlu0 %1142 }
 0x2da   : > { %v2369_v62 = vpack.c.bf16 %v2321_v19, %v2320_v18  ;;  %v1669_v23 = vsub.f32 1.5, %v1668_v54  ;;  %v1679_v4 = vsub.f32 1.5, %v1678_v17  ;;  %v2857_v24 = vmul.f32 %v2670_v49, %v5917_v8  ;;  %v7185_v54 = vpop.xlane.xlu1 %1193 }
 0x2db   : > { %v7153_v35 = vadd.f32 1e-05, %v1253_v29  ;;  %v2070_v29 = vmul.f32 %v6236_v22, %v2006_v50  ;;  %v2133_v19 = vadd.f32 %v6254_v43, %v2069_v0  ;;  %v1256_v47 = vmul.f32 %v1143_v63, %v5917_v8 }
 0x2dc   : > { %v1670_v25 = vmul.f32 %v7098_v52, %v1669_v23  ;;  %v1147_v50 = vsel %vm644_vm1, %v1006_v40, 0.0  ;;  %v1144_v18 = vsel %vm644_vm1, %v1005_v46, 0.0  ;;  %v1680_v17 = vmul.f32 %v7093_v14, %v1679_v4 }
 0x2dd   : > { %5401 = vrsqrt.f32 %v7153_v35  ;;  %v2134_v49 = vadd.f32 %v6254_v43, %v2070_v29  ;;  %v2259_v29 = vmul.f32 0.01, %v2133_v19  ;;  %vm2196_vm0 = vcmp.ge.f32.partialorder %v2133_v19, 0.0 }
 0x2de   : > { %5403 = vrsqrt.f32 %v7143_v30  ;;  %v1674_v27 = vsel %vm7204_vm3, %v7098_v52, %v1670_v25  ;;  %v7223_v63 = vadd.f32 1e-05, %v1256_v47  ;;  %v1684_v52 = vsel %vm7219_vm4, %v7093_v14, %v1680_v17  ;;  %v10011_v47 = vld [vmem:[#allocation27_spill] sm:$0xff]  ;;  %v10012_v17 = vld [vmem:[#allocation6_spill] sm:$0xff] }
 0x2df   : > { %5154 = vmatmul.msk.bf16.gmra.mxu1 %vm644_vm1, %v2369_v62  ;;  %vm2197_vm5 = vcmp.ge.f32.partialorder %v2134_v49, 0.0  ;;  %v2322_v0 = vsel %vm2196_vm0, %v2133_v19, %v2259_v29  ;;  %vm1691_vm8 = vweird.f32 %v7153_v35  ;;  %vm1701_vm9 = vweird.f32 %v7143_v30 }
 0x2e0   : > { %v1140_v6 = vpop.xlane.xlu2 %1139  ;;  %826 = vadd.xlane.f32.xlu0 %v825_v59  ;;  %1196 = vadd.xlane.f32.xlu2 %v1195_v42  ;;  %v7202_v59 = vsub.f32 %v6642_v56, %v2857_v24  ;;  %v10007_v56 = vld [vmem:[#allocation16_spill] sm:$0xff]  ;;  %v2260_v24 = vmul.f32 0.01, %v2134_v49  ;;  %vm1721_vm0 = vweird.f32 %v7223_v63 }
 0x2e1   : > { %v1255_v5 = vmul.f32 %v1140_v6, %v5917_v8  ;;  %v2539_v6 = vpop.f32.mrf.mxu1  ;;  %v897_v46 = vmul.f32 %v5917_v8, %v10007_v56  ;;  %v10013_v56 = vld [vmem:[#allocation17_spill] sm:$0xff] }
 0x2e2   : > { %v2679_v19 = vpop.xlane.xlu1 %2678  ;;  %v898_v4 = vmul.f32 %v5917_v8, %v10013_v56 }
 0x2e3   : > { %v7178_v34 = vpop.eup %5401  ;;  %v7208_v23 = vadd.f32 1e-05, %v1255_v5 }
 0x2e4   : > { %v7180_v61 = vpop.eup %5403  ;;  %v1686_v45 = vmul.f32 %v7178_v34, %v7153_v35  ;;  %vm1692_vm6 = vweird.f32 %v7178_v34 }
 0x2e5   : > { %v1696_v62 = vmul.f32 %v7180_v61, %v7143_v30  ;;  %5405 = vrsqrt.f32 %v7208_v23  ;;  %vm1702_vm7 = vweird.f32 %v7180_v61  ;;  %vm7291_vm10 = vmor %vm1691_vm8, %vm1692_vm6  ;;  %vm1711_vm2 = vweird.f32 %v7208_v23 }
 0x2e6   : > { %v1687_v40 = vmul.f32 %v7178_v34, %v1686_v45  ;;  %v2007_v45 = vmul.f32 %v1674_v27, %v6670_v13  ;;  %5407 = vrsqrt.f32 %v7223_v63  ;;  %v2323_v13 = vsel %vm2197_vm5, %v2134_v49, %v2260_v24  ;;  %vm1703_vm12 = vmor %vm1701_vm9, %vm1702_vm7 }
 0x2e7   : > { %v1697_v5 = vmul.f32 %v7180_v61, %v1696_v62  ;;  %v2008_v62 = vmul.f32 %v1684_v52, %v6554_v20  ;;  %v2370_v27 = vpack.c.bf16 %v2323_v13, %v2322_v0  ;;  %v2860_v52 = vmul.f32 %v2679_v19, %v5917_v8 }
 0x2e8   : > { %v2673_v42 = vpop.xlane.xlu2 %2672  ;;  %1148 = vadd.xlane.f32.xlu0 %v1147_v50  ;;  %1145 = vadd.xlane.f32.xlu2 %v1144_v18  ;;  %v7236_v50 = vadd.f32 %v10011_v47, %v5797_v37  ;;  %v1688_v18 = vmul.f32 0.5, %v1687_v40  ;;  %v2071_v40 = vmul.f32 %v6236_v22, %v2007_v45 }
 0x2e9   : > { %v2858_v36 = vmul.f32 %v2673_v42, %v5917_v8  ;;  %v2983_v42 = vmul.f32 %v7202_v59, %v7202_v59  ;;  %v1698_v29 = vmul.f32 0.5, %v1697_v5  ;;  %v2072_v24 = vmul.f32 %v6236_v22, %v2008_v62  ;;  %v2541_v5 = vpop.f32.mrf.mxu1 }
 0x2ea   : > { %v1689_v47 = vsub.f32 1.5, %v1688_v18  ;;  %v780_v49 = vsel %vm644_vm1, %v7236_v50, 0.0  ;;  %v7273_v19 = vadd.f32 %v2541_v5, %v6621_v10 }
 0x2eb   : > { %v7230_v25 = vsub.f32 %v6812_v60, %v2858_v36  ;;  %v7243_v60 = vsub.f32 %v10012_v17, %v897_v46  ;;  %v3046_v20 = vsel %vm644_vm1, %v2983_v42, 0.0  ;;  %v7255_v46 = vpop.eup %5405  ;;  %v1699_v0 = vsub.f32 1.5, %v1698_v29  ;;  %v10014_v29 = vld [vmem:[#allocation7_spill] sm:$0xff] }
 0x2ec   : > { %v7261_v18 = vpop.eup %5407  ;;  %v7264_v42 = vadd.f32 %v2539_v6, %v6621_v10  ;;  %v2135_v17 = vadd.f32 %v6254_v43, %v2071_v40  ;;  %v1690_v62 = vmul.f32 %v7178_v34, %v1689_v47  ;;  %v1706_v13 = vmul.f32 %v7255_v46, %v7208_v23  ;;  %v7288_v47 = vpop.f32.mrf.mxu3 }
 0x2ed   : > { %10010 = vst [vmem:[#allocation14_spill] sm:$0xff] %v7230_v25  ;;  %v2984_v14 = vmul.f32 %v7230_v25, %v7230_v25  ;;  %v2676_v25 = vpop.xlane.xlu0 %2675  ;;  %v1023_v45 = vmul.f32 %v7243_v60, %v7243_v60  ;;  %v7279_v6 = vsub.f32 %v6710_v3, %v2860_v52  ;;  %v1700_v40 = vmul.f32 %v7180_v61, %v1699_v0 }
 0x2ee   : > { %v1716_v56 = vmul.f32 %v7261_v18, %v7223_v63  ;;  %v1694_v35 = vsel %vm7291_vm10, %v7178_v34, %v1690_v62  ;;  %v2707_v30 = vsel %vm644_vm1, %v7273_v19, 0.0  ;;  %vm2198_vm11 = vcmp.ge.f32.partialorder %v2135_v17, 0.0 }
 0x2ef   : > { %v3049_v36 = vsel %vm644_vm1, %v2984_v14, 0.0  ;;  %5155 = vmatmul.msk.bf16.gmra.mxu1 %vm644_vm1, %v2370_v27  ;;  %v2859_v14 = vmul.f32 %v2676_v25, %v5917_v8  ;;  %v7276_v27 = vsub.f32 %v10014_v29, %v898_v4  ;;  %10015 = vst [vmem:[#allocation12_spill] sm:$0xff] %v7279_v6  ;;  %v1198_v25 = vsel %vm644_vm1, %v1023_v45, 0.0 }
 0x2f0   : > { %3050 = vadd.xlane.f32.xlu1 %v3049_v36  ;;  %3047 = vadd.xlane.f32.xlu0 %v3046_v20  ;;  %v2136_v36 = vadd.f32 %v6254_v43, %v2072_v24  ;;  %v2704_v20 = vsel %vm644_vm1, %v7264_v42, 0.0  ;;  %v1707_v24 = vmul.f32 %v7255_v46, %v1706_v13  ;;  %v882_v52 = vmul.f32 %v5917_v8, %v6908_v28 }
 0x2f1   : > { %781 = vadd.xlane.f32.xlu2 %v780_v49  ;;  %v7296_v4 = vsub.f32 %v6793_v31, %v2859_v14  ;;  %v2261_v49 = vmul.f32 0.01, %v2135_v17  ;;  %v1704_v5 = vsel %vm1703_vm12, %v7180_v61, %v1700_v40  ;;  %v1717_v45 = vmul.f32 %v7261_v18, %v1716_v56  ;;  %v10018_v61 = vld [vmem:[#allocation23_spill] sm:$0xff]  ;;  %v10019_v40 = vld [vmem:[#allocation32_spill] sm:$0xff] }
 0x2f2   : > { %v2262_v31 = vmul.f32 0.01, %v2136_v36  ;;  %vm2199_vm13 = vcmp.ge.f32.partialorder %v2136_v36, 0.0  ;;  %v2986_v34 = vmul.f32 %v7279_v6, %v7279_v6  ;;  %v881_v0 = vmul.f32 %v5917_v8, %v6832_v33 }
 0x2f3   : > { %v2009_v14 = vmul.f32 %v1694_v35, %v6741_v7  ;;  %v2324_v28 = vsel %vm2198_vm11, %v2135_v17, %v2261_v49  ;;  %v1708_v62 = vmul.f32 0.5, %v1707_v24  ;;  %v1024_v13 = vmul.f32 %v7276_v27, %v7276_v27  ;;  %v10020_v7 = vld [vmem:[#allocation18_spill] sm:$0xff] }
 0x2f4   : > { %v2985_v29 = vmul.f32 %v7296_v4, %v7296_v4  ;;  %v2010_v56 = vmul.f32 %v1704_v5, %v10019_v40  ;;  %v2325_v3 = vsel %vm2199_vm13, %v2136_v36, %v2262_v31  ;;  %v3055_v33 = vsel %vm644_vm1, %v2986_v34, 0.0  ;;  %v642_v6 = vpop.f32.mrf.mxu3  ;;  %v2682_v31 = vpop.xlane.xlu2 %2681 }
 0x2f5   : > { %v7327_v17 = vsub.f32 %v10020_v7, %v881_v0  ;;  %v2073_v49 = vmul.f32 %v6236_v22, %v2009_v14  ;;  %v2685_v35 = vpop.xlane.xlu0 %2684  ;;  %v1709_v24 = vsub.f32 1.5, %v1708_v62  ;;  %v10021_v0 = vld [vmem:[#allocation29_spill] sm:$0xff]  ;;  %vm1712_vm14 = vweird.f32 %v7255_v46 }
 0x2f6   : > { %v3052_v5 = vsel %vm644_vm1, %v2985_v29, 0.0  ;;  %v2074_v36 = vmul.f32 %v6236_v22, %v2010_v56  ;;  %v2862_v34 = vmul.f32 %v2685_v35, %v5917_v8  ;;  %v7339_v14 = vadd.f32 %v10021_v0, %v5797_v37  ;;  %vm7357_vm3 = vmor %vm1711_vm2, %vm1712_vm14 }
 0x2f7   : > { %v2137_v62 = vadd.f32 %v6254_v43, %v2073_v49  ;;  %v2861_v29 = vmul.f32 %v2682_v31, %v5917_v8  ;;  %vm1722_vm15 = vweird.f32 %v7261_v18 }
 0x2f8   : > { %1199 = vadd.xlane.f32.xlu1 %v1198_v25  ;;  %2708 = vadd.xlane.f32.xlu0 %v2707_v30  ;;  %v7322_v25 = vsub.f32 %v10018_v61, %v882_v52  ;;  %v2371_v30 = vpack.c.bf16 %v2325_v3, %v2324_v28  ;;  %v1201_v52 = vsel %vm644_vm1, %v1024_v13, 0.0  ;;  %v1007_v28 = vmul.f32 %v7327_v17, %v7327_v17  ;;  %v7347_v61 = vpop.f32.mrf.mxu1  ;;  %vm1723_vm5 = vmor %vm1721_vm0, %vm1722_vm15 }
 0x2f9   : > { %2705 = vadd.xlane.f32.xlu2 %v2704_v20  ;;  %v1718_v20 = vmul.f32 0.5, %v1717_v45  ;;  %v1710_v13 = vmul.f32 %v7255_v46, %v1709_v24  ;;  %v2138_v56 = vadd.f32 %v6254_v43, %v2074_v36  ;;  %v2263_v49 = vmul.f32 0.01, %v2137_v62 }
 0x2fa   : > { %v1008_v6 = vmul.f32 %v7322_v25, %v7322_v25  ;;  %v1150_v7 = vsel %vm644_vm1, %v1007_v28, 0.0  ;;  %vm2200_vm4 = vcmp.ge.f32.partialorder %v2137_v62, 0.0 }
 0x2fb   : > { %v1719_v45 = vsub.f32 1.5, %v1718_v20  ;;  %v7355_v20 = vsub.f32 %v6816_v53, %v2862_v34  ;;  %v1714_v23 = vsel %vm7357_vm3, %v7255_v46, %v1710_v13  ;;  %v7369_v53 = vsub.f32 %v6848_v11, %v2861_v29 }
 0x2fc   : > { %v1153_v40 = vsel %vm644_vm1, %v1008_v6, 0.0  ;;  %v2264_v35 = vmul.f32 0.01, %v2138_v56  ;;  %vm2201_vm6 = vcmp.ge.f32.partialorder %v2138_v56, 0.0  ;;  %v2011_v46 = vmul.f32 %v1714_v23, %v6766_v16 }
 0x2fd   : > { %v1720_v3 = vmul.f32 %v7261_v18, %v1719_v45  ;;  %v2988_v63 = vmul.f32 %v7355_v20, %v7355_v20  ;;  %v2987_v11 = vmul.f32 %v7369_v53, %v7369_v53  ;;  %v2691_v34 = vpop.xlane.xlu0 %2690 }
 0x2fe   : > { %v2327_v31 = vsel %vm2201_vm6, %v2138_v56, %v2264_v35  ;;  %v2075_v45 = vmul.f32 %v6236_v22, %v2011_v46 }
 0x2ff   : > { %5156 = vmatmul.msk.bf16.gmra.mxu1 %vm644_vm1, %v2371_v30  ;;  %v1724_v24 = vsel %vm1723_vm5, %v7261_v18, %v1720_v3  ;;  %v3058_v16 = vsel %vm644_vm1, %v2987_v11, 0.0 }
 0x300   : > { %3056 = vadd.xlane.f32.xlu1 %v3055_v33  ;;  %3053 = vadd.xlane.f32.xlu0 %v3052_v5  ;;  %v783_v33 = vsel %vm644_vm1, %v7339_v14, 0.0  ;;  %v2326_v5 = vsel %vm2200_vm4, %v2137_v62, %v2263_v49  ;;  %v2012_v36 = vmul.f32 %v1724_v24, %v6749_v48  ;;  %v2546_v0 = vpop.f32.mrf.mxu1  ;;  %v2688_v62 = vpop.xlane.xlu2 %2687  ;;  %v2864_v48 = vmul.f32 %v2691_v34, %v5917_v8  ;;  %v10026_v24 = vld [vmem:[#allocation28_spill] sm:$0xff] }
 0x301   : > { %1202 = vadd.xlane.f32.xlu2 %v1201_v52  ;;  %v7374_v52 = vadd.f32 %v7288_v47, %v5797_v37  ;;  %v2372_v6 = vpack.c.bf16 %v2327_v31, %v2326_v5  ;;  %v3061_v47 = vsel %vm644_vm1, %v2988_v63, 0.0  ;;  %v7391_v13 = vadd.f32 %v2546_v0, %v6621_v10  ;;  %v10030_v0 = vld [vmem:[#allocation22_spill] sm:$0xff] }
 0x302   : > { %v2076_v28 = vmul.f32 %v6236_v22, %v2012_v36  ;;  %v2139_v29 = vadd.f32 %v6254_v43, %v2075_v45  ;;  %v2863_v3 = vmul.f32 %v2688_v62, %v5917_v8  ;;  %v900_v63 = vmul.f32 %v5917_v8, %v10026_v24  ;;  %v10029_v45 = vld [vmem:[#allocation13_spill] sm:$0xff] }
 0x303   : > { %v831_v18 = vsel %vm644_vm1, %v7374_v52, 0.0  ;;  %v1269_v34 = vmul.f32 %v10029_v45, %v5917_v8 }
 0x304   : > { %v2140_v30 = vadd.f32 %v6254_v43, %v2076_v28  ;;  %v2265_v49 = vmul.f32 0.01, %v2139_v29  ;;  %v7406_v23 = vsub.f32 %v6871_v12, %v2863_v3  ;;  %vm2202_vm7 = vcmp.ge.f32.partialorder %v2139_v29, 0.0  ;;  %v10027_v12 = vld [vmem:[#allocation10_spill] sm:$0xff]  ;;  %v10032_v3 = vld [vmem:[#allocation9_spill] sm:$0xff] }
 0x305   : > { %v7417_v36 = vsub.f32 %v10027_v12, %v900_v63  ;;  %v7430_v28 = vadd.f32 %v7347_v61, %v6621_v10  ;;  %v10035_v61 = vld [vmem:[#allocation19_spill] sm:$0xff]  ;;  %v1273_v12 = vmul.f32 %v7185_v54, %v5917_v8 }
 0x306   : > { %10025 = vst [vmem:[#allocation3_spill] sm:$0xff] %v7406_v23  ;;  %vm2203_vm8 = vcmp.ge.f32.partialorder %v2140_v30, 0.0  ;;  %v2328_v46 = vsel %vm2202_vm7, %v2139_v29, %v2265_v49  ;;  %v2989_v5 = vmul.f32 %v7406_v23, %v7406_v23  ;;  %v10031_v29 = vld [vmem:[#allocation15_spill] sm:$0xff] }
 0x307   : > { %10028 = vst [vmem:[#allocation21_spill] sm:$0xff] %v7417_v36 }
 0x308   : > { %1154 = vadd.xlane.f32.xlu1 %v1153_v40  ;;  %1151 = vadd.xlane.f32.xlu0 %v1150_v7  ;;  %v10024_v40 = vld [vmem:[#allocation30_spill] sm:$0xff]  ;;  %v2713_v7 = vsel %vm644_vm1, %v7391_v13, 0.0  ;;  %v2549_v24 = vpop.f32.mrf.mxu1 }
 0x309   : > { %784 = vadd.xlane.f32.xlu2 %v783_v33  ;;  %v7396_v56 = vadd.f32 %v10024_v40, %v5797_v37  ;;  %v7401_v33 = vsub.f32 %v6855_v57, %v2864_v48  ;;  %v2266_v37 = vmul.f32 0.01, %v2140_v30  ;;  %v7433_v48 = vadd.f32 1e-05, %v1269_v34 }
 0x30a   : > { %v1270_v40 = vmul.f32 %v10031_v29, %v5917_v8 }
 0x30b   : > { %v786_v35 = vsel %vm644_vm1, %v7396_v56, 0.0  ;;  %v2990_v57 = vmul.f32 %v7401_v33, %v7401_v33  ;;  %v2329_v11 = vsel %vm2203_vm8, %v2140_v30, %v2266_v37  ;;  %v1271_v37 = vmul.f32 %v10035_v61, %v5917_v8 }
 0x30c   : > { %v2373_v31 = vpack.c.bf16 %v2329_v11, %v2328_v46  ;;  %5409 = vrsqrt.f32 %v7433_v48  ;;  %v7447_v63 = vadd.f32 1e-05, %v1270_v40  ;;  %v884_v46 = vmul.f32 %v5917_v8, %v6930_v2 }
 0x30d   : > { %v7455_v11 = vadd.f32 1e-05, %v1271_v37  ;;  %v7468_v2 = vadd.f32 1e-05, %v1273_v12  ;;  %vm1851_vm10 = vweird.f32 %v7433_v48 }
 0x30e   : > { %5411 = vrsqrt.f32 %v7447_v63  ;;  %vm1861_vm12 = vweird.f32 %v7447_v63 }
 0x30f   : > { %5157 = vmatmul.msk.bf16.gmra.mxu1 %vm644_vm1, %v2372_v6  ;;  %v3067_v6 = vsel %vm644_vm1, %v2990_v57, 0.0  ;;  %vm1871_vm0 = vweird.f32 %v7455_v11  ;;  %vm1891_vm7 = vweird.f32 %v7468_v2 }
 0x310   : > { %3062 = vadd.xlane.f32.xlu1 %v3061_v47  ;;  %3059 = vadd.xlane.f32.xlu0 %v3058_v16  ;;  %v1026_v47 = vmul.f32 %v7417_v36, %v7417_v36  ;;  %v899_v16 = vmul.f32 %v5917_v8, %v10030_v0  ;;  %v2551_v34 = vpop.f32.mrf.mxu1 }
 0x311   : > { %832 = vadd.xlane.f32.xlu2 %v831_v18  ;;  %v3064_v18 = vsel %vm644_vm1, %v2989_v5, 0.0 }
 0x312   : > { %v1207_v62 = vsel %vm644_vm1, %v1026_v47, 0.0  ;;  %v7438_v30 = vsub.f32 %v10032_v3, %v899_v16  ;;  %v7465_v47 = vpop.eup %5409 }
 0x313   : > { %v1846_v0 = vmul.f32 %v7465_v47, %v7433_v48  ;;  %vm1852_vm9 = vweird.f32 %v7465_v47 }
 0x314   : > { %10033 = vst [vmem:[#allocation26_spill] sm:$0xff] %v7438_v30  ;;  %v1025_v5 = vmul.f32 %v7438_v30, %v7438_v30  ;;  %v7475_v29 = vpop.eup %5411  ;;  %vm7546_vm11 = vmor %vm1851_vm10, %vm1852_vm9 }
 0x315   : > { %v1847_v61 = vmul.f32 %v7465_v47, %v1846_v0  ;;  %v7503_v0 = vadd.f32 %v2549_v24, %v6621_v10  ;;  %v883_v24 = vmul.f32 %v5917_v8, %v6898_v32  ;;  %vm1862_vm13 = vweird.f32 %v7475_v29 }
 0x316   : > { %vm7573_vm3 = vmor %vm1861_vm12, %vm1862_vm13 }
 0x318   : > { %2714 = vadd.xlane.f32.xlu1 %v2713_v7  ;;  %787 = vadd.xlane.f32.xlu0 %v786_v35  ;;  %v10034_v7 = vld [vmem:[#allocation25_spill] sm:$0xff]  ;;  %v2710_v35 = vsel %vm644_vm1, %v7430_v28, 0.0 }
 0x319   : > { %v1272_v49 = vmul.f32 %v10034_v7, %v5917_v8 }
 0x31b   : > { %v7449_v57 = vadd.f32 1e-05, %v1272_v49 }
 0x31d   : > { %5413 = vrsqrt.f32 %v7449_v57  ;;  %vm1881_vm2 = vweird.f32 %v7449_v57 }
 0x31e   : > { %5415 = vrsqrt.f32 %v7455_v11 }
 0x31f   : > { %5158 = vmatmul.msk.bf16.gmra.mxu1 %vm644_vm1, %v2373_v31  ;;  %v10036_v31 = vld [vmem:[#allocation24_spill] sm:$0xff]  ;;  %5417 = vrsqrt.f32 %v7468_v2 }
 0x320   : > { %3068 = vadd.xlane.f32.xlu1 %v3067_v6  ;;  %3065 = vadd.xlane.f32.xlu0 %v3064_v18  ;;  %v7462_v6 = vsub.f32 %v10036_v31, %v884_v46  ;;  %v1204_v18 = vsel %vm644_vm1, %v1025_v5, 0.0  ;;  %v1856_v46 = vmul.f32 %v7475_v29, %v7447_v63 }
 0x322   : > { %10037 = vst [vmem:[#allocation16_spill] sm:$0xff] %v7462_v6 }
 0x323   : > { %v7479_v3 = vpop.eup %5413 }
 0x324   : > { %v7483_v49 = vpop.eup %5415  ;;  %v1876_v5 = vmul.f32 %v7479_v3, %v7449_v57  ;;  %vm1882_vm14 = vweird.f32 %v7479_v3 }
 0x325   : > { %v1866_v31 = vmul.f32 %v7483_v49, %v7455_v11  ;;  %vm1872_vm15 = vweird.f32 %v7483_v49  ;;  %vm7583_vm4 = vmor %vm1881_vm2, %vm1882_vm14 }
 0x326   : > { %vm7592_vm5 = vmor %vm1871_vm0, %vm1872_vm15 }
 0x327   : > { %v1867_v30 = vmul.f32 %v7483_v49, %v1866_v31  ;;  %v2716_v31 = vsel %vm644_vm1, %v7503_v0, 0.0 }
 0x328   : > { %1208 = vadd.xlane.f32.xlu1 %v1207_v62  ;;  %2711 = vadd.xlane.f32.xlu0 %v2710_v35  ;;  %v1010_v62 = vmul.f32 %v7462_v6, %v7462_v6  ;;  %v7508_v6 = vpop.f32.mrf.mxu1 }
 0x32a   : > { %v1159_v37 = vsel %vm644_vm1, %v1010_v62, 0.0 }
 0x330   : > { %1205 = vadd.xlane.f32.xlu0 %v1204_v18  ;;  %v7499_v18 = vpop.eup %5417 }
 0x331   : > { %vm1892_vm6 = vweird.f32 %v7499_v18 }
 0x332   : > { %vm7617_vm8 = vmor %vm1891_vm7, %vm1892_vm6 }
 0x333   : > { %v1176_v45 = vpop.xlane.xlu1 %1175  ;;  %v2694_v16 = vpop.xlane.xlu2 %2693 }
 0x334   : > { %v1267_v54 = vmul.f32 %v1176_v45, %v5917_v8  ;;  %v2865_v40 = vmul.f32 %v2694_v16, %v5917_v8 }
 0x336   : > { %v7481_v7 = vadd.f32 1e-05, %v1267_v54  ;;  %v7486_v35 = vsub.f32 %v7020_v51, %v2865_v40  ;;  %v1848_v54 = vmul.f32 0.5, %v1847_v61  ;;  %v1857_v40 = vmul.f32 %v7475_v29, %v1856_v46 }
 0x337   : > { %v1886_v61 = vmul.f32 %v7499_v18, %v7468_v2 }
 0x338   : > { %10038 = vst [vmem:[#allocation27_spill] sm:$0xff] %v7486_v35  ;;  %1160 = vadd.xlane.f32.xlu0 %v1159_v37  ;;  %v2991_v12 = vmul.f32 %v7486_v35, %v7486_v35  ;;  %5419 = vrsqrt.f32 %v7481_v7  ;;  %v1877_v37 = vmul.f32 %v7479_v3, %v1876_v5  ;;  %v1849_v5 = vsub.f32 1.5, %v1848_v54 }
 0x339   : > { %v1887_v23 = vmul.f32 %v7499_v18, %v1886_v61  ;;  %vm1831_vm10 = vweird.f32 %v7481_v7 }
 0x33a   : > { %v3070_v45 = vsel %vm644_vm1, %v2991_v12, 0.0  ;;  %v7517_v12 = vadd.f32 %v2551_v34, %v6621_v10  ;;  %v1878_v36 = vmul.f32 0.5, %v1877_v37  ;;  %v1868_v34 = vmul.f32 0.5, %v1867_v30 }
 0x33b   : > { %v830_v51 = vpop.xlane.xlu1 %829  ;;  %3071 = vadd.xlane.f32.xlu1 %v3070_v45  ;;  %v2697_v62 = vpop.xlane.xlu0 %2696 }
 0x33c   : > { %v902_v16 = vmul.f32 %v5917_v8, %v830_v51  ;;  %v2866_v35 = vmul.f32 %v2697_v62, %v5917_v8  ;;  %10039 = vst [vmem:[#allocation6_spill] sm:$0xff] %v7517_v12  ;;  %v1858_v62 = vmul.f32 0.5, %v1857_v40  ;;  %v1850_v40 = vmul.f32 %v7465_v47, %v1849_v5  ;;  %v7550_v5 = vpop.f32.mrf.mxu1 }
 0x33e   : > { %v7520_v51 = vsub.f32 %v7050_v9, %v2866_v35  ;;  %v7522_v46 = vpop.eup %5419  ;;  %v7525_v45 = vsub.f32 %v7030_v41, %v902_v16  ;;  %v10042_v9 = vld [vmem:[#allocation20_spill] sm:$0xff]  ;;  %v2719_v41 = vsel %vm644_vm1, %v7517_v12, 0.0  ;;  %v1859_v61 = vsub.f32 1.5, %v1858_v62 }
 0x33f   : > { %v7533_v35 = vsub.f32 %v10042_v9, %v883_v24  ;;  %v1826_v54 = vmul.f32 %v7522_v46, %v7481_v7  ;;  %v1879_v24 = vsub.f32 1.5, %v1878_v36  ;;  %v1888_v12 = vmul.f32 0.5, %v1887_v23 }
 0x340   : > { %10040 = vst [vmem:[#allocation17_spill] sm:$0xff] %v7520_v51  ;;  %2717 = vadd.xlane.f32.xlu0 %v2716_v31  ;;  %v2992_v32 = vmul.f32 %v7520_v51, %v7520_v51  ;;  %v1028_v30 = vmul.f32 %v7525_v45, %v7525_v45  ;;  %v1869_v51 = vsub.f32 1.5, %v1868_v34  ;;  %v1854_v23 = vsel %vm7546_vm11, %v7465_v47, %v1850_v40 }
 0x341   : > { %10041 = vst [vmem:[#allocation7_spill] sm:$0xff] %v7525_v45  ;;  %v1009_v36 = vmul.f32 %v7533_v35, %v7533_v35  ;;  %v1860_v62 = vmul.f32 %v7475_v29, %v1859_v61  ;;  %v1880_v34 = vmul.f32 %v7479_v3, %v1879_v24  ;;  %v1889_v63 = vsub.f32 1.5, %v1888_v12 }
 0x342   : > { %v3073_v16 = vsel %vm644_vm1, %v2992_v32, 0.0  ;;  %v1213_v48 = vsel %vm644_vm1, %v1028_v30, 0.0  ;;  %v10052_v32 = vld [vmem:[#allocation4_spill] sm:$0xff]  ;;  %vm1832_vm9 = vweird.f32 %v7522_v46 }
 0x343   : > { %v779_v37 = vpop.xlane.xlu1 %778  ;;  %v2700_v31 = vpop.xlane.xlu2 %2699  ;;  %2720 = vadd.xlane.f32.xlu1 %v2719_v41  ;;  %3074 = vadd.xlane.f32.xlu2 %v3073_v16  ;;  %v1827_v41 = vmul.f32 %v7522_v46, %v1826_v54  ;;  %v1870_v54 = vmul.f32 %v7483_v49, %v1869_v51  ;;  %v1156_v30 = vsel %vm644_vm1, %v1009_v36, 0.0  ;;  %v1864_v61 = vsel %vm7573_vm3, %v7475_v29, %v1860_v62  ;;  %vm1833_vm11 = vmor %vm1831_vm10, %vm1832_vm9 }
 0x344   : > { %v2867_v9 = vmul.f32 %v2700_v31, %v5917_v8  ;;  %v885_v16 = vmul.f32 %v5917_v8, %v779_v37  ;;  %v1884_v11 = vsel %vm7583_vm4, %v7479_v3, %v1880_v34  ;;  %v10054_v34 = vld [vmem:[#allocation5_spill] sm:$0xff] }
 0x345   : > { %v1828_v40 = vmul.f32 0.5, %v1827_v41  ;;  %v2025_v41 = vmul.f32 %v1854_v23, %v10052_v32  ;;  %v1874_v29 = vsel %vm7592_vm5, %v7483_v49, %v1870_v54  ;;  %v10055_v23 = vld [vmem:[#allocation11_spill] sm:$0xff]  ;;  %v7621_v54 = vpop.f32.mrf.mxu1 }
 0x346   : > { %v7555_v45 = vsub.f32 %v7081_v26, %v2867_v9  ;;  %v7578_v37 = vsub.f32 %v7068_v38, %v885_v16  ;;  %v1890_v16 = vmul.f32 %v7499_v18, %v1889_v63  ;;  %v2028_v47 = vmul.f32 %v1884_v11, %v10055_v23  ;;  %v10058_v63 = vld [vmem:[#allocation8_spill] sm:$0xff] }
 0x347   : > { %v1829_v36 = vsub.f32 1.5, %v1828_v40  ;;  %v2027_v40 = vmul.f32 %v1874_v29, %v10058_v63 }
 0x348   : > { %1214 = vadd.xlane.f32.xlu0 %v1213_v48  ;;  %v2993_v26 = vmul.f32 %v7555_v45, %v7555_v45  ;;  %10047 = vst [vmem:[#allocation23_spill] sm:$0xff] %v7578_v37  ;;  %v1011_v3 = vmul.f32 %v7578_v37, %v7578_v37  ;;  %v2092_v11 = vmul.f32 %v6236_v22, %v2028_v47 }
 0x349   : > { %v1830_v2 = vmul.f32 %v7522_v46, %v1829_v36 }
 0x34a   : > { %v3076_v31 = vsel %vm644_vm1, %v2993_v26, 0.0  ;;  %v2026_v26 = vmul.f32 %v1864_v61, %v10054_v34  ;;  %v1162_v51 = vsel %vm644_vm1, %v1011_v3, 0.0  ;;  %v2091_v34 = vmul.f32 %v6236_v22, %v2027_v40 }
 0x34b   : > { %v1179_v57 = vpop.xlane.xlu2 %1178  ;;  %3077 = vadd.xlane.f32.xlu1 %v3076_v31  ;;  %1157 = vadd.xlane.f32.xlu2 %v1156_v30  ;;  %v2703_v12 = vpop.xlane.xlu0 %2702  ;;  %v1894_v31 = vsel %vm7617_vm8, %v7499_v18, %v1890_v16  ;;  %v2089_v30 = vmul.f32 %v6236_v22, %v2025_v41  ;;  %v1834_v16 = vsel %vm1833_vm11, %v7522_v46, %v1830_v2 }
 0x34c   : > { %v1268_v24 = vmul.f32 %v1179_v57, %v5917_v8  ;;  %v2868_v9 = vmul.f32 %v2703_v12, %v5917_v8  ;;  %v2090_v38 = vmul.f32 %v6236_v22, %v2026_v26  ;;  %v2156_v47 = vadd.f32 %v6254_v43, %v2092_v11 }
 0x34d   : > { %v2153_v41 = vadd.f32 %v6254_v43, %v2089_v30  ;;  %v2023_v46 = vmul.f32 %v1834_v16, %v7012_v58  ;;  %v7656_v63 = vpop.f32.mrf.mxu1  ;;  %v2155_v40 = vadd.f32 %v6254_v43, %v2091_v34 }
 0x34e   : > { %v7607_v48 = vadd.f32 1e-05, %v1268_v24  ;;  %v7610_v62 = vsub.f32 %v7122_v55, %v2868_v9  ;;  %v10059_v24 = vld [vmem:[#allocation31_spill] sm:$0xff]  ;;  %v2154_v7 = vadd.f32 %v6254_v43, %v2090_v38  ;;  %vm2219_vm15 = vcmp.ge.f32.partialorder %v2156_v47, 0.0 }
 0x34f   : > { %v2029_v18 = vmul.f32 %v1894_v31, %v10059_v24  ;;  %vm2216_vm12 = vcmp.ge.f32.partialorder %v2153_v41, 0.0  ;;  %v2087_v11 = vmul.f32 %v6236_v22, %v2023_v46  ;;  %vm2218_vm3 = vcmp.ge.f32.partialorder %v2155_v40, 0.0 }
 0x350   : > { %10053 = vst [vmem:[#allocation32_spill] sm:$0xff] %v7610_v62  ;;  %5421 = vrsqrt.f32 %v7607_v48  ;;  %v2994_v55 = vmul.f32 %v7610_v62, %v7610_v62  ;;  %vm2217_vm13 = vcmp.ge.f32.partialorder %v2154_v7, 0.0  ;;  %vm1841_vm2 = vweird.f32 %v7607_v48 }
 0x351   : > { %v2093_v49 = vmul.f32 %v6236_v22, %v2029_v18 }
 0x352   : > { %v3079_v57 = vsel %vm644_vm1, %v2994_v55, 0.0 }
 0x353   : > { %v1197_v12 = vpop.xlane.xlu2 %1196  ;;  %1163 = vadd.xlane.f32.xlu1 %v1162_v51  ;;  %3080 = vadd.xlane.f32.xlu2 %v3079_v57  ;;  %v827_v61 = vpop.xlane.xlu0 %826  ;;  %v2279_v51 = vmul.f32 0.01, %v2153_v41  ;;  %v2280_v57 = vmul.f32 0.01, %v2154_v7  ;;  %v2157_v38 = vadd.f32 %v6254_v43, %v2093_v49 }
 0x354   : > { %v1274_v9 = vmul.f32 %v1197_v12, %v5917_v8  ;;  %v901_v32 = vmul.f32 %v5917_v8, %v827_v61  ;;  %v2282_v61 = vmul.f32 0.01, %v2156_v47 }
 0x355   : > { %v7671_v34 = vsel %vm2216_vm12, %v2153_v41, %v2279_v51  ;;  %v2283_v46 = vmul.f32 0.01, %v2157_v38  ;;  %vm2220_vm4 = vcmp.ge.f32.partialorder %v2157_v38, 0.0 }
 0x356   : > { %v5422_v29 = vpop.eup %5421  ;;  %v7643_v36 = vadd.f32 1e-05, %v1274_v9  ;;  %v7646_v3 = vsub.f32 %v7151_v1, %v901_v32  ;;  %v2281_v32 = vmul.f32 0.01, %v2155_v40  ;;  %v7679_v49 = vsel %vm2219_vm15, %v2156_v47, %v2282_v61  ;;  %v2564_v61 = vpop.f32.mrf.mxu1 }
 0x357   : > { %v1836_v26 = vmul.f32 %v5422_v29, %v7607_v48  ;;  %vm1842_vm14 = vweird.f32 %v5422_v29 }
 0x358   : > { %10060 = vst [vmem:[#allocation18_spill] sm:$0xff] %v7646_v3  ;;  %v1027_v23 = vmul.f32 %v7646_v3, %v7646_v3  ;;  %5423 = vrsqrt.f32 %v7643_v36  ;;  %vm1843_vm0 = vmor %vm1841_vm2, %vm1842_vm14  ;;  %vm1901_vm14 = vweird.f32 %v7643_v36 }
 0x359   : > { %v1837_v55 = vmul.f32 %v5422_v29, %v1836_v26 }
 0x35a   : > { %v1210_v1 = vsel %vm644_vm1, %v1027_v23, 0.0  ;;  %v7677_v23 = vsel %vm2217_vm13, %v2154_v7, %v2280_v57  ;;  %v7693_v7 = vadd.f32 %v7550_v5, %v6621_v10 }
 0x35b   : > { %v1838_v31 = vmul.f32 0.5, %v1837_v55  ;;  %v1146_v30 = vpop.xlane.xlu2 %1145  ;;  %1211 = vadd.xlane.f32.xlu2 %v1210_v1  ;;  %v1149_v2 = vpop.xlane.xlu0 %1148  ;;  %v7683_v55 = vadd.f32 %v7508_v6, %v6621_v10  ;;  %v2151_v1 = vadd.f32 %v6254_v43, %v2087_v11 }
 0x35c   : > { %v1257_v12 = vmul.f32 %v1146_v30, %v5917_v8  ;;  %v1258_v58 = vmul.f32 %v1149_v2, %v5917_v8  ;;  %v7689_v2 = vsel %vm2218_vm3, %v2155_v40, %v2281_v32  ;;  %10062 = vst [vmem:[#allocation30_spill] sm:$0xff] %v7693_v7  ;;  %v7714_v32 = vsel %vm2220_vm4, %v2157_v38, %v2283_v46 }
 0x35d   : > { %v1839_v24 = vsub.f32 1.5, %v1838_v31  ;;  %10061 = vst [vmem:[#allocation29_spill] sm:$0xff] %v7683_v55  ;;  %v2277_v11 = vmul.f32 0.01, %v2151_v1  ;;  %vm2214_vm5 = vcmp.ge.f32.partialorder %v2151_v1, 0.0  ;;  %v7732_v46 = vsel %vm644_vm1, %v7693_v7, 0.0 }
 0x35e   : > { %v7665_v18 = vadd.f32 1e-05, %v1257_v12  ;;  %v7667_v9 = vadd.f32 1e-05, %v1258_v58  ;;  %v7673_v26 = vpop.eup %5423  ;;  %v7708_v58 = vadd.f32 %v7621_v54, %v6621_v10 }
 0x35f   : > { %v1840_v16 = vmul.f32 %v5422_v29, %v1839_v24  ;;  %v1896_v6 = vmul.f32 %v7673_v26, %v7643_v36  ;;  %v7712_v24 = vsel %vm644_vm1, %v7683_v55, 0.0  ;;  %vm1902_vm13 = vweird.f32 %v7673_v26 }
 0x360   : > { %5425 = vrsqrt.f32 %v7665_v18  ;;  %10063 = vst [vmem:[#allocation28_spill] sm:$0xff] %v7708_v58  ;;  %vm1731_vm6 = vweird.f32 %v7665_v18  ;;  %vm1741_vm7 = vweird.f32 %v7667_v9  ;;  %vm7836_vm2 = vmor %vm1901_vm14, %vm1902_vm13 }
 0x361   : > { %v1844_v48 = vsel %vm1843_vm0, %v5422_v29, %v1840_v16  ;;  %5427 = vrsqrt.f32 %v7667_v9 }
 0x362   : > { %v2024_v31 = vmul.f32 %v1844_v48, %v7096_v39  ;;  %v2340_v39 = vsel %vm2214_vm5, %v2151_v1, %v2277_v11 }
 0x363   : > { %v3051_v41 = vpop.xlane.xlu1 %3050  ;;  %v3048_v47 = vpop.xlane.xlu0 %3047 }
 0x364   : > { %v3236_v30 = vmul.f32 %v3051_v41, %v5917_v8  ;;  %v782_v29 = vpop.xlane.xlu2 %781  ;;  %v2088_v57 = vmul.f32 %v6236_v22, %v2024_v31  ;;  %v3235_v5 = vmul.f32 %v3048_v47, %v5917_v8  ;;  %v1897_v31 = vmul.f32 %v7673_v26, %v1896_v6 }
 0x365   : > { %v886_v12 = vmul.f32 %v5917_v8, %v782_v29  ;;  %v7739_v29 = vadd.f32 %v7656_v63, %v6621_v10  ;;  %v7742_v47 = vadd.f32 %v2564_v61, %v6621_v10  ;;  %v7752_v63 = vsel %vm644_vm1, %v7708_v58, 0.0  ;;  %v5230_v58 = vld [vmem:[%s9913_s3] sm:$0xff] }
 0x366   : > { %v7702_v40 = vadd.f32 1e-05, %v3236_v30  ;;  %v7716_v16 = vpop.eup %5425  ;;  %v7722_v41 = vadd.f32 1e-05, %v3235_v5  ;;  %v2152_v38 = vadd.f32 %v6254_v43, %v2088_v57 }
 0x367   : > { %v7720_v48 = vsub.f32 %v7236_v50, %v886_v12  ;;  %v7724_v54 = vpop.eup %5427  ;;  %v1726_v30 = vmul.f32 %v7716_v16, %v7665_v18  ;;  %v5231_v50 = vld [vmem:[%s9913_s3 + $0x8] sm:$0xff]  ;;  %10065 = vst [vmem:[#allocation13_spill] sm:$0xff] %v7742_v47  ;;  %vm1732_vm8 = vweird.f32 %v7716_v16 }
 0x368   : > { %5429 = vrsqrt.f32 %v7702_v40  ;;  %v1736_v6 = vmul.f32 %v7724_v54, %v7667_v9  ;;  %4525 = vmatpush.bf16.msra.mxu2 %v5231_v50  ;;  %5238 = vmatpush.bf16.msra.mxu3 %v5231_v50  ;;  %v2278_v11 = vmul.f32 0.01, %v2152_v38  ;;  %vm2215_vm9 = vcmp.ge.f32.partialorder %v2152_v38, 0.0  ;;  %vm7784_vm11 = vmor %vm1731_vm6, %vm1732_vm8 }
 0x369   : > { %10064 = vst [vmem:[#allocation10_spill] sm:$0xff] %v7720_v48  ;;  %5431 = vrsqrt.f32 %v7722_v41  ;;  %v1727_v57 = vmul.f32 %v7716_v16, %v1726_v30  ;;  %v1012_v5 = vmul.f32 %v7720_v48, %v7720_v48  ;;  %v1898_v30 = vmul.f32 0.5, %v1897_v31 }
 0x36a   : > { %v1737_v61 = vmul.f32 %v7724_v54, %v1736_v6  ;;  %vm1742_vm10 = vweird.f32 %v7724_v54  ;;  %v7811_v9 = vsel %vm644_vm1, %v7742_v47, 0.0  ;;  %vm3367_vm3 = vweird.f32 %v7722_v41 }
 0x36b   : > { %v1200_v12 = vpop.xlane.xlu1 %1199  ;;  %v1728_v7 = vmul.f32 0.5, %v1727_v57  ;;  %v1165_v48 = vsel %vm644_vm1, %v1012_v5, 0.0  ;;  %v2709_v1 = vpop.xlane.xlu0 %2708  ;;  %vm7799_vm12 = vmor %vm1741_vm7, %vm1742_vm10  ;;  %vm3377_vm4 = vweird.f32 %v7702_v40 }
 0x36c   : > { %v1275_v51 = vmul.f32 %v1200_v12, %v5917_v8  ;;  %v2706_v37 = vpop.xlane.xlu2 %2705  ;;  %v1738_v55 = vmul.f32 0.5, %v1737_v61  ;;  %1166 = vadd.xlane.f32.xlu2 %v1165_v48  ;;  %v2870_v31 = vmul.f32 %v2709_v1, %v5917_v8  ;;  %4526 = vmatpush.bf16.msra.mxu2 %v5230_v58 }
 0x36d   : > { %v2869_v6 = vmul.f32 %v2706_v37, %v5917_v8  ;;  %v1729_v57 = vsub.f32 1.5, %v1728_v7  ;;  %5239 = vmatpush.bf16.msra.mxu3 %v5230_v58 }
 0x36e   : > { %v7762_v50 = vpop.eup %5429  ;;  %v7764_v3 = vadd.f32 1e-05, %v1275_v51  ;;  %v1739_v62 = vsub.f32 1.5, %v1738_v55  ;;  %v1899_v51 = vsub.f32 1.5, %v1898_v30  ;;  %v7790_v1 = vsub.f32 %v7273_v19, %v2870_v31 }
 0x36f   : > { %v3372_v12 = vmul.f32 %v7762_v50, %v7702_v40  ;;  %v7771_v5 = vpop.eup %5431  ;;  %v7776_v37 = vsub.f32 %v7264_v42, %v2869_v6  ;;  %v1730_v7 = vmul.f32 %v7716_v16, %v1729_v57  ;;  %v2341_v42 = vsel %vm2215_vm9, %v2152_v38, %v2278_v11 }
 0x370   : > { %5433 = vrsqrt.f32 %v7764_v3  ;;  %v3362_v61 = vmul.f32 %v7771_v5, %v7722_v41  ;;  %v1740_v55 = vmul.f32 %v7724_v54, %v1739_v62  ;;  %v1900_v58 = vmul.f32 %v7673_v26, %v1899_v51 }
 0x371   : > { %v3373_v48 = vmul.f32 %v7762_v50, %v3372_v12  ;;  %v2995_v30 = vmul.f32 %v7776_v37, %v7776_v37  ;;  %v1734_v6 = vsel %vm7784_vm11, %v7716_v16, %v1730_v7  ;;  %v2379_v12 = vpack.c.bf16 %v2341_v42, %v2340_v39 }
 0x372   : > { %v3363_v62 = vmul.f32 %v7771_v5, %v3362_v61  ;;  %v1744_v38 = vsel %vm7799_vm12, %v7724_v54, %v1740_v55  ;;  %v2013_v16 = vmul.f32 %v1734_v6, %v7157_v15  ;;  %v2996_v54 = vmul.f32 %v7790_v1, %v7790_v1 }
 0x373   : > { %v3374_v57 = vmul.f32 0.5, %v3373_v48  ;;  %v3057_v19 = vpop.xlane.xlu1 %3056  ;;  %v3082_v31 = vsel %vm644_vm1, %v2995_v30, 0.0  ;;  %5164 = vmatmul.msk.bf16.vlgmr.msrb.gmra.mxu3 %vm644_vm1, %v2379_v12  ;;  %v3054_v48 = vpop.xlane.xlu0 %3053  ;;  %v2014_v30 = vmul.f32 %v1744_v38, %v7163_v21  ;;  %vm3368_vm15 = vweird.f32 %v7771_v5 }
 0x374   : > { %v3238_v11 = vmul.f32 %v3057_v19, %v5917_v8  ;;  %v3364_v7 = vmul.f32 0.5, %v3363_v62  ;;  %v1203_v39 = vpop.xlane.xlu2 %1202  ;;  %3083 = vadd.xlane.f32.xlu0 %v3082_v31  ;;  %2723 = vadd.xlane.f32.xlu2 %v7712_v24  ;;  %v3237_v15 = vmul.f32 %v3054_v48, %v5917_v8  ;;  %v2077_v21 = vmul.f32 %v6236_v22, %v2013_v16  ;;  %vm7857_vm5 = vmor %vm3367_vm3, %vm3368_vm15 }
 0x375   : > { %v1276_v42 = vmul.f32 %v1203_v39, %v5917_v8  ;;  %v3375_v6 = vsub.f32 1.5, %v3374_v57  ;;  %v3085_v36 = vsel %vm644_vm1, %v2996_v54, 0.0  ;;  %v1904_v19 = vsel %vm7836_vm2, %v7673_v26, %v1900_v58  ;;  %v5586_v39 = vld [vmem:[%s9914_s4] sm:$0x3f]  ;;  %v10076_v26 = vld [vmem:[#allocation14_spill] sm:$0xff] }
 0x376   : > { %v7818_v61 = vpop.eup %5433  ;;  %v7821_v55 = vadd.f32 1e-05, %v3238_v11  ;;  %v3365_v18 = vsub.f32 1.5, %v3364_v7  ;;  %3086 = vadd.xlane.f32.xlu1 %v3085_v36  ;;  %v7849_v38 = vadd.f32 1e-05, %v3237_v15  ;;  %v2078_v11 = vmul.f32 %v6236_v22, %v2014_v30 }
 0x377   : > { %v1906_v62 = vmul.f32 %v7818_v61, %v7764_v3  ;;  %v7832_v51 = vadd.f32 1e-05, %v1276_v42  ;;  %v3376_v31 = vmul.f32 %v7762_v50, %v3375_v6  ;;  %vm3378_vm0 = vweird.f32 %v7762_v50 }
 0x378   : > { %5435 = vrsqrt.f32 %v7821_v55  ;;  %v3366_v57 = vmul.f32 %v7771_v5, %v3365_v18  ;;  %v7866_v54 = vperm.slane %v5586_v39, 4  ;;  %v7869_v48 = vmul.f32 %v1904_v19, %v7104_v44  ;;  %vm7882_vm6 = vmor %vm3377_vm4, %vm3378_vm0 }
 0x379   : > { %v1907_v12 = vmul.f32 %v7818_v61, %v1906_v62  ;;  %5437 = vrsqrt.f32 %v7832_v51  ;;  %v2141_v15 = vadd.f32 %v6254_v43, %v2077_v21  ;;  %v7876_v30 = vperm.slane %v5586_v39, 5 }
 0x37a   : > { %5439 = vrsqrt.f32 %v7849_v38  ;;  %v3370_v40 = vsel %vm7857_vm5, %v7771_v5, %v3366_v57  ;;  %v3380_v24 = vsel %vm7882_vm6, %v7762_v50, %v3376_v31  ;;  %vm1911_vm7 = vweird.f32 %v7764_v3 }
 0x37b   : > { %v1908_v16 = vmul.f32 0.5, %v1907_v12  ;;  %v1155_v7 = vpop.xlane.xlu1 %1154  ;;  %v1152_v42 = vpop.xlane.xlu0 %1151  ;;  %v2142_v57 = vadd.f32 %v6254_v43, %v2078_v11  ;;  %vm1912_vm8 = vweird.f32 %v7818_v61  ;;  %v3991_v50 = vmul.f32 %v3370_v40, %v7202_v59 }
 0x37c   : > { %v1260_v41 = vmul.f32 %v1155_v7, %v5917_v8  ;;  %v785_v58 = vpop.xlane.xlu2 %784  ;;  %2726 = vadd.xlane.f32.xlu0 %v7732_v46  ;;  %v1259_v46 = vmul.f32 %v1152_v42, %v5917_v8  ;;  %v2267_v7 = vmul.f32 0.01, %v2141_v15  ;;  %vm2204_vm9 = vcmp.ge.f32.partialorder %v2141_v15, 0.0  ;;  %vm7935_vm13 = vmor %vm1911_vm7, %vm1912_vm8 }
 0x37d   : > { %v1909_v44 = vsub.f32 1.5, %v1908_v16  ;;  %v887_v5 = vmul.f32 %v5917_v8, %v785_v58  ;;  %vm3397_vm10 = vweird.f32 %v7821_v55  ;;  %vm2205_vm11 = vcmp.ge.f32.partialorder %v2142_v57, 0.0 }
 0x37e   : > { %v7878_v6 = vpop.eup %5435  ;;  %v7886_v62 = vadd.f32 1e-05, %v1260_v41  ;;  %v7904_v19 = vadd.f32 1e-05, %v1259_v46  ;;  %v3992_v41 = vmul.f32 %v3380_v24, %v10076_v26  ;;  %vm3387_vm12 = vweird.f32 %v7849_v38 }
 0x37f   : > { %v3392_v21 = vmul.f32 %v7878_v6, %v7821_v55  ;;  %v7897_v12 = vpop.eup %5437  ;;  %v7902_v36 = vsub.f32 %v7339_v14, %v887_v5  ;;  %v1910_v39 = vmul.f32 %v7818_v61, %v1909_v44  ;;  %v2268_v42 = vmul.f32 0.01, %v2142_v57  ;;  %v10086_v55 = vld [vmem:[#allocation12_spill] sm:$0xff] }
 0x380   : > { %5441 = vrsqrt.f32 %v7886_v62  ;;  %v1916_v16 = vmul.f32 %v7897_v12, %v7832_v51  ;;  %v7910_v11 = vpop.eup %5439  ;;  %v2330_v24 = vsel %vm2204_vm9, %v2141_v15, %v2267_v7  ;;  %v4055_v26 = vmul.f32 %v7866_v54, %v3991_v50 }
 0x381   : > { %v3393_v31 = vmul.f32 %v7878_v6, %v3392_v21  ;;  %5443 = vrsqrt.f32 %v7904_v19  ;;  %v3382_v40 = vmul.f32 %v7910_v11, %v7849_v38  ;;  %v1013_v44 = vmul.f32 %v7902_v36, %v7902_v36 }
 0x382   : > { %v1917_v59 = vmul.f32 %v7897_v12, %v1916_v16  ;;  %v10077_v21 = vpack.c.bf16 %v7677_v23, %v7671_v34  ;;  %vm3398_vm14 = vweird.f32 %v7878_v6  ;;  %v2331_v34 = vsel %vm2205_vm11, %v2142_v57, %v2268_v42 }
 0x383   : > { %v3394_v14 = vmul.f32 0.5, %v3393_v31  ;;  %v3063_v58 = vpop.xlane.xlu1 %3062  ;;  %v3383_v46 = vmul.f32 %v7910_v11, %v3382_v40  ;;  %v3060_v16 = vpop.xlane.xlu0 %3059  ;;  %v1168_v15 = vsel %vm644_vm1, %v1013_v44, 0.0  ;;  %v1914_v50 = vsel %vm7935_vm13, %v7818_v61, %v1910_v39  ;;  %vm7971_vm0 = vmor %vm3397_vm10, %vm3398_vm14 }
 0x384   : > { %v3240_v18 = vmul.f32 %v3063_v58, %v5917_v8  ;;  %5165 = vmatmul.msk.bf16.gmra.mxu3 %vm644_vm1, %v10077_v21  ;;  %v833_v31 = vpop.xlane.xlu2 %832  ;;  %v1918_v7 = vmul.f32 0.5, %v1917_v59  ;;  %1169 = vadd.xlane.f32.xlu1 %v1168_v15  ;;  %vm1761_vm15 = vweird.f32 %v7886_v62  ;;  %v2374_v21 = vpack.c.bf16 %v2331_v34, %v2330_v24 }
 0x385   : > { %v3395_v5 = vsub.f32 1.5, %v3394_v14  ;;  %v3384_v40 = vmul.f32 0.5, %v3383_v46  ;;  %v903_v57 = vmul.f32 %v5917_v8, %v833_v31  ;;  %v4056_v39 = vmul.f32 %v7866_v54, %v3992_v41 }
 0x386   : > { %v7929_v47 = vpop.eup %5441  ;;  %v7941_v23 = vadd.f32 1e-05, %v3240_v18  ;;  %v7958_v59 = vmul.f32 %v1914_v50, %v7243_v60  ;;  %vm3388_vm2 = vweird.f32 %v7910_v11  ;;  %vm1751_vm3 = vweird.f32 %v7904_v19  ;;  %5159 = vmatmul.msk.bf16.gmra.mxu1 %vm644_vm1, %v2374_v21 }
 0x387   : > { %v1756_v3 = vmul.f32 %v7929_v47, %v7886_v62  ;;  %v7949_v58 = vpop.eup %5443  ;;  %v3396_v42 = vmul.f32 %v7878_v6, %v3395_v5  ;;  %v3385_v18 = vsub.f32 1.5, %v3384_v40  ;;  %v1919_v46 = vsub.f32 1.5, %v1918_v7  ;;  %vm7989_vm6 = vmor %vm3387_vm12, %vm3388_vm2 }
 0x388   : > { %5445 = vrsqrt.f32 %v7941_v23  ;;  %v1746_v44 = vmul.f32 %v7949_v58, %v7904_v19  ;;  %v3239_v31 = vmul.f32 %v3060_v16, %v5917_v8  ;;  %vm1922_vm4 = vweird.f32 %v7897_v12 }
 0x389   : > { %v1757_v61 = vmul.f32 %v7929_v47, %v1756_v3  ;;  %v3386_v5 = vmul.f32 %v7910_v11, %v3385_v18  ;;  %vm1762_vm5 = vweird.f32 %v7929_v47  ;;  %v7979_v34 = vsub.f32 %v7374_v52, %v903_v57 }
 0x38a   : > { %v1747_v41 = vmul.f32 %v7949_v58, %v1746_v44  ;;  %v4119_v16 = vadd.f32 %v7876_v30, %v4055_v26  ;;  %v3400_v15 = vsel %vm7971_vm0, %v7878_v6, %v3396_v42  ;;  %v7993_v7 = vadd.f32 1e-05, %v3239_v31  ;;  %vm8017_vm11 = vmor %vm1761_vm15, %vm1762_vm5 }
 0x38b   : > { %v1758_v24 = vmul.f32 0.5, %v1757_v61  ;;  %v2715_v14 = vpop.xlane.xlu1 %2714  ;;  %v4120_v52 = vadd.f32 %v7876_v30, %v4056_v39  ;;  %v788_v40 = vpop.xlane.xlu0 %787  ;;  %vm1921_vm7 = vweird.f32 %v7832_v51  ;;  %v3390_v6 = vsel %vm7989_vm6, %v7910_v11, %v3386_v5 }
 0x38c   : > { %v1748_v26 = vmul.f32 0.5, %v1747_v41  ;;  %vm4182_vm8 = vcmp.ge.f32.partialorder %v4119_v16, 0.0  ;;  %v4245_v38 = vmul.f32 0.01, %v4119_v16  ;;  %v8003_v21 = vmul.f32 %v7897_v12, %v1919_v46  ;;  %v8010_v39 = vpop.f32.mrf.mxu1  ;;  %vm8062_vm14 = vmor %vm1921_vm7, %vm1922_vm4 }
 0x38d   : > { %v1759_v50 = vsub.f32 1.5, %v1758_v24  ;;  %5447 = vrsqrt.f32 %v7993_v7  ;;  %vm1752_vm9 = vweird.f32 %v7949_v58  ;;  %vm4183_vm10 = vcmp.ge.f32.partialorder %v4120_v52, 0.0 }
 0x38e   : > { %v7996_v3 = vpop.eup %5445  ;;  %v1749_v18 = vsub.f32 1.5, %v1748_v26  ;;  %v4246_v61 = vmul.f32 0.01, %v4120_v52  ;;  %v3993_v11 = vmul.f32 %v3390_v6, %v7296_v4  ;;  %v4308_v5 = vsel %vm4182_vm8, %v4119_v16, %v4245_v38  ;;  %vm1753_vm12 = vmor %vm1751_vm3, %vm1752_vm9 }
 0x38f   : > { %v1760_v57 = vmul.f32 %v7929_v47, %v1759_v50  ;;  %v3412_v42 = vmul.f32 %v7996_v3, %v7941_v23  ;;  %v2872_v24 = vmul.f32 %v2715_v14, %v5917_v8  ;;  %v888_v41 = vmul.f32 %v5917_v8, %v788_v40 }
 0x390   : > { %v1750_v60 = vmul.f32 %v7949_v58, %v1749_v18  ;;  %v4309_v4 = vsel %vm4183_vm10, %v4120_v52, %v4246_v61  ;;  %v3994_v62 = vmul.f32 %v3400_v15, %v10086_v55  ;;  %vm3417_vm13 = vweird.f32 %v7941_v23 }
 0x391   : > { %v3413_v46 = vmul.f32 %v7996_v3, %v3412_v42  ;;  %v1764_v31 = vsel %vm8017_vm11, %v7929_v47, %v1760_v57  ;;  %v4371_v6 = vpack.c.bf16 %v4309_v4, %v4308_v5  ;;  %v8032_v16 = vsub.f32 %v7391_v13, %v2872_v24 }
 0x392   : > { %v1754_v26 = vsel %vm1753_vm12, %v7949_v58, %v1750_v60  ;;  %v8037_v47 = vsub.f32 %v7396_v56, %v888_v41  ;;  %v2016_v19 = vmul.f32 %v1764_v31, %v7322_v25  ;;  %v10087_v13 = vpack.c.bf16 %v7679_v49, %v7689_v2 }
 0x393   : > { %v3414_v50 = vmul.f32 0.5, %v3413_v46  ;;  %v3069_v14 = vpop.xlane.xlu1 %3068  ;;  %v8040_v40 = vpop.eup %5447  ;;  %v2015_v15 = vmul.f32 %v1754_v26, %v7327_v17  ;;  %5180 = vmatmul.msk.bf16.vlgmr.msra.gmra.mxu2 %vm644_vm1, %v4371_v6  ;;  %v2998_v56 = vmul.f32 %v8032_v16, %v8032_v16  ;;  %v4057_v17 = vmul.f32 %v7866_v54, %v3993_v11 }
 0x394   : > { %v3242_v52 = vmul.f32 %v3069_v14, %v5917_v8  ;;  %5166 = vmatmul.msk.bf16.gmra.mxu3 %vm644_vm1, %v10087_v13  ;;  %v3066_v58 = vpop.xlane.xlu0 %3065  ;;  %v3402_v57 = vmul.f32 %v8040_v40, %v7993_v7  ;;  %v1014_v25 = vmul.f32 %v8037_v47, %v8037_v47  ;;  %vm3418_vm15 = vweird.f32 %v7996_v3  ;;  %v8091_v4 = vpop.f32.mrf.mxu1 }
 0x395   : > { %v3415_v38 = vsub.f32 1.5, %v3414_v50  ;;  %v3091_v18 = vsel %vm644_vm1, %v2998_v56, 0.0  ;;  %v3241_v61 = vmul.f32 %v3066_v58, %v5917_v8  ;;  %v1924_v11 = vsel %vm8062_vm14, %v7897_v12, %v8003_v21  ;;  %vm8084_vm2 = vmor %vm3417_vm13, %vm3418_vm15 }
 0x396   : > { %v8053_v42 = vadd.f32 1e-05, %v3242_v52  ;;  %v3403_v44 = vmul.f32 %v8040_v40, %v3402_v57  ;;  %3092 = vadd.xlane.f32.xlu1 %v3091_v18  ;;  %v1171_v51 = vsel %vm644_vm1, %v1014_v25, 0.0  ;;  %v2080_v46 = vmul.f32 %v6236_v22, %v2016_v19 }
 0x397   : > { %v3416_v2 = vmul.f32 %v7996_v3, %v3415_v38  ;;  %v2079_v5 = vmul.f32 %v6236_v22, %v2015_v15  ;;  %1172 = vadd.xlane.f32.xlu2 %v1171_v51  ;;  %v8079_v24 = vadd.f32 1e-05, %v3241_v61  ;;  %v4058_v31 = vmul.f32 %v7866_v54, %v3994_v62 }
 0x398   : > { %5449 = vrsqrt.f32 %v8053_v42  ;;  %v3404_v21 = vmul.f32 0.5, %v3403_v44  ;;  %vm3407_vm3 = vweird.f32 %v7993_v7  ;;  %vm3408_vm0 = vweird.f32 %v8040_v40 }
 0x399   : > { %v4121_v60 = vadd.f32 %v7876_v30, %v4057_v17  ;;  %v3420_v41 = vsel %vm8084_vm2, %v7996_v3, %v3416_v2  ;;  %5451 = vrsqrt.f32 %v8079_v24  ;;  %v4122_v23 = vadd.f32 %v7876_v30, %v4058_v31  ;;  %vm3409_vm6 = vmor %vm3407_vm3, %vm3408_vm0 }
 0x39a   : > { %v1029_v62 = vmul.f32 %v7979_v34, %v7979_v34  ;;  %v3405_v50 = vsub.f32 1.5, %v3404_v21  ;;  %v2143_v19 = vadd.f32 %v6254_v43, %v2079_v5  ;;  %v2144_v3 = vadd.f32 %v6254_v43, %v2080_v46 }
 0x39b   : > { %v1209_v55 = vpop.xlane.xlu1 %1208  ;;  %vm4184_vm4 = vcmp.ge.f32.partialorder %v4121_v60, 0.0  ;;  %v4247_v6 = vmul.f32 0.01, %v4121_v60  ;;  %vm4185_vm5 = vcmp.ge.f32.partialorder %v4122_v23, 0.0  ;;  %v4248_v26 = vmul.f32 0.01, %v4122_v23 }
 0x39c   : > { %v1278_v14 = vmul.f32 %v1209_v55, %v5917_v8  ;;  %v2712_v52 = vpop.xlane.xlu0 %2711  ;;  %v3406_v38 = vmul.f32 %v8040_v40, %v3405_v50  ;;  %v8110_v57 = vmul.f32 %v1924_v11, %v7276_v27  ;;  %v1216_v49 = vsel %vm644_vm1, %v1029_v62, 0.0  ;;  %v8140_v21 = vpop.f32.mrf.mxu1 }
 0x39d   : > { %v4310_v13 = vsel %vm4184_vm4, %v4121_v60, %v4247_v6  ;;  %v2871_v58 = vmul.f32 %v2712_v52, %v5917_v8  ;;  %v4311_v17 = vsel %vm4185_vm5, %v4122_v23, %v4248_v26  ;;  %v3996_v2 = vmul.f32 %v3420_v41, %v7355_v20 }
 0x39e   : > { %v8103_v15 = vpop.eup %5449  ;;  %v8106_v56 = vadd.f32 1e-05, %v1278_v14  ;;  %v3410_v18 = vsel %vm3409_vm6, %v8040_v40, %v3406_v38  ;;  %v4372_v61 = vpack.c.bf16 %v4311_v17, %v4310_v13  ;;  %1217 = vadd.xlane.f32.xlu1 %v1216_v49  ;;  %vm2206_vm7 = vcmp.ge.f32.partialorder %v2143_v19, 0.0 }
 0x39f   : > { %v3432_v25 = vmul.f32 %v8103_v15, %v8053_v42  ;;  %v8122_v27 = vpop.eup %5451  ;;  %v3995_v11 = vmul.f32 %v3410_v18, %v7369_v53  ;;  %2729 = vadd.xlane.f32.xlu2 %v7752_v63  ;;  %v8128_v44 = vsub.f32 %v7430_v28, %v2871_v58  ;;  %vm3438_vm8 = vweird.f32 %v8103_v15 }
 0x3a0   : > { %5453 = vrsqrt.f32 %v8106_v56  ;;  %v3422_v20 = vmul.f32 %v8122_v27, %v8079_v24  ;;  %vm2207_vm9 = vcmp.ge.f32.partialorder %v2144_v3, 0.0  ;;  %v2269_v40 = vmul.f32 0.01, %v2143_v19 }
 0x3a1   : > { %v3433_v7 = vmul.f32 %v8103_v15, %v3432_v25  ;;  %v2270_v46 = vmul.f32 0.01, %v2144_v3  ;;  %v2094_v53 = vmul.f32 %v6236_v22, %v7869_v48  ;;  %v2997_v5 = vmul.f32 %v8128_v44, %v8128_v44 }
 0x3a2   : > { %v3423_v63 = vmul.f32 %v8122_v27, %v3422_v20  ;;  %v2332_v28 = vsel %vm2206_vm7, %v2143_v19, %v2269_v40  ;;  %v4059_v31 = vmul.f32 %v7866_v54, %v3995_v11  ;;  %v4060_v12 = vmul.f32 %v7866_v54, %v3996_v2  ;;  %v10092_v40 = vld [vmem:[#allocation3_spill] sm:$0xff] }
 0x3a3   : > { %v3434_v51 = vmul.f32 0.5, %v3433_v7  ;;  %5181 = vmatmul.msk.bf16.gmra.mxu2 %vm644_vm1, %v4372_v61  ;;  %v2333_v41 = vsel %vm2207_vm9, %v2144_v3, %v2270_v46  ;;  %v2158_v23 = vadd.f32 %v6254_v43, %v2094_v53  ;;  %v3088_v48 = vsel %vm644_vm1, %v2997_v5, 0.0 }
 0x3a4   : > { %v1206_v55 = vpop.xlane.xlu0 %1205  ;;  %v3424_v50 = vmul.f32 0.5, %v3423_v63  ;;  %v2375_v6 = vpack.c.bf16 %v2333_v41, %v2332_v28  ;;  %3089 = vadd.xlane.f32.xlu0 %v3088_v48  ;;  %v4123_v26 = vadd.f32 %v7876_v30, %v4059_v31  ;;  %vm3437_vm10 = vweird.f32 %v8053_v42  ;;  %v8180_v53 = vpop.f32.mrf.mxu1 }
 0x3a5   : > { %v3435_v60 = vsub.f32 1.5, %v3434_v51  ;;  %v1277_v14 = vmul.f32 %v1206_v55, %v5917_v8  ;;  %vm2221_vm11 = vcmp.ge.f32.partialorder %v2158_v23, 0.0  ;;  %vm3439_vm12 = vmor %vm3437_vm10, %vm3438_vm8  ;;  %vm3428_vm13 = vweird.f32 %v8122_v27 }
 0x3a6   : > { %v8145_v62 = vpop.eup %5453  ;;  %v3425_v3 = vsub.f32 1.5, %v3424_v50  ;;  %5160 = vmatmul.msk.bf16.gmra.mxu1 %vm644_vm1, %v2375_v6  ;;  %v2284_v38 = vmul.f32 0.01, %v2158_v23  ;;  %2735 = vadd.xlane.f32.xlu1 %v7811_v9  ;;  %vm3427_vm14 = vweird.f32 %v8079_v24  ;;  %v4124_v25 = vadd.f32 %v7876_v30, %v4060_v12 }
 0x3a7   : > { %v3436_v52 = vmul.f32 %v8103_v15, %v3435_v60  ;;  %v1936_v19 = vmul.f32 %v8145_v62, %v8106_v56  ;;  %v8158_v13 = vadd.f32 1e-05, %v1277_v14  ;;  %vm4186_vm15 = vcmp.ge.f32.partialorder %v4123_v26, 0.0  ;;  %vm3429_vm2 = vmor %vm3427_vm14, %vm3428_vm13 }
 0x3a8   : > { %v3426_v17 = vmul.f32 %v8122_v27, %v3425_v3  ;;  %v2347_v49 = vsel %vm2221_vm11, %v2158_v23, %v2284_v38  ;;  %vm4187_vm3 = vcmp.ge.f32.partialorder %v4124_v25, 0.0  ;;  %v4249_v24 = vmul.f32 0.01, %v4123_v26 }
 0x3a9   : > { %v3440_v58 = vsel %vm3439_vm12, %v8103_v15, %v3436_v52  ;;  %v1937_v42 = vmul.f32 %v8145_v62, %v1936_v19  ;;  %5455 = vrsqrt.f32 %v8158_v13  ;;  %v2382_v18 = vpack.c.bf16 %v2347_v49, %v7714_v32  ;;  %v10093_v52 = vld [vmem:[#allocation21_spill] sm:$0xff] }
 0x3aa   : > { %v3998_v2 = vmul.f32 %v3440_v58, %v7401_v33  ;;  %v3430_v15 = vsel %vm3429_vm2, %v8122_v27, %v3426_v17  ;;  %v4250_v61 = vmul.f32 0.01, %v4124_v25  ;;  %v2095_v11 = vmul.f32 %v6236_v22, %v7958_v59 }
 0x3ab   : > { %v1938_v9 = vmul.f32 0.5, %v1937_v42  ;;  %vm1942_vm0 = vweird.f32 %v8145_v62  ;;  %5167 = vmatmul.msk.bf16.gmra.mxu3 %vm644_vm1, %v2382_v18  ;;  %v2731_v33 = vsel %vm644_vm1, %v7739_v29, 0.0  ;;  %v2096_v32 = vmul.f32 %v6236_v22, %v8110_v57 }
 0x3ac   : > { %v1161_v20 = vpop.xlane.xlu0 %1160  ;;  %v3997_v51 = vmul.f32 %v3430_v15, %v10092_v40  ;;  %v4312_v27 = vsel %vm4186_vm15, %v4123_v26, %v4249_v24  ;;  %v4313_v46 = vsel %vm4187_vm3, %v4124_v25, %v4250_v61  ;;  %2732 = vadd.xlane.f32.xlu0 %v2731_v33  ;;  %vm1941_vm4 = vweird.f32 %v8106_v56  ;;  %v8211_v24 = vpop.f32.mrf.mxu1 }
 0x3ad   : > { %v1939_v7 = vsub.f32 1.5, %v1938_v9  ;;  %v1262_v59 = vmul.f32 %v1161_v20, %v5917_v8  ;;  %v2159_v31 = vadd.f32 %v6254_v43, %v2095_v11  ;;  %v2160_v57 = vadd.f32 %v6254_v43, %v2096_v32  ;;  %vm1943_vm5 = vmor %vm1941_vm4, %vm1942_vm0 }
 0x3ae   : > { %v3072_v12 = vpop.xlane.xlu1 %3071  ;;  %v4062_v60 = vmul.f32 %v7866_v54, %v3998_v2  ;;  %v4373_v23 = vpack.c.bf16 %v4313_v46, %v4312_v27  ;;  %v4061_v56 = vmul.f32 %v7866_v54, %v3997_v51  ;;  %vm1931_vm9 = vweird.f32 %v8158_v13  ;;  %v10094_v27 = vld [vmem:[#allocation26_spill] sm:$0xff] }
 0x3af   : > { %v1940_v5 = vmul.f32 %v8145_v62, %v1939_v7  ;;  %v5456_v63 = vpop.eup %5455  ;;  %v8184_v28 = vadd.f32 1e-05, %v1262_v59  ;;  %v3243_v50 = vmul.f32 %v3072_v12, %v5917_v8  ;;  %vm2222_vm6 = vcmp.ge.f32.partialorder %v2159_v31, 0.0  ;;  %v10095_v59 = vld [vmem:[#allocation6_spill] sm:$0xff] }
 0x3b0   : > { %v1926_v41 = vmul.f32 %v5456_v63, %v8158_v13  ;;  %v2285_v6 = vmul.f32 0.01, %v2159_v31  ;;  %v2286_v14 = vmul.f32 0.01, %v2160_v57  ;;  %v4126_v26 = vadd.f32 %v7876_v30, %v4062_v60 }
 0x3b1   : > { %v1944_v48 = vsel %vm1943_vm5, %v8145_v62, %v1940_v5  ;;  %5457 = vrsqrt.f32 %v8184_v28  ;;  %vm2223_vm7 = vcmp.ge.f32.partialorder %v2160_v57, 0.0  ;;  %v8199_v38 = vadd.f32 1e-05, %v3243_v50 }
 0x3b2   : > { %v1927_v55 = vmul.f32 %v5456_v63, %v1926_v41  ;;  %v2034_v19 = vmul.f32 %v1944_v48, %v10093_v52  ;;  %v4125_v42 = vadd.f32 %v7876_v30, %v4061_v56  ;;  %vm1932_vm8 = vweird.f32 %v5456_v63 }
 0x3b3   : > { %5182 = vmatmul.msk.bf16.gmra.mxu2 %vm644_vm1, %v4373_v23  ;;  %5459 = vrsqrt.f32 %v8199_v38  ;;  %v2348_v49 = vsel %vm2222_vm6, %v2159_v31, %v2285_v6  ;;  %v2349_v2 = vsel %vm2223_vm7, %v2160_v57, %v2286_v14  ;;  %vm4189_vm10 = vcmp.ge.f32.partialorder %v4126_v26, 0.0  ;;  %vm1933_vm11 = vmor %vm1931_vm9, %vm1932_vm8 }
 0x3b4   : > { %v1928_v3 = vmul.f32 0.5, %v1927_v55  ;;  %v2718_v62 = vpop.xlane.xlu0 %2717  ;;  %v2098_v61 = vmul.f32 %v6236_v22, %v2034_v19  ;;  %v4252_v7 = vmul.f32 0.01, %v4126_v26  ;;  %v4251_v33 = vmul.f32 0.01, %v4125_v42 }
 0x3b5   : > { %v2873_v58 = vmul.f32 %v2718_v62, %v5917_v8  ;;  %v2383_v51 = vpack.c.bf16 %v2349_v2, %v2348_v49  ;;  %vm4188_vm12 = vcmp.ge.f32.partialorder %v4125_v42, 0.0  ;;  %v8237_v56 = vadd.f32 %v8010_v39, %v6621_v10 }
 0x3b6   : > { %v1929_v25 = vsub.f32 1.5, %v1928_v3  ;;  %v2721_v18 = vpop.xlane.xlu1 %2720  ;;  %v3075_v15 = vpop.xlane.xlu2 %3074  ;;  %v4314_v48 = vsel %vm4188_vm12, %v4125_v42, %v4251_v33  ;;  %v2162_v6 = vadd.f32 %v6254_v43, %v2098_v61  ;;  %vm3447_vm2 = vweird.f32 %v8199_v38 }
 0x3b7   : > { %v8204_v17 = vpop.eup %5457  ;;  %v8209_v9 = vsub.f32 %v7503_v0, %v2873_v58  ;;  %v2874_v20 = vmul.f32 %v2721_v18, %v5917_v8  ;;  %v3244_v13 = vmul.f32 %v3075_v15, %v5917_v8  ;;  %v8251_v18 = vpop.f32.mrf.mxu1  ;;  %v2737_v61 = vsel %vm644_vm1, %v8237_v56, 0.0 }
 0x3b8   : > { %v1930_v11 = vmul.f32 %v5456_v63, %v1929_v25  ;;  %v1776_v40 = vmul.f32 %v8204_v17, %v8184_v28  ;;  %vm2225_vm14 = vcmp.ge.f32.partialorder %v2162_v6, 0.0  ;;  %vm1782_vm0 = vweird.f32 %v8204_v17 }
 0x3b9   : > { %v2999_v32 = vmul.f32 %v8209_v9, %v8209_v9  ;;  %v8222_v5 = vsub.f32 %v10095_v59, %v2874_v20  ;;  %v8224_v31 = vadd.f32 1e-05, %v3244_v13  ;;  %v8227_v12 = vpop.eup %5459  ;;  %vm1781_vm6 = vweird.f32 %v8184_v28 }
 0x3ba   : > { %v1934_v0 = vsel %vm1933_vm11, %v5456_v63, %v1930_v11  ;;  %v4315_v63 = vsel %vm4189_vm10, %v4126_v26, %v4252_v7  ;;  %v3442_v23 = vmul.f32 %v8227_v12, %v8199_v38  ;;  %v1777_v14 = vmul.f32 %v8204_v17, %v1776_v40  ;;  %vm1783_vm8 = vmor %vm1781_vm6, %vm1782_vm0 }
 0x3bb   : > { %v2033_v46 = vmul.f32 %v1934_v0, %v10094_v27  ;;  %v3094_v57 = vsel %vm644_vm1, %v2999_v32, 0.0  ;;  %5168 = vmatmul.msk.bf16.gmra.mxu3 %vm644_vm1, %v2383_v51  ;;  %5461 = vrsqrt.f32 %v8224_v31  ;;  %v3000_v50 = vmul.f32 %v8222_v5, %v8222_v5 }
 0x3bc   : > { %3095 = vadd.xlane.f32.xlu2 %v3094_v57  ;;  %v1215_v60 = vpop.xlane.xlu0 %1214  ;;  %v3443_v26 = vmul.f32 %v8227_v12, %v3442_v23  ;;  %v4374_v62 = vpack.c.bf16 %v4315_v63, %v4314_v48  ;;  %v2288_v11 = vmul.f32 0.01, %v2162_v6  ;;  %v1778_v33 = vmul.f32 0.5, %v1777_v14 }
 0x3bd   : > { %v2097_v41 = vmul.f32 %v6236_v22, %v2033_v46  ;;  %v1280_v55 = vmul.f32 %v1215_v60, %v5917_v8  ;;  %v3097_v49 = vsel %vm644_vm1, %v3000_v50, 0.0  ;;  %vm3448_vm15 = vweird.f32 %v8227_v12 }
 0x3be   : > { %v3078_v52 = vpop.xlane.xlu1 %3077  ;;  %v1158_v19 = vpop.xlane.xlu2 %1157  ;;  %v3444_v25 = vmul.f32 0.5, %v3443_v26  ;;  %3098 = vadd.xlane.f32.xlu0 %v3097_v49  ;;  %v8267_v40 = vadd.f32 %v8091_v4, %v6621_v10  ;;  %v8271_v51 = vadd.f32 %v8140_v21, %v6621_v10  ;;  %v2351_v59 = vsel %vm2225_vm14, %v2162_v6, %v2288_v11  ;;  %vm8276_vm3 = vmor %vm3447_vm2, %vm3448_vm15 }
 0x3bf   : > { %v2161_v3 = vadd.f32 %v6254_v43, %v2097_v41  ;;  %v8246_v58 = vadd.f32 1e-05, %v1280_v55  ;;  %v3245_v39 = vmul.f32 %v3078_v52, %v5917_v8  ;;  %v1261_v42 = vmul.f32 %v1158_v19, %v5917_v8 }
 0x3c0   : > { %v3445_v20 = vsub.f32 1.5, %v3444_v25  ;;  %v1779_v57 = vsub.f32 1.5, %v1778_v33  ;;  %v2743_v6 = vsel %vm644_vm1, %v8271_v51, 0.0  ;;  %v2740_v14 = vsel %vm644_vm1, %v8267_v40, 0.0 }
 0x3c1   : > { %vm2224_vm13 = vcmp.ge.f32.partialorder %v2161_v3, 0.0  ;;  %v2287_v2 = vmul.f32 0.01, %v2161_v3  ;;  %5463 = vrsqrt.f32 %v8246_v58  ;;  %v8254_v15 = vadd.f32 1e-05, %v3245_v39  ;;  %v5462_v7 = vpop.eup %5461  ;;  %v10098_v39 = vld [vmem:[#allocation27_spill] sm:$0xff] }
 0x3c2   : > { %v8258_v13 = vadd.f32 1e-05, %v1261_v42  ;;  %v3452_v32 = vmul.f32 %v5462_v7, %v8224_v31  ;;  %v3446_v27 = vmul.f32 %v8227_v12, %v3445_v20  ;;  %vm3458_vm4 = vweird.f32 %v5462_v7 }
 0x3c3   : > { %5183 = vmatmul.msk.bf16.gmra.mxu2 %vm644_vm1, %v4374_v62  ;;  %5465 = vrsqrt.f32 %v8254_v15  ;;  %v2350_v0 = vsel %vm2224_vm13, %v2161_v3, %v2287_v2  ;;  %v1780_v62 = vmul.f32 %v8204_v17, %v1779_v57  ;;  %v2581_v2 = vpop.f32.mrf.mxu1  ;;  %vm3457_vm5 = vweird.f32 %v8224_v31 }
 0x3c4   : > { %2738 = vadd.xlane.f32.xlu2 %v2737_v61  ;;  %5467 = vrsqrt.f32 %v8258_v13  ;;  %v3453_v46 = vmul.f32 %v5462_v7, %v3452_v32  ;;  %v2384_v60 = vpack.c.bf16 %v2351_v59, %v2350_v0  ;;  %v3450_v21 = vsel %vm8276_vm3, %v8227_v12, %v3446_v27  ;;  %vm3459_vm7 = vmor %vm3457_vm5, %vm3458_vm4 }
 0x3c5   : > { %v3999_v42 = vmul.f32 %v3450_v21, %v10098_v39  ;;  %v8316_v0 = vadd.f32 %v2581_v2, %v6621_v10  ;;  %v1784_v27 = vsel %vm1783_vm8, %v8204_v17, %v1780_v62  ;;  %vm1771_vm10 = vweird.f32 %v8258_v13 }
 0x3c6   : > { %v1164_v4 = vpop.xlane.xlu1 %1163  ;;  %v3081_v41 = vpop.xlane.xlu2 %3080  ;;  %v3454_v48 = vmul.f32 0.5, %v3453_v46  ;;  %2744 = vadd.xlane.f32.xlu0 %v2743_v6  ;;  %v10099_v46 = vld [vmem:[#allocation17_spill] sm:$0xff]  ;;  %vm1961_vm11 = vweird.f32 %v8246_v58  ;;  %vm3467_vm14 = vweird.f32 %v8254_v15 }
 0x3c7   : > { %v8280_v23 = vpop.eup %5463  ;;  %v1263_v55 = vmul.f32 %v1164_v4, %v5917_v8  ;;  %v3246_v38 = vmul.f32 %v3081_v41, %v5917_v8  ;;  %v4063_v57 = vmul.f32 %v7866_v54, %v3999_v42  ;;  %v2755_v17 = vsel %vm644_vm1, %v8316_v0, 0.0 }
 0x3c8   : > { %v1956_v50 = vmul.f32 %v8280_v23, %v8246_v58  ;;  %v3455_v52 = vsub.f32 1.5, %v3454_v48  ;;  %v10100_v48 = vld [vmem:[#allocation16_spill] sm:$0xff]  ;;  %vm1962_vm12 = vweird.f32 %v8280_v23 }
 0x3c9   : > { %v8294_v26 = vpop.eup %5465  ;;  %v8296_v12 = vadd.f32 1e-05, %v1263_v55  ;;  %v8298_v19 = vadd.f32 1e-05, %v3246_v38  ;;  %vm8343_vm15 = vmor %vm1961_vm11, %vm1962_vm12 }
 0x3ca   : > { %v5468_v3 = vpop.eup %5467  ;;  %v1957_v25 = vmul.f32 %v8280_v23, %v1956_v50  ;;  %v3462_v49 = vmul.f32 %v8294_v26, %v8254_v15  ;;  %v3456_v61 = vmul.f32 %v5462_v7, %v3455_v52  ;;  %vm3468_vm2 = vweird.f32 %v8294_v26 }
 0x3cb   : > { %v1766_v11 = vmul.f32 %v5468_v3, %v8258_v13  ;;  %5169 = vmatmul.msk.bf16.gmra.mxu3 %vm644_vm1, %v2384_v60  ;;  %5469 = vrsqrt.f32 %v8296_v12  ;;  %vm1772_vm9 = vweird.f32 %v5468_v3  ;;  %vm8357_vm5 = vmor %vm3467_vm14, %vm3468_vm2  ;;  %vm3477_vm6 = vweird.f32 %v8298_v19 }
 0x3cc   : > { %2741 = vadd.xlane.f32.xlu2 %v2740_v14  ;;  %v1958_v33 = vmul.f32 0.5, %v1957_v25  ;;  %v3463_v20 = vmul.f32 %v8294_v26, %v3462_v49  ;;  %5471 = vrsqrt.f32 %v8298_v19  ;;  %v3460_v31 = vsel %vm3459_vm7, %v5462_v7, %v3456_v61  ;;  %vm1773_vm13 = vmor %vm1771_vm10, %vm1772_vm9 }
 0x3cd   : > { %v1767_v32 = vmul.f32 %v5468_v3, %v1766_v11  ;;  %v4000_v59 = vmul.f32 %v3460_v31, %v10099_v46  ;;  %v2018_v7 = vmul.f32 %v1784_v27, %v10100_v48  ;;  %v4127_v14 = vadd.f32 %v7876_v30, %v4063_v57 }
 0x3ce   : > { %v1212_v28 = vpop.xlane.xlu2 %1211  ;;  %v3464_v63 = vmul.f32 0.5, %v3463_v20  ;;  %v1959_v41 = vsub.f32 1.5, %v1958_v33  ;;  %vm1791_vm2 = vweird.f32 %v8296_v12 }
 0x3cf   : > { %v1768_v60 = vmul.f32 0.5, %v1767_v32  ;;  %v1279_v4 = vmul.f32 %v1212_v28, %v5917_v8  ;;  %v4064_v6 = vmul.f32 %v7866_v54, %v4000_v59  ;;  %v2082_v25 = vmul.f32 %v6236_v22, %v2018_v7 }
 0x3d0   : > { %v3465_v52 = vsub.f32 1.5, %v3464_v63  ;;  %v1960_v42 = vmul.f32 %v8280_v23, %v1959_v41  ;;  %v4253_v33 = vmul.f32 0.01, %v4127_v14  ;;  %vm4190_vm3 = vcmp.ge.f32.partialorder %v4127_v14, 0.0 }
 0x3d1   : > { %v8322_v21 = vpop.eup %5469  ;;  %v1769_v55 = vsub.f32 1.5, %v1768_v60  ;;  %v8325_v38 = vadd.f32 1e-05, %v1279_v4  ;;  %v4128_v11 = vadd.f32 %v7876_v30, %v4064_v6  ;;  %v2146_v59 = vadd.f32 %v6254_v43, %v2082_v25 }
 0x3d2   : > { %v5472_v50 = vpop.eup %5471  ;;  %v1786_v2 = vmul.f32 %v8322_v21, %v8296_v12  ;;  %v3466_v20 = vmul.f32 %v8294_v26, %v3465_v52  ;;  %v1964_v31 = vsel %vm8343_vm15, %v8280_v23, %v1960_v42  ;;  %v4316_v23 = vsel %vm4190_vm3, %v4127_v14, %v4253_v33 }
 0x3d3   : > { %v1770_v62 = vmul.f32 %v5468_v3, %v1769_v55  ;;  %v3472_v39 = vmul.f32 %v5472_v50, %v8298_v19  ;;  %5473 = vrsqrt.f32 %v8325_v38  ;;  %vm4191_vm0 = vcmp.ge.f32.partialorder %v4128_v11, 0.0  ;;  %v10105_v55 = vld [vmem:[#allocation7_spill] sm:$0xff] }
 0x3d4   : > { %2756 = vadd.xlane.f32.xlu2 %v2755_v17  ;;  %v1787_v27 = vmul.f32 %v8322_v21, %v1786_v2  ;;  %vm3478_vm4 = vweird.f32 %v5472_v50  ;;  %v3470_v4 = vsel %vm8357_vm5, %v8294_v26, %v3466_v20  ;;  %v2036_v15 = vmul.f32 %v1964_v31, %v10105_v55 }
 0x3d5   : > { %v1774_v49 = vsel %vm1773_vm13, %v5468_v3, %v1770_v62  ;;  %v3473_v61 = vmul.f32 %v5472_v50, %v3472_v39  ;;  %vm3479_vm7 = vmor %vm3477_vm6, %vm3478_vm4  ;;  %vm2209_vm9 = vcmp.ge.f32.partialorder %v2146_v59, 0.0  ;;  %v2272_v52 = vmul.f32 0.01, %v2146_v59  ;;  %v10106_v39 = vld [vmem:[#allocation32_spill] sm:$0xff] }
 0x3d6   : > { %v2017_v13 = vmul.f32 %v1774_v49, %v7533_v35  ;;  %v4254_v35 = vmul.f32 0.01, %v4128_v11  ;;  %v1788_v6 = vmul.f32 0.5, %v1787_v27  ;;  %v4001_v62 = vmul.f32 %v3470_v4, %v7555_v45 }
 0x3d7   : > { %v3474_v3 = vmul.f32 0.5, %v3473_v61  ;;  %v2335_v2 = vsel %vm2209_vm9, %v2146_v59, %v2272_v52  ;;  %vm1951_vm11 = vweird.f32 %v8325_v38  ;;  %vm1792_vm13 = vweird.f32 %v8322_v21  ;;  %v10107_v59 = vld [vmem:[#allocation18_spill] sm:$0xff] }
 0x3d8   : > { %v2081_v32 = vmul.f32 %v6236_v22, %v2017_v13  ;;  %v4317_v63 = vsel %vm4191_vm0, %v4128_v11, %v4254_v35  ;;  %v2100_v11 = vmul.f32 %v6236_v22, %v2036_v15  ;;  %v1789_v33 = vsub.f32 1.5, %v1788_v6  ;;  %vm8388_vm3 = vmor %vm1791_vm2, %vm1792_vm13  ;;  %v10110_v6 = vld [vmem:[#allocation29_spill] sm:$0xff] }
 0x3d9   : > { %v3475_v46 = vsub.f32 1.5, %v3474_v3  ;;  %v5474_v28 = vpop.eup %5473  ;;  %v4375_v7 = vpack.c.bf16 %v4317_v63, %v4316_v23  ;;  %v4065_v45 = vmul.f32 %v7866_v54, %v4001_v62 }
 0x3da   : > { %v2145_v60 = vadd.f32 %v6254_v43, %v2081_v32  ;;  %v1946_v48 = vmul.f32 %v5474_v28, %v8325_v38  ;;  %vm1952_vm10 = vweird.f32 %v5474_v28  ;;  %v1790_v35 = vmul.f32 %v8322_v21, %v1789_v33 }
 0x3db   : > { %v3476_v41 = vmul.f32 %v5472_v50, %v3475_v46  ;;  %5184 = vmatmul.msk.bf16.gmra.mxu2 %vm644_vm1, %v4375_v7  ;;  %vm1953_vm12 = vmor %vm1951_vm11, %vm1952_vm10  ;;  %v4129_v31 = vadd.f32 %v7876_v30, %v4065_v45  ;;  %v2164_v46 = vadd.f32 %v6254_v43, %v2100_v11 }
 0x3dc   : > { %vm2208_vm8 = vcmp.ge.f32.partialorder %v2145_v60, 0.0  ;;  %v2271_v17 = vmul.f32 0.01, %v2145_v60  ;;  %v1947_v14 = vmul.f32 %v5474_v28, %v1946_v48  ;;  %v1794_v7 = vsel %vm8388_vm3, %v8322_v21, %v1790_v35 }
 0x3dd   : > { %v3480_v19 = vsel %vm3479_vm7, %v5472_v50, %v3476_v41  ;;  %vm4192_vm14 = vcmp.ge.f32.partialorder %v4129_v31, 0.0  ;;  %v4255_v38 = vmul.f32 0.01, %v4129_v31  ;;  %v2290_v62 = vmul.f32 0.01, %v2164_v46 }
 0x3de   : > { %v4002_v26 = vmul.f32 %v3480_v19, %v10106_v39  ;;  %v2334_v42 = vsel %vm2208_vm8, %v2145_v60, %v2271_v17  ;;  %v1948_v25 = vmul.f32 0.5, %v1947_v14  ;;  %v8403_v39 = vpop.f32.mrf.mxu1  ;;  %vm2227_vm0 = vcmp.ge.f32.partialorder %v2164_v46, 0.0 }
 0x3df   : > { %v1167_v49 = vpop.xlane.xlu2 %1166  ;;  %v2376_v13 = vpack.c.bf16 %v2335_v2, %v2334_v42  ;;  %v4318_v15 = vsel %vm4192_vm14, %v4129_v31, %v4255_v38  ;;  %v10111_v2 = vld [vmem:[#allocation23_spill] sm:$0xff] }
 0x3e0   : > { %v1264_v61 = vmul.f32 %v1167_v49, %v5917_v8  ;;  %v1949_v58 = vsub.f32 1.5, %v1948_v25  ;;  %v4066_v20 = vmul.f32 %v7866_v54, %v4002_v26 }
 0x3e1   : > { %5161 = vmatmul.msk.bf16.gmra.mxu1 %vm644_vm1, %v2376_v13 }
 0x3e2   : > { %v8373_v50 = vadd.f32 1e-05, %v1264_v61  ;;  %v1950_v3 = vmul.f32 %v5474_v28, %v1949_v58  ;;  %v4130_v32 = vadd.f32 %v7876_v30, %v4066_v20  ;;  %v2019_v61 = vmul.f32 %v1794_v7, %v10111_v2 }
 0x3e3   : > { %v2353_v20 = vsel %vm2227_vm0, %v2164_v46, %v2290_v62 }
 0x3e4   : > { %5475 = vrsqrt.f32 %v8373_v50  ;;  %v1954_v27 = vsel %vm1953_vm12, %v5474_v28, %v1950_v3  ;;  %vm4193_vm15 = vcmp.ge.f32.partialorder %v4130_v32, 0.0  ;;  %v4256_v4 = vmul.f32 0.01, %v4130_v32 }
 0x3e5   : > { %v2035_v57 = vmul.f32 %v1954_v27, %v10107_v59  ;;  %v10112_v59 = vld [vmem:[#allocation30_spill] sm:$0xff]  ;;  %v2083_v46 = vmul.f32 %v6236_v22, %v2019_v61  ;;  %vm1801_vm6 = vweird.f32 %v8373_v50 }
 0x3e6   : > { %v4319_v12 = vsel %vm4193_vm15, %v4130_v32, %v4256_v4  ;;  %v2586_v41 = vpop.f32.mrf.mxu1 }
 0x3e7   : > { %v3084_v23 = vpop.xlane.xlu0 %3083  ;;  %v2724_v63 = vpop.xlane.xlu2 %2723  ;;  %v2099_v28 = vmul.f32 %v6236_v22, %v2035_v57  ;;  %v4376_v14 = vpack.c.bf16 %v4319_v12, %v4318_v15  ;;  %v10113_v15 = vld [vmem:[#allocation10_spill] sm:$0xff] }
 0x3e8   : > { %v3247_v60 = vmul.f32 %v3084_v23, %v5917_v8  ;;  %v2875_v48 = vmul.f32 %v2724_v63, %v5917_v8  ;;  %v8423_v23 = vadd.f32 %v8180_v53, %v6621_v10 }
 0x3e9   : > { %v2163_v52 = vadd.f32 %v6254_v43, %v2099_v28  ;;  %v3087_v42 = vpop.xlane.xlu1 %3086 }
 0x3ea   : > { %v8397_v55 = vadd.f32 1e-05, %v3247_v60  ;;  %v5476_v17 = vpop.eup %5475  ;;  %v8400_v19 = vsub.f32 %v10110_v6, %v2875_v48  ;;  %v3248_v21 = vmul.f32 %v3087_v42, %v5917_v8  ;;  %v2746_v6 = vsel %vm644_vm1, %v8423_v23, 0.0 }
 0x3eb   : > { %v1796_v26 = vmul.f32 %v5476_v17, %v8373_v50  ;;  %vm2226_vm4 = vcmp.ge.f32.partialorder %v2163_v52, 0.0  ;;  %v2289_v49 = vmul.f32 0.01, %v2163_v52  ;;  %5185 = vmatmul.msk.bf16.gmra.mxu2 %vm644_vm1, %v4376_v14  ;;  %vm1802_vm5 = vweird.f32 %v5476_v17 }
 0x3ec   : > { %5477 = vrsqrt.f32 %v8397_v55  ;;  %v3001_v25 = vmul.f32 %v8400_v19, %v8400_v19  ;;  %v8412_v11 = vadd.f32 1e-05, %v3248_v21  ;;  %vm1803_vm7 = vmor %vm1801_vm6, %vm1802_vm5  ;;  %v2147_v14 = vadd.f32 %v6254_v43, %v2083_v46 }
 0x3ed   : > { %v1797_v13 = vmul.f32 %v5476_v17, %v1796_v26  ;;  %v2352_v45 = vsel %vm2226_vm4, %v2163_v52, %v2289_v49  ;;  %v8439_v26 = vadd.f32 %v8211_v24, %v6621_v10  ;;  %v8442_v42 = vadd.f32 %v2586_v41, %v6621_v10 }
 0x3ee   : > { %v3100_v33 = vsel %vm644_vm1, %v3001_v25, 0.0  ;;  %v2385_v32 = vpack.c.bf16 %v2353_v20, %v2352_v45  ;;  %5479 = vrsqrt.f32 %v8412_v11  ;;  %vm3487_vm9 = vweird.f32 %v8397_v55 }
 0x3ef   : > { %v2727_v58 = vpop.xlane.xlu0 %2726  ;;  %v1798_v3 = vmul.f32 0.5, %v1797_v13  ;;  %3101 = vadd.xlane.f32.xlu0 %v3100_v33  ;;  %v2273_v61 = vmul.f32 0.01, %v2147_v14  ;;  %vm2210_vm11 = vcmp.ge.f32.partialorder %v2147_v14, 0.0  ;;  %vm3497_vm14 = vweird.f32 %v8412_v11 }
 0x3f0   : > { %v2876_v31 = vmul.f32 %v2727_v58, %v5917_v8  ;;  %5170 = vmatmul.msk.bf16.gmra.mxu3 %vm644_vm1, %v2385_v32  ;;  %vm4687_vm6 = vcmask 97280  }
 0x3f1   : > { %v1799_v27 = vsub.f32 1.5, %v1798_v3  ;;  %v2761_v3 = vsel %vm644_vm1, %v8442_v42, 0.0 }
 0x3f2   : > { %v5478_v35 = vpop.eup %5477  ;;  %v8418_v57 = vsub.f32 %v10112_v59, %v2876_v31  ;;  %v2336_v31 = vsel %vm2210_vm11, %v2147_v14, %v2273_v61 }
 0x3f3   : > { %v3482_v38 = vmul.f32 %v5478_v35, %v8397_v55  ;;  %v1800_v63 = vmul.f32 %v5476_v17, %v1799_v27  ;;  %vm3488_vm8 = vweird.f32 %v5478_v35  ;;  %v2749_v55 = vsel %vm644_vm1, %v8439_v26, 0.0  ;;  %v2589_v27 = vpop.f32.mrf.mxu1 }
 0x3f4   : > { %v3002_v60 = vmul.f32 %v8418_v57, %v8418_v57  ;;  %v5480_v7 = vpop.eup %5479  ;;  %vm8447_vm10 = vmor %vm3487_vm9, %vm3488_vm8 }
 0x3f5   : > { %v3483_v4 = vmul.f32 %v5478_v35, %v3482_v38  ;;  %v1804_v28 = vsel %vm1803_vm7, %v5476_v17, %v1800_v63  ;;  %v3492_v50 = vmul.f32 %v5480_v7, %v8412_v11  ;;  %vm3498_vm13 = vweird.f32 %v5480_v7 }
 0x3f6   : > { %v3103_v48 = vsel %vm644_vm1, %v3002_v60, 0.0  ;;  %v2020_v53 = vmul.f32 %v1804_v28, %v10113_v15  ;;  %vm3499_vm15 = vmor %vm3497_vm14, %vm3498_vm13  ;;  %v8464_v63 = vadd.f32 %v2589_v27, %v6621_v10  ;;  %v10116_v27 = vld [vmem:[#allocation28_spill] sm:$0xff] }
 0x3f7   : > { %v3484_v12 = vmul.f32 0.5, %v3483_v4  ;;  %3104 = vadd.xlane.f32.xlu1 %v3103_v48  ;;  %2747 = vadd.xlane.f32.xlu0 %v2746_v6  ;;  %v1170_v17 = vpop.xlane.xlu1 %1169  ;;  %v3493_v21 = vmul.f32 %v5480_v7, %v3492_v50 }
 0x3f8   : > { %v2084_v52 = vmul.f32 %v6236_v22, %v2020_v53  ;;  %v1265_v25 = vmul.f32 %v1170_v17, %v5917_v8  ;;  %v2764_v48 = vsel %vm644_vm1, %v8464_v63, 0.0 }
 0x3f9   : > { %v3485_v62 = vsub.f32 1.5, %v3484_v12  ;;  %v3494_v13 = vmul.f32 0.5, %v3493_v21 }
 0x3fa   : > { %v2148_v2 = vadd.f32 %v6254_v43, %v2084_v52  ;;  %v8451_v58 = vadd.f32 1e-05, %v1265_v25 }
 0x3fb   : > { %v3486_v49 = vmul.f32 %v5478_v35, %v3485_v62  ;;  %v3495_v20 = vsub.f32 1.5, %v3494_v13 }
 0x3fc   : > { %vm2211_vm12 = vcmp.ge.f32.partialorder %v2148_v2, 0.0  ;;  %v2274_v45 = vmul.f32 0.01, %v2148_v2  ;;  %5481 = vrsqrt.f32 %v8451_v58  ;;  %vm1811_vm4 = vweird.f32 %v8451_v58 }
 0x3fd   : > { %v3490_v24 = vsel %vm8447_vm10, %v5478_v35, %v3486_v49  ;;  %v3496_v59 = vmul.f32 %v5480_v7, %v3495_v20 }
 0x3fe   : > { %v2337_v32 = vsel %vm2211_vm12, %v2148_v2, %v2274_v45  ;;  %v4003_v35 = vmul.f32 %v3490_v24, %v7776_v37  ;;  %v8485_v45 = vld [vmem:[%s9915_s5] ss:$0 sm:$0xff] }
 0x3ff   : > { %2750 = vadd.xlane.f32.xlu1 %v2749_v55  ;;  %2762 = vadd.xlane.f32.xlu0 %v2761_v3  ;;  %v2377_v46 = vpack.c.bf16 %v2337_v32, %v2336_v31  ;;  %v3500_v38 = vsel %vm3499_vm15, %v5480_v7, %v3496_v59 }
 0x400   : > { %v4004_v60 = vmul.f32 %v3500_v38, %v7790_v1  ;;  %v4067_v41 = vmul.f32 %v7866_v54, %v4003_v35  ;;  %v2591_v35 = vpop.f32.mrf.mxu1 }
 0x401   : > { %5162 = vmatmul.msk.bf16.gmra.mxu1 %vm644_vm1, %v2377_v46 }
 0x402   : > { %v5482_v4 = vpop.eup %5481  ;;  %v4068_v11 = vmul.f32 %v7866_v54, %v4004_v60  ;;  %v4131_v37 = vadd.f32 %v7876_v30, %v4067_v41 }
 0x403   : > { %v1806_v28 = vmul.f32 %v5482_v4, %v8451_v58  ;;  %vm1812_vm0 = vweird.f32 %v5482_v4 }
 0x404   : > { %v4132_v7 = vadd.f32 %v7876_v30, %v4068_v11  ;;  %vm4194_vm2 = vcmp.ge.f32.partialorder %v4131_v37, 0.0  ;;  %v4257_v53 = vmul.f32 0.01, %v4131_v37  ;;  %vm8498_vm5 = vmor %vm1811_vm4, %vm1812_vm0 }
 0x405   : > { %v1807_v15 = vmul.f32 %v5482_v4, %v1806_v28 }
 0x406   : > { %vm4195_vm3 = vcmp.ge.f32.partialorder %v4132_v7, 0.0  ;;  %v4258_v1 = vmul.f32 0.01, %v4132_v7  ;;  %v4320_v6 = vsel %vm4194_vm2, %v4131_v37, %v4257_v53 }
 0x407   : > { %2765 = vadd.xlane.f32.xlu0 %v2764_v48  ;;  %v1808_v62 = vmul.f32 0.5, %v1807_v15 }
 0x408   : > { %v4321_v52 = vsel %vm4195_vm3, %v4132_v7, %v4258_v1 }
 0x409   : > { %v3093_v12 = vpop.xlane.xlu1 %3092  ;;  %v4377_v21 = vpack.c.bf16 %v4321_v52, %v4320_v6  ;;  %v1809_v2 = vsub.f32 1.5, %v1808_v62  ;;  %v8521_v52 = vadd.f32 %v8251_v18, %v6621_v10 }
 0x40a   : > { %v3250_v14 = vmul.f32 %v3093_v12, %v5917_v8  ;;  %v1173_v50 = vpop.xlane.xlu2 %1172 }
 0x40b   : > { %v1266_v17 = vmul.f32 %v1173_v50, %v5917_v8  ;;  %5186 = vmatmul.msk.bf16.gmra.mxu2 %vm644_vm1, %v4377_v21  ;;  %v1810_v24 = vmul.f32 %v5482_v4, %v1809_v2 }
 0x40c   : > { %v8476_v25 = vadd.f32 1e-05, %v3250_v14 }
 0x40d   : > { %v1329_v49 = vadd.f32 1e-05, %v1266_v17  ;;  %v1814_v41 = vsel %vm8498_vm5, %v5482_v4, %v1810_v24  ;;  %v8528_v24 = vpop.f32.mrf.mxu1 }
 0x40e   : > { %5483 = vrsqrt.f32 %v8476_v25  ;;  %v2021_v4 = vmul.f32 %v1814_v41, %v7902_v36  ;;  %vm3517_vm11 = vweird.f32 %v8476_v25 }
 0x40f   : > { %5485 = vrsqrt.f32 %v1329_v49  ;;  %vm1821_vm8 = vweird.f32 %v1329_v49 }
 0x410   : > { %v2085_v17 = vmul.f32 %v6236_v22, %v2021_v4 }
 0x411   : > { %v1218_v61 = vpop.xlane.xlu1 %1217 }
 0x412   : > { %v1281_v13 = vmul.f32 %v1218_v61, %v5917_v8  ;;  %v2730_v33 = vpop.xlane.xlu2 %2729 }
 0x413   : > { %v2877_v20 = vmul.f32 %v2730_v33, %v5917_v8 }
 0x414   : > { %v8488_v55 = vpop.eup %5483  ;;  %v8490_v3 = vadd.f32 1e-05, %v1281_v13 }
 0x415   : > { %v5486_v31 = vpop.eup %5485  ;;  %v3512_v32 = vmul.f32 %v8488_v55, %v8476_v25  ;;  %v8496_v59 = vsub.f32 %v10116_v27, %v2877_v20  ;;  %vm3518_vm9 = vweird.f32 %v8488_v55  ;;  %v2752_v27 = vsel %vm644_vm1, %v8521_v52, 0.0 }
 0x416   : > { %v1816_v38 = vmul.f32 %v5486_v31, %v1329_v49  ;;  %v4528_v60 = vpop.f32.mrf.mxu2  ;;  %5487 = vrsqrt.f32 %v8490_v3  ;;  %vm1822_vm7 = vweird.f32 %v5486_v31  ;;  %vm3519_vm12 = vmor %vm3517_vm11, %vm3518_vm9  ;;  %vm1971_vm14 = vweird.f32 %v8490_v3 }
 0x417   : > { %v3513_v58 = vmul.f32 %v8488_v55, %v3512_v32  ;;  %v4529_v28 = vadd.f32 %v8485_v45, %v4528_v60  ;;  %v3003_v11 = vmul.f32 %v8496_v59, %v8496_v59  ;;  %v3090_v37 = vpop.xlane.xlu0 %3089  ;;  %vm1823_vm10 = vmor %vm1821_vm8, %vm1822_vm7 }
 0x418   : > { %v1817_v48 = vmul.f32 %v5486_v31, %v1816_v38  ;;  %v3249_v7 = vmul.f32 %v3090_v37, %v5917_v8 }
 0x419   : > { %v3514_v15 = vmul.f32 0.5, %v3513_v58  ;;  %4688 = vst.msk [vmem:[%s8510_s21] sm:$0xff] %vm4687_vm6, %v4529_v28  ;;  %v3106_v53 = vsel %vm644_vm1, %v3003_v11, 0.0  ;;  %v8545_v58 = vadd.f32 %v2591_v35, %v6621_v10 }
 0x41a   : > { %v1818_v1 = vmul.f32 0.5, %v1817_v48  ;;  %3107 = vadd.xlane.f32.xlu1 %v3106_v53  ;;  %v8516_v12 = vadd.f32 1e-05, %v3249_v7 }
 0x41b   : > { %v3515_v6 = vsub.f32 1.5, %v3514_v15 }
 0x41c   : > { %v5488_v14 = vpop.eup %5487  ;;  %v1819_v50 = vsub.f32 1.5, %v1818_v1  ;;  %5489 = vrsqrt.f32 %v8516_v12  ;;  %vm3507_vm4 = vweird.f32 %v8516_v12 }
 0x41d   : > { %v1966_v62 = vmul.f32 %v5488_v14, %v8490_v3  ;;  %v3516_v2 = vmul.f32 %v8488_v55, %v3515_v6  ;;  %vm1972_vm13 = vweird.f32 %v5488_v14  ;;  %v8557_v3 = vadd.f32 %v8403_v39, %v6621_v10 }
 0x41e   : > { %v1820_v36 = vmul.f32 %v5486_v31, %v1819_v50  ;;  %v4530_v21 = vpop.f32.mrf.mxu2  ;;  %vm1973_vm15 = vmor %vm1971_vm14, %vm1972_vm13 }
 0x41f   : > { %v1967_v61 = vmul.f32 %v5488_v14, %v1966_v62  ;;  %v4531_v13 = vadd.f32 %v8485_v45, %v4530_v21  ;;  %v2733_v33 = vpop.xlane.xlu0 %2732  ;;  %v3520_v60 = vsel %vm3519_vm12, %v8488_v55, %v3516_v2  ;;  %v2736_v55 = vpop.xlane.xlu1 %2735 }
 0x420   : > { %v1824_v18 = vsel %vm1823_vm10, %v5486_v31, %v1820_v36  ;;  %v2878_v20 = vmul.f32 %v2733_v33, %v5917_v8  ;;  %v2149_v31 = vadd.f32 %v6254_v43, %v2085_v17  ;;  %v4006_v48 = vmul.f32 %v3520_v60, %v8032_v16  ;;  %v2596_v17 = vpop.f32.mrf.mxu1 }
 0x421   : > { %v2022_v32 = vmul.f32 %v1824_v18, %v8037_v47  ;;  %v1968_v49 = vmul.f32 0.5, %v1967_v61  ;;  %4689 = vst.msk [vmem:[%s8510_s21 + $0x8] sm:$0xff] %vm4687_vm6, %v4531_v13  ;;  %v2879_v50 = vmul.f32 %v2736_v55, %v5917_v8  ;;  %v8571_v33 = vadd.f32 %v2596_v17, %v6621_v10  ;;  %v10119_v18 = vld [vmem:[#allocation13_spill] sm:$0xff] }
 0x422   : > { %v5490_v46 = vpop.eup %5489  ;;  %2753 = vadd.xlane.f32.xlu1 %v2752_v27  ;;  %v8538_v38 = vsub.f32 %v7739_v29, %v2878_v20  ;;  %vm2212_vm2 = vcmp.ge.f32.partialorder %v2149_v31, 0.0  ;;  %v2275_v35 = vmul.f32 0.01, %v2149_v31  ;;  %v4070_v61 = vmul.f32 %v7866_v54, %v4006_v48 }
 0x423   : > { %v2086_v25 = vmul.f32 %v6236_v22, %v2022_v32  ;;  %v1969_v47 = vsub.f32 1.5, %v1968_v49  ;;  %v3502_v41 = vmul.f32 %v5490_v46, %v8516_v12  ;;  %vm3508_vm0 = vweird.f32 %v5490_v46 }
 0x424   : > { %v3004_v28 = vmul.f32 %v8538_v38, %v8538_v38  ;;  %v2338_v21 = vsel %vm2212_vm2, %v2149_v31, %v2275_v35  ;;  %vm3509_vm5 = vmor %vm3507_vm4, %vm3508_vm0  ;;  %v8574_v20 = vsub.f32 %v10119_v18, %v2879_v50  ;;  %v2758_v32 = vsel %vm644_vm1, %v8557_v3, 0.0 }
 0x425   : > { %v1970_v11 = vmul.f32 %v5488_v14, %v1969_v47  ;;  %v3503_v29 = vmul.f32 %v5490_v46, %v3502_v41  ;;  %v2150_v37 = vadd.f32 %v6254_v43, %v2086_v25  ;;  %v8582_v25 = vpop.f32.mrf.mxu3 }
 0x426   : > { %v4533_v7 = vpop.f32.mrf.mxu2  ;;  %v3109_v15 = vsel %vm644_vm1, %v3004_v28, 0.0 }
 0x427   : > { %v1974_v53 = vsel %vm1973_vm15, %v5488_v14, %v1970_v11  ;;  %v3504_v4 = vmul.f32 0.5, %v3503_v29  ;;  %v4534_v1 = vadd.f32 %v8485_v45, %v4533_v7  ;;  %3110 = vadd.xlane.f32.xlu2 %v3109_v15  ;;  %vm2213_vm3 = vcmp.ge.f32.partialorder %v2150_v37, 0.0 }
 0x428   : > { %v2037_v16 = vmul.f32 %v1974_v53, %v7979_v34  ;;  %v2276_v6 = vmul.f32 0.01, %v2150_v37  ;;  %v2767_v14 = vsel %vm644_vm1, %v8545_v58, 0.0  ;;  %v3005_v29 = vmul.f32 %v8574_v20, %v8574_v20 }
 0x429   : > { %v3505_v62 = vsub.f32 1.5, %v3504_v4  ;;  %4690 = vst.msk [vmem:[%s8510_s21 + $0x10] sm:$0xff] %vm4687_vm6, %v4534_v1 }
 0x42a   : > { %v2101_v36 = vmul.f32 %v6236_v22, %v2037_v16  ;;  %2768 = vadd.xlane.f32.xlu1 %v2767_v14  ;;  %v2339_v39 = vsel %vm2213_vm3, %v2150_v37, %v2276_v6  ;;  %v3112_v53 = vsel %vm644_vm1, %v3005_v29, 0.0 }
 0x42b   : > { %v3506_v2 = vmul.f32 %v5490_v46, %v3505_v62  ;;  %v2378_v34 = vpack.c.bf16 %v2339_v39, %v2338_v21 }
 0x42c   : > { %v2165_v13 = vadd.f32 %v6254_v43, %v2101_v36  ;;  %v4134_v43 = vadd.f32 %v7876_v30, %v4070_v61  ;;  %v8601_v36 = vpop.f32.mrf.mxu1 }
 0x42d   : > { %v3510_v22 = vsel %vm3509_vm5, %v5490_v46, %v3506_v2  ;;  %5163 = vmatmul.msk.bf16.gmra.mxu1 %vm644_vm1, %v2378_v34  ;;  %v8603_v21 = vpop.f32.mrf.mxu3 }
 0x42e   : > { %v4005_v12 = vmul.f32 %v3510_v22, %v8128_v44  ;;  %v4535_v49 = vpop.f32.mrf.mxu2  ;;  %vm2228_vm7 = vcmp.ge.f32.partialorder %v2165_v13, 0.0  ;;  %v2291_v27 = vmul.f32 0.01, %v2165_v13  ;;  %v2773_v44 = vsel %vm644_vm1, %v8571_v33, 0.0 }
 0x42f   : > { %v4536_v31 = vadd.f32 %v8485_v45, %v4535_v49  ;;  %v3096_v60 = vpop.xlane.xlu2 %3095  ;;  %2759 = vadd.xlane.f32.xlu2 %v2758_v32  ;;  %v4260_v48 = vmul.f32 0.01, %v4134_v43  ;;  %vm4197_vm8 = vcmp.ge.f32.partialorder %v4134_v43, 0.0 }
 0x430   : > { %v3251_v46 = vmul.f32 %v3096_v60, %v5917_v8  ;;  %v2354_v47 = vsel %vm2228_vm7, %v2165_v13, %v2291_v27  ;;  %v4069_v41 = vmul.f32 %v7866_v54, %v4005_v12  ;;  %v8618_v60 = vadd.f32 %v8528_v24, %v6621_v10 }
 0x431   : > { %4691 = vst.msk [vmem:[%s8510_s21 + $0x18] sm:$0xff] %vm4687_vm6, %v4536_v31  ;;  %v2386_v28 = vpack.c.bf16 %v2354_v47, %v2354_v47  ;;  %v3099_v55 = vpop.xlane.xlu0 %3098  ;;  %v4323_v1 = vsel %vm4197_vm8, %v4134_v43, %v4260_v48 }
 0x432   : > { %v3314_v11 = vadd.f32 1e-05, %v3251_v46  ;;  %2774 = vadd.xlane.f32.xlu1 %v2773_v44  ;;  %v4133_v37 = vadd.f32 %v7876_v30, %v4069_v41  ;;  %v3252_v15 = vmul.f32 %v3099_v55, %v5917_v8  ;;  %v2770_v55 = vsel %vm644_vm1, %v8618_v60, 0.0 }
 0x433   : > { %5171 = vmatmul.msk.bf16.gmra.mxu3 %vm644_vm1, %v2386_v28 }
 0x434   : > { %5491 = vrsqrt.f32 %v3314_v11  ;;  %vm4196_vm9 = vcmp.ge.f32.partialorder %v4133_v37, 0.0  ;;  %v4259_v7 = vmul.f32 0.01, %v4133_v37  ;;  %v3315_v6 = vadd.f32 1e-05, %v3252_v15  ;;  %v2601_v29 = vpop.f32.mrf.mxu1 }
 0x435   : > { %vm3527_vm11 = vweird.f32 %v3314_v11 }
 0x436   : > { %v4538_v35 = vpop.f32.mrf.mxu2  ;;  %v4322_v4 = vsel %vm4196_vm9, %v4133_v37, %v4259_v7  ;;  %5493 = vrsqrt.f32 %v3315_v6  ;;  %v8626_v37 = vpop.f32.mrf.mxu3  ;;  %vm3537_vm14 = vweird.f32 %v3315_v6 }
 0x437   : > { %v4539_v16 = vadd.f32 %v8485_v45, %v4538_v35  ;;  %v2739_v50 = vpop.xlane.xlu2 %2738  ;;  %3113 = vadd.xlane.f32.xlu2 %v3112_v53  ;;  %v4378_v62 = vpack.c.bf16 %v4323_v1, %v4322_v4  ;;  %v8635_v53 = vadd.f32 %v2601_v29, %v6621_v10 }
 0x438   : > { %v2880_v14 = vmul.f32 %v2739_v50, %v5917_v8 }
 0x439   : > { %4692 = vst.msk [vmem:[%s8510_s21 + $0x20] sm:$0xff] %vm4687_vm6, %v4539_v16  ;;  %5187 = vmatmul.msk.bf16.gmra.mxu2 %vm644_vm1, %v4378_v62  ;;  %v2745_v34 = vpop.xlane.xlu0 %2744  ;;  %v2779_v62 = vsel %vm644_vm1, %v8635_v53, 0.0 }
 0x43a   : > { %v5492_v17 = vpop.eup %5491  ;;  %v8606_v39 = vsub.f32 %v8237_v56, %v2880_v14  ;;  %v2882_v18 = vmul.f32 %v2745_v34, %v5917_v8 }
 0x43b   : > { %v3522_v2 = vmul.f32 %v5492_v17, %v3314_v11  ;;  %vm3528_vm10 = vweird.f32 %v5492_v17 }
 0x43c   : > { %v3006_v61 = vmul.f32 %v8606_v39, %v8606_v39  ;;  %v5494_v12 = vpop.eup %5493  ;;  %v8614_v43 = vsub.f32 %v8271_v51, %v2882_v18  ;;  %vm3529_vm12 = vmor %vm3527_vm11, %vm3528_vm10 }
 0x43d   : > { %v3523_v13 = vmul.f32 %v5492_v17, %v3522_v2  ;;  %v3532_v31 = vmul.f32 %v5494_v12, %v3315_v6  ;;  %vm3538_vm13 = vweird.f32 %v5494_v12 }
 0x43e   : > { %v4540_v22 = vpop.f32.mrf.mxu2  ;;  %v3115_v32 = vsel %vm644_vm1, %v3006_v61, 0.0  ;;  %v3008_v47 = vmul.f32 %v8614_v43, %v8614_v43  ;;  %vm3539_vm15 = vmor %vm3537_vm14, %vm3538_vm13 }
 0x43f   : > { %v3524_v49 = vmul.f32 0.5, %v3523_v13  ;;  %v4541_v27 = vadd.f32 %v8485_v45, %v4540_v22  ;;  %3116 = vadd.xlane.f32.xlu0 %v3115_v32  ;;  %v2742_v56 = vpop.xlane.xlu2 %2741  ;;  %v3533_v41 = vmul.f32 %v5494_v12, %v3532_v31  ;;  %v8657_v22 = vadd.f32 %v8601_v36, %v6621_v10 }
 0x440   : > { %v2881_v44 = vmul.f32 %v2742_v56, %v5917_v8  ;;  %v3121_v51 = vsel %vm644_vm1, %v3008_v47, 0.0  ;;  %v2604_v56 = vpop.f32.mrf.mxu1 }
 0x441   : > { %v3525_v46 = vsub.f32 1.5, %v3524_v49  ;;  %4693 = vst.msk [vmem:[%s8510_s21 + $0x28] sm:$0xff] %vm4687_vm6, %v4541_v27  ;;  %v3534_v24 = vmul.f32 0.5, %v3533_v41  ;;  %3122 = vadd.xlane.f32.xlu1 %v3121_v51  ;;  %v2776_v27 = vsel %vm644_vm1, %v8657_v22, 0.0 }
 0x442   : > { %v8632_v11 = vsub.f32 %v8267_v40, %v2881_v44  ;;  %v8672_v44 = vadd.f32 %v8603_v21, %v6621_v10 }
 0x443   : > { %v3526_v28 = vmul.f32 %v5492_v17, %v3525_v46  ;;  %v3535_v15 = vsub.f32 1.5, %v3534_v24  ;;  %v8665_v46 = vadd.f32 %v2604_v56, %v6621_v10 }
 0x444   : > { %v3007_v50 = vmul.f32 %v8632_v11, %v8632_v11 }
 0x445   : > { %v3530_v48 = vsel %vm3529_vm12, %v5492_v17, %v3526_v28  ;;  %v3536_v1 = vmul.f32 %v5494_v12, %v3535_v15  ;;  %v8648_v17 = vpop.f32.mrf.mxu3  ;;  %v2782_v36 = vsel %vm644_vm1, %v8665_v46, 0.0 }
 0x446   : > { %v4007_v7 = vmul.f32 %v3530_v48, %v8209_v9  ;;  %v4543_v35 = vpop.f32.mrf.mxu2  ;;  %v3118_v34 = vsel %vm644_vm1, %v3007_v50, 0.0  ;;  %v2815_v48 = vsel %vm644_vm1, %v8672_v44, 0.0 }
 0x447   : > { %v4544_v4 = vadd.f32 %v8485_v45, %v4543_v35  ;;  %2771 = vadd.xlane.f32.xlu0 %v2770_v55  ;;  %v3540_v9 = vsel %vm3539_vm15, %v5494_v12, %v3536_v1 }
 0x448   : > { %v4071_v16 = vmul.f32 %v7866_v54, %v4007_v7  ;;  %v4008_v40 = vmul.f32 %v3540_v9, %v8222_v5 }
 0x449   : > { %4694 = vst.msk [vmem:[%s8510_s21 + $0x30] sm:$0xff] %vm4687_vm6, %v4544_v4  ;;  %2780 = vadd.xlane.f32.xlu1 %v2779_v62 }
 0x44a   : > { %v4135_v14 = vadd.f32 %v7876_v30, %v4071_v16  ;;  %v4072_v6 = vmul.f32 %v7866_v54, %v4008_v40 }
 0x44c   : > { %v4136_v13 = vadd.f32 %v7876_v30, %v4072_v6  ;;  %v4261_v18 = vmul.f32 0.01, %v4135_v14  ;;  %vm4198_vm2 = vcmp.ge.f32.partialorder %v4135_v14, 0.0 }
 0x44d   : > { %v8662_v31 = vpop.f32.mrf.mxu3 }
 0x44e   : > { %v4545_v2 = vpop.f32.mrf.mxu2  ;;  %vm4199_vm3 = vcmp.ge.f32.partialorder %v4136_v13, 0.0  ;;  %v4262_v5 = vmul.f32 0.01, %v4136_v13  ;;  %v4324_v32 = vsel %vm4198_vm2, %v4135_v14, %v4261_v18  ;;  %v2606_v14 = vpop.f32.mrf.mxu1 }
 0x44f   : > { %v4546_v61 = vadd.f32 %v8485_v45, %v4545_v2  ;;  %3119 = vadd.xlane.f32.xlu0 %v3118_v34  ;;  %v2757_v34 = vpop.xlane.xlu2 %2756 }
 0x450   : > { %v4325_v12 = vsel %vm4199_vm3, %v4136_v13, %v4262_v5 }
 0x451   : > { %4695 = vst.msk [vmem:[%s8510_s21 + $0x38] sm:$0xff] %vm4687_vm6, %v4546_v61  ;;  %v4379_v49 = vpack.c.bf16 %v4325_v12, %v4324_v32  ;;  %v8699_v12 = vadd.f32 %v2606_v14, %v6621_v10 }
 0x453   : > { %5188 = vmatmul.msk.bf16.gmra.mxu2 %vm644_vm1, %v4379_v49  ;;  %v2886_v49 = vmul.f32 %v2757_v34, %v5917_v8 }
 0x455   : > { %v8674_v28 = vpop.f32.mrf.mxu3 }
 0x457   : > { %2777 = vadd.xlane.f32.xlu0 %v2776_v27 }
 0x45d   : > { %v8686_v1 = vpop.f32.mrf.mxu3 }
 0x45e   : > { %v4548_v47 = vpop.f32.mrf.mxu2 }
 0x45f   : > { %2783 = vadd.xlane.f32.xlu0 %v2782_v36  ;;  %v4549_v41 = vadd.f32 %v8485_v45, %v4548_v47 }
 0x461   : > { %4696 = vst.msk [vmem:[%s8510_s21 + $0x40] sm:$0xff] %vm4687_vm6, %v4549_v41 }
 0x462   : > { %v3102_v51 = vpop.xlane.xlu0 %3101 }
 0x463   : > { %v3253_v29 = vmul.f32 %v3102_v51, %v5917_v8 }
 0x465   : > { %v3316_v24 = vadd.f32 1e-05, %v3253_v29  ;;  %v8705_v47 = vpop.f32.mrf.mxu3  ;;  %v8710_v29 = vsub.f32 %v8316_v0, %v2886_v49 }
 0x466   : > { %v4550_v55 = vpop.f32.mrf.mxu2 }
 0x467   : > { %5495 = vrsqrt.f32 %v3316_v24  ;;  %2816 = vadd.xlane.f32.xlu0 %v2815_v48  ;;  %v4551_v7 = vadd.f32 %v8485_v45, %v4550_v55  ;;  %vm3547_vm4 = vweird.f32 %v3316_v24 }
 0x469   : > { %4697 = vst.msk [vmem:[%s8510_s21 + $0x48] sm:$0xff] %vm4687_vm6, %v4551_v7  ;;  %v2785_v7 = vsel %vm644_vm1, %v8699_v12, 0.0 }
 0x46a   : > { %v3105_v15 = vpop.xlane.xlu1 %3104  ;;  %v2748_v35 = vpop.xlane.xlu0 %2747 }
 0x46b   : > { %v3254_v21 = vmul.f32 %v3105_v15, %v5917_v8  ;;  %v2883_v4 = vmul.f32 %v2748_v35, %v5917_v8 }
 0x46d   : > { %v3317_v16 = vadd.f32 1e-05, %v3254_v21  ;;  %v5496_v9 = vpop.eup %5495  ;;  %v8689_v50 = vsub.f32 %v8423_v23, %v2883_v4 }
 0x46e   : > { %v3542_v40 = vmul.f32 %v5496_v9, %v3316_v24  ;;  %v4553_v2 = vpop.f32.mrf.mxu2  ;;  %vm3548_vm0 = vweird.f32 %v5496_v9 }
 0x46f   : > { %5497 = vrsqrt.f32 %v3317_v16  ;;  %v3009_v62 = vmul.f32 %v8689_v50, %v8689_v50  ;;  %v4554_v61 = vadd.f32 %v8485_v45, %v4553_v2  ;;  %vm3549_vm7 = vmor %vm3547_vm4, %vm3548_vm0  ;;  %vm3557_vm8 = vweird.f32 %v3317_v16  ;;  %v8721_v2 = vpop.f32.mrf.mxu3 }
 0x470   : > { %v3543_v6 = vmul.f32 %v5496_v9, %v3542_v40  ;;  %v3012_v40 = vmul.f32 %v8710_v29, %v8710_v29 }
 0x471   : > { %v3124_v18 = vsel %vm644_vm1, %v3009_v62, 0.0  ;;  %4698 = vst.msk [vmem:[%s8510_s21 + $0x50] sm:$0xff] %vm4687_vm6, %v4554_v61 }
 0x472   : > { %v2751_v13 = vpop.xlane.xlu1 %2750  ;;  %v3544_v5 = vmul.f32 0.5, %v3543_v6  ;;  %3125 = vadd.xlane.f32.xlu1 %v3124_v18  ;;  %v2763_v21 = vpop.xlane.xlu0 %2762 }
 0x473   : > { %v2884_v32 = vmul.f32 %v2751_v13, %v5917_v8  ;;  %v2888_v0 = vmul.f32 %v2763_v21, %v5917_v8  ;;  %v3133_v13 = vsel %vm644_vm1, %v3012_v40, 0.0 }
 0x474   : > { %v3545_v56 = vsub.f32 1.5, %v3544_v5 }
 0x475   : > { %v5498_v23 = vpop.eup %5497  ;;  %v8703_v27 = vsub.f32 %v8439_v26, %v2884_v32  ;;  %v8726_v61 = vsub.f32 %v8442_v42, %v2888_v0 }
 0x476   : > { %v3552_v36 = vmul.f32 %v5498_v23, %v3317_v16  ;;  %v4555_v48 = vpop.f32.mrf.mxu2  ;;  %v3546_v26 = vmul.f32 %v5496_v9, %v3545_v56  ;;  %vm3558_vm5 = vweird.f32 %v5498_v23 }
 0x477   : > { %v3010_v41 = vmul.f32 %v8703_v27, %v8703_v27  ;;  %v4556_v35 = vadd.f32 %v8485_v45, %v4555_v48  ;;  %vm3559_vm9 = vmor %vm3557_vm8, %vm3558_vm5  ;;  %v3014_v18 = vmul.f32 %v8726_v61, %v8726_v61 }
 0x478   : > { %v3553_v51 = vmul.f32 %v5498_v23, %v3552_v36  ;;  %v3550_v62 = vsel %vm3549_vm7, %v5496_v9, %v3546_v26 }
 0x479   : > { %v3127_v55 = vsel %vm644_vm1, %v3010_v41, 0.0  ;;  %4699 = vst.msk [vmem:[%s8510_s21 + $0x58] sm:$0xff] %vm4687_vm6, %v4556_v35  ;;  %v4009_v34 = vmul.f32 %v3550_v62, %v8400_v19  ;;  %v3139_v19 = vsel %vm644_vm1, %v3014_v18, 0.0 }
 0x47a   : > { %v3554_v15 = vmul.f32 0.5, %v3553_v51  ;;  %3128 = vadd.xlane.f32.xlu2 %v3127_v55  ;;  %2786 = vadd.xlane.f32.xlu1 %v2785_v7 }
 0x47b   : > { %v4073_v9 = vmul.f32 %v7866_v54, %v4009_v34 }
 0x47c   : > { %v3555_v4 = vsub.f32 1.5, %v3554_v15 }
 0x47d   : > { %v4137_v5 = vadd.f32 %v7876_v30, %v4073_v9 }
 0x47e   : > { %v3556_v14 = vmul.f32 %v5498_v23, %v3555_v4 }
 0x47f   : > { %vm4200_vm10 = vcmp.ge.f32.partialorder %v4137_v5, 0.0 }
 0x480   : > { %v3560_v6 = vsel %vm3559_vm9, %v5498_v23, %v3556_v14  ;;  %v8736_v23 = vpop.f32.mrf.mxu3 }
 0x481   : > { %v4010_v24 = vmul.f32 %v3560_v6, %v8418_v57  ;;  %v4263_v57 = vmul.f32 0.01, %v4137_v5 }
 0x482   : > { %3134 = vadd.xlane.f32.xlu2 %v3133_v13 }
 0x483   : > { %v4074_v16 = vmul.f32 %v7866_v54, %v4010_v24  ;;  %v4326_v49 = vsel %vm4200_vm10, %v4137_v5, %v4263_v57  ;;  %v2766_v57 = vpop.xlane.xlu0 %2765 }
 0x485   : > { %v4138_v32 = vadd.f32 %v7876_v30, %v4074_v16 }
 0x487   : > { %vm4201_vm11 = vcmp.ge.f32.partialorder %v4138_v32, 0.0  ;;  %v4264_v42 = vmul.f32 0.01, %v4138_v32 }
 0x488   : > { %v8741_v26 = vpop.f32.mrf.mxu3 }
 0x489   : > { %v4327_v56 = vsel %vm4201_vm11, %v4138_v32, %v4264_v42 }
 0x48a   : > { %3140 = vadd.xlane.f32.xlu2 %v3139_v19  ;;  %v4380_v36 = vpack.c.bf16 %v4327_v56, %v4326_v49 }
 0x48c   : > { %5189 = vmatmul.msk.bf16.gmra.mxu2 %vm644_vm1, %v4380_v36 }
 0x48d   : > { %v3108_v41 = vpop.xlane.xlu1 %3107 }
 0x48e   : > { %v3255_v51 = vmul.f32 %v3108_v41, %v5917_v8  ;;  %v4558_v55 = vpop.f32.mrf.mxu2 }
 0x48f   : > { %v4559_v7 = vadd.f32 %v8485_v45, %v4558_v55  ;;  %v2889_v55 = vmul.f32 %v2766_v57, %v5917_v8 }
 0x490   : > { %v3318_v48 = vadd.f32 1e-05, %v3255_v51  ;;  %v8755_v13 = vpop.f32.mrf.mxu3 }
 0x491   : > { %4700 = vst.msk [vmem:[%s8510_s21 + $0x60] sm:$0xff] %vm4687_vm6, %v4559_v7 }
 0x492   : > { %5499 = vrsqrt.f32 %v3318_v48  ;;  %vm3567_vm13 = vweird.f32 %v3318_v48 }
 0x495   : > { %v2754_v15 = vpop.xlane.xlu1 %2753 }
 0x496   : > { %v2885_v21 = vmul.f32 %v2754_v15, %v5917_v8  ;;  %v4560_v0 = vpop.f32.mrf.mxu2 }
 0x497   : > { %v4561_v62 = vadd.f32 %v8485_v45, %v4560_v0  ;;  %v8776_v0 = vadd.f32 %v8582_v25, %v6621_v10 }
 0x498   : > { %v5500_v35 = vpop.eup %5499  ;;  %v8747_v4 = vsub.f32 %v8521_v52, %v2885_v21  ;;  %v8765_v36 = vpop.f32.mrf.mxu3 }
 0x499   : > { %v3562_v40 = vmul.f32 %v5500_v35, %v3318_v48  ;;  %4701 = vst.msk [vmem:[%s8510_s21 + $0x68] sm:$0xff] %vm4687_vm6, %v4561_v62  ;;  %vm3568_vm12 = vweird.f32 %v5500_v35  ;;  %v8779_v62 = vsub.f32 %v8464_v63, %v2889_v55  ;;  %v2812_v25 = vsel %vm644_vm1, %v8776_v0, 0.0 }
 0x49a   : > { %v3111_v14 = vpop.xlane.xlu2 %3110  ;;  %v3011_v6 = vmul.f32 %v8747_v4, %v8747_v4  ;;  %vm3569_vm14 = vmor %vm3567_vm13, %vm3568_vm12 }
 0x49b   : > { %v3563_v34 = vmul.f32 %v5500_v35, %v3562_v40  ;;  %v3256_v24 = vmul.f32 %v3111_v14, %v5917_v8 }
 0x49c   : > { %v3130_v18 = vsel %vm644_vm1, %v3011_v6, 0.0 }
 0x49d   : > { %v3564_v9 = vmul.f32 0.5, %v3563_v34  ;;  %v2769_v52 = vpop.xlane.xlu1 %2768  ;;  %v3319_v16 = vadd.f32 1e-05, %v3256_v24  ;;  %3131 = vadd.xlane.f32.xlu1 %v3130_v18 }
 0x49e   : > { %v2890_v5 = vmul.f32 %v2769_v52, %v5917_v8  ;;  %v2609_v52 = vpop.f32.mrf.mxu1 }
 0x49f   : > { %5501 = vrsqrt.f32 %v3319_v16  ;;  %v3565_v19 = vsub.f32 1.5, %v3564_v9  ;;  %vm3577_vm2 = vweird.f32 %v3319_v16 }
 0x4a0   : > { %v8760_v32 = vsub.f32 %v8545_v58, %v2890_v5 }
 0x4a1   : > { %v3566_v7 = vmul.f32 %v5500_v35, %v3565_v19  ;;  %v8789_v19 = vpop.f32.mrf.mxu3 }
 0x4a2   : > { %v2760_v42 = vpop.xlane.xlu2 %2759  ;;  %v3016_v49 = vmul.f32 %v8760_v32, %v8760_v32 }
 0x4a3   : > { %v2887_v56 = vmul.f32 %v2760_v42, %v5917_v8  ;;  %v3570_v14 = vsel %vm3569_vm14, %v5500_v35, %v3566_v7  ;;  %v3015_v35 = vmul.f32 %v8779_v62, %v8779_v62 }
 0x4a4   : > { %v3145_v41 = vsel %vm644_vm1, %v3016_v49, 0.0  ;;  %v4011_v18 = vmul.f32 %v3570_v14, %v8496_v59  ;;  %v8792_v59 = vadd.f32 %v2609_v52, %v6621_v10 }
 0x4a5   : > { %v5502_v51 = vpop.eup %5501  ;;  %v8770_v58 = vsub.f32 %v8557_v3, %v2887_v56  ;;  %3146 = vadd.xlane.f32.xlu2 %v3145_v41  ;;  %v2775_v34 = vpop.xlane.xlu1 %2774  ;;  %v3142_v55 = vsel %vm644_vm1, %v3015_v35, 0.0 }
 0x4a6   : > { %v3572_v15 = vmul.f32 %v5502_v51, %v3319_v16  ;;  %vm3578_vm15 = vweird.f32 %v5502_v51  ;;  %v2892_v63 = vmul.f32 %v2775_v34, %v5917_v8  ;;  %v4075_v49 = vmul.f32 %v7866_v54, %v4011_v18 }
 0x4a7   : > { %v3013_v21 = vmul.f32 %v8770_v58, %v8770_v58  ;;  %vm3579_vm3 = vmor %vm3577_vm2, %vm3578_vm15 }
 0x4a8   : > { %v3573_v40 = vmul.f32 %v5502_v51, %v3572_v15  ;;  %v8797_v41 = vsub.f32 %v8571_v33, %v2892_v63  ;;  %v4139_v15 = vadd.f32 %v7876_v30, %v4075_v49 }
 0x4a9   : > { %v3136_v6 = vsel %vm644_vm1, %v3013_v21, 0.0 }
 0x4aa   : > { %v3574_v3 = vmul.f32 0.5, %v3573_v40  ;;  %v3114_v24 = vpop.xlane.xlu2 %3113  ;;  %3137 = vadd.xlane.f32.xlu1 %v3136_v6  ;;  %v4265_v34 = vmul.f32 0.01, %v4139_v15  ;;  %vm4202_vm0 = vcmp.ge.f32.partialorder %v4139_v15, 0.0 }
 0x4ab   : > { %v3257_v48 = vmul.f32 %v3114_v24, %v5917_v8 }
 0x4ac   : > { %v3575_v9 = vsub.f32 1.5, %v3574_v3 }
 0x4ad   : > { %v3320_v5 = vadd.f32 1e-05, %v3257_v48  ;;  %2813 = vadd.xlane.f32.xlu2 %v2812_v25  ;;  %v8815_v48 = vadd.f32 %v8626_v37, %v6621_v10 }
 0x4ae   : > { %v3576_v57 = vmul.f32 %v5502_v51, %v3575_v9 }
 0x4af   : > { %5503 = vrsqrt.f32 %v3320_v5  ;;  %v2818_v37 = vsel %vm644_vm1, %v8815_v48, 0.0  ;;  %vm3587_vm7 = vweird.f32 %v3320_v5 }
 0x4b0   : > { %v3580_v42 = vsel %vm3579_vm3, %v5502_v51, %v3576_v57  ;;  %v2788_v51 = vsel %vm644_vm1, %v8792_v59, 0.0 }
 0x4b1   : > { %v4012_v56 = vmul.f32 %v3580_v42, %v8538_v38  ;;  %v3018_v38 = vmul.f32 %v8797_v41, %v8797_v41  ;;  %v4328_v42 = vsel %vm4202_vm0, %v4139_v15, %v4265_v34 }
 0x4b2   : > { %3143 = vadd.xlane.f32.xlu1 %v3142_v55  ;;  %v3117_v7 = vpop.xlane.xlu0 %3116 }
 0x4b3   : > { %v3258_v16 = vmul.f32 %v3117_v7, %v5917_v8  ;;  %v4076_v21 = vmul.f32 %v7866_v54, %v4012_v56  ;;  %v3151_v52 = vsel %vm644_vm1, %v3018_v38, 0.0 }
 0x4b4   : > { %v3123_v24 = vpop.xlane.xlu1 %3122 }
 0x4b5   : > { %v5504_v40 = vpop.eup %5503  ;;  %2789 = vadd.xlane.f32.xlu2 %v2788_v51  ;;  %v8805_v14 = vadd.f32 1e-05, %v3258_v16  ;;  %v4140_v33 = vadd.f32 %v7876_v30, %v4076_v21  ;;  %v3260_v9 = vmul.f32 %v3123_v24, %v5917_v8  ;;  %v8827_v51 = vadd.f32 %v8686_v1, %v6621_v10 }
 0x4b6   : > { %v3582_v6 = vmul.f32 %v5504_v40, %v3320_v5  ;;  %v8810_v3 = vpop.f32.mrf.mxu3  ;;  %vm3588_vm5 = vweird.f32 %v5504_v40  ;;  %v8841_v24 = vadd.f32 %v8662_v31, %v6621_v10 }
 0x4b7   : > { %5505 = vrsqrt.f32 %v8805_v14  ;;  %vm4203_vm4 = vcmp.ge.f32.partialorder %v4140_v33, 0.0  ;;  %v4266_v25 = vmul.f32 0.01, %v4140_v33  ;;  %v8819_v35 = vadd.f32 1e-05, %v3260_v9  ;;  %vm3589_vm8 = vmor %vm3587_vm7, %vm3588_vm5 }
 0x4b8   : > { %v3583_v18 = vmul.f32 %v5504_v40, %v3582_v6  ;;  %v2830_v5 = vsel %vm644_vm1, %v8827_v51, 0.0  ;;  %vm3597_vm10 = vweird.f32 %v8805_v14 }
 0x4b9   : > { %v4329_v49 = vsel %vm4203_vm4, %v4140_v33, %v4266_v25  ;;  %5507 = vrsqrt.f32 %v8819_v35  ;;  %vm3617_vm13 = vweird.f32 %v8819_v35 }
 0x4ba   : > { %v3584_v63 = vmul.f32 0.5, %v3583_v18  ;;  %3152 = vadd.xlane.f32.xlu1 %v3151_v52  ;;  %v2772_v57 = vpop.xlane.xlu0 %2771  ;;  %v4381_v55 = vpack.c.bf16 %v4329_v49, %v4328_v42  ;;  %v8849_v49 = vadd.f32 %v8648_v17, %v6621_v10 }
 0x4bb   : > { %v2891_v56 = vmul.f32 %v2772_v57, %v5917_v8 }
 0x4bc   : > { %v3585_v7 = vsub.f32 1.5, %v3584_v63  ;;  %v4563_v16 = vpop.f32.mrf.mxu2  ;;  %5190 = vmatmul.msk.bf16.gmra.mxu2 %vm644_vm1, %v4381_v55  ;;  %v2611_v63 = vpop.f32.mrf.mxu1  ;;  %v2824_v55 = vsel %vm644_vm1, %v8841_v24, 0.0 }
 0x4bd   : > { %v5506_v21 = vpop.eup %5505  ;;  %2819 = vadd.xlane.f32.xlu2 %v2818_v37  ;;  %v8830_v15 = vsub.f32 %v8618_v60, %v2891_v56  ;;  %v4564_v38 = vadd.f32 %v8485_v45, %v4563_v16 }
 0x4be   : > { %v3586_v33 = vmul.f32 %v5504_v40, %v3585_v7  ;;  %v3592_v6 = vmul.f32 %v5506_v21, %v8805_v14  ;;  %v2666_v34 = vpop.f32.mrf.mxu3  ;;  %vm3598_vm9 = vweird.f32 %v5506_v21 }
 0x4bf   : > { %4702 = vst.msk [vmem:[%s8510_s21 + $0x70] sm:$0xff] %vm4687_vm6, %v4564_v38  ;;  %v3017_v1 = vmul.f32 %v8830_v15, %v8830_v15  ;;  %v5508_v52 = vpop.eup %5507  ;;  %vm3599_vm11 = vmor %vm3597_vm10, %vm3598_vm9 }
 0x4c0   : > { %v3590_v60 = vsel %vm3589_vm8, %v5504_v40, %v3586_v33  ;;  %v3593_v18 = vmul.f32 %v5506_v21, %v3592_v6  ;;  %v3612_v31 = vmul.f32 %v5508_v52, %v8819_v35  ;;  %vm3618_vm12 = vweird.f32 %v5508_v52 }
 0x4c1   : > { %v4013_v9 = vmul.f32 %v3590_v60, %v8574_v20  ;;  %v3148_v25 = vsel %vm644_vm1, %v3017_v1, 0.0  ;;  %v8855_v20 = vadd.f32 %v8736_v23, %v6621_v10  ;;  %v8866_v23 = vadd.f32 %v8705_v47, %v6621_v10  ;;  %vm3619_vm14 = vmor %vm3617_vm13, %vm3618_vm12 }
 0x4c2   : > { %v3594_v57 = vmul.f32 0.5, %v3593_v18  ;;  %2831 = vadd.xlane.f32.xlu1 %v2830_v5  ;;  %3149 = vadd.xlane.f32.xlu0 %v3148_v25  ;;  %v3120_v42 = vpop.xlane.xlu0 %3119  ;;  %v3613_v37 = vmul.f32 %v5508_v52, %v3612_v31  ;;  %v2821_v1 = vsel %vm644_vm1, %v8849_v49, 0.0  ;;  %v8878_v25 = vadd.f32 %v2611_v63, %v6621_v10 }
 0x4c3   : > { %v3259_v40 = vmul.f32 %v3120_v42, %v5917_v8  ;;  %v4077_v38 = vmul.f32 %v7866_v54, %v4013_v9  ;;  %v2839_v18 = vsel %vm644_vm1, %v8855_v20, 0.0 }
 0x4c4   : > { %v3595_v56 = vsub.f32 1.5, %v3594_v57  ;;  %v4565_v7 = vpop.f32.mrf.mxu2  ;;  %v3614_v6 = vmul.f32 0.5, %v3613_v37  ;;  %v2614_v9 = vpop.f32.mrf.mxu1  ;;  %v2791_v35 = vsel %vm644_vm1, %v8878_v25, 0.0 }
 0x4c5   : > { %2825 = vadd.xlane.f32.xlu2 %v2824_v55  ;;  %v3322_v16 = vadd.f32 1e-05, %v3259_v40  ;;  %v4566_v17 = vadd.f32 %v8485_v45, %v4565_v7  ;;  %v4141_v14 = vadd.f32 %v7876_v30, %v4077_v38  ;;  %v8884_v42 = vadd.f32 %v2614_v9, %v6621_v10 }
 0x4c6   : > { %v3596_v33 = vmul.f32 %v5506_v21, %v3595_v56  ;;  %v3615_v60 = vsub.f32 1.5, %v3614_v6 }
 0x4c7   : > { %5509 = vrsqrt.f32 %v3322_v16  ;;  %4703 = vst.msk [vmem:[%s8510_s21 + $0x78] sm:$0xff] %vm4687_vm6, %v4566_v17  ;;  %v4267_v40 = vmul.f32 0.01, %v4141_v14  ;;  %vm4204_vm15 = vcmp.ge.f32.partialorder %v4141_v14, 0.0  ;;  %v2794_v17 = vsel %vm644_vm1, %v8884_v42, 0.0 }
 0x4c8   : > { %v3600_v34 = vsel %vm3599_vm11, %v5506_v21, %v3596_v33  ;;  %v3616_v47 = vmul.f32 %v5508_v52, %v3615_v60  ;;  %vm3607_vm0 = vweird.f32 %v3322_v16 }
 0x4c9   : > { %v4014_v45 = vmul.f32 %v3600_v34, %v8606_v39  ;;  %v2833_v39 = vsel %vm644_vm1, %v8866_v23, 0.0  ;;  %v4330_v38 = vsel %vm4204_vm15, %v4141_v14, %v4267_v40 }
 0x4ca   : > { %2840 = vadd.xlane.f32.xlu1 %v2839_v18  ;;  %2822 = vadd.xlane.f32.xlu0 %v2821_v1  ;;  %v8874_v5 = vpop.xlane.xlu0 %2777  ;;  %v3620_v56 = vsel %vm3619_vm14, %v5508_v52, %v3616_v47 }
 0x4cb   : > { %v4078_v21 = vmul.f32 %v7866_v54, %v4014_v45  ;;  %v4016_v37 = vmul.f32 %v3620_v56, %v8614_v43  ;;  %v8897_v45 = vadd.f32 %v8674_v28, %v6621_v10  ;;  %v8907_v28 = vld [vmem:[%s9915_s5] ss:$0 sm:$0xff] }
 0x4cd   : > { %v5510_v57 = vpop.eup %5509  ;;  %2834 = vadd.xlane.f32.xlu2 %v2833_v39  ;;  %v4142_v31 = vadd.f32 %v7876_v30, %v4078_v21  ;;  %v4080_v43 = vmul.f32 %v7866_v54, %v4016_v37  ;;  %v2827_v47 = vsel %vm644_vm1, %v8897_v45, 0.0 }
 0x4ce   : > { %v3602_v55 = vmul.f32 %v5510_v57, %v3322_v16  ;;  %vm3608_vm3 = vweird.f32 %v5510_v57 }
 0x4cf   : > { %vm4205_vm2 = vcmp.ge.f32.partialorder %v4142_v31, 0.0  ;;  %v4268_v63 = vmul.f32 0.01, %v4142_v31  ;;  %vm3609_vm4 = vmor %vm3607_vm0, %vm3608_vm3  ;;  %v4144_v21 = vadd.f32 %v7876_v30, %v4080_v43 }
 0x4d0   : > { %v3603_v7 = vmul.f32 %v5510_v57, %v3602_v55 }
 0x4d1   : > { %v4331_v33 = vsel %vm4205_vm2, %v4142_v31, %v4268_v63  ;;  %v4270_v55 = vmul.f32 0.01, %v4144_v21  ;;  %vm4207_vm5 = vcmp.ge.f32.partialorder %v4144_v21, 0.0 }
 0x4d2   : > { %v3604_v6 = vmul.f32 0.5, %v3603_v7  ;;  %2795 = vadd.xlane.f32.xlu1 %v2794_v17  ;;  %2792 = vadd.xlane.f32.xlu0 %v2791_v35  ;;  %v8892_v34 = vpop.xlane.xlu0 %2783  ;;  %v4382_v52 = vpack.c.bf16 %v4331_v33, %v4330_v38 }
 0x4d3   : > { %v4333_v38 = vsel %vm4207_vm5, %v4144_v21, %v4270_v55 }
 0x4d4   : > { %v3605_v1 = vsub.f32 1.5, %v3604_v6  ;;  %5191 = vmatmul.msk.bf16.gmra.mxu2 %vm644_vm1, %v4382_v52 }
 0x4d6   : > { %v3606_v60 = vmul.f32 %v5510_v57, %v3605_v1  ;;  %v4568_v9 = vpop.f32.mrf.mxu2 }
 0x4d7   : > { %v4569_v39 = vadd.f32 %v8907_v28, %v4568_v9 }
 0x4d8   : > { %v3610_v18 = vsel %vm3609_vm4, %v5510_v57, %v3606_v60 }
 0x4d9   : > { %v4015_v14 = vmul.f32 %v3610_v18, %v8632_v11  ;;  %4704 = vst.msk [vmem:[%s8510_s21 + $0x80] sm:$0xff] %vm4687_vm6, %v4569_v39  ;;  %v2781_v11 = vpop.xlane.xlu1 %2780 }
 0x4da   : > { %2828 = vadd.xlane.f32.xlu0 %v2827_v47  ;;  %v2817_v31 = vpop.xlane.xlu0 %2816  ;;  %v2894_v52 = vmul.f32 %v2781_v11, %v5917_v8  ;;  %v8942_v11 = vadd.f32 %v8755_v13, %v6621_v10 }
 0x4db   : > { %v4079_v16 = vmul.f32 %v7866_v54, %v4015_v14  ;;  %v2906_v57 = vmul.f32 %v2817_v31, %v5917_v8 }
 0x4dc   : > { %v8932_v18 = vsub.f32 %v8635_v53, %v2894_v52 }
 0x4dd   : > { %v8915_v40 = vsub.f32 %v8672_v44, %v2906_v57  ;;  %v4143_v56 = vadd.f32 %v7876_v30, %v4079_v16  ;;  %v8927_v44 = vadd.f32 %v8721_v2, %v6621_v10 }
 0x4de   : > { %v4570_v35 = vpop.f32.mrf.mxu2  ;;  %v3020_v2 = vmul.f32 %v8932_v18, %v8932_v18 }
 0x4df   : > { %v3032_v63 = vmul.f32 %v8915_v40, %v8915_v40  ;;  %vm4206_vm7 = vcmp.ge.f32.partialorder %v4143_v56, 0.0  ;;  %v4269_v7 = vmul.f32 0.01, %v4143_v56  ;;  %v4571_v33 = vadd.f32 %v8907_v28, %v4570_v35 }
 0x4e0   : > { %v2836_v14 = vsel %vm644_vm1, %v8927_v44, 0.0  ;;  %v3157_v16 = vsel %vm644_vm1, %v3020_v2, 0.0 }
 0x4e1   : > { %v3193_v37 = vsel %vm644_vm1, %v3032_v63, 0.0  ;;  %v4332_v17 = vsel %vm4206_vm7, %v4143_v56, %v4269_v7  ;;  %4705 = vst.msk [vmem:[%s8510_s21 + $0x88] sm:$0xff] %vm4687_vm6, %v4571_v33 }
 0x4e2   : > { %3194 = vadd.xlane.f32.xlu0 %v3193_v37  ;;  %v4383_v6 = vpack.c.bf16 %v4333_v38, %v4332_v17  ;;  %v2845_v37 = vsel %vm644_vm1, %v8942_v11, 0.0 }
 0x4e4   : > { %5192 = vmatmul.msk.bf16.gmra.mxu2 %vm644_vm1, %v4383_v6 }
 0x4e5   : > { %v3126_v1 = vpop.xlane.xlu1 %3125 }
 0x4e6   : > { %v3261_v43 = vmul.f32 %v3126_v1, %v5917_v8 }
 0x4e8   : > { %v3324_v60 = vadd.f32 1e-05, %v3261_v43 }
 0x4ea   : > { %5511 = vrsqrt.f32 %v3324_v60  ;;  %2837 = vadd.xlane.f32.xlu0 %v2836_v14  ;;  %vm3627_vm9 = vweird.f32 %v3324_v60 }
 0x4ed   : > { %v3129_v9 = vpop.xlane.xlu2 %3128 }
 0x4ee   : > { %v3262_v47 = vmul.f32 %v3129_v9, %v5917_v8 }
 0x4f0   : > { %v3325_v21 = vadd.f32 1e-05, %v3262_v47  ;;  %v5512_v39 = vpop.eup %5511 }
 0x4f1   : > { %v3622_v31 = vmul.f32 %v5512_v39, %v3324_v60  ;;  %vm3628_vm8 = vweird.f32 %v5512_v39 }
 0x4f2   : > { %5513 = vrsqrt.f32 %v3325_v21  ;;  %3158 = vadd.xlane.f32.xlu0 %v3157_v16  ;;  %vm3629_vm10 = vmor %vm3627_vm9, %vm3628_vm8  ;;  %vm3637_vm12 = vweird.f32 %v3325_v21 }
 0x4f3   : > { %v3623_v53 = vmul.f32 %v5512_v39, %v3622_v31 }
 0x4f5   : > { %v3135_v57 = vpop.xlane.xlu2 %3134  ;;  %v3624_v56 = vmul.f32 0.5, %v3623_v53 }
 0x4f6   : > { %v3264_v7 = vmul.f32 %v3135_v57, %v5917_v8 }
 0x4f7   : > { %v3625_v63 = vsub.f32 1.5, %v3624_v56 }
 0x4f8   : > { %v5514_v55 = vpop.eup %5513  ;;  %v3327_v33 = vadd.f32 1e-05, %v3264_v7 }
 0x4f9   : > { %v3632_v35 = vmul.f32 %v5514_v55, %v3325_v21  ;;  %v3626_v17 = vmul.f32 %v5512_v39, %v3625_v63  ;;  %vm3638_vm11 = vweird.f32 %v5514_v55 }
 0x4fa   : > { %2846 = vadd.xlane.f32.xlu0 %v2845_v37  ;;  %5515 = vrsqrt.f32 %v3327_v33  ;;  %vm3639_vm13 = vmor %vm3637_vm12, %vm3638_vm11  ;;  %vm3657_vm3 = vweird.f32 %v3327_v33 }
 0x4fb   : > { %v3633_v38 = vmul.f32 %v5514_v55, %v3632_v35  ;;  %v3630_v52 = vsel %vm3629_vm10, %v5512_v39, %v3626_v17  ;;  %v8952_v39 = vpop.xlane.xlu1 %2786 }
 0x4fc   : > { %v4017_v43 = vmul.f32 %v3630_v52, %v8689_v50 }
 0x4fd   : > { %v3634_v6 = vmul.f32 0.5, %v3633_v38  ;;  %v3141_v9 = vpop.xlane.xlu2 %3140 }
 0x4fe   : > { %v4081_v31 = vmul.f32 %v7866_v54, %v4017_v43  ;;  %v3266_v16 = vmul.f32 %v3141_v9, %v5917_v8 }
 0x4ff   : > { %v3635_v13 = vsub.f32 1.5, %v3634_v6 }
 0x500   : > { %v5516_v2 = vpop.eup %5515  ;;  %v8954_v57 = vadd.f32 1e-05, %v3266_v16  ;;  %v4145_v21 = vadd.f32 %v7876_v30, %v4081_v31 }
 0x501   : > { %v3636_v1 = vmul.f32 %v5514_v55, %v3635_v13  ;;  %v3652_v53 = vmul.f32 %v5516_v2, %v3327_v33  ;;  %vm3658_vm2 = vweird.f32 %v5516_v2 }
 0x502   : > { %vm4208_vm14 = vcmp.ge.f32.partialorder %v4145_v21, 0.0  ;;  %5517 = vrsqrt.f32 %v8954_v57  ;;  %vm3659_vm0 = vmor %vm3657_vm3, %vm3658_vm2  ;;  %vm3677_vm9 = vweird.f32 %v8954_v57 }
 0x503   : > { %v3640_v14 = vsel %vm3639_vm13, %v5514_v55, %v3636_v1  ;;  %v3653_v56 = vmul.f32 %v5516_v2, %v3652_v53 }
 0x504   : > { %v4018_v47 = vmul.f32 %v3640_v14, %v8703_v27  ;;  %v4271_v27 = vmul.f32 0.01, %v4145_v21 }
 0x505   : > { %v3654_v37 = vmul.f32 0.5, %v3653_v56 }
 0x506   : > { %v4082_v60 = vmul.f32 %v7866_v54, %v4018_v47  ;;  %v4334_v63 = vsel %vm4208_vm14, %v4145_v21, %v4271_v27 }
 0x507   : > { %v3655_v43 = vsub.f32 1.5, %v3654_v37 }
 0x508   : > { %v4146_v50 = vadd.f32 %v7876_v30, %v4082_v60  ;;  %v8962_v13 = vpop.eup %5517 }
 0x509   : > { %v3672_v14 = vmul.f32 %v8962_v13, %v8954_v57  ;;  %v3656_v9 = vmul.f32 %v5516_v2, %v3655_v43  ;;  %vm3678_vm8 = vweird.f32 %v8962_v13 }
 0x50a   : > { %vm4209_vm15 = vcmp.ge.f32.partialorder %v4146_v50, 0.0  ;;  %v4272_v55 = vmul.f32 0.01, %v4146_v50  ;;  %vm3679_vm10 = vmor %vm3677_vm9, %vm3678_vm8 }
 0x50b   : > { %v3673_v53 = vmul.f32 %v8962_v13, %v3672_v14  ;;  %v3660_v27 = vsel %vm3659_vm0, %v5516_v2, %v3656_v9 }
 0x50c   : > { %v4335_v7 = vsel %vm4209_vm15, %v4146_v50, %v4272_v55  ;;  %v4020_v37 = vmul.f32 %v3660_v27, %v8710_v29 }
 0x50d   : > { %v4384_v35 = vpack.c.bf16 %v4335_v7, %v4334_v63  ;;  %v3674_v63 = vmul.f32 0.5, %v3673_v53 }
 0x50e   : > { %v4084_v14 = vmul.f32 %v7866_v54, %v4020_v37  ;;  %v2616_v37 = vpop.f32.mrf.mxu1 }
 0x50f   : > { %v4573_v38 = vpop.f32.mrf.mxu2  ;;  %5193 = vmatmul.msk.bf16.gmra.mxu2 %vm644_vm1, %v4384_v35  ;;  %v3675_v2 = vsub.f32 1.5, %v3674_v63 }
 0x510   : > { %v3132_v17 = vpop.xlane.xlu1 %3131  ;;  %v4574_v52 = vadd.f32 %v8907_v28, %v4573_v38 }
 0x511   : > { %v3263_v6 = vmul.f32 %v3132_v17, %v5917_v8 }
 0x512   : > { %4706 = vst.msk [vmem:[%s8510_s21 + $0x90] sm:$0xff] %vm4687_vm6, %v4574_v52 }
 0x513   : > { %v3326_v1 = vadd.f32 1e-05, %v3263_v6  ;;  %v2893_v6 = vmul.f32 %v8874_v5, %v5917_v8 }
 0x515   : > { %5519 = vrsqrt.f32 %v3326_v1  ;;  %vm3647_vm5 = vweird.f32 %v3326_v1 }
 0x517   : > { %v4575_v31 = vpop.f32.mrf.mxu2 }
 0x518   : > { %v3147_v47 = vpop.xlane.xlu2 %3146  ;;  %v4576_v16 = vadd.f32 %v8907_v28, %v4575_v31  ;;  %v8991_v31 = vsub.f32 %v8657_v22, %v2893_v6 }
 0x519   : > { %v3268_v60 = vmul.f32 %v3147_v47, %v5917_v8 }
 0x51a   : > { %4707 = vst.msk [vmem:[%s8510_s21 + $0x98] sm:$0xff] %vm4687_vm6, %v4576_v16  ;;  %v3676_v16 = vmul.f32 %v8962_v13, %v3675_v2  ;;  %v3019_v57 = vmul.f32 %v8991_v31, %v8991_v31 }
 0x51b   : > { %v5520_v21 = vpop.eup %5519  ;;  %v8971_v50 = vadd.f32 1e-05, %v3268_v60 }
 0x51c   : > { %v3642_v56 = vmul.f32 %v5520_v21, %v3326_v1  ;;  %vm3648_vm4 = vweird.f32 %v5520_v21 }
 0x51d   : > { %v3138_v55 = vpop.xlane.xlu1 %3137  ;;  %5521 = vrsqrt.f32 %v8971_v50  ;;  %vm3649_vm7 = vmor %vm3647_vm5, %vm3648_vm4  ;;  %vm3697_vm2 = vweird.f32 %v8971_v50 }
 0x51e   : > { %v3643_v7 = vmul.f32 %v5520_v21, %v3642_v56  ;;  %v3265_v35 = vmul.f32 %v3138_v55, %v5917_v8  ;;  %v4148_v56 = vadd.f32 %v7876_v30, %v4084_v14 }
 0x520   : > { %v3644_v33 = vmul.f32 0.5, %v3643_v7  ;;  %v8978_v17 = vadd.f32 1e-05, %v3265_v35  ;;  %v2814_v38 = vpop.xlane.xlu2 %2813  ;;  %v3680_v35 = vsel %vm3679_vm10, %v8962_v13, %v3676_v16  ;;  %v4274_v6 = vmul.f32 0.01, %v4148_v56 }
 0x521   : > { %v2905_v52 = vmul.f32 %v2814_v38, %v5917_v8  ;;  %vm4211_vm11 = vcmp.ge.f32.partialorder %v4148_v56, 0.0  ;;  %v4022_v2 = vmul.f32 %v3680_v35, %v8726_v61  ;;  %v9018_v13 = vadd.f32 %v2616_v37, %v6621_v10 }
 0x522   : > { %v3645_v43 = vsub.f32 1.5, %v3644_v33  ;;  %5523 = vrsqrt.f32 %v8978_v17  ;;  %vm3667_vm14 = vweird.f32 %v8978_v17 }
 0x523   : > { %v8986_v29 = vsub.f32 %v8776_v0, %v2905_v52  ;;  %v8988_v47 = vpop.eup %5521  ;;  %v4086_v35 = vmul.f32 %v7866_v54, %v4022_v2 }
 0x524   : > { %v3646_v9 = vmul.f32 %v5520_v21, %v3645_v43  ;;  %v3692_v55 = vmul.f32 %v8988_v47, %v8971_v50  ;;  %vm3698_vm3 = vweird.f32 %v8988_v47 }
 0x525   : > { %v3031_v5 = vmul.f32 %v8986_v29, %v8986_v29  ;;  %v3144_v60 = vpop.xlane.xlu1 %3143  ;;  %vm3699_vm9 = vmor %vm3697_vm2, %vm3698_vm3 }
 0x526   : > { %v3650_v53 = vsel %vm3649_vm7, %v5520_v21, %v3646_v9  ;;  %v3267_v0 = vmul.f32 %v3144_v60, %v5917_v8  ;;  %v3693_v52 = vmul.f32 %v8988_v47, %v3692_v55  ;;  %v3154_v60 = vsel %vm644_vm1, %v3019_v57, 0.0 }
 0x527   : > { %v4019_v27 = vmul.f32 %v3650_v53, %v8747_v4  ;;  %v3190_v1 = vsel %vm644_vm1, %v3031_v5, 0.0 }
 0x528   : > { %v5524_v22 = vpop.eup %5523  ;;  %3191 = vadd.xlane.f32.xlu2 %v3190_v1  ;;  %v9004_v63 = vpop.xlane.xlu2 %2789  ;;  %v9006_v7 = vadd.f32 1e-05, %v3267_v0  ;;  %v4337_v0 = vsel %vm4211_vm11, %v4148_v56, %v4274_v6  ;;  %v2895_v1 = vmul.f32 %v8892_v34, %v5917_v8  ;;  %v3694_v61 = vmul.f32 0.5, %v3693_v52 }
 0x529   : > { %v4083_v21 = vmul.f32 %v7866_v54, %v4019_v27  ;;  %v3662_v4 = vmul.f32 %v5524_v22, %v8978_v17  ;;  %vm3668_vm13 = vweird.f32 %v5524_v22 }
 0x52a   : > { %5525 = vrsqrt.f32 %v9006_v7  ;;  %vm3669_vm15 = vmor %vm3667_vm14, %vm3668_vm13  ;;  %v9037_v2 = vsub.f32 %v8665_v46, %v2895_v1  ;;  %vm3687_vm0 = vweird.f32 %v9006_v7 }
 0x52b   : > { %v3663_v33 = vmul.f32 %v5524_v22, %v3662_v4  ;;  %v4147_v38 = vadd.f32 %v7876_v30, %v4083_v21 }
 0x52d   : > { %v3664_v43 = vmul.f32 0.5, %v3663_v33  ;;  %v3153_v14 = vpop.xlane.xlu1 %3152  ;;  %vm4210_vm12 = vcmp.ge.f32.partialorder %v4147_v38, 0.0  ;;  %v4273_v9 = vmul.f32 0.01, %v4147_v38 }
 0x52e   : > { %v3270_v5 = vmul.f32 %v3153_v14, %v5917_v8 }
 0x52f   : > { %v3665_v16 = vsub.f32 1.5, %v3664_v43  ;;  %v4336_v53 = vsel %vm4210_vm12, %v4147_v38, %v4273_v9  ;;  %v3695_v38 = vsub.f32 1.5, %v3694_v61  ;;  %v2797_v43 = vsel %vm644_vm1, %v9018_v13, 0.0 }
 0x530   : > { %v5526_v27 = vpop.eup %5525  ;;  %v2820_v55 = vpop.xlane.xlu2 %2819  ;;  %v9024_v21 = vadd.f32 1e-05, %v3270_v5  ;;  %3155 = vadd.xlane.f32.xlu2 %v3154_v60  ;;  %v4385_v4 = vpack.c.bf16 %v4337_v0, %v4336_v53  ;;  %v4150_v9 = vadd.f32 %v7876_v30, %v4086_v35 }
 0x531   : > { %v3666_v37 = vmul.f32 %v5524_v22, %v3665_v16  ;;  %v3682_v57 = vmul.f32 %v5526_v27, %v9006_v7  ;;  %v2907_v56 = vmul.f32 %v2820_v55, %v5917_v8  ;;  %vm3688_vm4 = vweird.f32 %v5526_v27 }
 0x532   : > { %5527 = vrsqrt.f32 %v9024_v21  ;;  %5194 = vmatmul.msk.bf16.gmra.mxu2 %vm644_vm1, %v4385_v4  ;;  %v3696_v60 = vmul.f32 %v8988_v47, %v3695_v38  ;;  %v4276_v7 = vmul.f32 0.01, %v4150_v9  ;;  %vm3689_vm5 = vmor %vm3687_vm0, %vm3688_vm4  ;;  %vm4213_vm8 = vcmp.ge.f32.partialorder %v4150_v9, 0.0 }
 0x533   : > { %v3670_v34 = vsel %vm3669_vm15, %v5524_v22, %v3666_v37  ;;  %v3683_v33 = vmul.f32 %v5526_v27, %v3682_v57  ;;  %v9034_v52 = vsub.f32 %v8815_v48, %v2907_v56  ;;  %v2619_v56 = vpop.f32.mrf.mxu1  ;;  %v3021_v38 = vmul.f32 %v9037_v2, %v9037_v2 }
 0x534   : > { %v4021_v6 = vmul.f32 %v3670_v34, %v8770_v58  ;;  %v3700_v34 = vsel %vm3699_vm9, %v8988_v47, %v3696_v60  ;;  %vm3717_vm13 = vweird.f32 %v9024_v21 }
 0x535   : > { %v3684_v17 = vmul.f32 0.5, %v3683_v33  ;;  %v3150_v14 = vpop.xlane.xlu0 %3149  ;;  %v3033_v58 = vmul.f32 %v9034_v52, %v9034_v52  ;;  %v3160_v60 = vsel %vm644_vm1, %v3021_v38, 0.0 }
 0x536   : > { %v4085_v22 = vmul.f32 %v7866_v54, %v4021_v6  ;;  %v3269_v48 = vmul.f32 %v3150_v14, %v5917_v8  ;;  %v4339_v14 = vsel %vm4213_vm8, %v4150_v9, %v4276_v7 }
 0x537   : > { %v3685_v46 = vsub.f32 1.5, %v3684_v17  ;;  %v3196_v53 = vsel %vm644_vm1, %v3033_v58, 0.0 }
 0x538   : > { %v9049_v5 = vpop.eup %5527  ;;  %v2826_v16 = vpop.xlane.xlu2 %2825  ;;  %2798 = vadd.xlane.f32.xlu2 %v2797_v43  ;;  %v9053_v0 = vadd.f32 1e-05, %v3269_v48  ;;  %v4149_v1 = vadd.f32 %v7876_v30, %v4085_v22  ;;  %3197 = vadd.xlane.f32.xlu1 %v3196_v53  ;;  %v4024_v22 = vmul.f32 %v3700_v34, %v8760_v32  ;;  %v9084_v32 = vadd.f32 %v2619_v56, %v6621_v10 }
 0x539   : > { %v3686_v61 = vmul.f32 %v5526_v27, %v3685_v46  ;;  %v3712_v55 = vmul.f32 %v9049_v5, %v9024_v21  ;;  %v2909_v4 = vmul.f32 %v2826_v16, %v5917_v8  ;;  %vm3718_vm11 = vweird.f32 %v9049_v5 }
 0x53a   : > { %5529 = vrsqrt.f32 %v9053_v0  ;;  %vm4212_vm7 = vcmp.ge.f32.partialorder %v4149_v1, 0.0  ;;  %v4275_v35 = vmul.f32 0.01, %v4149_v1  ;;  %v2800_v38 = vsel %vm644_vm1, %v9084_v32, 0.0  ;;  %vm9117_vm2 = vmor %vm3717_vm13, %vm3718_vm11 }
 0x53b   : > { %v3690_v37 = vsel %vm3689_vm5, %v5526_v27, %v3686_v61  ;;  %v9065_v57 = vsub.f32 %v8841_v24, %v2909_v4  ;;  %v3713_v33 = vmul.f32 %v9049_v5, %v3712_v55  ;;  %v4088_v55 = vmul.f32 %v7866_v54, %v4024_v22 }
 0x53c   : > { %v4338_v6 = vsel %vm4212_vm7, %v4149_v1, %v4275_v35  ;;  %v4023_v17 = vmul.f32 %v3690_v37, %v8779_v62  ;;  %vm3707_vm12 = vweird.f32 %v9053_v0 }
 0x53d   : > { %v3035_v43 = vmul.f32 %v9065_v57, %v9065_v57  ;;  %v2823_v50 = vpop.xlane.xlu0 %2822  ;;  %v4386_v24 = vpack.c.bf16 %v4339_v14, %v4338_v6  ;;  %v3714_v48 = vmul.f32 0.5, %v3713_v33  ;;  %v2621_v33 = vpop.f32.mrf.mxu1  ;;  %v2896_v14 = vmul.f32 %v8952_v39, %v5917_v8 }
 0x53e   : > { %v2908_v27 = vmul.f32 %v2823_v50, %v5917_v8  ;;  %v4087_v9 = vmul.f32 %v7866_v54, %v4023_v17  ;;  %v9106_v50 = vadd.f32 %v8741_v26, %v6621_v10  ;;  %v2897_v26 = vmul.f32 %v9004_v63, %v5917_v8 }
 0x53f   : > { %v3202_v47 = vsel %vm644_vm1, %v3035_v43, 0.0  ;;  %v4578_v16 = vpop.f32.mrf.mxu2  ;;  %v3715_v7 = vsub.f32 1.5, %v3714_v48  ;;  %v4152_v43 = vadd.f32 %v7876_v30, %v4088_v55 }
 0x540   : > { %v5530_v58 = vpop.eup %5529  ;;  %v2835_v46 = vpop.xlane.xlu2 %2834  ;;  %3203 = vadd.xlane.f32.xlu0 %v3202_v47  ;;  %v9079_v62 = vsub.f32 %v8849_v49, %v2908_v27  ;;  %3161 = vadd.xlane.f32.xlu1 %v3160_v60  ;;  %v4579_v1 = vadd.f32 %v8907_v28, %v4578_v16  ;;  %v4151_v34 = vadd.f32 %v7876_v30, %v4087_v9  ;;  %v2842_v63 = vsel %vm644_vm1, %v9106_v50, 0.0 }
 0x541   : > { %v3702_v53 = vmul.f32 %v5530_v58, %v9053_v0  ;;  %v2912_v4 = vmul.f32 %v2835_v46, %v5917_v8  ;;  %vm3708_vm10 = vweird.f32 %v5530_v58  ;;  %v3716_v27 = vmul.f32 %v9049_v5, %v3715_v7 }
 0x542   : > { %5195 = vmatmul.msk.bf16.gmra.mxu2 %vm644_vm1, %v4386_v24  ;;  %v3034_v61 = vmul.f32 %v9079_v62, %v9079_v62  ;;  %4708 = vst.msk [vmem:[%s8510_s21 + $0xa0] sm:$0xff] %vm4687_vm6, %v4579_v1  ;;  %v4277_v47 = vmul.f32 0.01, %v4151_v34  ;;  %vm3709_vm14 = vmor %vm3707_vm12, %vm3708_vm10  ;;  %vm4214_vm15 = vcmp.ge.f32.partialorder %v4151_v34, 0.0  ;;  %v4278_v46 = vmul.f32 0.01, %v4152_v43 }
 0x543   : > { %v3703_v49 = vmul.f32 %v5530_v58, %v3702_v53  ;;  %v9101_v17 = vsub.f32 %v8866_v23, %v2912_v4  ;;  %v9126_v60 = vsub.f32 %v8699_v12, %v2896_v14  ;;  %v3720_v21 = vsel %vm9117_vm2, %v9049_v5, %v3716_v27 }
 0x544   : > { %v3199_v35 = vsel %vm644_vm1, %v3034_v61, 0.0  ;;  %vm4215_vm3 = vcmp.ge.f32.partialorder %v4152_v43, 0.0  ;;  %v4340_v9 = vsel %vm4214_vm15, %v4151_v34, %v4277_v47  ;;  %v9136_v61 = vsub.f32 %v8792_v59, %v2897_v26  ;;  %v2832_v34 = vpop.xlane.xlu1 %2831 }
 0x545   : > { %v3704_v37 = vmul.f32 0.5, %v3703_v49  ;;  %3200 = vadd.xlane.f32.xlu2 %v3199_v35  ;;  %v9095_v56 = vpop.xlane.xlu0 %2792  ;;  %v3038_v0 = vmul.f32 %v9101_v17, %v9101_v17  ;;  %v2624_v53 = vpop.f32.mrf.mxu1  ;;  %v4026_v12 = vmul.f32 %v3720_v21, %v8797_v41  ;;  %v4341_v5 = vsel %vm4215_vm3, %v4152_v43, %v4278_v46 }
 0x546   : > { %v4387_v4 = vpack.c.bf16 %v4341_v5, %v4340_v9  ;;  %v3023_v35 = vmul.f32 %v9136_v61, %v9136_v61  ;;  %v2911_v47 = vmul.f32 %v2832_v34, %v5917_v8  ;;  %v2898_v9 = vmul.f32 %v9095_v56, %v5917_v8 }
 0x547   : > { %v3705_v6 = vsub.f32 1.5, %v3704_v37  ;;  %v4580_v24 = vpop.f32.mrf.mxu2  ;;  %v3211_v55 = vsel %vm644_vm1, %v3038_v0, 0.0  ;;  %v4090_v41 = vmul.f32 %v7866_v54, %v4026_v12 }
 0x548   : > { %2801 = vadd.xlane.f32.xlu0 %v2800_v38  ;;  %v4581_v23 = vadd.f32 %v8907_v28, %v4580_v24  ;;  %v9161_v24 = vadd.f32 %v8789_v19, %v6621_v10  ;;  %v9174_v19 = vsub.f32 %v8827_v51, %v2911_v47  ;;  %v9199_v56 = vsub.f32 %v8878_v25, %v2898_v9 }
 0x549   : > { %v3706_v22 = vmul.f32 %v5530_v58, %v3705_v6  ;;  %v3166_v6 = vsel %vm644_vm1, %v3023_v35, 0.0  ;;  %v4154_v27 = vadd.f32 %v7876_v30, %v4090_v41 }
 0x54a   : > { %4709 = vst.msk [vmem:[%s8510_s21 + $0xa8] sm:$0xff] %vm4687_vm6, %v4581_v23 }
 0x54b   : > { %v3710_v48 = vsel %vm3709_vm14, %v5530_v58, %v3706_v22  ;;  %v9164_v22 = vadd.f32 %v2621_v33, %v6621_v10  ;;  %v4280_v0 = vmul.f32 0.01, %v4154_v27  ;;  %v2851_v33 = vsel %vm644_vm1, %v9161_v24, 0.0 }
 0x54c   : > { %v4025_v16 = vmul.f32 %v3710_v48, %v8830_v15  ;;  %v3022_v15 = vmul.f32 %v9126_v60, %v9126_v60  ;;  %vm4217_vm4 = vcmp.ge.f32.partialorder %v4154_v27, 0.0 }
 0x54d   : > { %2843 = vadd.xlane.f32.xlu2 %v2842_v63  ;;  %v2829_v58 = vpop.xlane.xlu0 %2828  ;;  %v2626_v23 = vpop.f32.mrf.mxu1  ;;  %v2803_v46 = vsel %vm644_vm1, %v9164_v22, 0.0  ;;  %v9182_v63 = vadd.f32 %v8765_v36, %v6621_v10  ;;  %v9196_v36 = vadd.f32 %v8810_v3, %v6621_v10 }
 0x54e   : > { %v2910_v1 = vmul.f32 %v2829_v58, %v5917_v8  ;;  %v4089_v7 = vmul.f32 %v7866_v54, %v4025_v16  ;;  %v3163_v37 = vsel %vm644_vm1, %v3022_v15, 0.0  ;;  %v9171_v48 = vadd.f32 %v2626_v23, %v6621_v10 }
 0x54f   : > { %v4343_v58 = vsel %vm4217_vm4, %v4154_v27, %v4280_v0  ;;  %v2854_v41 = vsel %vm644_vm1, %v9196_v36, 0.0 }
 0x550   : > { %3212 = vadd.xlane.f32.xlu0 %v3211_v55  ;;  %v9141_v49 = vsub.f32 %v8897_v45, %v2910_v1  ;;  %v4153_v38 = vadd.f32 %v7876_v30, %v4089_v7  ;;  %v2809_v16 = vsel %vm644_vm1, %v9171_v48, 0.0  ;;  %v3037_v55 = vmul.f32 %v9174_v19, %v9174_v19 }
 0x551   : > { %v2848_v7 = vsel %vm644_vm1, %v9182_v63, 0.0 }
 0x552   : > { %5196 = vmatmul.msk.bf16.gmra.mxu2 %vm644_vm1, %v4387_v4  ;;  %v3036_v59 = vmul.f32 %v9141_v49, %v9141_v49  ;;  %v4279_v39 = vmul.f32 0.01, %v4153_v38  ;;  %vm4216_vm0 = vcmp.ge.f32.partialorder %v4153_v38, 0.0  ;;  %v2841_v4 = vpop.xlane.xlu1 %2840  ;;  %v3208_v15 = vsel %vm644_vm1, %v3037_v55, 0.0 }
 0x553   : > { %v2914_v3 = vmul.f32 %v2841_v4, %v5917_v8 }
 0x554   : > { %v3205_v45 = vsel %vm644_vm1, %v3036_v59, 0.0  ;;  %v4342_v21 = vsel %vm4216_vm0, %v4153_v38, %v4279_v39  ;;  %v9205_v59 = vadd.f32 %v2624_v53, %v6621_v10 }
 0x555   : > { %3164 = vadd.xlane.f32.xlu2 %v3163_v37  ;;  %3206 = vadd.xlane.f32.xlu1 %v3205_v45  ;;  %v9156_v43 = vpop.xlane.xlu0 %3194  ;;  %v4388_v12 = vpack.c.bf16 %v4343_v58, %v4342_v21  ;;  %v3024_v45 = vmul.f32 %v9199_v56, %v9199_v56  ;;  %v9217_v10 = vsub.f32 %v8855_v20, %v2914_v3 }
 0x556   : > { %v2806_v38 = vsel %vm644_vm1, %v9205_v59, 0.0  ;;  %v3284_v58 = vmul.f32 %v9156_v43, %v5917_v8 }
 0x557   : > { %v4583_v14 = vpop.f32.mrf.mxu2  ;;  %v3040_v20 = vmul.f32 %v9217_v10, %v9217_v10 }
 0x558   : > { %3167 = vadd.xlane.f32.xlu0 %v3166_v6  ;;  %v4584_v26 = vadd.f32 %v8907_v28, %v4583_v14  ;;  %v3169_v6 = vsel %vm644_vm1, %v3024_v45, 0.0 }
 0x559   : > { %v3217_v39 = vsel %vm644_vm1, %v3040_v20, 0.0 }
 0x55a   : > { %4710 = vst.msk [vmem:[%s8510_s21 + $0xb0] sm:$0xff] %vm4687_vm6, %v4584_v26  ;;  %v2796_v14 = vpop.xlane.xlu1 %2795 }
 0x55b   : > { %v2899_v23 = vmul.f32 %v2796_v14, %v5917_v8 }
 0x55d   : > { %2852 = vadd.xlane.f32.xlu2 %v2851_v33  ;;  %2804 = vadd.xlane.f32.xlu1 %v2803_v46  ;;  %v2838_v5 = vpop.xlane.xlu0 %2837  ;;  %v9234_v26 = vsub.f32 %v8884_v42, %v2899_v23 }
 0x55e   : > { %v2913_v37 = vmul.f32 %v2838_v5, %v5917_v8 }
 0x55f   : > { %v4585_v51 = vpop.f32.mrf.mxu2  ;;  %v3025_v21 = vmul.f32 %v9234_v26, %v9234_v26 }
 0x560   : > { %2810 = vadd.xlane.f32.xlu0 %v2809_v16  ;;  %v4586_v1 = vadd.f32 %v8907_v28, %v4585_v51  ;;  %v9220_v53 = vsub.f32 %v8927_v44, %v2913_v37 }
 0x561   : > { %v3172_v51 = vsel %vm644_vm1, %v3025_v21, 0.0 }
 0x562   : > { %4711 = vst.msk [vmem:[%s8510_s21 + $0xb8] sm:$0xff] %vm4687_vm6, %v4586_v1  ;;  %5197 = vmatmul.msk.bf16.gmra.mxu2 %vm644_vm1, %v4388_v12  ;;  %v3039_v44 = vmul.f32 %v9220_v53, %v9220_v53  ;;  %v3347_v1 = vadd.f32 1e-05, %v3284_v58 }
 0x564   : > { %v3214_v0 = vsel %vm644_vm1, %v3039_v44, 0.0  ;;  %5531 = vrsqrt.f32 %v3347_v1  ;;  %vm3857_vm7 = vweird.f32 %v3347_v1 }
 0x565   : > { %3209 = vadd.xlane.f32.xlu2 %v3208_v15  ;;  %2849 = vadd.xlane.f32.xlu1 %v2848_v7  ;;  %v3159_v34 = vpop.xlane.xlu0 %3158 }
 0x566   : > { %v3272_v12 = vmul.f32 %v3159_v34, %v5917_v8 }
 0x567   : > { %v4588_v35 = vpop.f32.mrf.mxu2 }
 0x568   : > { %2855 = vadd.xlane.f32.xlu0 %v2854_v41  ;;  %v4589_v25 = vadd.f32 %v8907_v28, %v4588_v35 }
 0x56a   : > { %4712 = vst.msk [vmem:[%s8510_s21 + $0xc0] sm:$0xff] %vm4687_vm6, %v4589_v25  ;;  %v5532_v55 = vpop.eup %5531 }
 0x56b   : > { %v3852_v5 = vmul.f32 %v5532_v55, %v3347_v1  ;;  %vm3858_vm5 = vweird.f32 %v5532_v55 }
 0x56c   : > { %vm3859_vm8 = vmor %vm3857_vm7, %vm3858_vm5 }
 0x56d   : > { %2807 = vadd.xlane.f32.xlu2 %v2806_v38  ;;  %3170 = vadd.xlane.f32.xlu1 %v3169_v6  ;;  %v2847_v33 = vpop.xlane.xlu0 %2846  ;;  %v3853_v7 = vmul.f32 %v5532_v55, %v3852_v5 }
 0x56e   : > { %v2916_v46 = vmul.f32 %v2847_v33, %v5917_v8 }
 0x56f   : > { %v4590_v27 = vpop.f32.mrf.mxu2  ;;  %v3854_v43 = vmul.f32 0.5, %v3853_v7 }
 0x570   : > { %v4591_v47 = vadd.f32 %v8907_v28, %v4590_v27  ;;  %v9242_v16 = vsub.f32 %v8942_v11, %v2916_v46  ;;  %v3335_v11 = vadd.f32 1e-05, %v3272_v12 }
 0x571   : > { %v3855_v38 = vsub.f32 1.5, %v3854_v43 }
 0x572   : > { %4713 = vst.msk [vmem:[%s8510_s21 + $0xc8] sm:$0xff] %vm4687_vm6, %v4591_v47  ;;  %v3042_v42 = vmul.f32 %v9242_v16, %v9242_v16  ;;  %5533 = vrsqrt.f32 %v3335_v11  ;;  %vm3737_vm11 = vweird.f32 %v3335_v11 }
 0x573   : > { %v3856_v14 = vmul.f32 %v5532_v55, %v3855_v38 }
 0x574   : > { %v3223_v9 = vsel %vm644_vm1, %v3042_v42, 0.0 }
 0x575   : > { %3218 = vadd.xlane.f32.xlu2 %v3217_v39  ;;  %3215 = vadd.xlane.f32.xlu1 %v3214_v0  ;;  %v3860_v39 = vsel %vm3859_vm8, %v5532_v55, %v3856_v14 }
 0x576   : > { %v4040_v21 = vmul.f32 %v3860_v39, %v8915_v40 }
 0x578   : > { %v5534_v41 = vpop.eup %5533  ;;  %v4104_v55 = vmul.f32 %v7866_v54, %v4040_v21 }
 0x579   : > { %v3732_v25 = vmul.f32 %v5534_v41, %v3335_v11  ;;  %vm3738_vm9 = vweird.f32 %v5534_v41 }
 0x57a   : > { %vm9266_vm12 = vmor %vm3737_vm11, %vm3738_vm9 }
 0x57b   : > { %v3733_v6 = vmul.f32 %v5534_v41, %v3732_v25 }
 0x57d   : > { %3173 = vadd.xlane.f32.xlu1 %v3172_v51  ;;  %v3734_v47 = vmul.f32 0.5, %v3733_v6 }
 0x57f   : > { %v3735_v33 = vsub.f32 1.5, %v3734_v47 }
 0x581   : > { %v3736_v12 = vmul.f32 %v5534_v41, %v3735_v33 }
 0x585   : > { %3224 = vadd.xlane.f32.xlu1 %v3223_v9 }
 0x592   : > { %v4593_v4 = vpop.f32.mrf.mxu2 }
 0x593   : > { %v4594_v15 = vadd.f32 %v8907_v28, %v4593_v4 }
 0x595   : > { %4714 = vst.msk [vmem:[%s8510_s21 + $0xd0] sm:$0xff] %vm4687_vm6, %v4594_v15 }
 0x59a   : > { %v4595_v37 = vpop.f32.mrf.mxu2 }
 0x59b   : > { %v3192_v35 = vpop.xlane.xlu2 %3191  ;;  %v4596_v45 = vadd.f32 %v8907_v28, %v4595_v37  ;;  %v3740_v37 = vsel %vm9266_vm12, %v5534_v41, %v3736_v12 }
 0x59c   : > { %v3283_v3 = vmul.f32 %v3192_v35, %v5917_v8  ;;  %v4028_v14 = vmul.f32 %v3740_v37, %v8932_v18 }
 0x59d   : > { %4715 = vst.msk [vmem:[%s8510_s21 + $0xd8] sm:$0xff] %vm4687_vm6, %v4596_v45 }
 0x59e   : > { %v3346_v34 = vadd.f32 1e-05, %v3283_v3 }
 0x5a0   : > { %5535 = vrsqrt.f32 %v3346_v34  ;;  %vm3847_vm13 = vweird.f32 %v3346_v34 }
 0x5a3   : > { %v3156_v27 = vpop.xlane.xlu2 %3155 }
 0x5a4   : > { %v3271_v23 = vmul.f32 %v3156_v27, %v5917_v8 }
 0x5a6   : > { %v5536_v20 = vpop.eup %5535  ;;  %v3334_v44 = vadd.f32 1e-05, %v3271_v23 }
 0x5a7   : > { %v3842_v0 = vmul.f32 %v5536_v20, %v3346_v34  ;;  %vm3848_vm10 = vweird.f32 %v5536_v20 }
 0x5a8   : > { %5537 = vrsqrt.f32 %v3334_v44  ;;  %vm3849_vm14 = vmor %vm3847_vm13, %vm3848_vm10  ;;  %vm3727_vm3 = vweird.f32 %v3334_v44 }
 0x5a9   : > { %v3843_v46 = vmul.f32 %v5536_v20, %v3842_v0 }
 0x5ab   : > { %v3844_v51 = vmul.f32 0.5, %v3843_v46  ;;  %v2799_v42 = vpop.xlane.xlu2 %2798  ;;  %v3198_v58 = vpop.xlane.xlu1 %3197 }
 0x5ac   : > { %v2900_v9 = vmul.f32 %v2799_v42, %v5917_v8  ;;  %v3285_v1 = vmul.f32 %v3198_v58, %v5917_v8  ;;  %v4092_v42 = vmul.f32 %v7866_v54, %v4028_v14 }
 0x5ad   : > { %v3845_v5 = vsub.f32 1.5, %v3844_v51 }
 0x5ae   : > { %v5538_v4 = vpop.eup %5537  ;;  %v9264_v15 = vsub.f32 %v9018_v13, %v2900_v9  ;;  %v9270_v35 = vadd.f32 1e-05, %v3285_v1  ;;  %v4168_v13 = vadd.f32 %v7876_v30, %v4104_v55 }
 0x5af   : > { %v3846_v7 = vmul.f32 %v5536_v20, %v3845_v5  ;;  %v3722_v43 = vmul.f32 %v5538_v4, %v3334_v44  ;;  %vm3728_vm15 = vweird.f32 %v5538_v4 }
 0x5b0   : > { %v3026_v3 = vmul.f32 %v9264_v15, %v9264_v15  ;;  %5539 = vrsqrt.f32 %v9270_v35  ;;  %v4294_v0 = vmul.f32 0.01, %v4168_v13  ;;  %vm4231_vm2 = vcmp.ge.f32.partialorder %v4168_v13, 0.0  ;;  %vm3729_vm4 = vmor %vm3727_vm3, %vm3728_vm15 }
 0x5b1   : > { %v3850_v11 = vsel %vm3849_vm14, %v5536_v20, %v3846_v7  ;;  %v3723_v25 = vmul.f32 %v5538_v4, %v3722_v43  ;;  %vm3867_vm9 = vweird.f32 %v9270_v35 }
 0x5b2   : > { %v4039_v45 = vmul.f32 %v3850_v11, %v8986_v29  ;;  %v3175_v34 = vsel %vm644_vm1, %v3026_v3, 0.0  ;;  %v4357_v1 = vsel %vm4231_vm2, %v4168_v13, %v4294_v0 }
 0x5b3   : > { %v3724_v38 = vmul.f32 0.5, %v3723_v25  ;;  %3176 = vadd.xlane.f32.xlu2 %v3175_v34  ;;  %v3204_v6 = vpop.xlane.xlu0 %3203  ;;  %v3162_v23 = vpop.xlane.xlu1 %3161 }
 0x5b4   : > { %v4103_v27 = vmul.f32 %v7866_v54, %v4039_v45  ;;  %v3287_v41 = vmul.f32 %v3204_v6, %v5917_v8  ;;  %v3273_v20 = vmul.f32 %v3162_v23, %v5917_v8 }
 0x5b5   : > { %v3725_v47 = vsub.f32 1.5, %v3724_v38  ;;  %v4598_v39 = vpop.f32.mrf.mxu2 }
 0x5b6   : > { %v4167_v29 = vadd.f32 %v7876_v30, %v4103_v27  ;;  %v9285_v33 = vadd.f32 1e-05, %v3287_v41  ;;  %v4599_v46 = vadd.f32 %v8907_v28, %v4598_v39  ;;  %v9288_v21 = vpop.eup %5539  ;;  %v9290_v51 = vadd.f32 1e-05, %v3273_v20 }
 0x5b7   : > { %v3726_v18 = vmul.f32 %v5538_v4, %v3725_v47  ;;  %v3862_v9 = vmul.f32 %v9288_v21, %v9270_v35  ;;  %vm3868_vm8 = vweird.f32 %v9288_v21 }
 0x5b8   : > { %vm4230_vm0 = vcmp.ge.f32.partialorder %v4167_v29, 0.0  ;;  %v4293_v58 = vmul.f32 0.01, %v4167_v29  ;;  %4716 = vst.msk [vmem:[%s8510_s21 + $0xe0] sm:$0xff] %vm4687_vm6, %v4599_v46  ;;  %v3201_v12 = vpop.xlane.xlu2 %3200  ;;  %5541 = vrsqrt.f32 %v9290_v51  ;;  %vm9360_vm11 = vmor %vm3867_vm9, %vm3868_vm8  ;;  %vm3747_vm12 = vweird.f32 %v9290_v51 }
 0x5b9   : > { %v3730_v5 = vsel %vm3729_vm4, %v5538_v4, %v3726_v18  ;;  %5543 = vrsqrt.f32 %v9285_v33  ;;  %v3863_v40 = vmul.f32 %v9288_v21, %v3862_v9  ;;  %v3286_v7 = vmul.f32 %v3201_v12, %v5917_v8 }
 0x5ba   : > { %v4356_v55 = vsel %vm4230_vm0, %v4167_v29, %v4293_v58  ;;  %v4027_v44 = vmul.f32 %v3730_v5, %v8991_v31  ;;  %v4156_v4 = vadd.f32 %v7876_v30, %v4092_v42  ;;  %vm3887_vm3 = vweird.f32 %v9285_v33 }
 0x5bb   : > { %v2802_v43 = vpop.xlane.xlu0 %2801  ;;  %v4395_v3 = vpack.c.bf16 %v4357_v1, %v4356_v55  ;;  %v9306_v25 = vadd.f32 1e-05, %v3286_v7  ;;  %v3864_v6 = vmul.f32 0.5, %v3863_v40 }
 0x5bc   : > { %v4091_v37 = vmul.f32 %v7866_v54, %v4027_v44  ;;  %v2901_v11 = vmul.f32 %v2802_v43, %v5917_v8  ;;  %v4282_v41 = vmul.f32 0.01, %v4156_v4  ;;  %vm4219_vm7 = vcmp.ge.f32.partialorder %v4156_v4, 0.0 }
 0x5bd   : > { %v4600_v13 = vpop.f32.mrf.mxu2  ;;  %5204 = vmatmul.msk.bf16.vlgmr.msra.gmra.mxu3 %vm644_vm1, %v4395_v3  ;;  %5545 = vrsqrt.f32 %v9306_v25  ;;  %v3865_v29 = vsub.f32 1.5, %v3864_v6  ;;  %vm3877_vm14 = vweird.f32 %v9306_v25 }
 0x5be   : > { %v9310_v31 = vsub.f32 %v9084_v32, %v2901_v11  ;;  %v4601_v45 = vadd.f32 %v8907_v28, %v4600_v13  ;;  %v4155_v34 = vadd.f32 %v7876_v30, %v4091_v37  ;;  %v9314_v38 = vpop.eup %5541  ;;  %v4345_v5 = vsel %vm4219_vm7, %v4156_v4, %v4282_v41  ;;  %v9345_v11 = vld [vmem:[%s9915_s5] ss:$0 sm:$0xff] }
 0x5bf   : > { %v9317_v14 = vpop.eup %5543  ;;  %v3742_v27 = vmul.f32 %v9314_v38, %v9290_v51  ;;  %vm3748_vm10 = vweird.f32 %v9314_v38 }
 0x5c0   : > { %4717 = vst.msk [vmem:[%s8510_s21 + $0xe8] sm:$0xff] %vm4687_vm6, %v4601_v45  ;;  %v2844_v23 = vpop.xlane.xlu2 %2843  ;;  %v3027_v32 = vmul.f32 %v9310_v31, %v9310_v31  ;;  %v3882_v28 = vmul.f32 %v9317_v14, %v9285_v33  ;;  %vm4218_vm5 = vcmp.ge.f32.partialorder %v4155_v34, 0.0  ;;  %v4281_v0 = vmul.f32 0.01, %v4155_v34  ;;  %vm9374_vm13 = vmor %vm3747_vm12, %vm3748_vm10 }
 0x5c1   : > { %v2915_v47 = vmul.f32 %v2844_v23, %v5917_v8  ;;  %v3743_v20 = vmul.f32 %v9314_v38, %v3742_v27  ;;  %vm3888_vm2 = vweird.f32 %v9317_v14 }
 0x5c2   : > { %v3178_v39 = vsel %vm644_vm1, %v3027_v32, 0.0  ;;  %v3883_v46 = vmul.f32 %v9317_v14, %v3882_v28  ;;  %v4344_v12 = vsel %vm4218_vm5, %v4155_v34, %v4281_v0  ;;  %vm9397_vm4 = vmor %vm3887_vm3, %vm3888_vm2 }
 0x5c3   : > { %v9332_v18 = vsub.f32 %v9106_v50, %v2915_v47  ;;  %3179 = vadd.xlane.f32.xlu2 %v3178_v39  ;;  %v3213_v42 = vpop.xlane.xlu0 %3212  ;;  %v3744_v58 = vmul.f32 0.5, %v3743_v20  ;;  %v5546_v1 = vpop.eup %5545  ;;  %v4389_v40 = vpack.c.bf16 %v4345_v5, %v4344_v12  ;;  %v3866_v50 = vmul.f32 %v9288_v21, %v3865_v29 }
 0x5c4   : > { %v3290_v9 = vmul.f32 %v3213_v42, %v5917_v8  ;;  %v3884_v55 = vmul.f32 0.5, %v3883_v46  ;;  %v3872_v3 = vmul.f32 %v5546_v1, %v9306_v25  ;;  %vm3878_vm15 = vweird.f32 %v5546_v1 }
 0x5c5   : > { %v4603_v44 = vpop.f32.mrf.mxu2  ;;  %v3041_v7 = vmul.f32 %v9332_v18, %v9332_v18  ;;  %v3745_v43 = vsub.f32 1.5, %v3744_v58  ;;  %5198 = vmatmul.msk.bf16.gmra.mxu2 %vm644_vm1, %v4389_v40  ;;  %v3870_v47 = vsel %vm9360_vm11, %v9288_v21, %v3866_v50  ;;  %vm3879_vm0 = vmor %vm3877_vm14, %vm3878_vm15 }
 0x5c6   : > { %v9338_v37 = vadd.f32 1e-05, %v3290_v9  ;;  %v4604_v4 = vadd.f32 %v9345_v11, %v4603_v44  ;;  %v3873_v45 = vmul.f32 %v5546_v1, %v3872_v3  ;;  %v3885_v23 = vsub.f32 1.5, %v3884_v55 }
 0x5c7   : > { %v3220_v13 = vsel %vm644_vm1, %v3041_v7, 0.0  ;;  %v3746_v27 = vmul.f32 %v9314_v38, %v3745_v43  ;;  %v4041_v12 = vmul.f32 %v3870_v47, %v9034_v52 }
 0x5c8   : > { %5547 = vrsqrt.f32 %v9338_v37  ;;  %3221 = vadd.xlane.f32.xlu0 %v3220_v13  ;;  %v3165_v34 = vpop.xlane.xlu2 %3164  ;;  %v3207_v6 = vpop.xlane.xlu1 %3206  ;;  %4718 = vst.msk [vmem:[%s8510_s21 + $0xf0] sm:$0xff] %vm4687_vm6, %v4604_v4  ;;  %v3874_v28 = vmul.f32 0.5, %v3873_v45  ;;  %v3886_v51 = vmul.f32 %v9317_v14, %v3885_v23  ;;  %vm3917_vm15 = vweird.f32 %v9338_v37 }
 0x5c9   : > { %v3274_v32 = vmul.f32 %v3165_v34, %v5917_v8  ;;  %v3288_v41 = vmul.f32 %v3207_v6, %v5917_v8  ;;  %v3750_v21 = vsel %vm9374_vm13, %v9314_v38, %v3746_v27  ;;  %v4105_v4 = vmul.f32 %v7866_v54, %v4041_v12 }
 0x5ca   : > { %v3875_v46 = vsub.f32 1.5, %v3874_v28  ;;  %v4029_v44 = vmul.f32 %v3750_v21, %v9037_v2  ;;  %v3890_v33 = vsel %vm9397_vm4, %v9317_v14, %v3886_v51 }
 0x5cb   : > { %v9368_v20 = vadd.f32 1e-05, %v3274_v32  ;;  %v9370_v39 = vadd.f32 1e-05, %v3288_v41  ;;  %v3168_v0 = vpop.xlane.xlu0 %3167  ;;  %v9422_v27 = vmul.f32 %v3890_v33, %v9065_v57 }
 0x5cc   : > { %v3275_v42 = vmul.f32 %v3168_v0, %v5917_v8  ;;  %v3876_v25 = vmul.f32 %v5546_v1, %v3875_v46  ;;  %v4169_v0 = vadd.f32 %v7876_v30, %v4105_v4 }
 0x5cd   : > { %5549 = vrsqrt.f32 %v9368_v20  ;;  %v4605_v58 = vpop.f32.mrf.mxu2  ;;  %vm3757_vm5 = vweird.f32 %v9368_v20  ;;  %vm3897_vm7 = vweird.f32 %v9370_v39 }
 0x5ce   : > { %v9386_v9 = vpop.eup %5547  ;;  %5551 = vrsqrt.f32 %v9370_v39  ;;  %v9390_v5 = vadd.f32 1e-05, %v3275_v42  ;;  %v4606_v55 = vadd.f32 %v9345_v11, %v4605_v58  ;;  %v3880_v52 = vsel %vm3879_vm0, %v5546_v1, %v3876_v25 }
 0x5cf   : > { %v3912_v38 = vmul.f32 %v9386_v9, %v9338_v37  ;;  %v4042_v3 = vmul.f32 %v3880_v52, %v9079_v62  ;;  %v9419_v62 = vmul.f32 %v7866_v54, %v4029_v44  ;;  %vm3918_vm9 = vweird.f32 %v9386_v9 }
 0x5d0   : > { %5553 = vrsqrt.f32 %v9390_v5  ;;  %v2853_v7 = vpop.xlane.xlu2 %2852  ;;  %v2805_v43 = vpop.xlane.xlu1 %2804  ;;  %4719 = vst.msk [vmem:[%s8510_s21 + $0xf8] sm:$0xff] %vm4687_vm6, %v4606_v55  ;;  %vm4232_vm11 = vcmp.ge.f32.partialorder %v4169_v0, 0.0  ;;  %vm3767_vm2 = vweird.f32 %v9390_v5  ;;  %vm9501_vm0 = vmor %vm3917_vm15, %vm3918_vm9 }
 0x5d1   : > { %v2918_v50 = vmul.f32 %v2853_v7, %v5917_v8  ;;  %v2902_v2 = vmul.f32 %v2805_v43, %v5917_v8  ;;  %v3913_v1 = vmul.f32 %v9386_v9, %v3912_v38  ;;  %v4106_v32 = vmul.f32 %v7866_v54, %v4042_v3 }
 0x5d2   : > { %v4157_v37 = vadd.f32 %v7876_v30, %v9419_v62 }
 0x5d3   : > { %v5550_v13 = vpop.eup %5549  ;;  %v9413_v45 = vsub.f32 %v9161_v24, %v2918_v50  ;;  %v9416_v34 = vsub.f32 %v9164_v22, %v2902_v2  ;;  %v2811_v14 = vpop.xlane.xlu0 %2810  ;;  %v3914_v29 = vmul.f32 0.5, %v3913_v1  ;;  %v4170_v40 = vadd.f32 %v7876_v30, %v4106_v32 }
 0x5d4   : > { %v5552_v6 = vpop.eup %5551  ;;  %v3752_v23 = vmul.f32 %v5550_v13, %v9368_v20  ;;  %vm3758_vm8 = vweird.f32 %v5550_v13  ;;  %v2904_v55 = vmul.f32 %v2811_v14, %v5917_v8  ;;  %v4295_v2 = vmul.f32 0.01, %v4169_v0 }
 0x5d5   : > { %v3892_v24 = vmul.f32 %v5552_v6, %v9370_v39  ;;  %v4608_v41 = vpop.f32.mrf.mxu2  ;;  %v3028_v22 = vmul.f32 %v9416_v34, %v9416_v34  ;;  %v3044_v57 = vmul.f32 %v9413_v45, %v9413_v45  ;;  %vm3898_vm10 = vweird.f32 %v5552_v6  ;;  %vm3759_vm12 = vmor %vm3757_vm5, %vm3758_vm8 }
 0x5d6   : > { %v9430_v35 = vpop.eup %5553  ;;  %v3753_v28 = vmul.f32 %v5550_v13, %v3752_v23  ;;  %v4609_v47 = vadd.f32 %v9345_v11, %v4608_v41  ;;  %v3915_v4 = vsub.f32 1.5, %v3914_v29  ;;  %vm4233_vm13 = vcmp.ge.f32.partialorder %v4170_v40, 0.0  ;;  %vm3899_vm14 = vmor %vm3897_vm7, %vm3898_vm10 }
 0x5d7   : > { %v3893_v46 = vmul.f32 %v5552_v6, %v3892_v24  ;;  %v3762_v42 = vmul.f32 %v9430_v35, %v9390_v5  ;;  %v3181_v58 = vsel %vm644_vm1, %v3028_v22, 0.0  ;;  %v3229_v25 = vsel %vm644_vm1, %v3044_v57, 0.0 }
 0x5d8   : > { %v3754_v21 = vmul.f32 0.5, %v3753_v28  ;;  %4720 = vst.msk [vmem:[%s8510_s21 + $0x100] sm:$0xff] %vm4687_vm6, %v4609_v47  ;;  %v3210_v51 = vpop.xlane.xlu2 %3209  ;;  %v2850_v12 = vpop.xlane.xlu1 %2849  ;;  %3182 = vadd.xlane.f32.xlu0 %v3181_v58  ;;  %3230 = vadd.xlane.f32.xlu2 %v3229_v25  ;;  %v9459_v24 = vsub.f32 %v9171_v48, %v2904_v55  ;;  %v4296_v28 = vmul.f32 0.01, %v4170_v40  ;;  %v4358_v29 = vsel %vm4232_vm11, %v4169_v0, %v4295_v2 }
 0x5d9   : > { %v3894_v38 = vmul.f32 0.5, %v3893_v46  ;;  %v3289_v44 = vmul.f32 %v3210_v51, %v5917_v8  ;;  %v2917_v7 = vmul.f32 %v2850_v12, %v5917_v8  ;;  %v3763_v33 = vmul.f32 %v9430_v35, %v3762_v42 }
 0x5da   : > { %v3755_v52 = vsub.f32 1.5, %v3754_v21  ;;  %v9479_v51 = vmul.f32 %v9386_v9, %v3915_v4  ;;  %vm3768_vm3 = vweird.f32 %v9430_v35  ;;  %vm4220_vm4 = vcmp.ge.f32.partialorder %v4157_v37, 0.0 }
 0x5db   : > { %v3895_v43 = vsub.f32 1.5, %v3894_v38  ;;  %v9449_v3 = vadd.f32 1e-05, %v3289_v44  ;;  %v2856_v50 = vpop.xlane.xlu0 %2855  ;;  %v9452_v14 = vsub.f32 %v9182_v63, %v2917_v7  ;;  %v3764_v48 = vmul.f32 0.5, %v3763_v33  ;;  %vm9541_vm9 = vmor %vm3767_vm2, %vm3768_vm3 }
 0x5dc   : > { %v3756_v1 = vmul.f32 %v5550_v13, %v3755_v52  ;;  %v2919_v23 = vmul.f32 %v2856_v50, %v5917_v8  ;;  %v3920_v62 = vsel %vm9501_vm0, %v9386_v9, %v9479_v51  ;;  %v3030_v33 = vmul.f32 %v9459_v24, %v9459_v24 }
 0x5dd   : > { %v3896_v32 = vmul.f32 %v5552_v6, %v3895_v43  ;;  %5555 = vrsqrt.f32 %v9449_v3  ;;  %v4610_v41 = vpop.f32.mrf.mxu2  ;;  %v4283_v9 = vmul.f32 0.01, %v4157_v37  ;;  %vm3907_vm8 = vweird.f32 %v9449_v3 }
 0x5de   : > { %v3760_v22 = vsel %vm3759_vm12, %v5550_v13, %v3756_v1  ;;  %v9466_v63 = vsub.f32 %v9196_v36, %v2919_v23  ;;  %v4611_v20 = vadd.f32 %v9345_v11, %v4610_v41  ;;  %v4359_v13 = vsel %vm4233_vm13, %v4170_v40, %v4296_v28 }
 0x5df   : > { %v4030_v47 = vmul.f32 %v3760_v22, %v9126_v60  ;;  %v3900_v57 = vsel %vm3899_vm14, %v5552_v6, %v3896_v32  ;;  %v3043_v36 = vmul.f32 %v9452_v14, %v9452_v14  ;;  %v4396_v6 = vpack.c.bf16 %v4359_v13, %v4358_v29 }
 0x5e0   : > { %v4044_v46 = vmul.f32 %v3900_v57, %v9141_v49  ;;  %4721 = vst.msk [vmem:[%s8510_s21 + $0x108] sm:$0xff] %vm4687_vm6, %v4611_v20  ;;  %v2808_v42 = vpop.xlane.xlu2 %2807  ;;  %v3171_v39 = vpop.xlane.xlu1 %3170  ;;  %v3045_v21 = vmul.f32 %v9466_v63, %v9466_v63  ;;  %v4107_v49 = vmul.f32 %v7866_v54, %v9422_v27  ;;  %v3765_v40 = vsub.f32 1.5, %v3764_v48 }
 0x5e1   : > { %v4094_v60 = vmul.f32 %v7866_v54, %v4030_v47  ;;  %v2903_v0 = vmul.f32 %v2808_v42, %v5917_v8  ;;  %v3276_v58 = vmul.f32 %v3171_v39, %v5917_v8  ;;  %v3226_v12 = vsel %vm644_vm1, %v3043_v36, 0.0  ;;  %5205 = vmatmul.msk.bf16.gmra.mxu3 %vm644_vm1, %v4396_v6 }
 0x5e2   : > { %3227 = vadd.xlane.f32.xlu1 %v3226_v12  ;;  %v3232_v27 = vsel %vm644_vm1, %v3045_v21, 0.0  ;;  %v4108_v44 = vmul.f32 %v7866_v54, %v4044_v46  ;;  %v3766_v32 = vmul.f32 %v9430_v35, %v3765_v40  ;;  %v4171_v28 = vadd.f32 %v7876_v30, %v4107_v49 }
 0x5e3   : > { %v9488_v25 = vpop.eup %5555  ;;  %v9494_v38 = vsub.f32 %v9205_v59, %v2903_v0  ;;  %v9508_v59 = vadd.f32 1e-05, %v3276_v58  ;;  %3233 = vadd.xlane.f32.xlu2 %v3232_v27  ;;  %v4158_v50 = vadd.f32 %v7876_v30, %v4094_v60  ;;  %v4346_v29 = vsel %vm4220_vm4, %v4157_v37, %v4283_v9 }
 0x5e4   : > { %v3902_v52 = vmul.f32 %v9488_v25, %v9449_v3  ;;  %v4172_v47 = vadd.f32 %v7876_v30, %v4108_v44  ;;  %vm3908_vm7 = vweird.f32 %v9488_v25  ;;  %v3187_v42 = vsel %vm644_vm1, %v3030_v33, 0.0 }
 0x5e5   : > { %v4613_v7 = vpop.f32.mrf.mxu2  ;;  %v3029_v43 = vmul.f32 %v9494_v38, %v9494_v38  ;;  %5557 = vrsqrt.f32 %v9508_v59  ;;  %vm4221_vm5 = vcmp.ge.f32.partialorder %v4158_v50, 0.0  ;;  %v4284_v23 = vmul.f32 0.01, %v4158_v50  ;;  %vm3909_vm12 = vmor %vm3907_vm8, %vm3908_vm7 }
 0x5e6   : > { %v3903_v2 = vmul.f32 %v9488_v25, %v3902_v52  ;;  %v4614_v4 = vadd.f32 %v9345_v11, %v4613_v7  ;;  %v4297_v51 = vmul.f32 0.01, %v4171_v28  ;;  %vm4234_vm10 = vcmp.ge.f32.partialorder %v4171_v28, 0.0 }
 0x5e7   : > { %v3184_v1 = vsel %vm644_vm1, %v3029_v43, 0.0  ;;  %v4347_v46 = vsel %vm4221_vm5, %v4158_v50, %v4284_v23  ;;  %vm4235_vm11 = vcmp.ge.f32.partialorder %v4172_v47, 0.0  ;;  %v4298_v3 = vmul.f32 0.01, %v4172_v47 }
 0x5e8   : > { %v3904_v41 = vmul.f32 0.5, %v3903_v2  ;;  %4722 = vst.msk [vmem:[%s8510_s21 + $0x110] sm:$0xff] %vm4687_vm6, %v4614_v4  ;;  %v3219_v22 = vpop.xlane.xlu2 %3218  ;;  %3185 = vadd.xlane.f32.xlu0 %v3184_v1  ;;  %v3216_v20 = vpop.xlane.xlu1 %3215  ;;  %v4390_v39 = vpack.c.bf16 %v4347_v46, %v4346_v29  ;;  %v3770_v49 = vsel %vm9541_vm9, %v9430_v35, %v3766_v32  ;;  %v4046_v12 = vmul.f32 %v3920_v62, %v9101_v17 }
 0x5e9   : > { %v3292_v57 = vmul.f32 %v3219_v22, %v5917_v8  ;;  %v3291_v48 = vmul.f32 %v3216_v20, %v5917_v8  ;;  %v4360_v35 = vsel %vm4234_vm10, %v4171_v28, %v4297_v51  ;;  %v4361_v40 = vsel %vm4235_vm11, %v4172_v47, %v4298_v3 }
 0x5ea   : > { %v3905_v13 = vsub.f32 1.5, %v3904_v41  ;;  %3188 = vadd.xlane.f32.xlu1 %v3187_v42  ;;  %5199 = vmatmul.msk.bf16.gmra.mxu2 %vm644_vm1, %v4390_v39  ;;  %v4031_v52 = vmul.f32 %v3770_v49, %v9136_v61  ;;  %v4397_v7 = vpack.c.bf16 %v4361_v40, %v4360_v35  ;;  %v4110_v17 = vmul.f32 %v7866_v54, %v4046_v12 }
 0x5eb   : > { %v9533_v36 = vadd.f32 1e-05, %v3292_v57  ;;  %v9535_v21 = vadd.f32 1e-05, %v3291_v48  ;;  %v5558_v60 = vpop.eup %5557  ;;  %vm3777_vm14 = vweird.f32 %v9508_v59 }
 0x5ec   : > { %v3906_v0 = vmul.f32 %v9488_v25, %v3905_v13  ;;  %v3772_v5 = vmul.f32 %v5558_v60, %v9508_v59  ;;  %vm3778_vm13 = vweird.f32 %v5558_v60  ;;  %v4174_v23 = vadd.f32 %v7876_v30, %v4110_v17 }
 0x5ed   : > { %5559 = vrsqrt.f32 %v9533_v36  ;;  %v4615_v58 = vpop.f32.mrf.mxu2  ;;  %vm3779_vm15 = vmor %vm3777_vm14, %vm3778_vm13  ;;  %vm3937_vm0 = vweird.f32 %v9533_v36  ;;  %vm3927_vm8 = vweird.f32 %v9535_v21 }
 0x5ee   : > { %v3910_v27 = vsel %vm3909_vm12, %v9488_v25, %v3906_v0  ;;  %5561 = vrsqrt.f32 %v9535_v21  ;;  %v4616_v37 = vadd.f32 %v9345_v11, %v4615_v58  ;;  %v3773_v44 = vmul.f32 %v5558_v60, %v3772_v5 }
 0x5ef   : > { %v4045_v55 = vmul.f32 %v3910_v27, %v9174_v19  ;;  %v4095_v19 = vmul.f32 %v7866_v54, %v4031_v52  ;;  %v4300_v59 = vmul.f32 0.01, %v4174_v23  ;;  %vm4237_vm5 = vcmp.ge.f32.partialorder %v4174_v23, 0.0 }
 0x5f0   : > { %4723 = vst.msk [vmem:[%s8510_s21 + $0x118] sm:$0xff] %vm4687_vm6, %v4616_v37  ;;  %v3774_v33 = vmul.f32 0.5, %v3773_v44 }
 0x5f1   : > { %v4109_v43 = vmul.f32 %v7866_v54, %v4045_v55  ;;  %5206 = vmatmul.msk.bf16.gmra.mxu3 %vm644_vm1, %v4397_v7  ;;  %v4159_v47 = vadd.f32 %v7876_v30, %v4095_v19  ;;  %v4363_v6 = vsel %vm4237_vm5, %v4174_v23, %v4300_v59 }
 0x5f2   : > { %v3775_v62 = vsub.f32 1.5, %v3774_v33 }
 0x5f3   : > { %v5560_v25 = vpop.eup %5559  ;;  %v4173_v61 = vadd.f32 %v7876_v30, %v4109_v43  ;;  %v4285_v39 = vmul.f32 0.01, %v4159_v47  ;;  %vm4222_vm9 = vcmp.ge.f32.partialorder %v4159_v47, 0.0 }
 0x5f4   : > { %v5562_v50 = vpop.eup %5561  ;;  %v3932_v2 = vmul.f32 %v5560_v25, %v9533_v36  ;;  %v3776_v4 = vmul.f32 %v5558_v60, %v3775_v62  ;;  %vm3938_vm3 = vweird.f32 %v5560_v25 }
 0x5f5   : > { %v3922_v1 = vmul.f32 %v5562_v50, %v9535_v21  ;;  %v4299_v28 = vmul.f32 0.01, %v4173_v61  ;;  %vm4236_vm2 = vcmp.ge.f32.partialorder %v4173_v61, 0.0  ;;  %vm3928_vm4 = vweird.f32 %v5562_v50  ;;  %vm3939_vm7 = vmor %vm3937_vm0, %vm3938_vm3 }
 0x5f6   : > { %v3933_v9 = vmul.f32 %v5560_v25, %v3932_v2  ;;  %v3780_v32 = vsel %vm3779_vm15, %v5558_v60, %v3776_v4  ;;  %vm3929_vm10 = vmor %vm3927_vm8, %vm3928_vm4  ;;  %v4348_v58 = vsel %vm4222_vm9, %v4159_v47, %v4285_v39 }
 0x5f7   : > { %v3923_v41 = vmul.f32 %v5562_v50, %v3922_v1  ;;  %v4032_v22 = vmul.f32 %v3780_v32, %v9199_v56  ;;  %v4362_v42 = vsel %vm4236_vm2, %v4173_v61, %v4299_v28 }
 0x5f8   : > { %v3934_v20 = vmul.f32 0.5, %v3933_v9  ;;  %v4398_v49 = vpack.c.bf16 %v4363_v6, %v4362_v42 }
 0x5f9   : > { %v3924_v57 = vmul.f32 0.5, %v3923_v41  ;;  %v4096_v48 = vmul.f32 %v7866_v54, %v4032_v22 }
 0x5fa   : > { %v3935_v29 = vsub.f32 1.5, %v3934_v20 }
 0x5fb   : > { %v3925_v46 = vsub.f32 1.5, %v3924_v57  ;;  %v4160_v56 = vadd.f32 %v7876_v30, %v4096_v48 }
 0x5fc   : > { %v3936_v13 = vmul.f32 %v5560_v25, %v3935_v29 }
 0x5fd   : > { %v3926_v51 = vmul.f32 %v5562_v50, %v3925_v46  ;;  %vm4223_vm11 = vcmp.ge.f32.partialorder %v4160_v56, 0.0  ;;  %v4286_v0 = vmul.f32 0.01, %v4160_v56 }
 0x5fe   : > { %v3940_v60 = vsel %vm3939_vm7, %v5560_v25, %v3936_v13 }
 0x5ff   : > { %v4048_v36 = vmul.f32 %v3940_v60, %v9217_v10  ;;  %v3930_v3 = vsel %vm3929_vm10, %v5562_v50, %v3926_v51  ;;  %v4349_v12 = vsel %vm4223_vm11, %v4160_v56, %v4286_v0 }
 0x600   : > { %v4047_v5 = vmul.f32 %v3930_v3, %v9220_v53  ;;  %v4391_v37 = vpack.c.bf16 %v4349_v12, %v4348_v58  ;;  %v3174_v53 = vpop.xlane.xlu1 %3173 }
 0x601   : > { %v4112_v27 = vmul.f32 %v7866_v54, %v4048_v36  ;;  %5207 = vmatmul.msk.bf16.gmra.mxu3 %vm644_vm1, %v4398_v49  ;;  %v3277_v7 = vmul.f32 %v3174_v53, %v5917_v8 }
 0x602   : > { %v4111_v55 = vmul.f32 %v7866_v54, %v4047_v5  ;;  %5200 = vmatmul.msk.bf16.gmra.mxu2 %vm644_vm1, %v4391_v37 }
 0x603   : > { %v4176_v44 = vadd.f32 %v7876_v30, %v4112_v27  ;;  %v3340_v33 = vadd.f32 1e-05, %v3277_v7 }
 0x604   : > { %v4175_v21 = vadd.f32 %v7876_v30, %v4111_v55 }
 0x605   : > { %v4302_v35 = vmul.f32 0.01, %v4176_v44  ;;  %vm4239_vm13 = vcmp.ge.f32.partialorder %v4176_v44, 0.0  ;;  %5563 = vrsqrt.f32 %v3340_v33  ;;  %vm3787_vm15 = vweird.f32 %v3340_v33 }
 0x606   : > { %v4301_v10 = vmul.f32 0.01, %v4175_v21  ;;  %vm4238_vm12 = vcmp.ge.f32.partialorder %v4175_v21, 0.0 }
 0x607   : > { %v4365_v52 = vsel %vm4239_vm13, %v4176_v44, %v4302_v35 }
 0x608   : > { %v4364_v40 = vsel %vm4238_vm12, %v4175_v21, %v4301_v10  ;;  %v3225_v19 = vpop.xlane.xlu1 %3224 }
 0x609   : > { %v4399_v43 = vpack.c.bf16 %v4365_v52, %v4364_v40  ;;  %v3294_v4 = vmul.f32 %v3225_v19, %v5917_v8 }
 0x60b   : > { %v5564_v17 = vpop.eup %5563  ;;  %v9589_v23 = vadd.f32 1e-05, %v3294_v4 }
 0x60c   : > { %v3782_v25 = vmul.f32 %v5564_v17, %v3340_v33  ;;  %vm3788_vm14 = vweird.f32 %v5564_v17 }
 0x60d   : > { %vm3789_vm2 = vmor %vm3787_vm15, %vm3788_vm14  ;;  %vm3957_vm9 = vweird.f32 %v9589_v23 }
 0x60e   : > { %v3783_v62 = vmul.f32 %v5564_v17, %v3782_v25 }
 0x610   : > { %v3784_v50 = vmul.f32 0.5, %v3783_v62 }
 0x611   : > { %5208 = vmatmul.msk.bf16.gmra.mxu3 %vm644_vm1, %v4399_v43 }
 0x612   : > { %v3785_v9 = vsub.f32 1.5, %v3784_v50 }
 0x614   : > { %v3786_v32 = vmul.f32 %v5564_v17, %v3785_v9 }
 0x616   : > { %v3790_v22 = vsel %vm3789_vm2, %v5564_v17, %v3786_v32 }
 0x617   : > { %v4033_v47 = vmul.f32 %v3790_v22, %v9234_v26 }
 0x619   : > { %v4097_v13 = vmul.f32 %v7866_v54, %v4033_v47 }
 0x61b   : > { %v4161_v0 = vadd.f32 %v7876_v30, %v4097_v13 }
 0x61d   : > { %v4287_v37 = vmul.f32 0.01, %v4161_v0  ;;  %vm4224_vm5 = vcmp.ge.f32.partialorder %v4161_v0, 0.0 }
 0x61f   : > { %v4350_v44 = vsel %vm4224_vm5, %v4161_v0, %v4287_v37 }
 0x626   : > { %v3177_v2 = vpop.xlane.xlu2 %3176 }
 0x627   : > { %v3278_v61 = vmul.f32 %v3177_v2, %v5917_v8 }
 0x629   : > { %v3341_v1 = vadd.f32 1e-05, %v3278_v61 }
 0x62b   : > { %5565 = vrsqrt.f32 %v3341_v1  ;;  %vm3797_vm0 = vweird.f32 %v3341_v1 }
 0x62c   : > { %5567 = vrsqrt.f32 %v9589_v23 }
 0x631   : > { %v5566_v41 = vpop.eup %5565 }
 0x632   : > { %v3792_v20 = vmul.f32 %v5566_v41, %v3341_v1  ;;  %v9593_v29 = vpop.eup %5567  ;;  %vm3798_vm3 = vweird.f32 %v5566_v41 }
 0x633   : > { %v3952_v56 = vmul.f32 %v9593_v29, %v9589_v23  ;;  %vm3799_vm4 = vmor %vm3797_vm0, %vm3798_vm3  ;;  %vm3958_vm8 = vweird.f32 %v9593_v29 }
 0x634   : > { %v3793_v28 = vmul.f32 %v5566_v41, %v3792_v20  ;;  %vm3959_vm10 = vmor %vm3957_vm9, %vm3958_vm8 }
 0x635   : > { %v3953_v36 = vmul.f32 %v9593_v29, %v3952_v56 }
 0x636   : > { %v3794_v57 = vmul.f32 0.5, %v3793_v28  ;;  %v3180_v48 = vpop.xlane.xlu2 %3179 }
 0x637   : > { %v3279_v59 = vmul.f32 %v3180_v48, %v5917_v8  ;;  %v3954_v55 = vmul.f32 0.5, %v3953_v36 }
 0x638   : > { %v3795_v46 = vsub.f32 1.5, %v3794_v57 }
 0x639   : > { %v9597_v42 = vadd.f32 1e-05, %v3279_v59  ;;  %v3955_v53 = vsub.f32 1.5, %v3954_v55 }
 0x63a   : > { %v3796_v39 = vmul.f32 %v5566_v41, %v3795_v46 }
 0x63b   : > { %5569 = vrsqrt.f32 %v9597_v42  ;;  %v3222_v26 = vpop.xlane.xlu0 %3221  ;;  %v3956_v25 = vmul.f32 %v9593_v29, %v3955_v53  ;;  %vm3807_vm15 = vweird.f32 %v9597_v42 }
 0x63c   : > { %v3800_v51 = vsel %vm3799_vm4, %v5566_v41, %v3796_v39  ;;  %v3293_v60 = vmul.f32 %v3222_v26, %v5917_v8 }
 0x63d   : > { %v4034_v6 = vmul.f32 %v3800_v51, %v9264_v15  ;;  %v3960_v41 = vsel %vm3959_vm10, %v9593_v29, %v3956_v25 }
 0x63e   : > { %v3356_v3 = vadd.f32 1e-05, %v3293_v60  ;;  %v4050_v23 = vmul.f32 %v3960_v41, %v9242_v16 }
 0x63f   : > { %v4098_v49 = vmul.f32 %v7866_v54, %v4034_v6 }
 0x640   : > { %5571 = vrsqrt.f32 %v3356_v3  ;;  %v4648_v5 = vpop.f32.mrf.mxu3  ;;  %vm3947_vm12 = vweird.f32 %v3356_v3  ;;  %v4114_v56 = vmul.f32 %v7866_v54, %v4050_v23 }
 0x641   : > { %v9607_v58 = vpop.eup %5569  ;;  %v4649_v12 = vadd.f32 %v9345_v11, %v4648_v5  ;;  %v4162_v27 = vadd.f32 %v7876_v30, %v4098_v49 }
 0x642   : > { %v3802_v15 = vmul.f32 %v9607_v58, %v9597_v42  ;;  %vm3808_vm14 = vweird.f32 %v9607_v58  ;;  %v4178_v5 = vadd.f32 %v7876_v30, %v4114_v56 }
 0x643   : > { %4736 = vst.msk [vmem:[%s8510_s21 + $0x180] sm:$0xff] %vm4687_vm6, %v4649_v12  ;;  %vm4225_vm7 = vcmp.ge.f32.partialorder %v4162_v27, 0.0  ;;  %v4288_v21 = vmul.f32 0.01, %v4162_v27  ;;  %vm3809_vm2 = vmor %vm3807_vm15, %vm3808_vm14 }
 0x644   : > { %v3803_v40 = vmul.f32 %v9607_v58, %v3802_v15  ;;  %vm4241_vm0 = vcmp.ge.f32.partialorder %v4178_v5, 0.0 }
 0x645   : > { %v4351_v10 = vsel %vm4225_vm7, %v4162_v27, %v4288_v21 }
 0x646   : > { %v5572_v35 = vpop.eup %5571  ;;  %v4392_v52 = vpack.c.bf16 %v4351_v10, %v4350_v44  ;;  %v3804_v62 = vmul.f32 0.5, %v3803_v40  ;;  %v4304_v44 = vmul.f32 0.01, %v4178_v5 }
 0x647   : > { %v3942_v7 = vmul.f32 %v5572_v35, %v3356_v3  ;;  %vm3948_vm11 = vweird.f32 %v5572_v35 }
 0x648   : > { %5201 = vmatmul.msk.bf16.gmra.mxu2 %vm644_vm1, %v4392_v52  ;;  %v4650_v43 = vpop.f32.mrf.mxu3  ;;  %v4618_v50 = vpop.f32.mrf.mxu2  ;;  %v3805_v22 = vsub.f32 1.5, %v3804_v62  ;;  %vm3949_vm13 = vmor %vm3947_vm12, %vm3948_vm11 }
 0x649   : > { %v3943_v33 = vmul.f32 %v5572_v35, %v3942_v7  ;;  %v4651_v17 = vadd.f32 %v9345_v11, %v4650_v43  ;;  %v4619_v2 = vadd.f32 %v9345_v11, %v4618_v50 }
 0x64a   : > { %v3806_v48 = vmul.f32 %v9607_v58, %v3805_v22 }
 0x64b   : > { %v3944_v19 = vmul.f32 0.5, %v3943_v33  ;;  %4737 = vst.msk [vmem:[%s8510_s21 + $0x188] sm:$0xff] %vm4687_vm6, %v4651_v17  ;;  %v3231_v61 = vpop.xlane.xlu2 %3230  ;;  %v3183_v4 = vpop.xlane.xlu0 %3182  ;;  %v4367_v33 = vsel %vm4241_vm0, %v4178_v5, %v4304_v44 }
 0x64c   : > { %4724 = vst.msk [vmem:[%s8510_s21 + $0x120] sm:$0xff] %vm4687_vm6, %v4619_v2  ;;  %v3296_v9 = vmul.f32 %v3231_v61, %v5917_v8  ;;  %v3280_v32 = vmul.f32 %v3183_v4, %v5917_v8  ;;  %v3810_v16 = vsel %vm3809_vm2, %v9607_v58, %v3806_v48 }
 0x64d   : > { %v3945_v1 = vsub.f32 1.5, %v3944_v19  ;;  %v4035_v36 = vmul.f32 %v3810_v16, %v9310_v31 }
 0x64e   : > { %v3359_v28 = vadd.f32 1e-05, %v3296_v9  ;;  %v9629_v47 = vadd.f32 1e-05, %v3280_v32 }
 0x64f   : > { %v3946_v20 = vmul.f32 %v5572_v35, %v3945_v1 }
 0x650   : > { %5573 = vrsqrt.f32 %v3359_v28  ;;  %v4620_v29 = vpop.f32.mrf.mxu2  ;;  %vm3977_vm7 = vweird.f32 %v3359_v28  ;;  %vm3817_vm9 = vweird.f32 %v9629_v47 }
 0x651   : > { %v3950_v57 = vsel %vm3949_vm13, %v5572_v35, %v3946_v20  ;;  %5575 = vrsqrt.f32 %v9629_v47  ;;  %v4621_v46 = vadd.f32 %v9345_v11, %v4620_v29  ;;  %v4099_v35 = vmul.f32 %v7866_v54, %v4035_v36 }
 0x652   : > { %v4049_v59 = vmul.f32 %v3950_v57, %v9332_v18 }
 0x653   : > { %4725 = vst.msk [vmem:[%s8510_s21 + $0x128] sm:$0xff] %vm4687_vm6, %v4621_v46  ;;  %v4163_v9 = vadd.f32 %v7876_v30, %v4099_v35 }
 0x654   : > { %v4113_v13 = vmul.f32 %v7866_v54, %v4049_v59 }
 0x655   : > { %v3228_v39 = vpop.xlane.xlu1 %3227  ;;  %v4289_v46 = vmul.f32 0.01, %v4163_v9  ;;  %vm4226_vm12 = vcmp.ge.f32.partialorder %v4163_v9, 0.0 }
 0x656   : > { %v5574_v26 = vpop.eup %5573  ;;  %v3295_v18 = vmul.f32 %v3228_v39, %v5917_v8  ;;  %v3234_v51 = vpop.xlane.xlu2 %3233  ;;  %v4177_v42 = vadd.f32 %v7876_v30, %v4113_v13 }
 0x657   : > { %v5576_v60 = vpop.eup %5575  ;;  %v3972_v6 = vmul.f32 %v5574_v26, %v3359_v28  ;;  %v3297_v0 = vmul.f32 %v3234_v51, %v5917_v8  ;;  %vm3978_vm4 = vweird.f32 %v5574_v26 }
 0x658   : > { %v3812_v3 = vmul.f32 %v5576_v60, %v9629_v47  ;;  %v9648_v49 = vadd.f32 1e-05, %v3295_v18  ;;  %vm4240_vm3 = vcmp.ge.f32.partialorder %v4177_v42, 0.0  ;;  %v4303_v27 = vmul.f32 0.01, %v4177_v42  ;;  %vm3979_vm8 = vmor %vm3977_vm7, %vm3978_vm4 }
 0x659   : > { %v3973_v58 = vmul.f32 %v5574_v26, %v3972_v6  ;;  %v9651_v12 = vadd.f32 1e-05, %v3297_v0  ;;  %vm3818_vm5 = vweird.f32 %v5576_v60  ;;  %v4352_v6 = vsel %vm4226_vm12, %v4163_v9, %v4289_v46 }
 0x65a   : > { %v3813_v37 = vmul.f32 %v5576_v60, %v3812_v3  ;;  %5577 = vrsqrt.f32 %v9648_v49  ;;  %v4366_v10 = vsel %vm4240_vm3, %v4177_v42, %v4303_v27  ;;  %vm3819_vm10 = vmor %vm3817_vm9, %vm3818_vm5  ;;  %vm3967_vm13 = vweird.f32 %v9648_v49 }
 0x65b   : > { %v3186_v55 = vpop.xlane.xlu0 %3185  ;;  %v3974_v15 = vmul.f32 0.5, %v3973_v58  ;;  %5579 = vrsqrt.f32 %v9651_v12  ;;  %v4400_v25 = vpack.c.bf16 %v4367_v33, %v4366_v10  ;;  %vm3987_vm0 = vweird.f32 %v9651_v12 }
 0x65c   : > { %v3281_v31 = vmul.f32 %v3186_v55, %v5917_v8  ;;  %v3814_v21 = vmul.f32 0.5, %v3813_v37 }
 0x65d   : > { %v3975_v53 = vsub.f32 1.5, %v3974_v15  ;;  %v3189_v40 = vpop.xlane.xlu1 %3188  ;;  %5209 = vmatmul.msk.bf16.gmra.mxu3 %vm644_vm1, %v4400_v25 }
 0x65e   : > { %v9657_v52 = vadd.f32 1e-05, %v3281_v31  ;;  %v3815_v7 = vsub.f32 1.5, %v3814_v21  ;;  %v3282_v43 = vmul.f32 %v3189_v40, %v5917_v8 }
 0x65f   : > { %v3976_v17 = vmul.f32 %v5574_v26, %v3975_v53 }
 0x660   : > { %5581 = vrsqrt.f32 %v9657_v52  ;;  %v5578_v62 = vpop.eup %5577  ;;  %v3816_v50 = vmul.f32 %v5576_v60, %v3815_v7  ;;  %v9662_v19 = vadd.f32 1e-05, %v3282_v43  ;;  %vm3827_vm4 = vweird.f32 %v9657_v52 }
 0x661   : > { %v9664_v2 = vpop.eup %5579  ;;  %v3980_v61 = vsel %vm3979_vm8, %v5574_v26, %v3976_v17  ;;  %v3962_v4 = vmul.f32 %v5578_v62, %v9648_v49  ;;  %vm3968_vm11 = vweird.f32 %v5578_v62 }
 0x662   : > { %v3820_v8 = vsel %vm3819_vm10, %v5576_v60, %v3816_v50  ;;  %v3982_v1 = vmul.f32 %v9664_v2, %v9651_v12  ;;  %5583 = vrsqrt.f32 %v9662_v19  ;;  %v4052_v22 = vmul.f32 %v3980_v61, %v9413_v45  ;;  %vm3969_vm15 = vmor %vm3967_vm13, %vm3968_vm11 }
 0x663   : > { %v4036_v32 = vmul.f32 %v3820_v8, %v9416_v34  ;;  %v3963_v41 = vmul.f32 %v5578_v62, %v3962_v4  ;;  %vm3988_vm2 = vweird.f32 %v9664_v2  ;;  %vm3837_vm9 = vweird.f32 %v9662_v19 }
 0x664   : > { %v3983_v20 = vmul.f32 %v9664_v2, %v3982_v1  ;;  %v4653_v57 = vpop.f32.mrf.mxu3  ;;  %v4116_v45 = vmul.f32 %v7866_v54, %v4052_v22  ;;  %vm9693_vm5 = vmor %vm3987_vm0, %vm3988_vm2 }
 0x665   : > { %v4100_v47 = vmul.f32 %v7866_v54, %v4036_v32  ;;  %v3964_v23 = vmul.f32 0.5, %v3963_v41  ;;  %v4654_v29 = vadd.f32 %v9345_v11, %v4653_v57 }
 0x666   : > { %v5582_v28 = vpop.eup %5581  ;;  %v3984_v48 = vmul.f32 0.5, %v3983_v20  ;;  %v4180_v49 = vadd.f32 %v7876_v30, %v4116_v45 }
 0x667   : > { %v3822_v59 = vmul.f32 %v5582_v28, %v9657_v52  ;;  %v3965_v34 = vsub.f32 1.5, %v3964_v23  ;;  %v4164_v13 = vadd.f32 %v7876_v30, %v4100_v47  ;;  %4738 = vst.msk [vmem:[%s8510_s21 + $0x190] sm:$0xff] %vm4687_vm6, %v4654_v29  ;;  %vm3828_vm3 = vweird.f32 %v5582_v28 }
 0x668   : > { %v3985_v56 = vsub.f32 1.5, %v3984_v48  ;;  %v5584_v39 = vpop.eup %5583  ;;  %vm3829_vm8 = vmor %vm3827_vm4, %vm3828_vm3  ;;  %v4306_v52 = vmul.f32 0.01, %v4180_v49  ;;  %vm4243_vm10 = vcmp.ge.f32.partialorder %v4180_v49, 0.0 }
 0x669   : > { %v3823_v16 = vmul.f32 %v5582_v28, %v3822_v59  ;;  %v3966_v26 = vmul.f32 %v5578_v62, %v3965_v34  ;;  %vm4227_vm14 = vcmp.ge.f32.partialorder %v4164_v13, 0.0  ;;  %v4290_v18 = vmul.f32 0.01, %v4164_v13 }
 0x66a   : > { %v3832_v51 = vmul.f32 %v5584_v39, %v9662_v19  ;;  %v3986_v42 = vmul.f32 %v9664_v2, %v3985_v56  ;;  %vm3838_vm7 = vweird.f32 %v5584_v39 }
 0x66b   : > { %v3824_v60 = vmul.f32 0.5, %v3823_v16  ;;  %v3970_v0 = vsel %vm3969_vm15, %v5578_v62, %v3966_v26  ;;  %v4353_v36 = vsel %vm4227_vm14, %v4164_v13, %v4290_v18  ;;  %vm3839_vm12 = vmor %vm3837_vm9, %vm3838_vm7 }
 0x66c   : > { %v4051_v3 = vmul.f32 %v3970_v0, %v9452_v14  ;;  %v3833_v5 = vmul.f32 %v5584_v39, %v3832_v51  ;;  %v4655_v27 = vpop.f32.mrf.mxu3  ;;  %v4393_v37 = vpack.c.bf16 %v4353_v36, %v4352_v6  ;;  %v3990_v12 = vsel %vm9693_vm5, %v9664_v2, %v3986_v42 }
 0x66d   : > { %v3825_v58 = vsub.f32 1.5, %v3824_v60  ;;  %v4656_v21 = vadd.f32 %v9345_v11, %v4655_v27  ;;  %v4623_v44 = vpop.f32.mrf.mxu2  ;;  %v4053_v43 = vmul.f32 %v3990_v12, %v9466_v63  ;;  %v4369_v2 = vsel %vm4243_vm10, %v4180_v49, %v4306_v52 }
 0x66e   : > { %v4115_v55 = vmul.f32 %v7866_v54, %v4051_v3  ;;  %v3834_v14 = vmul.f32 0.5, %v3833_v5  ;;  %v4624_v10 = vadd.f32 %v9345_v11, %v4623_v44  ;;  %5202 = vmatmul.msk.bf16.gmra.mxu2 %vm644_vm1, %v4393_v37 }
 0x66f   : > { %v3826_v31 = vmul.f32 %v5582_v28, %v3825_v58  ;;  %4739 = vst.msk [vmem:[%s8510_s21 + $0x198] sm:$0xff] %vm4687_vm6, %v4656_v21  ;;  %v4117_v63 = vmul.f32 %v7866_v54, %v4053_v43 }
 0x670   : > { %v3835_v35 = vsub.f32 1.5, %v3834_v14  ;;  %v4179_v40 = vadd.f32 %v7876_v30, %v4115_v55  ;;  %4726 = vst.msk [vmem:[%s8510_s21 + $0x130] sm:$0xff] %vm4687_vm6, %v4624_v10 }
 0x671   : > { %v3830_v53 = vsel %vm3829_vm8, %v5582_v28, %v3826_v31  ;;  %v4181_v22 = vadd.f32 %v7876_v30, %v4117_v63 }
 0x672   : > { %v4037_v7 = vmul.f32 %v3830_v53, %v9494_v38  ;;  %v3836_v33 = vmul.f32 %v5584_v39, %v3835_v35  ;;  %vm4242_vm11 = vcmp.ge.f32.partialorder %v4179_v40, 0.0  ;;  %v4305_v17 = vmul.f32 0.01, %v4179_v40 }
 0x673   : > { %v4307_v48 = vmul.f32 0.01, %v4181_v22  ;;  %vm4244_vm15 = vcmp.ge.f32.partialorder %v4181_v22, 0.0 }
 0x674   : > { %v4101_v25 = vmul.f32 %v7866_v54, %v4037_v7  ;;  %v3840_v62 = vsel %vm3839_vm12, %v5584_v39, %v3836_v33  ;;  %v4368_v50 = vsel %vm4242_vm11, %v4179_v40, %v4305_v17  ;;  %v4658_v38 = vpop.f32.mrf.mxu3 }
 0x675   : > { %v4038_v19 = vmul.f32 %v3840_v62, %v9459_v24  ;;  %v4401_v61 = vpack.c.bf16 %v4369_v2, %v4368_v50  ;;  %v4659_v8 = vadd.f32 %v9345_v11, %v4658_v38  ;;  %v4625_v1 = vpop.f32.mrf.mxu2 }
 0x676   : > { %v4165_v4 = vadd.f32 %v7876_v30, %v4101_v25  ;;  %v4626_v32 = vadd.f32 %v9345_v11, %v4625_v1  ;;  %v5589_v11 = vld [vmem:[%s9915_s5] ss:$0 sm:$0xff] }
 0x677   : > { %v4102_v9 = vmul.f32 %v7866_v54, %v4038_v19  ;;  %5210 = vmatmul.msk.bf16.gmra.mxu3 %vm644_vm1, %v4401_v61  ;;  %4740 = vst.msk [vmem:[%s8510_s21 + $0x1a0] sm:$0xff] %vm4687_vm6, %v4659_v8 }
 0x678   : > { %v4291_v41 = vmul.f32 0.01, %v4165_v4  ;;  %vm4228_vm13 = vcmp.ge.f32.partialorder %v4165_v4, 0.0  ;;  %4727 = vst.msk [vmem:[%s8510_s21 + $0x138] sm:$0xff] %vm4687_vm6, %v4626_v32 }
 0x679   : > { %v4166_v24 = vadd.f32 %v7876_v30, %v4102_v9  ;;  %v4370_v30 = vsel %vm4244_vm15, %v4181_v22, %v4307_v48 }
 0x67a   : > { %v4354_v28 = vsel %vm4228_vm13, %v4165_v4, %v4291_v41  ;;  %v4402_v46 = vpack.c.bf16 %v4370_v30, %v4370_v30 }
 0x67b   : > { %vm4229_vm14 = vcmp.ge.f32.partialorder %v4166_v24, 0.0  ;;  %v4292_v20 = vmul.f32 0.01, %v4166_v24 }
 0x67c   : > { %v4660_v47 = vpop.f32.mrf.mxu3 }
 0x67d   : > { %v4355_v54 = vsel %vm4229_vm14, %v4166_v24, %v4292_v20  ;;  %v4661_v23 = vadd.f32 %v5589_v11, %v4660_v47 }
 0x67e   : > { %v4394_v57 = vpack.c.bf16 %v4355_v54, %v4354_v28 }
 0x67f   : > { %4741 = vst.msk [vmem:[%s8510_s21 + $0x1a8] sm:$0xff] %vm4687_vm6, %v4661_v23 }
 0x680   : > { %5203 = vmatmul.msk.bf16.gmra.mxu2 %vm644_vm1, %v4394_v57 }
 0x684   : > { %v4663_v59 = vpop.f32.mrf.mxu3 }
 0x685   : > { %v4628_v29 = vpop.f32.mrf.mxu2  ;;  %v4664_v34 = vadd.f32 %v5589_v11, %v4663_v59 }
 0x686   : > { %v4629_v13 = vadd.f32 %v5589_v11, %v4628_v29 }
 0x687   : > { %5211 = vmatmul.msk.bf16.gmra.mxu3 %vm644_vm1, %v4402_v46  ;;  %4742 = vst.msk [vmem:[%s8510_s21 + $0x1b0] sm:$0xff] %vm4687_vm6, %v4664_v34 }
 0x688   : > { %4728 = vst.msk [vmem:[%s8510_s21 + $0x140] sm:$0xff] %vm4687_vm6, %v4629_v13 }
 0x68c   : > { %v4665_v45 = vpop.f32.mrf.mxu3 }
 0x68d   : > { %v4630_v56 = vpop.f32.mrf.mxu2  ;;  %v4666_v16 = vadd.f32 %v5589_v11, %v4665_v45 }
 0x68e   : > { %v4631_v39 = vadd.f32 %v5589_v11, %v4630_v56 }
 0x68f   : > { %4743 = vst.msk [vmem:[%s8510_s21 + $0x1b8] sm:$0xff] %vm4687_vm6, %v4666_v16 }
 0x690   : > { %4729 = vst.msk [vmem:[%s8510_s21 + $0x148] sm:$0xff] %vm4687_vm6, %v4631_v39 }
 0x694   : > { %v4668_v26 = vpop.f32.mrf.mxu3 }
 0x695   : > { %v4669_v18 = vadd.f32 %v5589_v11, %v4668_v26 }
 0x697   : > { %4744 = vst.msk [vmem:[%s8510_s21 + $0x1c0] sm:$0xff] %vm4687_vm6, %v4669_v18 }
 0x69c   : > { %v4670_v51 = vpop.f32.mrf.mxu3 }
 0x69d   : > { %v4671_v60 = vadd.f32 %v5589_v11, %v4670_v51 }
 0x69f   : > { %4745 = vst.msk [vmem:[%s8510_s21 + $0x1c8] sm:$0xff] %vm4687_vm6, %v4671_v60 }
 0x6cb   : > { %v4633_v6 = vpop.f32.mrf.mxu2 }
 0x6cc   : > { %v4634_v0 = vadd.f32 %v5589_v11, %v4633_v6 }
 0x6ce   : > { %4730 = vst.msk [vmem:[%s8510_s21 + $0x150] sm:$0xff] %vm4687_vm6, %v4634_v0 }
 0x6d3   : > { %v4635_v42 = vpop.f32.mrf.mxu2 }
 0x6d4   : > { %v4636_v36 = vadd.f32 %v5589_v11, %v4635_v42 }
 0x6d6   : > { %4731 = vst.msk [vmem:[%s8510_s21 + $0x158] sm:$0xff] %vm4687_vm6, %v4636_v36 }
 0x6e0   : > { %v4673_v3 = vpop.f32.mrf.mxu3 }
 0x6e1   : > { %v4674_v5 = vadd.f32 %v5589_v11, %v4673_v3 }
 0x6e3   : > { %4746 = vst.msk [vmem:[%s8510_s21 + $0x1d0] sm:$0xff] %vm4687_vm6, %v4674_v5 }
 0x6e8   : > { %v4675_v58 = vpop.f32.mrf.mxu3 }
 0x6e9   : > { %v4676_v49 = vadd.f32 %v5589_v11, %v4675_v58 }
 0x6eb   : > { %4747 = vst.msk [vmem:[%s8510_s21 + $0x1d8] sm:$0xff] %vm4687_vm6, %v4676_v49 }
 0x6f1   : > { %v4638_v27 = vpop.f32.mrf.mxu2 }
 0x6f2   : > { %v4639_v37 = vadd.f32 %v5589_v11, %v4638_v27 }
 0x6f4   : > { %4732 = vst.msk [vmem:[%s8510_s21 + $0x160] sm:$0xff] %vm4687_vm6, %v4639_v37 }
 0x6f9   : > { %v4640_v55 = vpop.f32.mrf.mxu2 }
 0x6fa   : > { %v4678_v15 = vpop.f32.mrf.mxu3  ;;  %v4641_v14 = vadd.f32 %v5589_v11, %v4640_v55 }
 0x6fb   : > { %v4679_v31 = vadd.f32 %v5589_v11, %v4678_v15 }
 0x6fc   : > { %4733 = vst.msk [vmem:[%s8510_s21 + $0x168] sm:$0xff] %vm4687_vm6, %v4641_v14 }
 0x6fd   : > { %4748 = vst.msk [vmem:[%s8510_s21 + $0x1e0] sm:$0xff] %vm4687_vm6, %v4679_v31 }
 0x702   : > { %v4680_v21 = vpop.f32.mrf.mxu3 }
 0x703   : > { %v4643_v44 = vpop.f32.mrf.mxu2  ;;  %v4681_v12 = vadd.f32 %v5589_v11, %v4680_v21 }
 0x704   : > { %v4644_v10 = vadd.f32 %v5589_v11, %v4643_v44 }
 0x705   : > { %4749 = vst.msk [vmem:[%s8510_s21 + $0x1e8] sm:$0xff] %vm4687_vm6, %v4681_v12 }
 0x706   : > { %4734 = vst.msk [vmem:[%s8510_s21 + $0x170] sm:$0xff] %vm4687_vm6, %v4644_v10 }
 0x70a   : > { %v4683_v35 = vpop.f32.mrf.mxu3 }
 0x70b   : > { %v4645_v53 = vpop.f32.mrf.mxu2  ;;  %v4684_v40 = vadd.f32 %v5589_v11, %v4683_v35 }
 0x70c   : > { %v4646_v52 = vadd.f32 %v5589_v11, %v4645_v53 }
 0x70d   : > { %4750 = vst.msk [vmem:[%s8510_s21 + $0x1f0] sm:$0xff] %vm4687_vm6, %v4684_v40 }
 0x70e   : > { %4735 = vst.msk [vmem:[%s8510_s21 + $0x178] sm:$0xff] %vm4687_vm6, %v4646_v52  ;;  %4757 = sbr.rel (!%p5739_p4) target bundleno = 1875 (0x753), region = 48 }
 0x712   : > { %v4685_v7 = vpop.f32.mrf.mxu3 }
 0x713   : > { %s10145_s23 = smov (!%p4760_p8, %s4759_s23), 63 }
 0x714   : > { %s5212_s9 = sshll.u32 %s10145_s23, 3 }
 0x715   : > { %p5215_p9 = scmp.eq.s32.totalorder %s5212_s9, 0 }
 0x716   : > { %s9781_s10 = sshrl.u32 (!%p5215_p9), %s10145_s23, 5 }
 0x717   : > { %4768 = sbr.rel (%p5215_p9) target bundleno = 1875 (0x753), region = 52  ;;  %p5216_p10 = scmp.le.s32.totalorder (!%p5215_p9), %s9781_s10, 0 }
 0x71c   : > { %5047 = sbr.rel (%p5216_p10) target bundleno = 1858 (0x742), region = 128  ;;  %s10136_s24 = smov (!%p5216_p10), %s9775_s7 }
 0x71d   : > { %s10137_s29 = smov (!%p5216_p10), %s8510_s21  ;;  %s9790_s8 = smov (!%p5216_p10), 0  }
 0x71e   : > { %s9792_s11 = smov (!%p5216_p10), 0  }
 0x721 LB: >> { %v4893_v43 = vld [vmem:[%s5652_s29] sm:$0xff]  ;;  %v4895_v33 = vld [vmem:[%s5652_s29 + $0x8] sm:$0xff]  ;;  %v4897_v17 = vld [vmem:[%s5652_s29 + $0x10] sm:$0xff]  ;;  %s4957_s12 = sadd.s32 1, %s5656_s8  ;;  %s4887_s11 = sadd.s32 1, %s5660_s11   ;;  %s5660_s11 = sphi %s9792_s11, %s4887_s11   ;;  %s5656_s8 = sphi %s9790_s8, %s10140_s8   ;;  %s5652_s29 = sphi %s10137_s29, %s10139_s29   ;;  %s5648_s24 = sphi %s10136_s24, %s10138_s24  }
 0x722   : >> { %4894 = vst [vmem:[%s5648_s24] sm:$0xff] %v4893_v43  ;;  %v4899_v25 = vld [vmem:[%s5652_s29 + $0x18] sm:$0xff]  ;;  %p4958_p11 = scmp.ge.s32.totalorder %s4957_s12, %s9781_s10  ;;  %v4901_v62 = vld [vmem:[%s5652_s29 + $0x20] sm:$0xff]  ;;  %v4903_v50 = vld [vmem:[%s5652_s29 + $0x28] sm:$0xff]  ;;  %p4886_p12 = scmp.ge.s32.totalorder %s4887_s11, %s9781_s10 }
 0x723   : >> { %4896 = vst [vmem:[%s5648_s24 + $0x8] sm:$0xff] %v4895_v33  ;;  %v4905_v2 = vld [vmem:[%s5652_s29 + $0x30] sm:$0xff]  ;;  %v4907_v19 = vld [vmem:[%s5652_s29 + $0x38] sm:$0xff]  ;;  %v4909_v38 = vld [vmem:[%s5652_s29 + $0x40] sm:$0xff] }
 0x724   : >> { %4898 = vst [vmem:[%s5648_s24 + $0x10] sm:$0xff] %v4897_v17  ;;  %s10147_s12 = smov (%p4958_p11, %s4957_s12), 0  ;;  %v4911_v61 = vld [vmem:[%s5652_s29 + $0x48] sm:$0xff]  ;;  %v4913_v4 = vld [vmem:[%s5652_s29 + $0x50] sm:$0xff]  ;;  %v4915_v63 = vld [vmem:[%s5652_s29 + $0x58] sm:$0xff] }
 0x725   : >> { %4900 = vst [vmem:[%s5648_s24 + $0x18] sm:$0xff] %v4899_v25  ;;  %s5217_s13 = sshll.u32 %s10147_s12, 8  ;;  %v4917_v8 = vld [vmem:[%s5652_s29 + $0x60] sm:$0xff]  ;;  %v4919_v1 = vld [vmem:[%s5652_s29 + $0x68] sm:$0xff]  ;;  %v4921_v9 = vld [vmem:[%s5652_s29 + $0x70] sm:$0xff]  ;;  %s10140_s8 = smov %s10147_s12 }
 0x726   : >> { %4902 = vst [vmem:[%s5648_s24 + $0x20] sm:$0xff] %v4901_v62  ;;  %s9824_s14 = scalar_lea.vmem %s8510_s21, %s5217_s13 [#allocation2]   ;;  %s9827_s15 = scalar_lea.vmem %s9775_s7, %s5217_s13   ;;  %v4923_v32 = vld [vmem:[%s5652_s29 + $0x78] sm:$0xff]  ;;  %v4925_v41 = vld [vmem:[%s5652_s29 + $0x80] sm:$0xff]  ;;  %v4927_v24 = vld [vmem:[%s5652_s29 + $0x88] sm:$0xff] }
 0x727   : >> { %4904 = vst [vmem:[%s5648_s24 + $0x28] sm:$0xff] %v4903_v50  ;;  %v4929_v22 = vld [vmem:[%s5652_s29 + $0x90] sm:$0xff]  ;;  %v4931_v20 = vld [vmem:[%s5652_s29 + $0x98] sm:$0xff]  ;;  %v4933_v28 = vld [vmem:[%s5652_s29 + $0xa0] sm:$0xff] }
 0x728   : >> { %4906 = vst [vmem:[%s5648_s24 + $0x30] sm:$0xff] %v4905_v2  ;;  %v4935_v47 = vld [vmem:[%s5652_s29 + $0xa8] sm:$0xff]  ;;  %v4937_v54 = vld [vmem:[%s5652_s29 + $0xb0] sm:$0xff]  ;;  %v4939_v11 = vld [vmem:[%s5652_s29 + $0xb8] sm:$0xff] }
 0x729   : >> { %4908 = vst [vmem:[%s5648_s24 + $0x38] sm:$0xff] %v4907_v19  ;;  %v4941_v23 = vld [vmem:[%s5652_s29 + $0xc0] sm:$0xff]  ;;  %v4943_v57 = vld [vmem:[%s5652_s29 + $0xc8] sm:$0xff]  ;;  %v4945_v48 = vld [vmem:[%s5652_s29 + $0xd0] sm:$0xff] }
 0x72a   : >> { %4910 = vst [vmem:[%s5648_s24 + $0x40] sm:$0xff] %v4909_v38  ;;  %v4947_v30 = vld [vmem:[%s5652_s29 + $0xd8] sm:$0xff]  ;;  %v4949_v59 = vld [vmem:[%s5652_s29 + $0xe0] sm:$0xff]  ;;  %v4951_v29 = vld [vmem:[%s5652_s29 + $0xe8] sm:$0xff] }
 0x72b   : >> { %4912 = vst [vmem:[%s5648_s24 + $0x48] sm:$0xff] %v4911_v61  ;;  %v4953_v46 = vld [vmem:[%s5652_s29 + $0xf0] sm:$0xff]  ;;  %v4955_v34 = vld [vmem:[%s5652_s29 + $0xf8] sm:$0xff]  ;;  %s10139_s29 = smov %s9824_s14 }
 0x72c   : >> { %4914 = vst [vmem:[%s5648_s24 + $0x50] sm:$0xff] %v4913_v4 }
 0x72d   : >> { %4916 = vst [vmem:[%s5648_s24 + $0x58] sm:$0xff] %v4915_v63 }
 0x72e   : >> { %4918 = vst [vmem:[%s5648_s24 + $0x60] sm:$0xff] %v4917_v8 }
 0x72f   : >> { %4920 = vst [vmem:[%s5648_s24 + $0x68] sm:$0xff] %v4919_v1 }
 0x730   : >> { %4922 = vst [vmem:[%s5648_s24 + $0x70] sm:$0xff] %v4921_v9 }
 0x731   : >> { %4924 = vst [vmem:[%s5648_s24 + $0x78] sm:$0xff] %v4923_v32 }
 0x732   : >> { %4926 = vst [vmem:[%s5648_s24 + $0x80] sm:$0xff] %v4925_v41 }
 0x733   : >> { %4928 = vst [vmem:[%s5648_s24 + $0x88] sm:$0xff] %v4927_v24 }
 0x734   : >> { %4930 = vst [vmem:[%s5648_s24 + $0x90] sm:$0xff] %v4929_v22 }
 0x735   : >> { %4932 = vst [vmem:[%s5648_s24 + $0x98] sm:$0xff] %v4931_v20 }
 0x736   : >> { %4934 = vst [vmem:[%s5648_s24 + $0xa0] sm:$0xff] %v4933_v28 }
 0x737   : >> { %4936 = vst [vmem:[%s5648_s24 + $0xa8] sm:$0xff] %v4935_v47 }
 0x738   : >> { %4938 = vst [vmem:[%s5648_s24 + $0xb0] sm:$0xff] %v4937_v54 }
 0x739   : >> { %4940 = vst [vmem:[%s5648_s24 + $0xb8] sm:$0xff] %v4939_v11 }
 0x73a   : >> { %4942 = vst [vmem:[%s5648_s24 + $0xc0] sm:$0xff] %v4941_v23 }
 0x73b   : >> { %4944 = vst [vmem:[%s5648_s24 + $0xc8] sm:$0xff] %v4943_v57 }
 0x73c   : >> { %4946 = vst [vmem:[%s5648_s24 + $0xd0] sm:$0xff] %v4945_v48 }
 0x73d   : >> { %4948 = vst [vmem:[%s5648_s24 + $0xd8] sm:$0xff] %v4947_v30  ;;  %4889 = sbr.rel (!%p4886_p12) target bundleno = 1825 (0x721), region = 134 }
 0x73e   : >> { %4950 = vst [vmem:[%s5648_s24 + $0xe0] sm:$0xff] %v4949_v59 }
 0x73f   : >> { %4952 = vst [vmem:[%s5648_s24 + $0xe8] sm:$0xff] %v4951_v29 }
 0x740   : >> { %4954 = vst [vmem:[%s5648_s24 + $0xf0] sm:$0xff] %v4953_v46 }
 0x741   : >> { %4956 = vst [vmem:[%s5648_s24 + $0xf8] sm:$0xff] %v4955_v34  ;;  %s10138_s24 = smov %s9827_s15 }
 0x742 PF: > { %s9892_s16 = sand.u32 31, %s10145_s23   ;;  %s5233_s17 = sshll.u32 %s9781_s10, 8 }
 0x743   : > { %s4968_s18 = scalar_lea.vmem %s8510_s21, %s5233_s17 [#allocation2]   ;;  %s4970_s19 = scalar_lea.vmem %s9775_s7, %s5233_s17  }
 0x744   : > { %p5222_p13 = scmp.le.s32.totalorder %s9892_s16, 0 }
 0x745   : > { %s5662_s20 = smov (!%p5222_p13), %s4970_s19   ;;  %s5666_s26 = smov (!%p5222_p13), %s4968_s18  }
 0x746   : > { %5061 = sbr.rel (%p5222_p13) target bundleno = 1875 (0x753), region = 139  ;;  %s5670_s27 = smov (!%p5222_p13), 0  }
 0x747   : > { %s5674_s30 = smov (!%p5222_p13), 0  }
 0x74b LB: >> { %v4980_v13 = vld [vmem:[%s5668_s26] sm:$0xff]  ;;  %s4982_s23 = sadd.s32 1, %s5672_s27  ;;  %s4974_s30 = sadd.s32 1, %s5676_s30   ;;  %s5676_s30 = sphi %s5674_s30, %s4974_s30   ;;  %s5672_s27 = sphi %s5670_s27, %s5671_s27   ;;  %s5668_s26 = sphi %s5666_s26, %s4987_s26   ;;  %s5664_s20 = sphi %s5662_s20, %s4988_s20  }
 0x74c   : >> { %4981 = vst [vmem:[%s5664_s20] sm:$0xff] %v4980_v13  ;;  %p4983_p0 = scmp.ge.s32.totalorder %s4982_s23, %s9892_s16  ;;  %p4973_p1 = scmp.ge.s32.totalorder %s4974_s30, %s9892_s16 }
 0x74e   : >> { %s10149_s23 = smov (%p4983_p0, %s4982_s23), 0  ;;  %4976 = sbr.rel (!%p4973_p1) target bundleno = 1867 (0x74b), region = 145 }
 0x74f   : >> { %s5223_s21 = sshll.u32 %s10149_s23, 3  ;;  %s5671_s27 = smov %s10149_s23  }
 0x750   : >> { %s4987_s26 = scalar_lea.vmem %s4968_s18, %s5223_s21 [#allocation2]   ;;  %s4988_s20 = scalar_lea.vmem %s4970_s19, %s5223_s21  }
 0x753 PF: > { %p13_p2 = scmp.ge.s32.totalorder %s5729_s25, 4   ;;  %s10141_s21 = smov %s5640_s22 }
 0x754   : > { %s10142_s22 = smov %s5737_s28  ;;  %s10143_s23 = smov %s5729_s25 }
 0x755   :  { %15 = sbr.rel (!%p13_p2) target bundleno = 2 (0x2), region = 156 }

</bundles_post_ra>
